<compile_context>
chip_gen: v5e
topology: v5e:2x2
jax: 0.10.0
libtpu: 0.0.40
codegen_flags: <defaults>
</compile_context>

<pallas_src>
import math

import jax
import jax.numpy as jnp
from jax import lax
from jax.experimental import pallas as pl
from jax.experimental.pallas import tpu as pltpu

# ---------------- small synthetic config (consistent with the module) --------
B = 2            # batch
D = 32           # transformer_dim  (256 in the real model)
Q = 8            # num_queries      (200 in the real model)
NHEADS = 4       # nheads           (8 in the real model)
HD = D // NHEADS
F = 64           # dim_feedforward  (512 in the real model)
L = 2            # num_layers_low_res (6 in the real model)
H = W = 8        # low-res feature map (64x64 in the real model)
S = H * W
WINDOW = 1024.0  # window_size default in forward()
LN_EPS = 1e-5
CROSS_CHUNK = 256   # S-chunk for the online-softmax cross-attention (>=256
                    # keeps the P·V contraction deep enough on v6e while
                    # bounding the per-chunk working set on v7x)
HEAD_PAD = 128      # lane padding for the fused prediction head / outputs
BF16 = jnp.bfloat16


# ------------------------------ kernel helpers --------------------------------
def _layer_norm(x, w, b):
    mu = jnp.mean(x, axis=-1, keepdims=True)
    xc = x - mu
    var = jnp.mean(xc * xc, axis=-1, keepdims=True)
    return xc * lax.rsqrt(var + LN_EPS) * w + b


def _proj(x_f32, w_bf16, b_f32):
    """y = x @ W + b with bf16 MXU operands, f32 accumulate."""
    return jnp.dot(x_f32.astype(BF16), w_bf16,
                   preferred_element_type=jnp.float32) + b_f32


def _softmax_lastdim(s):
    s = s - jnp.max(s, axis=-1, keepdims=True)
    e = jnp.exp(s)
    return e * pl.reciprocal(jnp.sum(e, axis=-1, keepdims=True), approx=True)


def _mha_self(qk_in, v_in, wqkv, bqkv, wo, bo, b, n):
    """Self-attention on folded (b*n, D) rows.

    Heads are contiguous HD-lane slices of the projected q/k/v (no head
    transpose); the head-sum is folded into the output projection, so there is
    no head-merge concatenate/relayout.
    """
    scale = 1.0 / math.sqrt(HD)
    q = _proj(qk_in, wqkv[0], bqkv[0]) * scale          # (b*n, D) f32
    k = _proj(qk_in, wqkv[1], bqkv[1])
    v = _proj(v_in, wqkv[2], bqkv[2])
    acc = None
    for h in range(NHEADS):
        sl = slice(h * HD, (h + 1) * HD)
        qh = q[:, sl].reshape(b, n, HD).astype(BF16)
        kh = k[:, sl].reshape(b, n, HD).astype(BF16)
        vh = v[:, sl].reshape(b, n, HD).astype(BF16)
        s = jnp.einsum('bqd,bkd->bqk', qh, kh, preferred_element_type=jnp.float32)
        p = _softmax_lastdim(s)
        o = jnp.einsum('bqk,bkd->bqd', p.astype(BF16), vh,
                       preferred_element_type=jnp.float32)      # (b, n, HD)
        contrib = jnp.dot(o.reshape(b * n, HD).astype(BF16), wo[sl, :],
                          preferred_element_type=jnp.float32)
        acc = contrib if acc is None else acc + contrib
    return acc + bo


def _mha_cross(q_in, kpos_ref, memb_ref, wqkv, bqkv, wo, bo, b, nq):
    """Cross-attention, flash-style online softmax over S chunks.

    K/V are projected chunk-by-chunk from ref-sliced bf16 memory so the live
    working set is bounded by the chunk size.
    """
    s_len = kpos_ref.shape[1]
    d = q_in.shape[1]
    scale = 1.0 / math.sqrt(HD)
    q = _proj(q_in, wqkv[0], bqkv[0]) * scale           # (b*nq, D) f32
    qh = [q[:, h * HD:(h + 1) * HD].reshape(b, nq, HD).astype(BF16)
          for h in range(NHEADS)]

    chunk = min(CROSS_CHUNK, s_len)
    m = [jnp.full((b, nq, 1), -jnp.inf, jnp.float32) for _ in range(NHEADS)]
    lsum = [jnp.zeros((b, nq, 1), jnp.float32) for _ in range(NHEADS)]
    acc = [jnp.zeros((b, nq, HD), jnp.float32) for _ in range(NHEADS)]

    for c in range(0, s_len, chunk):
        cl = min(chunk, s_len - c)
        kp_c = kpos_ref[:, c:c + cl, :].reshape(b * cl, d)     # bf16 (b*cl, D)
        mm_c = memb_ref[:, c:c + cl, :].reshape(b * cl, d)
        k = jnp.dot(kp_c, wqkv[1], preferred_element_type=jnp.float32) + bqkv[1]
        v = jnp.dot(mm_c, wqkv[2], preferred_element_type=jnp.float32) + bqkv[2]
        for h in range(NHEADS):
            sl = slice(h * HD, (h + 1) * HD)
            kh = k[:, sl].reshape(b, cl, HD).astype(BF16)
            vh = v[:, sl].reshape(b, cl, HD).astype(BF16)
            s = jnp.einsum('bqd,bkd->bqk', qh[h], kh,
                           preferred_element_type=jnp.float32)
            m_new = jnp.maximum(m[h], jnp.max(s, axis=-1, keepdims=True))
            alpha = jnp.exp(m[h] - m_new)
            p = jnp.exp(s - m_new)
            lsum[h] = alpha * lsum[h] + jnp.sum(p, axis=-1, keepdims=True)
            acc[h] = alpha * acc[h] + jnp.einsum(
                'bqk,bkd->bqd', p.astype(BF16), vh,
                preferred_element_type=jnp.float32)
            m[h] = m_new

    out = None
    for h in range(NHEADS):
        o = acc[h] * pl.reciprocal(lsum[h], approx=True)
        contrib = jnp.dot(o.reshape(b * nq, HD).astype(BF16),
                          wo[h * HD:(h + 1) * HD, :],
                          preferred_element_type=jnp.float32)
        out = contrib if out is None else out + contrib
    return out + bo


# ------------------------------ Pallas kernel ---------------------------------
def detr_kernel(qpos_ref, kpos_ref, memb_ref,
                sa_wqkv_ref, sa_bqkv_ref, sa_wo_ref, sa_bo_ref,
                ca_wqkv_ref, ca_bqkv_ref, ca_wo_ref, ca_bo_ref,
                ln_w_ref, ln_b_ref,
                ffn_w1_ref, ffn_b1_ref, ffn_w2_ref, ffn_b2_ref,
                fln_w_ref, fln_b_ref,
                head_w_ref, head_b_ref,
                mlp_w2_ref, mlp_b2_ref, mlp_w3_ref, mlp_b3_ref,
                out_ref):
    b = memb_ref.shape[0]
    d = qpos_ref.shape[1]
    nq = qpos_ref.shape[0] // b
    n_layers = sa_wqkv_ref.shape[0]

    qpos = qpos_ref[...]                        # (B*Q, D)  query pos, tiled
    tgt = jnp.zeros((b * nq, d), jnp.float32)   # folded (batch, query) rows

    # Fully unrolled decoder: all layer weights resident in VMEM (tiny here).
    for l in range(n_layers):
        lnw, lnb = ln_w_ref[l], ln_b_ref[l]

        # --- pre-norm self-attention over the queries of each batch element ---
        t2 = _layer_norm(tgt, lnw[0], lnb[0])
        qk_in = t2 + qpos
        tgt = tgt + _mha_self(qk_in, t2, sa_wqkv_ref[l], sa_bqkv_ref[l],
                              sa_wo_ref[l], sa_bo_ref[l], b, nq)

        # --- pre-norm cross-attention to the image memory (flash over S) ---
        t2 = _layer_norm(tgt, lnw[1], lnb[1])
        tgt = tgt + _mha_cross(t2 + qpos, kpos_ref, memb_ref,
                               ca_wqkv_ref[l], ca_bqkv_ref[l],
                               ca_wo_ref[l], ca_bo_ref[l], b, nq)

        # --- pre-norm feed-forward ---
        t2 = _layer_norm(tgt, lnw[2], lnb[2])
        hmid = jnp.maximum(
            jnp.dot(t2.astype(BF16), ffn_w1_ref[l],
                    preferred_element_type=jnp.float32) + ffn_b1_ref[l], 0.0)
        tgt = tgt + jnp.dot(hmid.astype(BF16), ffn_w2_ref[l],
                            preferred_element_type=jnp.float32) + ffn_b2_ref[l]

    # --- final decoder norm + prediction heads + post-processing --------------
    t = _layer_norm(tgt, fln_w_ref[...], fln_b_ref[...])
    # fused, 128-lane-padded [bbox-MLP linear1 | class head | zeros]
    h_all = jnp.dot(t.astype(BF16), head_w_ref[...],
                    preferred_element_type=jnp.float32) + head_b_ref[...]
    h1 = jnp.maximum(h_all[:, :d], 0.0)
    # softmax(pred_logits)[..., 0] for 2 classes == sigmoid(l0 - l1) (exact)
    score = jax.nn.sigmoid(h_all[:, d:d + 1] - h_all[:, d + 1:d + 2])

    h2 = jnp.maximum(
        jnp.dot(h1.astype(BF16), mlp_w2_ref[...],
                preferred_element_type=jnp.float32) + mlp_b2_ref[...], 0.0)
    bl = jnp.dot(h2.astype(BF16), mlp_w3_ref[...],
                 preferred_element_type=jnp.float32) + mlp_b3_ref[...]
    coord = jax.nn.sigmoid(bl)                  # only columns 0..3 are real

    c0, c1 = coord[:, 0:1], coord[:, 1:2]
    c2, c3 = coord[:, 2:3], coord[:, 3:4]
    # Matches torch post-processing: stack([b1-b3/2, b0-b2/2, b1+b3/2, b0+b2/2]).
    pad = jnp.zeros((b * nq, out_ref.shape[-1] - 5), jnp.float32)
    out_ref[...] = jnp.concatenate(
        [score, c1 - 0.5 * c3, c0 - 0.5 * c2, c1 + 0.5 * c3, c0 + 0.5 * c2, pad],
        axis=-1)


# ------------------------------ JAX glue --------------------------------------
def position_embedding_sine(b, h, w, num_pos_feats, temperature=10000.0):
    """PositionEmbeddingSine(normalize=True), channel-last [B,H,W,2*npf]."""
    scale = 2.0 * math.pi
    ones = jnp.ones((b, h, w), jnp.float32)
    y_embed = jnp.cumsum(ones, axis=1)
    x_embed = jnp.cumsum(ones, axis=2)
    eps = 1e-6
    y_embed = y_embed / (y_embed[:, -1:, :] + eps) * scale
    x_embed = x_embed / (x_embed[:, :, -1:] + eps) * scale
    dim_t = jnp.arange(num_pos_feats, dtype=jnp.float32)
    dim_t = temperature ** (2.0 * jnp.floor(dim_t / 2.0) / num_pos_feats)
    pos_x = x_embed[..., None] / dim_t
    pos_y = y_embed[..., None] / dim_t
    pos_x = jnp.stack([jnp.sin(pos_x[..., 0::2]), jnp.cos(pos_x[..., 1::2])],
                      axis=4).reshape(b, h, w, num_pos_feats)
    pos_y = jnp.stack([jnp.sin(pos_y[..., 0::2]), jnp.cos(pos_y[..., 1::2])],
                      axis=4).reshape(b, h, w, num_pos_feats)
    return jnp.concatenate([pos_y, pos_x], axis=3)


def init_params(key):
    keys = iter(jax.random.split(key, 32))

    def nrm(shape, scl=0.05):
        return jax.random.normal(next(keys), shape, jnp.float32) * scl

    return {
        "query_embed": nrm((Q, D), 1.0),
        "sa_w": nrm((L, 4, D, D)), "sa_b": nrm((L, 4, D)),
        "ca_w": nrm((L, 4, D, D)), "ca_b": nrm((L, 4, D)),
        "ln_w": jnp.ones((L, 3, D), jnp.float32),
        "ln_b": jnp.zeros((L, 3, D), jnp.float32),
        "ffn_w1": nrm((L, D, F)), "ffn_b1": nrm((L, F)),
        "ffn_w2": nrm((L, F, D)), "ffn_b2": nrm((L, D)),
        "fln_w": jnp.ones((D,), jnp.float32),
        "fln_b": jnp.zeros((D,), jnp.float32),
        "cls_w": nrm((D, 2)), "cls_b": nrm((2,)),
        "mlp_w1": nrm((D, D)), "mlp_b1": nrm((D,)),
        "mlp_w2": nrm((D, D)), "mlp_b2": nrm((D,)),
        "mlp_w3": nrm((D, 4)), "mlp_b3": nrm((4,)),
    }


def _vmem_limit_bytes():
    """Generation-aware VMEM budget (~60% of capacity, capped)."""
    cap = 128 * 1024 * 1024
    try:
        info = pltpu.get_tpu_info()
        cap = int(getattr(info, "vmem_capacity_bytes", cap)) or cap
    except Exception:
        pass
    return max(32 * 1024 * 1024, min(int(cap * 0.6), 96 * 1024 * 1024))


def detr_forward(image_embeddings, params, window_size=WINDOW):
    b, c, hh, ww = image_embeddings.shape
    assert (c, hh, ww) == (D, H, W)
    s = hh * ww

    # NCHW -> [B, S, D]   (== .flatten(2).permute(0, 2, 1) in torch)
    mem = image_embeddings.reshape(b, c, s).transpose(0, 2, 1).astype(jnp.float32)
    pos = position_embedding_sine(b, hh, ww, c // 2).reshape(b, s, c).astype(jnp.float32)

    # Precompute bf16 cross-attention operands once (no f32 mem/pos in VMEM,
    # no duplicate scratch, no in-kernel cast pass).
    kpos_bf = (mem + pos).astype(BF16)             # (B, S, D)
    mem_bf = mem.astype(BF16)                      # (B, S, D)
    qpos = jnp.tile(params["query_embed"], (b, 1))  # (B*Q, D) f32

    # Attention weights: qkv stacks (bf16 MXU operands) + output projections.
    sa_wqkv = params["sa_w"][:, :3].astype(BF16)   # (L, 3, D, D)
    sa_bqkv = params["sa_b"][:, :3]                # (L, 3, D)
    sa_wo = params["sa_w"][:, 3].astype(BF16)      # (L, D, D)
    sa_bo = params["sa_b"][:, 3]                   # (L, D)
    ca_wqkv = params["ca_w"][:, :3].astype(BF16)
    ca_bqkv = params["ca_b"][:, :3]
    ca_wo = params["ca_w"][:, 3].astype(BF16)
    ca_bo = params["ca_b"][:, 3]

    ffn_w1 = params["ffn_w1"].astype(BF16)
    ffn_w2 = params["ffn_w2"].astype(BF16)

    # Fused, 128-lane-padded [bbox-MLP linear1 | class head | zeros].
    head_w = jnp.zeros((c, HEAD_PAD), jnp.float32)
    head_w = head_w.at[:, :c].set(params["mlp_w1"])
    head_w = head_w.at[:, c:c + 2].set(params["cls_w"]).astype(BF16)
    head_b = jnp.zeros((1, HEAD_PAD), jnp.float32)
    head_b = head_b.at[0, :c].set(params["mlp_b1"])
    head_b = head_b.at[0, c:c + 2].set(params["cls_b"])

    mlp_w2 = params["mlp_w2"].astype(BF16)
    mlp_b2 = params["mlp_b2"].reshape(1, c)
    # bbox-MLP linear3 padded to 128 lanes (lane-dense MXU output).
    mlp_w3 = jnp.zeros((c, HEAD_PAD), jnp.float32).at[:, :4].set(
        params["mlp_w3"]).astype(BF16)
    mlp_b3 = jnp.zeros((1, HEAD_PAD), jnp.float32).at[0, :4].set(params["mlp_b3"])

    fln_w = params["fln_w"].reshape(1, c)
    fln_b = params["fln_b"].reshape(1, c)

    # Single kernel invocation (no grid): all weights resident in VMEM, layer
    # loop unrolled in-kernel, batch folded into matmul rows. Lane-dense
    # (B*Q, 128) output slab.
    out = pl.pallas_call(
        detr_kernel,
        out_shape=jax.ShapeDtypeStruct((b * Q, HEAD_PAD), jnp.float32),
        compiler_params=pltpu.CompilerParams(
            vmem_limit_bytes=_vmem_limit_bytes()),
    )(qpos, kpos_bf, mem_bf,
      sa_wqkv, sa_bqkv, sa_wo, sa_bo,
      ca_wqkv, ca_bqkv, ca_wo, ca_bo,
      params["ln_w"], params["ln_b"],
      ffn_w1, params["ffn_b1"], ffn_w2, params["ffn_b2"],
      fln_w, fln_b,
      head_w, head_b,
      mlp_w2, mlp_b2, mlp_w3, mlp_b3)

    out = out.reshape(b, Q, HEAD_PAD)
    scores = out[:, :, 0]
    boxes = out[:, :, 1:5] * jnp.float32(window_size)
    # TODO(synk): torch uses int64 labels; JAX default config keeps int32 here.
    labels = jnp.zeros(scores.shape, dtype=jnp.int32)
    return [{"scores": scores[i], "boxes": boxes[i], "labels": labels[i]}
            for i in range(b)]


if __name__ == "__main__":
    key = jax.random.PRNGKey(0)
    kx, kp = jax.random.split(key)
    x = jax.random.normal(kx, (B, D, H, W), jnp.float32)   # NCHW backbone features
    params = init_params(kp)
    preds = detr_forward(x, params)
    jax.block_until_ready(preds)
    assert preds[0]["scores"].shape == (Q,)
    assert preds[0]["boxes"].shape == (Q, 4)
    print("KERNEL_OK")
</pallas_src>

<mosaic_0001>
module attributes {stable_mosaic.version = 11 : i64} {
  func.func @detr_kernel(%arg0: memref<16x32xf32, #tpu.memory_space<vmem>>, %arg1: memref<2x64x32xbf16, #tpu.memory_space<vmem>>, %arg2: memref<2x64x32xbf16, #tpu.memory_space<vmem>>, %arg3: memref<2x3x32x32xbf16, #tpu.memory_space<vmem>>, %arg4: memref<2x3x32xf32, #tpu.memory_space<vmem>>, %arg5: memref<2x32x32xbf16, #tpu.memory_space<vmem>>, %arg6: memref<2x32xf32, #tpu.memory_space<vmem>>, %arg7: memref<2x3x32x32xbf16, #tpu.memory_space<vmem>>, %arg8: memref<2x3x32xf32, #tpu.memory_space<vmem>>, %arg9: memref<2x32x32xbf16, #tpu.memory_space<vmem>>, %arg10: memref<2x32xf32, #tpu.memory_space<vmem>>, %arg11: memref<2x3x32xf32, #tpu.memory_space<vmem>>, %arg12: memref<2x3x32xf32, #tpu.memory_space<vmem>>, %arg13: memref<2x32x64xbf16, #tpu.memory_space<vmem>>, %arg14: memref<2x64xf32, #tpu.memory_space<vmem>>, %arg15: memref<2x64x32xbf16, #tpu.memory_space<vmem>>, %arg16: memref<2x32xf32, #tpu.memory_space<vmem>>, %arg17: memref<1x32xf32, #tpu.memory_space<vmem>>, %arg18: memref<1x32xf32, #tpu.memory_space<vmem>>, %arg19: memref<32x128xbf16, #tpu.memory_space<vmem>>, %arg20: memref<1x128xf32, #tpu.memory_space<vmem>>, %arg21: memref<32x32xbf16, #tpu.memory_space<vmem>>, %arg22: memref<1x32xf32, #tpu.memory_space<vmem>>, %arg23: memref<32x128xbf16, #tpu.memory_space<vmem>>, %arg24: memref<1x128xf32, #tpu.memory_space<vmem>>, %arg25: memref<16x128xf32, #tpu.memory_space<vmem>>) attributes {dimension_semantics = [], scalar_prefetch = 0 : i64, scratch_operands = 0 : i64, tpu.core_type = #tpu.core_type<tc>} {
    %c0 = arith.constant 0 : index
    %c0_0 = arith.constant 0 : index
    %0 = vector.load %arg0[%c0, %c0_0] : memref<16x32xf32, #tpu.memory_space<vmem>>, vector<16x32xf32>
    %cst = arith.constant 0.000000e+00 : f32
    %1 = vector.broadcast %cst : f32 to vector<16x32xf32>
    %c0_1 = arith.constant 0 : index
    %c0_2 = arith.constant 0 : index
    %c0_3 = arith.constant 0 : index
    %2 = vector.load %arg11[%c0_1, %c0_2, %c0_3] : memref<2x3x32xf32, #tpu.memory_space<vmem>>, vector<1x3x32xf32>
    %3 = vector.shape_cast %2 : vector<1x3x32xf32> to vector<3x32xf32>
    %c0_4 = arith.constant 0 : index
    %c0_5 = arith.constant 0 : index
    %c0_6 = arith.constant 0 : index
    %4 = vector.load %arg12[%c0_4, %c0_5, %c0_6] : memref<2x3x32xf32, #tpu.memory_space<vmem>>, vector<1x3x32xf32>
    %5 = vector.shape_cast %4 : vector<1x3x32xf32> to vector<3x32xf32>
    %6 = vector.extract_strided_slice %3 {offsets = [0, 0], sizes = [1, 32], strides = [1, 1]} : vector<3x32xf32> to vector<1x32xf32>
    %7 = vector.shape_cast %6 : vector<1x32xf32> to vector<32xf32>
    %8 = vector.extract_strided_slice %5 {offsets = [0, 0], sizes = [1, 32], strides = [1, 1]} : vector<3x32xf32> to vector<1x32xf32>
    %9 = vector.shape_cast %8 : vector<1x32xf32> to vector<32xf32>
    %cst_7 = arith.constant dense<0.000000e+00> : vector<16xf32>
    %10 = vector.multi_reduction <add>, %1, %cst_7 [1] : vector<16x32xf32> to vector<16xf32>
    %11 = vector.shape_cast %10 : vector<16xf32> to vector<16x1xf32>
    %cst_8 = arith.constant 3.200000e+01 : f32
    %12 = vector.broadcast %cst_8 : f32 to vector<16x1xf32>
    %13 = arith.divf %11, %12 : vector<16x1xf32>
    %14 = vector.broadcast %13 : vector<16x1xf32> to vector<16x32xf32>
    %15 = arith.subf %1, %14 : vector<16x32xf32>
    %16 = arith.mulf %15, %15 : vector<16x32xf32>
    %cst_9 = arith.constant dense<0.000000e+00> : vector<16xf32>
    %17 = vector.multi_reduction <add>, %16, %cst_9 [1] : vector<16x32xf32> to vector<16xf32>
    %18 = vector.shape_cast %17 : vector<16xf32> to vector<16x1xf32>
    %cst_10 = arith.constant 3.200000e+01 : f32
    %19 = vector.broadcast %cst_10 : f32 to vector<16x1xf32>
    %20 = arith.divf %18, %19 : vector<16x1xf32>
    %cst_11 = arith.constant 9.99999974E-6 : f32
    %21 = vector.broadcast %cst_11 : f32 to vector<16x1xf32>
    %22 = arith.addf %20, %21 : vector<16x1xf32>
    %23 = math.rsqrt %22 : vector<16x1xf32>
    %24 = vector.broadcast %23 : vector<16x1xf32> to vector<16x32xf32>
    %25 = arith.mulf %15, %24 : vector<16x32xf32>
    %26 = vector.shape_cast %7 : vector<32xf32> to vector<1x32xf32>
    %27 = vector.broadcast %26 : vector<1x32xf32> to vector<16x32xf32>
    %28 = arith.mulf %25, %27 : vector<16x32xf32>
    %29 = vector.shape_cast %9 : vector<32xf32> to vector<1x32xf32>
    %30 = vector.broadcast %29 : vector<1x32xf32> to vector<16x32xf32>
    %31 = arith.addf %28, %30 : vector<16x32xf32>
    %32 = arith.addf %31, %0 : vector<16x32xf32>
    %c0_12 = arith.constant 0 : index
    %c0_13 = arith.constant 0 : index
    %c0_14 = arith.constant 0 : index
    %c0_15 = arith.constant 0 : index
    %33 = vector.load %arg3[%c0_12, %c0_13, %c0_14, %c0_15] : memref<2x3x32x32xbf16, #tpu.memory_space<vmem>>, vector<1x3x32x32xbf16>
    %34 = vector.shape_cast %33 : vector<1x3x32x32xbf16> to vector<3x32x32xbf16>
    %c0_16 = arith.constant 0 : index
    %c0_17 = arith.constant 0 : index
    %c0_18 = arith.constant 0 : index
    %35 = vector.load %arg4[%c0_16, %c0_17, %c0_18] : memref<2x3x32xf32, #tpu.memory_space<vmem>>, vector<1x3x32xf32>
    %36 = vector.shape_cast %35 : vector<1x3x32xf32> to vector<3x32xf32>
    %c0_19 = arith.constant 0 : index
    %c0_20 = arith.constant 0 : index
    %c0_21 = arith.constant 0 : index
    %37 = vector.load %arg5[%c0_19, %c0_20, %c0_21] : memref<2x32x32xbf16, #tpu.memory_space<vmem>>, vector<1x32x32xbf16>
    %38 = vector.shape_cast %37 : vector<1x32x32xbf16> to vector<32x32xbf16>
    %c0_22 = arith.constant 0 : index
    %c0_23 = arith.constant 0 : index
    %39 = vector.load %arg6[%c0_22, %c0_23] : memref<2x32xf32, #tpu.memory_space<vmem>>, vector<1x32xf32>
    %40 = vector.shape_cast %39 : vector<1x32xf32> to vector<32xf32>
    %41 = vector.extract_strided_slice %34 {offsets = [0, 0, 0], sizes = [1, 32, 32], strides = [1, 1, 1]} : vector<3x32x32xbf16> to vector<1x32x32xbf16>
    %42 = vector.shape_cast %41 : vector<1x32x32xbf16> to vector<32x32xbf16>
    %43 = vector.extract_strided_slice %36 {offsets = [0, 0], sizes = [1, 32], strides = [1, 1]} : vector<3x32xf32> to vector<1x32xf32>
    %44 = vector.shape_cast %43 : vector<1x32xf32> to vector<32xf32>
    %45 = arith.truncf %32 : vector<16x32xf32> to vector<16x32xbf16>
    %cst_24 = arith.constant dense<0.000000e+00> : vector<16x32xf32>
    %46 = tpu.matmul %45, %42, %cst_24 {dimension_numbers = #tpu.dot_dimension_numbers<[1], [0], [0], [1], [0, 0, 1, 1], [], []>} : vector<16x32xbf16>, vector<32x32xbf16>, vector<16x32xf32> -> vector<16x32xf32>
    %47 = vector.shape_cast %44 : vector<32xf32> to vector<1x32xf32>
    %48 = vector.broadcast %47 : vector<1x32xf32> to vector<16x32xf32>
    %49 = arith.addf %46, %48 : vector<16x32xf32>
    %cst_25 = arith.constant 0.353553385 : f32
    %50 = vector.broadcast %cst_25 : f32 to vector<16x32xf32>
    %51 = arith.mulf %49, %50 : vector<16x32xf32>
    %52 = vector.extract_strided_slice %34 {offsets = [1, 0, 0], sizes = [1, 32, 32], strides = [1, 1, 1]} : vector<3x32x32xbf16> to vector<1x32x32xbf16>
    %53 = vector.shape_cast %52 : vector<1x32x32xbf16> to vector<32x32xbf16>
    %54 = vector.extract_strided_slice %36 {offsets = [1, 0], sizes = [1, 32], strides = [1, 1]} : vector<3x32xf32> to vector<1x32xf32>
    %55 = vector.shape_cast %54 : vector<1x32xf32> to vector<32xf32>
    %56 = arith.truncf %32 : vector<16x32xf32> to vector<16x32xbf16>
    %cst_26 = arith.constant dense<0.000000e+00> : vector<16x32xf32>
    %57 = tpu.matmul %56, %53, %cst_26 {dimension_numbers = #tpu.dot_dimension_numbers<[1], [0], [0], [1], [0, 0, 1, 1], [], []>} : vector<16x32xbf16>, vector<32x32xbf16>, vector<16x32xf32> -> vector<16x32xf32>
    %58 = vector.shape_cast %55 : vector<32xf32> to vector<1x32xf32>
    %59 = vector.broadcast %58 : vector<1x32xf32> to vector<16x32xf32>
    %60 = arith.addf %57, %59 : vector<16x32xf32>
    %61 = vector.extract_strided_slice %34 {offsets = [2, 0, 0], sizes = [1, 32, 32], strides = [1, 1, 1]} : vector<3x32x32xbf16> to vector<1x32x32xbf16>
    %62 = vector.shape_cast %61 : vector<1x32x32xbf16> to vector<32x32xbf16>
    %63 = vector.extract_strided_slice %36 {offsets = [2, 0], sizes = [1, 32], strides = [1, 1]} : vector<3x32xf32> to vector<1x32xf32>
    %64 = vector.shape_cast %63 : vector<1x32xf32> to vector<32xf32>
    %65 = arith.truncf %31 : vector<16x32xf32> to vector<16x32xbf16>
    %cst_27 = arith.constant dense<0.000000e+00> : vector<16x32xf32>
    %66 = tpu.matmul %65, %62, %cst_27 {dimension_numbers = #tpu.dot_dimension_numbers<[1], [0], [0], [1], [0, 0, 1, 1], [], []>} : vector<16x32xbf16>, vector<32x32xbf16>, vector<16x32xf32> -> vector<16x32xf32>
    %67 = vector.shape_cast %64 : vector<32xf32> to vector<1x32xf32>
    %68 = vector.broadcast %67 : vector<1x32xf32> to vector<16x32xf32>
    %69 = arith.addf %66, %68 : vector<16x32xf32>
    %70 = vector.extract_strided_slice %51 {offsets = [0, 0], sizes = [16, 8], strides = [1, 1]} : vector<16x32xf32> to vector<16x8xf32>
    %71 = vector.shape_cast %70 : vector<16x8xf32> to vector<2x8x8xf32>
    %72 = arith.truncf %71 : vector<2x8x8xf32> to vector<2x8x8xbf16>
    %73 = vector.extract_strided_slice %60 {offsets = [0, 0], sizes = [16, 8], strides = [1, 1]} : vector<16x32xf32> to vector<16x8xf32>
    %74 = vector.shape_cast %73 : vector<16x8xf32> to vector<2x8x8xf32>
    %75 = arith.truncf %74 : vector<2x8x8xf32> to vector<2x8x8xbf16>
    %76 = vector.extract_strided_slice %69 {offsets = [0, 0], sizes = [16, 8], strides = [1, 1]} : vector<16x32xf32> to vector<16x8xf32>
    %77 = vector.shape_cast %76 : vector<16x8xf32> to vector<2x8x8xf32>
    %78 = arith.truncf %77 : vector<2x8x8xf32> to vector<2x8x8xbf16>
    "tpu.trace_start"() <{level = 10 : i32, message = "bqd,bkd->bqk"}> : () -> ()
    %cst_28 = arith.constant dense<0.000000e+00> : vector<2x8x8xf32>
    %79 = tpu.matmul %72, %75, %cst_28 {dimension_numbers = #tpu.dot_dimension_numbers<[2], [2], [1], [1], [0, 0, 0, 1, 1, 1], [0], [0]>} : vector<2x8x8xbf16>, vector<2x8x8xbf16>, vector<2x8x8xf32> -> vector<2x8x8xf32>
    "tpu.trace_stop"() : () -> ()
    %cst_29 = arith.constant dense<0xFF800000> : vector<2x8xf32>
    %80 = vector.multi_reduction <maximumf>, %79, %cst_29 [2] : vector<2x8x8xf32> to vector<2x8xf32>
    %81 = vector.shape_cast %80 : vector<2x8xf32> to vector<2x8x1xf32>
    %82 = vector.broadcast %81 : vector<2x8x1xf32> to vector<2x8x8xf32>
    %83 = arith.subf %79, %82 : vector<2x8x8xf32>
    %84 = math.exp %83 : vector<2x8x8xf32>
    %cst_30 = arith.constant dense<0.000000e+00> : vector<2x8xf32>
    %85 = vector.multi_reduction <add>, %84, %cst_30 [2] : vector<2x8x8xf32> to vector<2x8xf32>
    %86 = vector.shape_cast %85 : vector<2x8xf32> to vector<2x8x1xf32>
    %87 = tpu.reciprocal %86 {approx = true} : vector<2x8x1xf32> -> vector<2x8x1xf32>
    %88 = vector.broadcast %87 : vector<2x8x1xf32> to vector<2x8x8xf32>
    %89 = arith.mulf %84, %88 : vector<2x8x8xf32>
    %90 = arith.truncf %89 : vector<2x8x8xf32> to vector<2x8x8xbf16>
    "tpu.trace_start"() <{level = 10 : i32, message = "bqk,bkd->bqd"}> : () -> ()
    %cst_31 = arith.constant dense<0.000000e+00> : vector<2x8x8xf32>
    %91 = tpu.matmul %90, %78, %cst_31 {dimension_numbers = #tpu.dot_dimension_numbers<[2], [1], [1], [2], [0, 0, 0, 1, 1, 2], [0], [0]>} : vector<2x8x8xbf16>, vector<2x8x8xbf16>, vector<2x8x8xf32> -> vector<2x8x8xf32>
    "tpu.trace_stop"() : () -> ()
    %92 = vector.shape_cast %91 : vector<2x8x8xf32> to vector<16x8xf32>
    %93 = arith.truncf %92 : vector<16x8xf32> to vector<16x8xbf16>
    %94 = vector.extract_strided_slice %38 {offsets = [0, 0], sizes = [8, 32], strides = [1, 1]} : vector<32x32xbf16> to vector<8x32xbf16>
    %cst_32 = arith.constant dense<0.000000e+00> : vector<16x32xf32>
    %95 = tpu.matmul %93, %94, %cst_32 {dimension_numbers = #tpu.dot_dimension_numbers<[1], [0], [0], [1], [0, 0, 1, 1], [], []>} : vector<16x8xbf16>, vector<8x32xbf16>, vector<16x32xf32> -> vector<16x32xf32>
    %96 = vector.extract_strided_slice %51 {offsets = [0, 8], sizes = [16, 8], strides = [1, 1]} : vector<16x32xf32> to vector<16x8xf32>
    %97 = vector.shape_cast %96 : vector<16x8xf32> to vector<2x8x8xf32>
    %98 = arith.truncf %97 : vector<2x8x8xf32> to vector<2x8x8xbf16>
    %99 = vector.extract_strided_slice %60 {offsets = [0, 8], sizes = [16, 8], strides = [1, 1]} : vector<16x32xf32> to vector<16x8xf32>
    %100 = vector.shape_cast %99 : vector<16x8xf32> to vector<2x8x8xf32>
    %101 = arith.truncf %100 : vector<2x8x8xf32> to vector<2x8x8xbf16>
    %102 = vector.extract_strided_slice %69 {offsets = [0, 8], sizes = [16, 8], strides = [1, 1]} : vector<16x32xf32> to vector<16x8xf32>
    %103 = vector.shape_cast %102 : vector<16x8xf32> to vector<2x8x8xf32>
    %104 = arith.truncf %103 : vector<2x8x8xf32> to vector<2x8x8xbf16>
    "tpu.trace_start"() <{level = 10 : i32, message = "bqd,bkd->bqk"}> : () -> ()
    %cst_33 = arith.constant dense<0.000000e+00> : vector<2x8x8xf32>
    %105 = tpu.matmul %98, %101, %cst_33 {dimension_numbers = #tpu.dot_dimension_numbers<[2], [2], [1], [1], [0, 0, 0, 1, 1, 1], [0], [0]>} : vector<2x8x8xbf16>, vector<2x8x8xbf16>, vector<2x8x8xf32> -> vector<2x8x8xf32>
    "tpu.trace_stop"() : () -> ()
    %cst_34 = arith.constant dense<0xFF800000> : vector<2x8xf32>
    %106 = vector.multi_reduction <maximumf>, %105, %cst_34 [2] : vector<2x8x8xf32> to vector<2x8xf32>
    %107 = vector.shape_cast %106 : vector<2x8xf32> to vector<2x8x1xf32>
    %108 = vector.broadcast %107 : vector<2x8x1xf32> to vector<2x8x8xf32>
    %109 = arith.subf %105, %108 : vector<2x8x8xf32>
    %110 = math.exp %109 : vector<2x8x8xf32>
    %cst_35 = arith.constant dense<0.000000e+00> : vector<2x8xf32>
    %111 = vector.multi_reduction <add>, %110, %cst_35 [2] : vector<2x8x8xf32> to vector<2x8xf32>
    %112 = vector.shape_cast %111 : vector<2x8xf32> to vector<2x8x1xf32>
    %113 = tpu.reciprocal %112 {approx = true} : vector<2x8x1xf32> -> vector<2x8x1xf32>
    %114 = vector.broadcast %113 : vector<2x8x1xf32> to vector<2x8x8xf32>
    %115 = arith.mulf %110, %114 : vector<2x8x8xf32>
    %116 = arith.truncf %115 : vector<2x8x8xf32> to vector<2x8x8xbf16>
    "tpu.trace_start"() <{level = 10 : i32, message = "bqk,bkd->bqd"}> : () -> ()
    %cst_36 = arith.constant dense<0.000000e+00> : vector<2x8x8xf32>
    %117 = tpu.matmul %116, %104, %cst_36 {dimension_numbers = #tpu.dot_dimension_numbers<[2], [1], [1], [2], [0, 0, 0, 1, 1, 2], [0], [0]>} : vector<2x8x8xbf16>, vector<2x8x8xbf16>, vector<2x8x8xf32> -> vector<2x8x8xf32>
    "tpu.trace_stop"() : () -> ()
    %118 = vector.shape_cast %117 : vector<2x8x8xf32> to vector<16x8xf32>
    %119 = arith.truncf %118 : vector<16x8xf32> to vector<16x8xbf16>
    %120 = vector.extract_strided_slice %38 {offsets = [8, 0], sizes = [8, 32], strides = [1, 1]} : vector<32x32xbf16> to vector<8x32xbf16>
    %cst_37 = arith.constant dense<0.000000e+00> : vector<16x32xf32>
    %121 = tpu.matmul %119, %120, %cst_37 {dimension_numbers = #tpu.dot_dimension_numbers<[1], [0], [0], [1], [0, 0, 1, 1], [], []>} : vector<16x8xbf16>, vector<8x32xbf16>, vector<16x32xf32> -> vector<16x32xf32>
    %122 = arith.addf %95, %121 : vector<16x32xf32>
    %123 = vector.extract_strided_slice %51 {offsets = [0, 16], sizes = [16, 8], strides = [1, 1]} : vector<16x32xf32> to vector<16x8xf32>
    %124 = vector.shape_cast %123 : vector<16x8xf32> to vector<2x8x8xf32>
    %125 = arith.truncf %124 : vector<2x8x8xf32> to vector<2x8x8xbf16>
    %126 = vector.extract_strided_slice %60 {offsets = [0, 16], sizes = [16, 8], strides = [1, 1]} : vector<16x32xf32> to vector<16x8xf32>
    %127 = vector.shape_cast %126 : vector<16x8xf32> to vector<2x8x8xf32>
    %128 = arith.truncf %127 : vector<2x8x8xf32> to vector<2x8x8xbf16>
    %129 = vector.extract_strided_slice %69 {offsets = [0, 16], sizes = [16, 8], strides = [1, 1]} : vector<16x32xf32> to vector<16x8xf32>
    %130 = vector.shape_cast %129 : vector<16x8xf32> to vector<2x8x8xf32>
    %131 = arith.truncf %130 : vector<2x8x8xf32> to vector<2x8x8xbf16>
    "tpu.trace_start"() <{level = 10 : i32, message = "bqd,bkd->bqk"}> : () -> ()
    %cst_38 = arith.constant dense<0.000000e+00> : vector<2x8x8xf32>
    %132 = tpu.matmul %125, %128, %cst_38 {dimension_numbers = #tpu.dot_dimension_numbers<[2], [2], [1], [1], [0, 0, 0, 1, 1, 1], [0], [0]>} : vector<2x8x8xbf16>, vector<2x8x8xbf16>, vector<2x8x8xf32> -> vector<2x8x8xf32>
    "tpu.trace_stop"() : () -> ()
    %cst_39 = arith.constant dense<0xFF800000> : vector<2x8xf32>
    %133 = vector.multi_reduction <maximumf>, %132, %cst_39 [2] : vector<2x8x8xf32> to vector<2x8xf32>
    %134 = vector.shape_cast %133 : vector<2x8xf32> to vector<2x8x1xf32>
    %135 = vector.broadcast %134 : vector<2x8x1xf32> to vector<2x8x8xf32>
    %136 = arith.subf %132, %135 : vector<2x8x8xf32>
    %137 = math.exp %136 : vector<2x8x8xf32>
    %cst_40 = arith.constant dense<0.000000e+00> : vector<2x8xf32>
    %138 = vector.multi_reduction <add>, %137, %cst_40 [2] : vector<2x8x8xf32> to vector<2x8xf32>
    %139 = vector.shape_cast %138 : vector<2x8xf32> to vector<2x8x1xf32>
    %140 = tpu.reciprocal %139 {approx = true} : vector<2x8x1xf32> -> vector<2x8x1xf32>
    %141 = vector.broadcast %140 : vector<2x8x1xf32> to vector<2x8x8xf32>
    %142 = arith.mulf %137, %141 : vector<2x8x8xf32>
    %143 = arith.truncf %142 : vector<2x8x8xf32> to vector<2x8x8xbf16>
    "tpu.trace_start"() <{level = 10 : i32, message = "bqk,bkd->bqd"}> : () -> ()
    %cst_41 = arith.constant dense<0.000000e+00> : vector<2x8x8xf32>
    %144 = tpu.matmul %143, %131, %cst_41 {dimension_numbers = #tpu.dot_dimension_numbers<[2], [1], [1], [2], [0, 0, 0, 1, 1, 2], [0], [0]>} : vector<2x8x8xbf16>, vector<2x8x8xbf16>, vector<2x8x8xf32> -> vector<2x8x8xf32>
    "tpu.trace_stop"() : () -> ()
    %145 = vector.shape_cast %144 : vector<2x8x8xf32> to vector<16x8xf32>
    %146 = arith.truncf %145 : vector<16x8xf32> to vector<16x8xbf16>
    %147 = vector.extract_strided_slice %38 {offsets = [16, 0], sizes = [8, 32], strides = [1, 1]} : vector<32x32xbf16> to vector<8x32xbf16>
    %cst_42 = arith.constant dense<0.000000e+00> : vector<16x32xf32>
    %148 = tpu.matmul %146, %147, %cst_42 {dimension_numbers = #tpu.dot_dimension_numbers<[1], [0], [0], [1], [0, 0, 1, 1], [], []>} : vector<16x8xbf16>, vector<8x32xbf16>, vector<16x32xf32> -> vector<16x32xf32>
    %149 = arith.addf %122, %148 : vector<16x32xf32>
    %150 = vector.extract_strided_slice %51 {offsets = [0, 24], sizes = [16, 8], strides = [1, 1]} : vector<16x32xf32> to vector<16x8xf32>
    %151 = vector.shape_cast %150 : vector<16x8xf32> to vector<2x8x8xf32>
    %152 = arith.truncf %151 : vector<2x8x8xf32> to vector<2x8x8xbf16>
    %153 = vector.extract_strided_slice %60 {offsets = [0, 24], sizes = [16, 8], strides = [1, 1]} : vector<16x32xf32> to vector<16x8xf32>
    %154 = vector.shape_cast %153 : vector<16x8xf32> to vector<2x8x8xf32>
    %155 = arith.truncf %154 : vector<2x8x8xf32> to vector<2x8x8xbf16>
    %156 = vector.extract_strided_slice %69 {offsets = [0, 24], sizes = [16, 8], strides = [1, 1]} : vector<16x32xf32> to vector<16x8xf32>
    %157 = vector.shape_cast %156 : vector<16x8xf32> to vector<2x8x8xf32>
    %158 = arith.truncf %157 : vector<2x8x8xf32> to vector<2x8x8xbf16>
    "tpu.trace_start"() <{level = 10 : i32, message = "bqd,bkd->bqk"}> : () -> ()
    %cst_43 = arith.constant dense<0.000000e+00> : vector<2x8x8xf32>
    %159 = tpu.matmul %152, %155, %cst_43 {dimension_numbers = #tpu.dot_dimension_numbers<[2], [2], [1], [1], [0, 0, 0, 1, 1, 1], [0], [0]>} : vector<2x8x8xbf16>, vector<2x8x8xbf16>, vector<2x8x8xf32> -> vector<2x8x8xf32>
    "tpu.trace_stop"() : () -> ()
    %cst_44 = arith.constant dense<0xFF800000> : vector<2x8xf32>
    %160 = vector.multi_reduction <maximumf>, %159, %cst_44 [2] : vector<2x8x8xf32> to vector<2x8xf32>
    %161 = vector.shape_cast %160 : vector<2x8xf32> to vector<2x8x1xf32>
    %162 = vector.broadcast %161 : vector<2x8x1xf32> to vector<2x8x8xf32>
    %163 = arith.subf %159, %162 : vector<2x8x8xf32>
    %164 = math.exp %163 : vector<2x8x8xf32>
    %cst_45 = arith.constant dense<0.000000e+00> : vector<2x8xf32>
    %165 = vector.multi_reduction <add>, %164, %cst_45 [2] : vector<2x8x8xf32> to vector<2x8xf32>
    %166 = vector.shape_cast %165 : vector<2x8xf32> to vector<2x8x1xf32>
    %167 = tpu.reciprocal %166 {approx = true} : vector<2x8x1xf32> -> vector<2x8x1xf32>
    %168 = vector.broadcast %167 : vector<2x8x1xf32> to vector<2x8x8xf32>
    %169 = arith.mulf %164, %168 : vector<2x8x8xf32>
    %170 = arith.truncf %169 : vector<2x8x8xf32> to vector<2x8x8xbf16>
    "tpu.trace_start"() <{level = 10 : i32, message = "bqk,bkd->bqd"}> : () -> ()
    %cst_46 = arith.constant dense<0.000000e+00> : vector<2x8x8xf32>
    %171 = tpu.matmul %170, %158, %cst_46 {dimension_numbers = #tpu.dot_dimension_numbers<[2], [1], [1], [2], [0, 0, 0, 1, 1, 2], [0], [0]>} : vector<2x8x8xbf16>, vector<2x8x8xbf16>, vector<2x8x8xf32> -> vector<2x8x8xf32>
    "tpu.trace_stop"() : () -> ()
    %172 = vector.shape_cast %171 : vector<2x8x8xf32> to vector<16x8xf32>
    %173 = arith.truncf %172 : vector<16x8xf32> to vector<16x8xbf16>
    %174 = vector.extract_strided_slice %38 {offsets = [24, 0], sizes = [8, 32], strides = [1, 1]} : vector<32x32xbf16> to vector<8x32xbf16>
    %cst_47 = arith.constant dense<0.000000e+00> : vector<16x32xf32>
    %175 = tpu.matmul %173, %174, %cst_47 {dimension_numbers = #tpu.dot_dimension_numbers<[1], [0], [0], [1], [0, 0, 1, 1], [], []>} : vector<16x8xbf16>, vector<8x32xbf16>, vector<16x32xf32> -> vector<16x32xf32>
    %176 = arith.addf %149, %175 : vector<16x32xf32>
    %177 = vector.shape_cast %40 : vector<32xf32> to vector<1x32xf32>
    %178 = vector.broadcast %177 : vector<1x32xf32> to vector<16x32xf32>
    %179 = arith.addf %176, %178 : vector<16x32xf32>
    %180 = arith.addf %1, %179 : vector<16x32xf32>
    %181 = vector.extract_strided_slice %3 {offsets = [1, 0], sizes = [1, 32], strides = [1, 1]} : vector<3x32xf32> to vector<1x32xf32>
    %182 = vector.shape_cast %181 : vector<1x32xf32> to vector<32xf32>
    %183 = vector.extract_strided_slice %5 {offsets = [1, 0], sizes = [1, 32], strides = [1, 1]} : vector<3x32xf32> to vector<1x32xf32>
    %184 = vector.shape_cast %183 : vector<1x32xf32> to vector<32xf32>
    %cst_48 = arith.constant dense<0.000000e+00> : vector<16xf32>
    %185 = vector.multi_reduction <add>, %180, %cst_48 [1] : vector<16x32xf32> to vector<16xf32>
    %186 = vector.shape_cast %185 : vector<16xf32> to vector<16x1xf32>
    %cst_49 = arith.constant 3.200000e+01 : f32
    %187 = vector.broadcast %cst_49 : f32 to vector<16x1xf32>
    %188 = arith.divf %186, %187 : vector<16x1xf32>
    %189 = vector.broadcast %188 : vector<16x1xf32> to vector<16x32xf32>
    %190 = arith.subf %180, %189 : vector<16x32xf32>
    %191 = arith.mulf %190, %190 : vector<16x32xf32>
    %cst_50 = arith.constant dense<0.000000e+00> : vector<16xf32>
    %192 = vector.multi_reduction <add>, %191, %cst_50 [1] : vector<16x32xf32> to vector<16xf32>
    %193 = vector.shape_cast %192 : vector<16xf32> to vector<16x1xf32>
    %cst_51 = arith.constant 3.200000e+01 : f32
    %194 = vector.broadcast %cst_51 : f32 to vector<16x1xf32>
    %195 = arith.divf %193, %194 : vector<16x1xf32>
    %cst_52 = arith.constant 9.99999974E-6 : f32
    %196 = vector.broadcast %cst_52 : f32 to vector<16x1xf32>
    %197 = arith.addf %195, %196 : vector<16x1xf32>
    %198 = math.rsqrt %197 : vector<16x1xf32>
    %199 = vector.broadcast %198 : vector<16x1xf32> to vector<16x32xf32>
    %200 = arith.mulf %190, %199 : vector<16x32xf32>
    %201 = vector.shape_cast %182 : vector<32xf32> to vector<1x32xf32>
    %202 = vector.broadcast %201 : vector<1x32xf32> to vector<16x32xf32>
    %203 = arith.mulf %200, %202 : vector<16x32xf32>
    %204 = vector.shape_cast %184 : vector<32xf32> to vector<1x32xf32>
    %205 = vector.broadcast %204 : vector<1x32xf32> to vector<16x32xf32>
    %206 = arith.addf %203, %205 : vector<16x32xf32>
    %207 = arith.addf %206, %0 : vector<16x32xf32>
    %c0_53 = arith.constant 0 : index
    %c0_54 = arith.constant 0 : index
    %c0_55 = arith.constant 0 : index
    %c0_56 = arith.constant 0 : index
    %208 = vector.load %arg7[%c0_53, %c0_54, %c0_55, %c0_56] : memref<2x3x32x32xbf16, #tpu.memory_space<vmem>>, vector<1x3x32x32xbf16>
    %209 = vector.shape_cast %208 : vector<1x3x32x32xbf16> to vector<3x32x32xbf16>
    %c0_57 = arith.constant 0 : index
    %c0_58 = arith.constant 0 : index
    %c0_59 = arith.constant 0 : index
    %210 = vector.load %arg8[%c0_57, %c0_58, %c0_59] : memref<2x3x32xf32, #tpu.memory_space<vmem>>, vector<1x3x32xf32>
    %211 = vector.shape_cast %210 : vector<1x3x32xf32> to vector<3x32xf32>
    %c0_60 = arith.constant 0 : index
    %c0_61 = arith.constant 0 : index
    %c0_62 = arith.constant 0 : index
    %212 = vector.load %arg9[%c0_60, %c0_61, %c0_62] : memref<2x32x32xbf16, #tpu.memory_space<vmem>>, vector<1x32x32xbf16>
    %213 = vector.shape_cast %212 : vector<1x32x32xbf16> to vector<32x32xbf16>
    %c0_63 = arith.constant 0 : index
    %c0_64 = arith.constant 0 : index
    %214 = vector.load %arg10[%c0_63, %c0_64] : memref<2x32xf32, #tpu.memory_space<vmem>>, vector<1x32xf32>
    %215 = vector.shape_cast %214 : vector<1x32xf32> to vector<32xf32>
    %216 = vector.extract_strided_slice %209 {offsets = [0, 0, 0], sizes = [1, 32, 32], strides = [1, 1, 1]} : vector<3x32x32xbf16> to vector<1x32x32xbf16>
    %217 = vector.shape_cast %216 : vector<1x32x32xbf16> to vector<32x32xbf16>
    %218 = vector.extract_strided_slice %211 {offsets = [0, 0], sizes = [1, 32], strides = [1, 1]} : vector<3x32xf32> to vector<1x32xf32>
    %219 = vector.shape_cast %218 : vector<1x32xf32> to vector<32xf32>
    %220 = arith.truncf %207 : vector<16x32xf32> to vector<16x32xbf16>
    %cst_65 = arith.constant dense<0.000000e+00> : vector<16x32xf32>
    %221 = tpu.matmul %220, %217, %cst_65 {dimension_numbers = #tpu.dot_dimension_numbers<[1], [0], [0], [1], [0, 0, 1, 1], [], []>} : vector<16x32xbf16>, vector<32x32xbf16>, vector<16x32xf32> -> vector<16x32xf32>
    %222 = vector.shape_cast %219 : vector<32xf32> to vector<1x32xf32>
    %223 = vector.broadcast %222 : vector<1x32xf32> to vector<16x32xf32>
    %224 = arith.addf %221, %223 : vector<16x32xf32>
    %cst_66 = arith.constant 0.353553385 : f32
    %225 = vector.broadcast %cst_66 : f32 to vector<16x32xf32>
    %226 = arith.mulf %224, %225 : vector<16x32xf32>
    %227 = vector.extract_strided_slice %226 {offsets = [0, 0], sizes = [16, 8], strides = [1, 1]} : vector<16x32xf32> to vector<16x8xf32>
    %228 = vector.shape_cast %227 : vector<16x8xf32> to vector<2x8x8xf32>
    %229 = arith.truncf %228 : vector<2x8x8xf32> to vector<2x8x8xbf16>
    %230 = vector.extract_strided_slice %226 {offsets = [0, 8], sizes = [16, 8], strides = [1, 1]} : vector<16x32xf32> to vector<16x8xf32>
    %231 = vector.shape_cast %230 : vector<16x8xf32> to vector<2x8x8xf32>
    %232 = arith.truncf %231 : vector<2x8x8xf32> to vector<2x8x8xbf16>
    %233 = vector.extract_strided_slice %226 {offsets = [0, 16], sizes = [16, 8], strides = [1, 1]} : vector<16x32xf32> to vector<16x8xf32>
    %234 = vector.shape_cast %233 : vector<16x8xf32> to vector<2x8x8xf32>
    %235 = arith.truncf %234 : vector<2x8x8xf32> to vector<2x8x8xbf16>
    %236 = vector.extract_strided_slice %226 {offsets = [0, 24], sizes = [16, 8], strides = [1, 1]} : vector<16x32xf32> to vector<16x8xf32>
    %237 = vector.shape_cast %236 : vector<16x8xf32> to vector<2x8x8xf32>
    %238 = arith.truncf %237 : vector<2x8x8xf32> to vector<2x8x8xbf16>
    %cst_67 = arith.constant 0xFF800000 : f32
    %239 = vector.broadcast %cst_67 : f32 to vector<2x8x1xf32>
    %cst_68 = arith.constant 0xFF800000 : f32
    %240 = vector.broadcast %cst_68 : f32 to vector<2x8x1xf32>
    %cst_69 = arith.constant 0xFF800000 : f32
    %241 = vector.broadcast %cst_69 : f32 to vector<2x8x1xf32>
    %cst_70 = arith.constant 0xFF800000 : f32
    %242 = vector.broadcast %cst_70 : f32 to vector<2x8x1xf32>
    %cst_71 = arith.constant 0.000000e+00 : f32
    %243 = vector.broadcast %cst_71 : f32 to vector<2x8x1xf32>
    %cst_72 = arith.constant 0.000000e+00 : f32
    %244 = vector.broadcast %cst_72 : f32 to vector<2x8x1xf32>
    %cst_73 = arith.constant 0.000000e+00 : f32
    %245 = vector.broadcast %cst_73 : f32 to vector<2x8x1xf32>
    %cst_74 = arith.constant 0.000000e+00 : f32
    %246 = vector.broadcast %cst_74 : f32 to vector<2x8x1xf32>
    %cst_75 = arith.constant 0.000000e+00 : f32
    %247 = vector.broadcast %cst_75 : f32 to vector<2x8x8xf32>
    %cst_76 = arith.constant 0.000000e+00 : f32
    %248 = vector.broadcast %cst_76 : f32 to vector<2x8x8xf32>
    %cst_77 = arith.constant 0.000000e+00 : f32
    %249 = vector.broadcast %cst_77 : f32 to vector<2x8x8xf32>
    %cst_78 = arith.constant 0.000000e+00 : f32
    %250 = vector.broadcast %cst_78 : f32 to vector<2x8x8xf32>
    %c0_79 = arith.constant 0 : index
    %c0_80 = arith.constant 0 : index
    %c0_81 = arith.constant 0 : index
    %251 = vector.load %arg1[%c0_79, %c0_80, %c0_81] : memref<2x64x32xbf16, #tpu.memory_space<vmem>>, vector<2x64x32xbf16>
    %252 = vector.shape_cast %251 : vector<2x64x32xbf16> to vector<128x32xbf16>
    %c0_82 = arith.constant 0 : index
    %c0_83 = arith.constant 0 : index
    %c0_84 = arith.constant 0 : index
    %253 = vector.load %arg2[%c0_82, %c0_83, %c0_84] : memref<2x64x32xbf16, #tpu.memory_space<vmem>>, vector<2x64x32xbf16>
    %254 = vector.shape_cast %253 : vector<2x64x32xbf16> to vector<128x32xbf16>
    %255 = vector.extract_strided_slice %209 {offsets = [1, 0, 0], sizes = [1, 32, 32], strides = [1, 1, 1]} : vector<3x32x32xbf16> to vector<1x32x32xbf16>
    %256 = vector.shape_cast %255 : vector<1x32x32xbf16> to vector<32x32xbf16>
    %cst_85 = arith.constant dense<0.000000e+00> : vector<128x32xf32>
    %257 = tpu.matmul %252, %256, %cst_85 {dimension_numbers = #tpu.dot_dimension_numbers<[1], [0], [0], [1], [0, 0, 1, 1], [], []>} : vector<128x32xbf16>, vector<32x32xbf16>, vector<128x32xf32> -> vector<128x32xf32>
    %258 = vector.extract_strided_slice %211 {offsets = [1, 0], sizes = [1, 32], strides = [1, 1]} : vector<3x32xf32> to vector<1x32xf32>
    %259 = vector.shape_cast %258 : vector<1x32xf32> to vector<32xf32>
    %260 = vector.shape_cast %259 : vector<32xf32> to vector<1x32xf32>
    %261 = vector.broadcast %260 : vector<1x32xf32> to vector<128x32xf32>
    %262 = arith.addf %257, %261 : vector<128x32xf32>
    %263 = vector.extract_strided_slice %209 {offsets = [2, 0, 0], sizes = [1, 32, 32], strides = [1, 1, 1]} : vector<3x32x32xbf16> to vector<1x32x32xbf16>
    %264 = vector.shape_cast %263 : vector<1x32x32xbf16> to vector<32x32xbf16>
    %cst_86 = arith.constant dense<0.000000e+00> : vector<128x32xf32>
    %265 = tpu.matmul %254, %264, %cst_86 {dimension_numbers = #tpu.dot_dimension_numbers<[1], [0], [0], [1], [0, 0, 1, 1], [], []>} : vector<128x32xbf16>, vector<32x32xbf16>, vector<128x32xf32> -> vector<128x32xf32>
    %266 = vector.extract_strided_slice %211 {offsets = [2, 0], sizes = [1, 32], strides = [1, 1]} : vector<3x32xf32> to vector<1x32xf32>
    %267 = vector.shape_cast %266 : vector<1x32xf32> to vector<32xf32>
    %268 = vector.shape_cast %267 : vector<32xf32> to vector<1x32xf32>
    %269 = vector.broadcast %268 : vector<1x32xf32> to vector<128x32xf32>
    %270 = arith.addf %265, %269 : vector<128x32xf32>
    %271 = vector.extract_strided_slice %262 {offsets = [0, 0], sizes = [128, 8], strides = [1, 1]} : vector<128x32xf32> to vector<128x8xf32>
    %272 = vector.shape_cast %271 : vector<128x8xf32> to vector<2x64x8xf32>
    %273 = arith.truncf %272 : vector<2x64x8xf32> to vector<2x64x8xbf16>
    %274 = vector.extract_strided_slice %270 {offsets = [0, 0], sizes = [128, 8], strides = [1, 1]} : vector<128x32xf32> to vector<128x8xf32>
    %275 = vector.shape_cast %274 : vector<128x8xf32> to vector<2x64x8xf32>
    %276 = arith.truncf %275 : vector<2x64x8xf32> to vector<2x64x8xbf16>
    "tpu.trace_start"() <{level = 10 : i32, message = "bqd,bkd->bqk"}> : () -> ()
    %cst_87 = arith.constant dense<0.000000e+00> : vector<2x8x64xf32>
    %277 = tpu.matmul %229, %273, %cst_87 {dimension_numbers = #tpu.dot_dimension_numbers<[2], [2], [1], [1], [0, 0, 0, 1, 1, 1], [0], [0]>} : vector<2x8x8xbf16>, vector<2x64x8xbf16>, vector<2x8x64xf32> -> vector<2x8x64xf32>
    "tpu.trace_stop"() : () -> ()
    %cst_88 = arith.constant dense<0xFF800000> : vector<2x8xf32>
    %278 = vector.multi_reduction <maximumf>, %277, %cst_88 [2] : vector<2x8x64xf32> to vector<2x8xf32>
    %279 = vector.shape_cast %278 : vector<2x8xf32> to vector<2x8x1xf32>
    %280 = arith.maximumf %239, %279 : vector<2x8x1xf32>
    %281 = arith.subf %239, %280 : vector<2x8x1xf32>
    %282 = math.exp %281 : vector<2x8x1xf32>
    %283 = vector.broadcast %280 : vector<2x8x1xf32> to vector<2x8x64xf32>
    %284 = arith.subf %277, %283 : vector<2x8x64xf32>
    %285 = math.exp %284 : vector<2x8x64xf32>
    %286 = arith.mulf %282, %243 : vector<2x8x1xf32>
    %cst_89 = arith.constant dense<0.000000e+00> : vector<2x8xf32>
    %287 = vector.multi_reduction <add>, %285, %cst_89 [2] : vector<2x8x64xf32> to vector<2x8xf32>
    %288 = vector.shape_cast %287 : vector<2x8xf32> to vector<2x8x1xf32>
    %289 = arith.addf %286, %288 : vector<2x8x1xf32>
    %290 = vector.broadcast %282 : vector<2x8x1xf32> to vector<2x8x8xf32>
    %291 = arith.mulf %290, %247 : vector<2x8x8xf32>
    %292 = arith.truncf %285 : vector<2x8x64xf32> to vector<2x8x64xbf16>
    "tpu.trace_start"() <{level = 10 : i32, message = "bqk,bkd->bqd"}> : () -> ()
    %cst_90 = arith.constant dense<0.000000e+00> : vector<2x8x8xf32>
    %293 = tpu.matmul %292, %276, %cst_90 {dimension_numbers = #tpu.dot_dimension_numbers<[2], [1], [1], [2], [0, 0, 0, 1, 1, 2], [0], [0]>} : vector<2x8x64xbf16>, vector<2x64x8xbf16>, vector<2x8x8xf32> -> vector<2x8x8xf32>
    "tpu.trace_stop"() : () -> ()
    %294 = arith.addf %291, %293 : vector<2x8x8xf32>
    %295 = vector.extract_strided_slice %262 {offsets = [0, 8], sizes = [128, 8], strides = [1, 1]} : vector<128x32xf32> to vector<128x8xf32>
    %296 = vector.shape_cast %295 : vector<128x8xf32> to vector<2x64x8xf32>
    %297 = arith.truncf %296 : vector<2x64x8xf32> to vector<2x64x8xbf16>
    %298 = vector.extract_strided_slice %270 {offsets = [0, 8], sizes = [128, 8], strides = [1, 1]} : vector<128x32xf32> to vector<128x8xf32>
    %299 = vector.shape_cast %298 : vector<128x8xf32> to vector<2x64x8xf32>
    %300 = arith.truncf %299 : vector<2x64x8xf32> to vector<2x64x8xbf16>
    "tpu.trace_start"() <{level = 10 : i32, message = "bqd,bkd->bqk"}> : () -> ()
    %cst_91 = arith.constant dense<0.000000e+00> : vector<2x8x64xf32>
    %301 = tpu.matmul %232, %297, %cst_91 {dimension_numbers = #tpu.dot_dimension_numbers<[2], [2], [1], [1], [0, 0, 0, 1, 1, 1], [0], [0]>} : vector<2x8x8xbf16>, vector<2x64x8xbf16>, vector<2x8x64xf32> -> vector<2x8x64xf32>
    "tpu.trace_stop"() : () -> ()
    %cst_92 = arith.constant dense<0xFF800000> : vector<2x8xf32>
    %302 = vector.multi_reduction <maximumf>, %301, %cst_92 [2] : vector<2x8x64xf32> to vector<2x8xf32>
    %303 = vector.shape_cast %302 : vector<2x8xf32> to vector<2x8x1xf32>
    %304 = arith.maximumf %240, %303 : vector<2x8x1xf32>
    %305 = arith.subf %240, %304 : vector<2x8x1xf32>
    %306 = math.exp %305 : vector<2x8x1xf32>
    %307 = vector.broadcast %304 : vector<2x8x1xf32> to vector<2x8x64xf32>
    %308 = arith.subf %301, %307 : vector<2x8x64xf32>
    %309 = math.exp %308 : vector<2x8x64xf32>
    %310 = arith.mulf %306, %244 : vector<2x8x1xf32>
    %cst_93 = arith.constant dense<0.000000e+00> : vector<2x8xf32>
    %311 = vector.multi_reduction <add>, %309, %cst_93 [2] : vector<2x8x64xf32> to vector<2x8xf32>
    %312 = vector.shape_cast %311 : vector<2x8xf32> to vector<2x8x1xf32>
    %313 = arith.addf %310, %312 : vector<2x8x1xf32>
    %314 = vector.broadcast %306 : vector<2x8x1xf32> to vector<2x8x8xf32>
    %315 = arith.mulf %314, %248 : vector<2x8x8xf32>
    %316 = arith.truncf %309 : vector<2x8x64xf32> to vector<2x8x64xbf16>
    "tpu.trace_start"() <{level = 10 : i32, message = "bqk,bkd->bqd"}> : () -> ()
    %cst_94 = arith.constant dense<0.000000e+00> : vector<2x8x8xf32>
    %317 = tpu.matmul %316, %300, %cst_94 {dimension_numbers = #tpu.dot_dimension_numbers<[2], [1], [1], [2], [0, 0, 0, 1, 1, 2], [0], [0]>} : vector<2x8x64xbf16>, vector<2x64x8xbf16>, vector<2x8x8xf32> -> vector<2x8x8xf32>
    "tpu.trace_stop"() : () -> ()
    %318 = arith.addf %315, %317 : vector<2x8x8xf32>
    %319 = vector.extract_strided_slice %262 {offsets = [0, 16], sizes = [128, 8], strides = [1, 1]} : vector<128x32xf32> to vector<128x8xf32>
    %320 = vector.shape_cast %319 : vector<128x8xf32> to vector<2x64x8xf32>
    %321 = arith.truncf %320 : vector<2x64x8xf32> to vector<2x64x8xbf16>
    %322 = vector.extract_strided_slice %270 {offsets = [0, 16], sizes = [128, 8], strides = [1, 1]} : vector<128x32xf32> to vector<128x8xf32>
    %323 = vector.shape_cast %322 : vector<128x8xf32> to vector<2x64x8xf32>
    %324 = arith.truncf %323 : vector<2x64x8xf32> to vector<2x64x8xbf16>
    "tpu.trace_start"() <{level = 10 : i32, message = "bqd,bkd->bqk"}> : () -> ()
    %cst_95 = arith.constant dense<0.000000e+00> : vector<2x8x64xf32>
    %325 = tpu.matmul %235, %321, %cst_95 {dimension_numbers = #tpu.dot_dimension_numbers<[2], [2], [1], [1], [0, 0, 0, 1, 1, 1], [0], [0]>} : vector<2x8x8xbf16>, vector<2x64x8xbf16>, vector<2x8x64xf32> -> vector<2x8x64xf32>
    "tpu.trace_stop"() : () -> ()
    %cst_96 = arith.constant dense<0xFF800000> : vector<2x8xf32>
    %326 = vector.multi_reduction <maximumf>, %325, %cst_96 [2] : vector<2x8x64xf32> to vector<2x8xf32>
    %327 = vector.shape_cast %326 : vector<2x8xf32> to vector<2x8x1xf32>
    %328 = arith.maximumf %241, %327 : vector<2x8x1xf32>
    %329 = arith.subf %241, %328 : vector<2x8x1xf32>
    %330 = math.exp %329 : vector<2x8x1xf32>
    %331 = vector.broadcast %328 : vector<2x8x1xf32> to vector<2x8x64xf32>
    %332 = arith.subf %325, %331 : vector<2x8x64xf32>
    %333 = math.exp %332 : vector<2x8x64xf32>
    %334 = arith.mulf %330, %245 : vector<2x8x1xf32>
    %cst_97 = arith.constant dense<0.000000e+00> : vector<2x8xf32>
    %335 = vector.multi_reduction <add>, %333, %cst_97 [2] : vector<2x8x64xf32> to vector<2x8xf32>
    %336 = vector.shape_cast %335 : vector<2x8xf32> to vector<2x8x1xf32>
    %337 = arith.addf %334, %336 : vector<2x8x1xf32>
    %338 = vector.broadcast %330 : vector<2x8x1xf32> to vector<2x8x8xf32>
    %339 = arith.mulf %338, %249 : vector<2x8x8xf32>
    %340 = arith.truncf %333 : vector<2x8x64xf32> to vector<2x8x64xbf16>
    "tpu.trace_start"() <{level = 10 : i32, message = "bqk,bkd->bqd"}> : () -> ()
    %cst_98 = arith.constant dense<0.000000e+00> : vector<2x8x8xf32>
    %341 = tpu.matmul %340, %324, %cst_98 {dimension_numbers = #tpu.dot_dimension_numbers<[2], [1], [1], [2], [0, 0, 0, 1, 1, 2], [0], [0]>} : vector<2x8x64xbf16>, vector<2x64x8xbf16>, vector<2x8x8xf32> -> vector<2x8x8xf32>
    "tpu.trace_stop"() : () -> ()
    %342 = arith.addf %339, %341 : vector<2x8x8xf32>
    %343 = vector.extract_strided_slice %262 {offsets = [0, 24], sizes = [128, 8], strides = [1, 1]} : vector<128x32xf32> to vector<128x8xf32>
    %344 = vector.shape_cast %343 : vector<128x8xf32> to vector<2x64x8xf32>
    %345 = arith.truncf %344 : vector<2x64x8xf32> to vector<2x64x8xbf16>
    %346 = vector.extract_strided_slice %270 {offsets = [0, 24], sizes = [128, 8], strides = [1, 1]} : vector<128x32xf32> to vector<128x8xf32>
    %347 = vector.shape_cast %346 : vector<128x8xf32> to vector<2x64x8xf32>
    %348 = arith.truncf %347 : vector<2x64x8xf32> to vector<2x64x8xbf16>
    "tpu.trace_start"() <{level = 10 : i32, message = "bqd,bkd->bqk"}> : () -> ()
    %cst_99 = arith.constant dense<0.000000e+00> : vector<2x8x64xf32>
    %349 = tpu.matmul %238, %345, %cst_99 {dimension_numbers = #tpu.dot_dimension_numbers<[2], [2], [1], [1], [0, 0, 0, 1, 1, 1], [0], [0]>} : vector<2x8x8xbf16>, vector<2x64x8xbf16>, vector<2x8x64xf32> -> vector<2x8x64xf32>
    "tpu.trace_stop"() : () -> ()
    %cst_100 = arith.constant dense<0xFF800000> : vector<2x8xf32>
    %350 = vector.multi_reduction <maximumf>, %349, %cst_100 [2] : vector<2x8x64xf32> to vector<2x8xf32>
    %351 = vector.shape_cast %350 : vector<2x8xf32> to vector<2x8x1xf32>
    %352 = arith.maximumf %242, %351 : vector<2x8x1xf32>
    %353 = arith.subf %242, %352 : vector<2x8x1xf32>
    %354 = math.exp %353 : vector<2x8x1xf32>
    %355 = vector.broadcast %352 : vector<2x8x1xf32> to vector<2x8x64xf32>
    %356 = arith.subf %349, %355 : vector<2x8x64xf32>
    %357 = math.exp %356 : vector<2x8x64xf32>
    %358 = arith.mulf %354, %246 : vector<2x8x1xf32>
    %cst_101 = arith.constant dense<0.000000e+00> : vector<2x8xf32>
    %359 = vector.multi_reduction <add>, %357, %cst_101 [2] : vector<2x8x64xf32> to vector<2x8xf32>
    %360 = vector.shape_cast %359 : vector<2x8xf32> to vector<2x8x1xf32>
    %361 = arith.addf %358, %360 : vector<2x8x1xf32>
    %362 = vector.broadcast %354 : vector<2x8x1xf32> to vector<2x8x8xf32>
    %363 = arith.mulf %362, %250 : vector<2x8x8xf32>
    %364 = arith.truncf %357 : vector<2x8x64xf32> to vector<2x8x64xbf16>
    "tpu.trace_start"() <{level = 10 : i32, message = "bqk,bkd->bqd"}> : () -> ()
    %cst_102 = arith.constant dense<0.000000e+00> : vector<2x8x8xf32>
    %365 = tpu.matmul %364, %348, %cst_102 {dimension_numbers = #tpu.dot_dimension_numbers<[2], [1], [1], [2], [0, 0, 0, 1, 1, 2], [0], [0]>} : vector<2x8x64xbf16>, vector<2x64x8xbf16>, vector<2x8x8xf32> -> vector<2x8x8xf32>
    "tpu.trace_stop"() : () -> ()
    %366 = arith.addf %363, %365 : vector<2x8x8xf32>
    %367 = tpu.reciprocal %289 {approx = true} : vector<2x8x1xf32> -> vector<2x8x1xf32>
    %368 = vector.broadcast %367 : vector<2x8x1xf32> to vector<2x8x8xf32>
    %369 = arith.mulf %294, %368 : vector<2x8x8xf32>
    %370 = vector.shape_cast %369 : vector<2x8x8xf32> to vector<16x8xf32>
    %371 = arith.truncf %370 : vector<16x8xf32> to vector<16x8xbf16>
    %372 = vector.extract_strided_slice %213 {offsets = [0, 0], sizes = [8, 32], strides = [1, 1]} : vector<32x32xbf16> to vector<8x32xbf16>
    %cst_103 = arith.constant dense<0.000000e+00> : vector<16x32xf32>
    %373 = tpu.matmul %371, %372, %cst_103 {dimension_numbers = #tpu.dot_dimension_numbers<[1], [0], [0], [1], [0, 0, 1, 1], [], []>} : vector<16x8xbf16>, vector<8x32xbf16>, vector<16x32xf32> -> vector<16x32xf32>
    %374 = tpu.reciprocal %313 {approx = true} : vector<2x8x1xf32> -> vector<2x8x1xf32>
    %375 = vector.broadcast %374 : vector<2x8x1xf32> to vector<2x8x8xf32>
    %376 = arith.mulf %318, %375 : vector<2x8x8xf32>
    %377 = vector.shape_cast %376 : vector<2x8x8xf32> to vector<16x8xf32>
    %378 = arith.truncf %377 : vector<16x8xf32> to vector<16x8xbf16>
    %379 = vector.extract_strided_slice %213 {offsets = [8, 0], sizes = [8, 32], strides = [1, 1]} : vector<32x32xbf16> to vector<8x32xbf16>
    %cst_104 = arith.constant dense<0.000000e+00> : vector<16x32xf32>
    %380 = tpu.matmul %378, %379, %cst_104 {dimension_numbers = #tpu.dot_dimension_numbers<[1], [0], [0], [1], [0, 0, 1, 1], [], []>} : vector<16x8xbf16>, vector<8x32xbf16>, vector<16x32xf32> -> vector<16x32xf32>
    %381 = arith.addf %373, %380 : vector<16x32xf32>
    %382 = tpu.reciprocal %337 {approx = true} : vector<2x8x1xf32> -> vector<2x8x1xf32>
    %383 = vector.broadcast %382 : vector<2x8x1xf32> to vector<2x8x8xf32>
    %384 = arith.mulf %342, %383 : vector<2x8x8xf32>
    %385 = vector.shape_cast %384 : vector<2x8x8xf32> to vector<16x8xf32>
    %386 = arith.truncf %385 : vector<16x8xf32> to vector<16x8xbf16>
    %387 = vector.extract_strided_slice %213 {offsets = [16, 0], sizes = [8, 32], strides = [1, 1]} : vector<32x32xbf16> to vector<8x32xbf16>
    %cst_105 = arith.constant dense<0.000000e+00> : vector<16x32xf32>
    %388 = tpu.matmul %386, %387, %cst_105 {dimension_numbers = #tpu.dot_dimension_numbers<[1], [0], [0], [1], [0, 0, 1, 1], [], []>} : vector<16x8xbf16>, vector<8x32xbf16>, vector<16x32xf32> -> vector<16x32xf32>
    %389 = arith.addf %381, %388 : vector<16x32xf32>
    %390 = tpu.reciprocal %361 {approx = true} : vector<2x8x1xf32> -> vector<2x8x1xf32>
    %391 = vector.broadcast %390 : vector<2x8x1xf32> to vector<2x8x8xf32>
    %392 = arith.mulf %366, %391 : vector<2x8x8xf32>
    %393 = vector.shape_cast %392 : vector<2x8x8xf32> to vector<16x8xf32>
    %394 = arith.truncf %393 : vector<16x8xf32> to vector<16x8xbf16>
    %395 = vector.extract_strided_slice %213 {offsets = [24, 0], sizes = [8, 32], strides = [1, 1]} : vector<32x32xbf16> to vector<8x32xbf16>
    %cst_106 = arith.constant dense<0.000000e+00> : vector<16x32xf32>
    %396 = tpu.matmul %394, %395, %cst_106 {dimension_numbers = #tpu.dot_dimension_numbers<[1], [0], [0], [1], [0, 0, 1, 1], [], []>} : vector<16x8xbf16>, vector<8x32xbf16>, vector<16x32xf32> -> vector<16x32xf32>
    %397 = arith.addf %389, %396 : vector<16x32xf32>
    %398 = vector.shape_cast %215 : vector<32xf32> to vector<1x32xf32>
    %399 = vector.broadcast %398 : vector<1x32xf32> to vector<16x32xf32>
    %400 = arith.addf %397, %399 : vector<16x32xf32>
    %401 = arith.addf %180, %400 : vector<16x32xf32>
    %402 = vector.extract_strided_slice %3 {offsets = [2, 0], sizes = [1, 32], strides = [1, 1]} : vector<3x32xf32> to vector<1x32xf32>
    %403 = vector.shape_cast %402 : vector<1x32xf32> to vector<32xf32>
    %404 = vector.extract_strided_slice %5 {offsets = [2, 0], sizes = [1, 32], strides = [1, 1]} : vector<3x32xf32> to vector<1x32xf32>
    %405 = vector.shape_cast %404 : vector<1x32xf32> to vector<32xf32>
    %cst_107 = arith.constant dense<0.000000e+00> : vector<16xf32>
    %406 = vector.multi_reduction <add>, %401, %cst_107 [1] : vector<16x32xf32> to vector<16xf32>
    %407 = vector.shape_cast %406 : vector<16xf32> to vector<16x1xf32>
    %cst_108 = arith.constant 3.200000e+01 : f32
    %408 = vector.broadcast %cst_108 : f32 to vector<16x1xf32>
    %409 = arith.divf %407, %408 : vector<16x1xf32>
    %410 = vector.broadcast %409 : vector<16x1xf32> to vector<16x32xf32>
    %411 = arith.subf %401, %410 : vector<16x32xf32>
    %412 = arith.mulf %411, %411 : vector<16x32xf32>
    %cst_109 = arith.constant dense<0.000000e+00> : vector<16xf32>
    %413 = vector.multi_reduction <add>, %412, %cst_109 [1] : vector<16x32xf32> to vector<16xf32>
    %414 = vector.shape_cast %413 : vector<16xf32> to vector<16x1xf32>
    %cst_110 = arith.constant 3.200000e+01 : f32
    %415 = vector.broadcast %cst_110 : f32 to vector<16x1xf32>
    %416 = arith.divf %414, %415 : vector<16x1xf32>
    %cst_111 = arith.constant 9.99999974E-6 : f32
    %417 = vector.broadcast %cst_111 : f32 to vector<16x1xf32>
    %418 = arith.addf %416, %417 : vector<16x1xf32>
    %419 = math.rsqrt %418 : vector<16x1xf32>
    %420 = vector.broadcast %419 : vector<16x1xf32> to vector<16x32xf32>
    %421 = arith.mulf %411, %420 : vector<16x32xf32>
    %422 = vector.shape_cast %403 : vector<32xf32> to vector<1x32xf32>
    %423 = vector.broadcast %422 : vector<1x32xf32> to vector<16x32xf32>
    %424 = arith.mulf %421, %423 : vector<16x32xf32>
    %425 = vector.shape_cast %405 : vector<32xf32> to vector<1x32xf32>
    %426 = vector.broadcast %425 : vector<1x32xf32> to vector<16x32xf32>
    %427 = arith.addf %424, %426 : vector<16x32xf32>
    %428 = arith.truncf %427 : vector<16x32xf32> to vector<16x32xbf16>
    %c0_112 = arith.constant 0 : index
    %c0_113 = arith.constant 0 : index
    %c0_114 = arith.constant 0 : index
    %429 = vector.load %arg13[%c0_112, %c0_113, %c0_114] : memref<2x32x64xbf16, #tpu.memory_space<vmem>>, vector<1x32x64xbf16>
    %430 = vector.shape_cast %429 : vector<1x32x64xbf16> to vector<32x64xbf16>
    %cst_115 = arith.constant dense<0.000000e+00> : vector<16x64xf32>
    %431 = tpu.matmul %428, %430, %cst_115 {dimension_numbers = #tpu.dot_dimension_numbers<[1], [0], [0], [1], [0, 0, 1, 1], [], []>} : vector<16x32xbf16>, vector<32x64xbf16>, vector<16x64xf32> -> vector<16x64xf32>
    %c0_116 = arith.constant 0 : index
    %c0_117 = arith.constant 0 : index
    %432 = vector.load %arg14[%c0_116, %c0_117] : memref<2x64xf32, #tpu.memory_space<vmem>>, vector<1x64xf32>
    %433 = vector.shape_cast %432 : vector<1x64xf32> to vector<64xf32>
    %434 = vector.shape_cast %433 : vector<64xf32> to vector<1x64xf32>
    %435 = vector.broadcast %434 : vector<1x64xf32> to vector<16x64xf32>
    %436 = arith.addf %431, %435 : vector<16x64xf32>
    %cst_118 = arith.constant 0.000000e+00 : f32
    %437 = vector.broadcast %cst_118 : f32 to vector<16x64xf32>
    %438 = arith.maximumf %436, %437 : vector<16x64xf32>
    %439 = arith.truncf %438 : vector<16x64xf32> to vector<16x64xbf16>
    %c0_119 = arith.constant 0 : index
    %c0_120 = arith.constant 0 : index
    %c0_121 = arith.constant 0 : index
    %440 = vector.load %arg15[%c0_119, %c0_120, %c0_121] : memref<2x64x32xbf16, #tpu.memory_space<vmem>>, vector<1x64x32xbf16>
    %441 = vector.shape_cast %440 : vector<1x64x32xbf16> to vector<64x32xbf16>
    %cst_122 = arith.constant dense<0.000000e+00> : vector<16x32xf32>
    %442 = tpu.matmul %439, %441, %cst_122 {dimension_numbers = #tpu.dot_dimension_numbers<[1], [0], [0], [1], [0, 0, 1, 1], [], []>} : vector<16x64xbf16>, vector<64x32xbf16>, vector<16x32xf32> -> vector<16x32xf32>
    %443 = arith.addf %401, %442 : vector<16x32xf32>
    %c0_123 = arith.constant 0 : index
    %c0_124 = arith.constant 0 : index
    %444 = vector.load %arg16[%c0_123, %c0_124] : memref<2x32xf32, #tpu.memory_space<vmem>>, vector<1x32xf32>
    %445 = vector.shape_cast %444 : vector<1x32xf32> to vector<32xf32>
    %446 = vector.shape_cast %445 : vector<32xf32> to vector<1x32xf32>
    %447 = vector.broadcast %446 : vector<1x32xf32> to vector<16x32xf32>
    %448 = arith.addf %443, %447 : vector<16x32xf32>
    %c1 = arith.constant 1 : index
    %c0_125 = arith.constant 0 : index
    %c0_126 = arith.constant 0 : index
    %449 = vector.load %arg11[%c1, %c0_125, %c0_126] : memref<2x3x32xf32, #tpu.memory_space<vmem>>, vector<1x3x32xf32>
    %450 = vector.shape_cast %449 : vector<1x3x32xf32> to vector<3x32xf32>
    %c1_127 = arith.constant 1 : index
    %c0_128 = arith.constant 0 : index
    %c0_129 = arith.constant 0 : index
    %451 = vector.load %arg12[%c1_127, %c0_128, %c0_129] : memref<2x3x32xf32, #tpu.memory_space<vmem>>, vector<1x3x32xf32>
    %452 = vector.shape_cast %451 : vector<1x3x32xf32> to vector<3x32xf32>
    %453 = vector.extract_strided_slice %450 {offsets = [0, 0], sizes = [1, 32], strides = [1, 1]} : vector<3x32xf32> to vector<1x32xf32>
    %454 = vector.shape_cast %453 : vector<1x32xf32> to vector<32xf32>
    %455 = vector.extract_strided_slice %452 {offsets = [0, 0], sizes = [1, 32], strides = [1, 1]} : vector<3x32xf32> to vector<1x32xf32>
    %456 = vector.shape_cast %455 : vector<1x32xf32> to vector<32xf32>
    %cst_130 = arith.constant dense<0.000000e+00> : vector<16xf32>
    %457 = vector.multi_reduction <add>, %448, %cst_130 [1] : vector<16x32xf32> to vector<16xf32>
    %458 = vector.shape_cast %457 : vector<16xf32> to vector<16x1xf32>
    %cst_131 = arith.constant 3.200000e+01 : f32
    %459 = vector.broadcast %cst_131 : f32 to vector<16x1xf32>
    %460 = arith.divf %458, %459 : vector<16x1xf32>
    %461 = vector.broadcast %460 : vector<16x1xf32> to vector<16x32xf32>
    %462 = arith.subf %448, %461 : vector<16x32xf32>
    %463 = arith.mulf %462, %462 : vector<16x32xf32>
    %cst_132 = arith.constant dense<0.000000e+00> : vector<16xf32>
    %464 = vector.multi_reduction <add>, %463, %cst_132 [1] : vector<16x32xf32> to vector<16xf32>
    %465 = vector.shape_cast %464 : vector<16xf32> to vector<16x1xf32>
    %cst_133 = arith.constant 3.200000e+01 : f32
    %466 = vector.broadcast %cst_133 : f32 to vector<16x1xf32>
    %467 = arith.divf %465, %466 : vector<16x1xf32>
    %cst_134 = arith.constant 9.99999974E-6 : f32
    %468 = vector.broadcast %cst_134 : f32 to vector<16x1xf32>
    %469 = arith.addf %467, %468 : vector<16x1xf32>
    %470 = math.rsqrt %469 : vector<16x1xf32>
    %471 = vector.broadcast %470 : vector<16x1xf32> to vector<16x32xf32>
    %472 = arith.mulf %462, %471 : vector<16x32xf32>
    %473 = vector.shape_cast %454 : vector<32xf32> to vector<1x32xf32>
    %474 = vector.broadcast %473 : vector<1x32xf32> to vector<16x32xf32>
    %475 = arith.mulf %472, %474 : vector<16x32xf32>
    %476 = vector.shape_cast %456 : vector<32xf32> to vector<1x32xf32>
    %477 = vector.broadcast %476 : vector<1x32xf32> to vector<16x32xf32>
    %478 = arith.addf %475, %477 : vector<16x32xf32>
    %479 = arith.addf %478, %0 : vector<16x32xf32>
    %c1_135 = arith.constant 1 : index
    %c0_136 = arith.constant 0 : index
    %c0_137 = arith.constant 0 : index
    %c0_138 = arith.constant 0 : index
    %480 = vector.load %arg3[%c1_135, %c0_136, %c0_137, %c0_138] : memref<2x3x32x32xbf16, #tpu.memory_space<vmem>>, vector<1x3x32x32xbf16>
    %481 = vector.shape_cast %480 : vector<1x3x32x32xbf16> to vector<3x32x32xbf16>
    %c1_139 = arith.constant 1 : index
    %c0_140 = arith.constant 0 : index
    %c0_141 = arith.constant 0 : index
    %482 = vector.load %arg4[%c1_139, %c0_140, %c0_141] : memref<2x3x32xf32, #tpu.memory_space<vmem>>, vector<1x3x32xf32>
    %483 = vector.shape_cast %482 : vector<1x3x32xf32> to vector<3x32xf32>
    %c1_142 = arith.constant 1 : index
    %c0_143 = arith.constant 0 : index
    %c0_144 = arith.constant 0 : index
    %484 = vector.load %arg5[%c1_142, %c0_143, %c0_144] : memref<2x32x32xbf16, #tpu.memory_space<vmem>>, vector<1x32x32xbf16>
    %485 = vector.shape_cast %484 : vector<1x32x32xbf16> to vector<32x32xbf16>
    %c1_145 = arith.constant 1 : index
    %c0_146 = arith.constant 0 : index
    %486 = vector.load %arg6[%c1_145, %c0_146] : memref<2x32xf32, #tpu.memory_space<vmem>>, vector<1x32xf32>
    %487 = vector.shape_cast %486 : vector<1x32xf32> to vector<32xf32>
    %488 = vector.extract_strided_slice %481 {offsets = [0, 0, 0], sizes = [1, 32, 32], strides = [1, 1, 1]} : vector<3x32x32xbf16> to vector<1x32x32xbf16>
    %489 = vector.shape_cast %488 : vector<1x32x32xbf16> to vector<32x32xbf16>
    %490 = vector.extract_strided_slice %483 {offsets = [0, 0], sizes = [1, 32], strides = [1, 1]} : vector<3x32xf32> to vector<1x32xf32>
    %491 = vector.shape_cast %490 : vector<1x32xf32> to vector<32xf32>
    %492 = arith.truncf %479 : vector<16x32xf32> to vector<16x32xbf16>
    %cst_147 = arith.constant dense<0.000000e+00> : vector<16x32xf32>
    %493 = tpu.matmul %492, %489, %cst_147 {dimension_numbers = #tpu.dot_dimension_numbers<[1], [0], [0], [1], [0, 0, 1, 1], [], []>} : vector<16x32xbf16>, vector<32x32xbf16>, vector<16x32xf32> -> vector<16x32xf32>
    %494 = vector.shape_cast %491 : vector<32xf32> to vector<1x32xf32>
    %495 = vector.broadcast %494 : vector<1x32xf32> to vector<16x32xf32>
    %496 = arith.addf %493, %495 : vector<16x32xf32>
    %cst_148 = arith.constant 0.353553385 : f32
    %497 = vector.broadcast %cst_148 : f32 to vector<16x32xf32>
    %498 = arith.mulf %496, %497 : vector<16x32xf32>
    %499 = vector.extract_strided_slice %481 {offsets = [1, 0, 0], sizes = [1, 32, 32], strides = [1, 1, 1]} : vector<3x32x32xbf16> to vector<1x32x32xbf16>
    %500 = vector.shape_cast %499 : vector<1x32x32xbf16> to vector<32x32xbf16>
    %501 = vector.extract_strided_slice %483 {offsets = [1, 0], sizes = [1, 32], strides = [1, 1]} : vector<3x32xf32> to vector<1x32xf32>
    %502 = vector.shape_cast %501 : vector<1x32xf32> to vector<32xf32>
    %503 = arith.truncf %479 : vector<16x32xf32> to vector<16x32xbf16>
    %cst_149 = arith.constant dense<0.000000e+00> : vector<16x32xf32>
    %504 = tpu.matmul %503, %500, %cst_149 {dimension_numbers = #tpu.dot_dimension_numbers<[1], [0], [0], [1], [0, 0, 1, 1], [], []>} : vector<16x32xbf16>, vector<32x32xbf16>, vector<16x32xf32> -> vector<16x32xf32>
    %505 = vector.shape_cast %502 : vector<32xf32> to vector<1x32xf32>
    %506 = vector.broadcast %505 : vector<1x32xf32> to vector<16x32xf32>
    %507 = arith.addf %504, %506 : vector<16x32xf32>
    %508 = vector.extract_strided_slice %481 {offsets = [2, 0, 0], sizes = [1, 32, 32], strides = [1, 1, 1]} : vector<3x32x32xbf16> to vector<1x32x32xbf16>
    %509 = vector.shape_cast %508 : vector<1x32x32xbf16> to vector<32x32xbf16>
    %510 = vector.extract_strided_slice %483 {offsets = [2, 0], sizes = [1, 32], strides = [1, 1]} : vector<3x32xf32> to vector<1x32xf32>
    %511 = vector.shape_cast %510 : vector<1x32xf32> to vector<32xf32>
    %512 = arith.truncf %478 : vector<16x32xf32> to vector<16x32xbf16>
    %cst_150 = arith.constant dense<0.000000e+00> : vector<16x32xf32>
    %513 = tpu.matmul %512, %509, %cst_150 {dimension_numbers = #tpu.dot_dimension_numbers<[1], [0], [0], [1], [0, 0, 1, 1], [], []>} : vector<16x32xbf16>, vector<32x32xbf16>, vector<16x32xf32> -> vector<16x32xf32>
    %514 = vector.shape_cast %511 : vector<32xf32> to vector<1x32xf32>
    %515 = vector.broadcast %514 : vector<1x32xf32> to vector<16x32xf32>
    %516 = arith.addf %513, %515 : vector<16x32xf32>
    %517 = vector.extract_strided_slice %498 {offsets = [0, 0], sizes = [16, 8], strides = [1, 1]} : vector<16x32xf32> to vector<16x8xf32>
    %518 = vector.shape_cast %517 : vector<16x8xf32> to vector<2x8x8xf32>
    %519 = arith.truncf %518 : vector<2x8x8xf32> to vector<2x8x8xbf16>
    %520 = vector.extract_strided_slice %507 {offsets = [0, 0], sizes = [16, 8], strides = [1, 1]} : vector<16x32xf32> to vector<16x8xf32>
    %521 = vector.shape_cast %520 : vector<16x8xf32> to vector<2x8x8xf32>
    %522 = arith.truncf %521 : vector<2x8x8xf32> to vector<2x8x8xbf16>
    %523 = vector.extract_strided_slice %516 {offsets = [0, 0], sizes = [16, 8], strides = [1, 1]} : vector<16x32xf32> to vector<16x8xf32>
    %524 = vector.shape_cast %523 : vector<16x8xf32> to vector<2x8x8xf32>
    %525 = arith.truncf %524 : vector<2x8x8xf32> to vector<2x8x8xbf16>
    "tpu.trace_start"() <{level = 10 : i32, message = "bqd,bkd->bqk"}> : () -> ()
    %cst_151 = arith.constant dense<0.000000e+00> : vector<2x8x8xf32>
    %526 = tpu.matmul %519, %522, %cst_151 {dimension_numbers = #tpu.dot_dimension_numbers<[2], [2], [1], [1], [0, 0, 0, 1, 1, 1], [0], [0]>} : vector<2x8x8xbf16>, vector<2x8x8xbf16>, vector<2x8x8xf32> -> vector<2x8x8xf32>
    "tpu.trace_stop"() : () -> ()
    %cst_152 = arith.constant dense<0xFF800000> : vector<2x8xf32>
    %527 = vector.multi_reduction <maximumf>, %526, %cst_152 [2] : vector<2x8x8xf32> to vector<2x8xf32>
    %528 = vector.shape_cast %527 : vector<2x8xf32> to vector<2x8x1xf32>
    %529 = vector.broadcast %528 : vector<2x8x1xf32> to vector<2x8x8xf32>
    %530 = arith.subf %526, %529 : vector<2x8x8xf32>
    %531 = math.exp %530 : vector<2x8x8xf32>
    %cst_153 = arith.constant dense<0.000000e+00> : vector<2x8xf32>
    %532 = vector.multi_reduction <add>, %531, %cst_153 [2] : vector<2x8x8xf32> to vector<2x8xf32>
    %533 = vector.shape_cast %532 : vector<2x8xf32> to vector<2x8x1xf32>
    %534 = tpu.reciprocal %533 {approx = true} : vector<2x8x1xf32> -> vector<2x8x1xf32>
    %535 = vector.broadcast %534 : vector<2x8x1xf32> to vector<2x8x8xf32>
    %536 = arith.mulf %531, %535 : vector<2x8x8xf32>
    %537 = arith.truncf %536 : vector<2x8x8xf32> to vector<2x8x8xbf16>
    "tpu.trace_start"() <{level = 10 : i32, message = "bqk,bkd->bqd"}> : () -> ()
    %cst_154 = arith.constant dense<0.000000e+00> : vector<2x8x8xf32>
    %538 = tpu.matmul %537, %525, %cst_154 {dimension_numbers = #tpu.dot_dimension_numbers<[2], [1], [1], [2], [0, 0, 0, 1, 1, 2], [0], [0]>} : vector<2x8x8xbf16>, vector<2x8x8xbf16>, vector<2x8x8xf32> -> vector<2x8x8xf32>
    "tpu.trace_stop"() : () -> ()
    %539 = vector.shape_cast %538 : vector<2x8x8xf32> to vector<16x8xf32>
    %540 = arith.truncf %539 : vector<16x8xf32> to vector<16x8xbf16>
    %541 = vector.extract_strided_slice %485 {offsets = [0, 0], sizes = [8, 32], strides = [1, 1]} : vector<32x32xbf16> to vector<8x32xbf16>
    %cst_155 = arith.constant dense<0.000000e+00> : vector<16x32xf32>
    %542 = tpu.matmul %540, %541, %cst_155 {dimension_numbers = #tpu.dot_dimension_numbers<[1], [0], [0], [1], [0, 0, 1, 1], [], []>} : vector<16x8xbf16>, vector<8x32xbf16>, vector<16x32xf32> -> vector<16x32xf32>
    %543 = vector.extract_strided_slice %498 {offsets = [0, 8], sizes = [16, 8], strides = [1, 1]} : vector<16x32xf32> to vector<16x8xf32>
    %544 = vector.shape_cast %543 : vector<16x8xf32> to vector<2x8x8xf32>
    %545 = arith.truncf %544 : vector<2x8x8xf32> to vector<2x8x8xbf16>
    %546 = vector.extract_strided_slice %507 {offsets = [0, 8], sizes = [16, 8], strides = [1, 1]} : vector<16x32xf32> to vector<16x8xf32>
    %547 = vector.shape_cast %546 : vector<16x8xf32> to vector<2x8x8xf32>
    %548 = arith.truncf %547 : vector<2x8x8xf32> to vector<2x8x8xbf16>
    %549 = vector.extract_strided_slice %516 {offsets = [0, 8], sizes = [16, 8], strides = [1, 1]} : vector<16x32xf32> to vector<16x8xf32>
    %550 = vector.shape_cast %549 : vector<16x8xf32> to vector<2x8x8xf32>
    %551 = arith.truncf %550 : vector<2x8x8xf32> to vector<2x8x8xbf16>
    "tpu.trace_start"() <{level = 10 : i32, message = "bqd,bkd->bqk"}> : () -> ()
    %cst_156 = arith.constant dense<0.000000e+00> : vector<2x8x8xf32>
    %552 = tpu.matmul %545, %548, %cst_156 {dimension_numbers = #tpu.dot_dimension_numbers<[2], [2], [1], [1], [0, 0, 0, 1, 1, 1], [0], [0]>} : vector<2x8x8xbf16>, vector<2x8x8xbf16>, vector<2x8x8xf32> -> vector<2x8x8xf32>
    "tpu.trace_stop"() : () -> ()
    %cst_157 = arith.constant dense<0xFF800000> : vector<2x8xf32>
    %553 = vector.multi_reduction <maximumf>, %552, %cst_157 [2] : vector<2x8x8xf32> to vector<2x8xf32>
    %554 = vector.shape_cast %553 : vector<2x8xf32> to vector<2x8x1xf32>
    %555 = vector.broadcast %554 : vector<2x8x1xf32> to vector<2x8x8xf32>
    %556 = arith.subf %552, %555 : vector<2x8x8xf32>
    %557 = math.exp %556 : vector<2x8x8xf32>
    %cst_158 = arith.constant dense<0.000000e+00> : vector<2x8xf32>
    %558 = vector.multi_reduction <add>, %557, %cst_158 [2] : vector<2x8x8xf32> to vector<2x8xf32>
    %559 = vector.shape_cast %558 : vector<2x8xf32> to vector<2x8x1xf32>
    %560 = tpu.reciprocal %559 {approx = true} : vector<2x8x1xf32> -> vector<2x8x1xf32>
    %561 = vector.broadcast %560 : vector<2x8x1xf32> to vector<2x8x8xf32>
    %562 = arith.mulf %557, %561 : vector<2x8x8xf32>
    %563 = arith.truncf %562 : vector<2x8x8xf32> to vector<2x8x8xbf16>
    "tpu.trace_start"() <{level = 10 : i32, message = "bqk,bkd->bqd"}> : () -> ()
    %cst_159 = arith.constant dense<0.000000e+00> : vector<2x8x8xf32>
    %564 = tpu.matmul %563, %551, %cst_159 {dimension_numbers = #tpu.dot_dimension_numbers<[2], [1], [1], [2], [0, 0, 0, 1, 1, 2], [0], [0]>} : vector<2x8x8xbf16>, vector<2x8x8xbf16>, vector<2x8x8xf32> -> vector<2x8x8xf32>
    "tpu.trace_stop"() : () -> ()
    %565 = vector.shape_cast %564 : vector<2x8x8xf32> to vector<16x8xf32>
    %566 = arith.truncf %565 : vector<16x8xf32> to vector<16x8xbf16>
    %567 = vector.extract_strided_slice %485 {offsets = [8, 0], sizes = [8, 32], strides = [1, 1]} : vector<32x32xbf16> to vector<8x32xbf16>
    %cst_160 = arith.constant dense<0.000000e+00> : vector<16x32xf32>
    %568 = tpu.matmul %566, %567, %cst_160 {dimension_numbers = #tpu.dot_dimension_numbers<[1], [0], [0], [1], [0, 0, 1, 1], [], []>} : vector<16x8xbf16>, vector<8x32xbf16>, vector<16x32xf32> -> vector<16x32xf32>
    %569 = arith.addf %542, %568 : vector<16x32xf32>
    %570 = vector.extract_strided_slice %498 {offsets = [0, 16], sizes = [16, 8], strides = [1, 1]} : vector<16x32xf32> to vector<16x8xf32>
    %571 = vector.shape_cast %570 : vector<16x8xf32> to vector<2x8x8xf32>
    %572 = arith.truncf %571 : vector<2x8x8xf32> to vector<2x8x8xbf16>
    %573 = vector.extract_strided_slice %507 {offsets = [0, 16], sizes = [16, 8], strides = [1, 1]} : vector<16x32xf32> to vector<16x8xf32>
    %574 = vector.shape_cast %573 : vector<16x8xf32> to vector<2x8x8xf32>
    %575 = arith.truncf %574 : vector<2x8x8xf32> to vector<2x8x8xbf16>
    %576 = vector.extract_strided_slice %516 {offsets = [0, 16], sizes = [16, 8], strides = [1, 1]} : vector<16x32xf32> to vector<16x8xf32>
    %577 = vector.shape_cast %576 : vector<16x8xf32> to vector<2x8x8xf32>
    %578 = arith.truncf %577 : vector<2x8x8xf32> to vector<2x8x8xbf16>
    "tpu.trace_start"() <{level = 10 : i32, message = "bqd,bkd->bqk"}> : () -> ()
    %cst_161 = arith.constant dense<0.000000e+00> : vector<2x8x8xf32>
    %579 = tpu.matmul %572, %575, %cst_161 {dimension_numbers = #tpu.dot_dimension_numbers<[2], [2], [1], [1], [0, 0, 0, 1, 1, 1], [0], [0]>} : vector<2x8x8xbf16>, vector<2x8x8xbf16>, vector<2x8x8xf32> -> vector<2x8x8xf32>
    "tpu.trace_stop"() : () -> ()
    %cst_162 = arith.constant dense<0xFF800000> : vector<2x8xf32>
    %580 = vector.multi_reduction <maximumf>, %579, %cst_162 [2] : vector<2x8x8xf32> to vector<2x8xf32>
    %581 = vector.shape_cast %580 : vector<2x8xf32> to vector<2x8x1xf32>
    %582 = vector.broadcast %581 : vector<2x8x1xf32> to vector<2x8x8xf32>
    %583 = arith.subf %579, %582 : vector<2x8x8xf32>
    %584 = math.exp %583 : vector<2x8x8xf32>
    %cst_163 = arith.constant dense<0.000000e+00> : vector<2x8xf32>
    %585 = vector.multi_reduction <add>, %584, %cst_163 [2] : vector<2x8x8xf32> to vector<2x8xf32>
    %586 = vector.shape_cast %585 : vector<2x8xf32> to vector<2x8x1xf32>
    %587 = tpu.reciprocal %586 {approx = true} : vector<2x8x1xf32> -> vector<2x8x1xf32>
    %588 = vector.broadcast %587 : vector<2x8x1xf32> to vector<2x8x8xf32>
    %589 = arith.mulf %584, %588 : vector<2x8x8xf32>
    %590 = arith.truncf %589 : vector<2x8x8xf32> to vector<2x8x8xbf16>
    "tpu.trace_start"() <{level = 10 : i32, message = "bqk,bkd->bqd"}> : () -> ()
    %cst_164 = arith.constant dense<0.000000e+00> : vector<2x8x8xf32>
    %591 = tpu.matmul %590, %578, %cst_164 {dimension_numbers = #tpu.dot_dimension_numbers<[2], [1], [1], [2], [0, 0, 0, 1, 1, 2], [0], [0]>} : vector<2x8x8xbf16>, vector<2x8x8xbf16>, vector<2x8x8xf32> -> vector<2x8x8xf32>
    "tpu.trace_stop"() : () -> ()
    %592 = vector.shape_cast %591 : vector<2x8x8xf32> to vector<16x8xf32>
    %593 = arith.truncf %592 : vector<16x8xf32> to vector<16x8xbf16>
    %594 = vector.extract_strided_slice %485 {offsets = [16, 0], sizes = [8, 32], strides = [1, 1]} : vector<32x32xbf16> to vector<8x32xbf16>
    %cst_165 = arith.constant dense<0.000000e+00> : vector<16x32xf32>
    %595 = tpu.matmul %593, %594, %cst_165 {dimension_numbers = #tpu.dot_dimension_numbers<[1], [0], [0], [1], [0, 0, 1, 1], [], []>} : vector<16x8xbf16>, vector<8x32xbf16>, vector<16x32xf32> -> vector<16x32xf32>
    %596 = arith.addf %569, %595 : vector<16x32xf32>
    %597 = vector.extract_strided_slice %498 {offsets = [0, 24], sizes = [16, 8], strides = [1, 1]} : vector<16x32xf32> to vector<16x8xf32>
    %598 = vector.shape_cast %597 : vector<16x8xf32> to vector<2x8x8xf32>
    %599 = arith.truncf %598 : vector<2x8x8xf32> to vector<2x8x8xbf16>
    %600 = vector.extract_strided_slice %507 {offsets = [0, 24], sizes = [16, 8], strides = [1, 1]} : vector<16x32xf32> to vector<16x8xf32>
    %601 = vector.shape_cast %600 : vector<16x8xf32> to vector<2x8x8xf32>
    %602 = arith.truncf %601 : vector<2x8x8xf32> to vector<2x8x8xbf16>
    %603 = vector.extract_strided_slice %516 {offsets = [0, 24], sizes = [16, 8], strides = [1, 1]} : vector<16x32xf32> to vector<16x8xf32>
    %604 = vector.shape_cast %603 : vector<16x8xf32> to vector<2x8x8xf32>
    %605 = arith.truncf %604 : vector<2x8x8xf32> to vector<2x8x8xbf16>
    "tpu.trace_start"() <{level = 10 : i32, message = "bqd,bkd->bqk"}> : () -> ()
    %cst_166 = arith.constant dense<0.000000e+00> : vector<2x8x8xf32>
    %606 = tpu.matmul %599, %602, %cst_166 {dimension_numbers = #tpu.dot_dimension_numbers<[2], [2], [1], [1], [0, 0, 0, 1, 1, 1], [0], [0]>} : vector<2x8x8xbf16>, vector<2x8x8xbf16>, vector<2x8x8xf32> -> vector<2x8x8xf32>
    "tpu.trace_stop"() : () -> ()
    %cst_167 = arith.constant dense<0xFF800000> : vector<2x8xf32>
    %607 = vector.multi_reduction <maximumf>, %606, %cst_167 [2] : vector<2x8x8xf32> to vector<2x8xf32>
    %608 = vector.shape_cast %607 : vector<2x8xf32> to vector<2x8x1xf32>
    %609 = vector.broadcast %608 : vector<2x8x1xf32> to vector<2x8x8xf32>
    %610 = arith.subf %606, %609 : vector<2x8x8xf32>
    %611 = math.exp %610 : vector<2x8x8xf32>
    %cst_168 = arith.constant dense<0.000000e+00> : vector<2x8xf32>
    %612 = vector.multi_reduction <add>, %611, %cst_168 [2] : vector<2x8x8xf32> to vector<2x8xf32>
    %613 = vector.shape_cast %612 : vector<2x8xf32> to vector<2x8x1xf32>
    %614 = tpu.reciprocal %613 {approx = true} : vector<2x8x1xf32> -> vector<2x8x1xf32>
    %615 = vector.broadcast %614 : vector<2x8x1xf32> to vector<2x8x8xf32>
    %616 = arith.mulf %611, %615 : vector<2x8x8xf32>
    %617 = arith.truncf %616 : vector<2x8x8xf32> to vector<2x8x8xbf16>
    "tpu.trace_start"() <{level = 10 : i32, message = "bqk,bkd->bqd"}> : () -> ()
    %cst_169 = arith.constant dense<0.000000e+00> : vector<2x8x8xf32>
    %618 = tpu.matmul %617, %605, %cst_169 {dimension_numbers = #tpu.dot_dimension_numbers<[2], [1], [1], [2], [0, 0, 0, 1, 1, 2], [0], [0]>} : vector<2x8x8xbf16>, vector<2x8x8xbf16>, vector<2x8x8xf32> -> vector<2x8x8xf32>
    "tpu.trace_stop"() : () -> ()
    %619 = vector.shape_cast %618 : vector<2x8x8xf32> to vector<16x8xf32>
    %620 = arith.truncf %619 : vector<16x8xf32> to vector<16x8xbf16>
    %621 = vector.extract_strided_slice %485 {offsets = [24, 0], sizes = [8, 32], strides = [1, 1]} : vector<32x32xbf16> to vector<8x32xbf16>
    %cst_170 = arith.constant dense<0.000000e+00> : vector<16x32xf32>
    %622 = tpu.matmul %620, %621, %cst_170 {dimension_numbers = #tpu.dot_dimension_numbers<[1], [0], [0], [1], [0, 0, 1, 1], [], []>} : vector<16x8xbf16>, vector<8x32xbf16>, vector<16x32xf32> -> vector<16x32xf32>
    %623 = arith.addf %596, %622 : vector<16x32xf32>
    %624 = vector.shape_cast %487 : vector<32xf32> to vector<1x32xf32>
    %625 = vector.broadcast %624 : vector<1x32xf32> to vector<16x32xf32>
    %626 = arith.addf %623, %625 : vector<16x32xf32>
    %627 = arith.addf %448, %626 : vector<16x32xf32>
    %628 = vector.extract_strided_slice %450 {offsets = [1, 0], sizes = [1, 32], strides = [1, 1]} : vector<3x32xf32> to vector<1x32xf32>
    %629 = vector.shape_cast %628 : vector<1x32xf32> to vector<32xf32>
    %630 = vector.extract_strided_slice %452 {offsets = [1, 0], sizes = [1, 32], strides = [1, 1]} : vector<3x32xf32> to vector<1x32xf32>
    %631 = vector.shape_cast %630 : vector<1x32xf32> to vector<32xf32>
    %cst_171 = arith.constant dense<0.000000e+00> : vector<16xf32>
    %632 = vector.multi_reduction <add>, %627, %cst_171 [1] : vector<16x32xf32> to vector<16xf32>
    %633 = vector.shape_cast %632 : vector<16xf32> to vector<16x1xf32>
    %cst_172 = arith.constant 3.200000e+01 : f32
    %634 = vector.broadcast %cst_172 : f32 to vector<16x1xf32>
    %635 = arith.divf %633, %634 : vector<16x1xf32>
    %636 = vector.broadcast %635 : vector<16x1xf32> to vector<16x32xf32>
    %637 = arith.subf %627, %636 : vector<16x32xf32>
    %638 = arith.mulf %637, %637 : vector<16x32xf32>
    %cst_173 = arith.constant dense<0.000000e+00> : vector<16xf32>
    %639 = vector.multi_reduction <add>, %638, %cst_173 [1] : vector<16x32xf32> to vector<16xf32>
    %640 = vector.shape_cast %639 : vector<16xf32> to vector<16x1xf32>
    %cst_174 = arith.constant 3.200000e+01 : f32
    %641 = vector.broadcast %cst_174 : f32 to vector<16x1xf32>
    %642 = arith.divf %640, %641 : vector<16x1xf32>
    %cst_175 = arith.constant 9.99999974E-6 : f32
    %643 = vector.broadcast %cst_175 : f32 to vector<16x1xf32>
    %644 = arith.addf %642, %643 : vector<16x1xf32>
    %645 = math.rsqrt %644 : vector<16x1xf32>
    %646 = vector.broadcast %645 : vector<16x1xf32> to vector<16x32xf32>
    %647 = arith.mulf %637, %646 : vector<16x32xf32>
    %648 = vector.shape_cast %629 : vector<32xf32> to vector<1x32xf32>
    %649 = vector.broadcast %648 : vector<1x32xf32> to vector<16x32xf32>
    %650 = arith.mulf %647, %649 : vector<16x32xf32>
    %651 = vector.shape_cast %631 : vector<32xf32> to vector<1x32xf32>
    %652 = vector.broadcast %651 : vector<1x32xf32> to vector<16x32xf32>
    %653 = arith.addf %650, %652 : vector<16x32xf32>
    %654 = arith.addf %653, %0 : vector<16x32xf32>
    %c1_176 = arith.constant 1 : index
    %c0_177 = arith.constant 0 : index
    %c0_178 = arith.constant 0 : index
    %c0_179 = arith.constant 0 : index
    %655 = vector.load %arg7[%c1_176, %c0_177, %c0_178, %c0_179] : memref<2x3x32x32xbf16, #tpu.memory_space<vmem>>, vector<1x3x32x32xbf16>
    %656 = vector.shape_cast %655 : vector<1x3x32x32xbf16> to vector<3x32x32xbf16>
    %c1_180 = arith.constant 1 : index
    %c0_181 = arith.constant 0 : index
    %c0_182 = arith.constant 0 : index
    %657 = vector.load %arg8[%c1_180, %c0_181, %c0_182] : memref<2x3x32xf32, #tpu.memory_space<vmem>>, vector<1x3x32xf32>
    %658 = vector.shape_cast %657 : vector<1x3x32xf32> to vector<3x32xf32>
    %c1_183 = arith.constant 1 : index
    %c0_184 = arith.constant 0 : index
    %c0_185 = arith.constant 0 : index
    %659 = vector.load %arg9[%c1_183, %c0_184, %c0_185] : memref<2x32x32xbf16, #tpu.memory_space<vmem>>, vector<1x32x32xbf16>
    %660 = vector.shape_cast %659 : vector<1x32x32xbf16> to vector<32x32xbf16>
    %c1_186 = arith.constant 1 : index
    %c0_187 = arith.constant 0 : index
    %661 = vector.load %arg10[%c1_186, %c0_187] : memref<2x32xf32, #tpu.memory_space<vmem>>, vector<1x32xf32>
    %662 = vector.shape_cast %661 : vector<1x32xf32> to vector<32xf32>
    %663 = vector.extract_strided_slice %656 {offsets = [0, 0, 0], sizes = [1, 32, 32], strides = [1, 1, 1]} : vector<3x32x32xbf16> to vector<1x32x32xbf16>
    %664 = vector.shape_cast %663 : vector<1x32x32xbf16> to vector<32x32xbf16>
    %665 = vector.extract_strided_slice %658 {offsets = [0, 0], sizes = [1, 32], strides = [1, 1]} : vector<3x32xf32> to vector<1x32xf32>
    %666 = vector.shape_cast %665 : vector<1x32xf32> to vector<32xf32>
    %667 = arith.truncf %654 : vector<16x32xf32> to vector<16x32xbf16>
    %cst_188 = arith.constant dense<0.000000e+00> : vector<16x32xf32>
    %668 = tpu.matmul %667, %664, %cst_188 {dimension_numbers = #tpu.dot_dimension_numbers<[1], [0], [0], [1], [0, 0, 1, 1], [], []>} : vector<16x32xbf16>, vector<32x32xbf16>, vector<16x32xf32> -> vector<16x32xf32>
    %669 = vector.shape_cast %666 : vector<32xf32> to vector<1x32xf32>
    %670 = vector.broadcast %669 : vector<1x32xf32> to vector<16x32xf32>
    %671 = arith.addf %668, %670 : vector<16x32xf32>
    %cst_189 = arith.constant 0.353553385 : f32
    %672 = vector.broadcast %cst_189 : f32 to vector<16x32xf32>
    %673 = arith.mulf %671, %672 : vector<16x32xf32>
    %674 = vector.extract_strided_slice %673 {offsets = [0, 0], sizes = [16, 8], strides = [1, 1]} : vector<16x32xf32> to vector<16x8xf32>
    %675 = vector.shape_cast %674 : vector<16x8xf32> to vector<2x8x8xf32>
    %676 = arith.truncf %675 : vector<2x8x8xf32> to vector<2x8x8xbf16>
    %677 = vector.extract_strided_slice %673 {offsets = [0, 8], sizes = [16, 8], strides = [1, 1]} : vector<16x32xf32> to vector<16x8xf32>
    %678 = vector.shape_cast %677 : vector<16x8xf32> to vector<2x8x8xf32>
    %679 = arith.truncf %678 : vector<2x8x8xf32> to vector<2x8x8xbf16>
    %680 = vector.extract_strided_slice %673 {offsets = [0, 16], sizes = [16, 8], strides = [1, 1]} : vector<16x32xf32> to vector<16x8xf32>
    %681 = vector.shape_cast %680 : vector<16x8xf32> to vector<2x8x8xf32>
    %682 = arith.truncf %681 : vector<2x8x8xf32> to vector<2x8x8xbf16>
    %683 = vector.extract_strided_slice %673 {offsets = [0, 24], sizes = [16, 8], strides = [1, 1]} : vector<16x32xf32> to vector<16x8xf32>
    %684 = vector.shape_cast %683 : vector<16x8xf32> to vector<2x8x8xf32>
    %685 = arith.truncf %684 : vector<2x8x8xf32> to vector<2x8x8xbf16>
    %cst_190 = arith.constant 0xFF800000 : f32
    %686 = vector.broadcast %cst_190 : f32 to vector<2x8x1xf32>
    %cst_191 = arith.constant 0xFF800000 : f32
    %687 = vector.broadcast %cst_191 : f32 to vector<2x8x1xf32>
    %cst_192 = arith.constant 0xFF800000 : f32
    %688 = vector.broadcast %cst_192 : f32 to vector<2x8x1xf32>
    %cst_193 = arith.constant 0xFF800000 : f32
    %689 = vector.broadcast %cst_193 : f32 to vector<2x8x1xf32>
    %cst_194 = arith.constant 0.000000e+00 : f32
    %690 = vector.broadcast %cst_194 : f32 to vector<2x8x1xf32>
    %cst_195 = arith.constant 0.000000e+00 : f32
    %691 = vector.broadcast %cst_195 : f32 to vector<2x8x1xf32>
    %cst_196 = arith.constant 0.000000e+00 : f32
    %692 = vector.broadcast %cst_196 : f32 to vector<2x8x1xf32>
    %cst_197 = arith.constant 0.000000e+00 : f32
    %693 = vector.broadcast %cst_197 : f32 to vector<2x8x1xf32>
    %cst_198 = arith.constant 0.000000e+00 : f32
    %694 = vector.broadcast %cst_198 : f32 to vector<2x8x8xf32>
    %cst_199 = arith.constant 0.000000e+00 : f32
    %695 = vector.broadcast %cst_199 : f32 to vector<2x8x8xf32>
    %cst_200 = arith.constant 0.000000e+00 : f32
    %696 = vector.broadcast %cst_200 : f32 to vector<2x8x8xf32>
    %cst_201 = arith.constant 0.000000e+00 : f32
    %697 = vector.broadcast %cst_201 : f32 to vector<2x8x8xf32>
    %c0_202 = arith.constant 0 : index
    %c0_203 = arith.constant 0 : index
    %c0_204 = arith.constant 0 : index
    %698 = vector.load %arg1[%c0_202, %c0_203, %c0_204] : memref<2x64x32xbf16, #tpu.memory_space<vmem>>, vector<2x64x32xbf16>
    %699 = vector.shape_cast %698 : vector<2x64x32xbf16> to vector<128x32xbf16>
    %c0_205 = arith.constant 0 : index
    %c0_206 = arith.constant 0 : index
    %c0_207 = arith.constant 0 : index
    %700 = vector.load %arg2[%c0_205, %c0_206, %c0_207] : memref<2x64x32xbf16, #tpu.memory_space<vmem>>, vector<2x64x32xbf16>
    %701 = vector.shape_cast %700 : vector<2x64x32xbf16> to vector<128x32xbf16>
    %702 = vector.extract_strided_slice %656 {offsets = [1, 0, 0], sizes = [1, 32, 32], strides = [1, 1, 1]} : vector<3x32x32xbf16> to vector<1x32x32xbf16>
    %703 = vector.shape_cast %702 : vector<1x32x32xbf16> to vector<32x32xbf16>
    %cst_208 = arith.constant dense<0.000000e+00> : vector<128x32xf32>
    %704 = tpu.matmul %699, %703, %cst_208 {dimension_numbers = #tpu.dot_dimension_numbers<[1], [0], [0], [1], [0, 0, 1, 1], [], []>} : vector<128x32xbf16>, vector<32x32xbf16>, vector<128x32xf32> -> vector<128x32xf32>
    %705 = vector.extract_strided_slice %658 {offsets = [1, 0], sizes = [1, 32], strides = [1, 1]} : vector<3x32xf32> to vector<1x32xf32>
    %706 = vector.shape_cast %705 : vector<1x32xf32> to vector<32xf32>
    %707 = vector.shape_cast %706 : vector<32xf32> to vector<1x32xf32>
    %708 = vector.broadcast %707 : vector<1x32xf32> to vector<128x32xf32>
    %709 = arith.addf %704, %708 : vector<128x32xf32>
    %710 = vector.extract_strided_slice %656 {offsets = [2, 0, 0], sizes = [1, 32, 32], strides = [1, 1, 1]} : vector<3x32x32xbf16> to vector<1x32x32xbf16>
    %711 = vector.shape_cast %710 : vector<1x32x32xbf16> to vector<32x32xbf16>
    %cst_209 = arith.constant dense<0.000000e+00> : vector<128x32xf32>
    %712 = tpu.matmul %701, %711, %cst_209 {dimension_numbers = #tpu.dot_dimension_numbers<[1], [0], [0], [1], [0, 0, 1, 1], [], []>} : vector<128x32xbf16>, vector<32x32xbf16>, vector<128x32xf32> -> vector<128x32xf32>
    %713 = vector.extract_strided_slice %658 {offsets = [2, 0], sizes = [1, 32], strides = [1, 1]} : vector<3x32xf32> to vector<1x32xf32>
    %714 = vector.shape_cast %713 : vector<1x32xf32> to vector<32xf32>
    %715 = vector.shape_cast %714 : vector<32xf32> to vector<1x32xf32>
    %716 = vector.broadcast %715 : vector<1x32xf32> to vector<128x32xf32>
    %717 = arith.addf %712, %716 : vector<128x32xf32>
    %718 = vector.extract_strided_slice %709 {offsets = [0, 0], sizes = [128, 8], strides = [1, 1]} : vector<128x32xf32> to vector<128x8xf32>
    %719 = vector.shape_cast %718 : vector<128x8xf32> to vector<2x64x8xf32>
    %720 = arith.truncf %719 : vector<2x64x8xf32> to vector<2x64x8xbf16>
    %721 = vector.extract_strided_slice %717 {offsets = [0, 0], sizes = [128, 8], strides = [1, 1]} : vector<128x32xf32> to vector<128x8xf32>
    %722 = vector.shape_cast %721 : vector<128x8xf32> to vector<2x64x8xf32>
    %723 = arith.truncf %722 : vector<2x64x8xf32> to vector<2x64x8xbf16>
    "tpu.trace_start"() <{level = 10 : i32, message = "bqd,bkd->bqk"}> : () -> ()
    %cst_210 = arith.constant dense<0.000000e+00> : vector<2x8x64xf32>
    %724 = tpu.matmul %676, %720, %cst_210 {dimension_numbers = #tpu.dot_dimension_numbers<[2], [2], [1], [1], [0, 0, 0, 1, 1, 1], [0], [0]>} : vector<2x8x8xbf16>, vector<2x64x8xbf16>, vector<2x8x64xf32> -> vector<2x8x64xf32>
    "tpu.trace_stop"() : () -> ()
    %cst_211 = arith.constant dense<0xFF800000> : vector<2x8xf32>
    %725 = vector.multi_reduction <maximumf>, %724, %cst_211 [2] : vector<2x8x64xf32> to vector<2x8xf32>
    %726 = vector.shape_cast %725 : vector<2x8xf32> to vector<2x8x1xf32>
    %727 = arith.maximumf %686, %726 : vector<2x8x1xf32>
    %728 = arith.subf %686, %727 : vector<2x8x1xf32>
    %729 = math.exp %728 : vector<2x8x1xf32>
    %730 = vector.broadcast %727 : vector<2x8x1xf32> to vector<2x8x64xf32>
    %731 = arith.subf %724, %730 : vector<2x8x64xf32>
    %732 = math.exp %731 : vector<2x8x64xf32>
    %733 = arith.mulf %729, %690 : vector<2x8x1xf32>
    %cst_212 = arith.constant dense<0.000000e+00> : vector<2x8xf32>
    %734 = vector.multi_reduction <add>, %732, %cst_212 [2] : vector<2x8x64xf32> to vector<2x8xf32>
    %735 = vector.shape_cast %734 : vector<2x8xf32> to vector<2x8x1xf32>
    %736 = arith.addf %733, %735 : vector<2x8x1xf32>
    %737 = vector.broadcast %729 : vector<2x8x1xf32> to vector<2x8x8xf32>
    %738 = arith.mulf %737, %694 : vector<2x8x8xf32>
    %739 = arith.truncf %732 : vector<2x8x64xf32> to vector<2x8x64xbf16>
    "tpu.trace_start"() <{level = 10 : i32, message = "bqk,bkd->bqd"}> : () -> ()
    %cst_213 = arith.constant dense<0.000000e+00> : vector<2x8x8xf32>
    %740 = tpu.matmul %739, %723, %cst_213 {dimension_numbers = #tpu.dot_dimension_numbers<[2], [1], [1], [2], [0, 0, 0, 1, 1, 2], [0], [0]>} : vector<2x8x64xbf16>, vector<2x64x8xbf16>, vector<2x8x8xf32> -> vector<2x8x8xf32>
    "tpu.trace_stop"() : () -> ()
    %741 = arith.addf %738, %740 : vector<2x8x8xf32>
    %742 = vector.extract_strided_slice %709 {offsets = [0, 8], sizes = [128, 8], strides = [1, 1]} : vector<128x32xf32> to vector<128x8xf32>
    %743 = vector.shape_cast %742 : vector<128x8xf32> to vector<2x64x8xf32>
    %744 = arith.truncf %743 : vector<2x64x8xf32> to vector<2x64x8xbf16>
    %745 = vector.extract_strided_slice %717 {offsets = [0, 8], sizes = [128, 8], strides = [1, 1]} : vector<128x32xf32> to vector<128x8xf32>
    %746 = vector.shape_cast %745 : vector<128x8xf32> to vector<2x64x8xf32>
    %747 = arith.truncf %746 : vector<2x64x8xf32> to vector<2x64x8xbf16>
    "tpu.trace_start"() <{level = 10 : i32, message = "bqd,bkd->bqk"}> : () -> ()
    %cst_214 = arith.constant dense<0.000000e+00> : vector<2x8x64xf32>
    %748 = tpu.matmul %679, %744, %cst_214 {dimension_numbers = #tpu.dot_dimension_numbers<[2], [2], [1], [1], [0, 0, 0, 1, 1, 1], [0], [0]>} : vector<2x8x8xbf16>, vector<2x64x8xbf16>, vector<2x8x64xf32> -> vector<2x8x64xf32>
    "tpu.trace_stop"() : () -> ()
    %cst_215 = arith.constant dense<0xFF800000> : vector<2x8xf32>
    %749 = vector.multi_reduction <maximumf>, %748, %cst_215 [2] : vector<2x8x64xf32> to vector<2x8xf32>
    %750 = vector.shape_cast %749 : vector<2x8xf32> to vector<2x8x1xf32>
    %751 = arith.maximumf %687, %750 : vector<2x8x1xf32>
    %752 = arith.subf %687, %751 : vector<2x8x1xf32>
    %753 = math.exp %752 : vector<2x8x1xf32>
    %754 = vector.broadcast %751 : vector<2x8x1xf32> to vector<2x8x64xf32>
    %755 = arith.subf %748, %754 : vector<2x8x64xf32>
    %756 = math.exp %755 : vector<2x8x64xf32>
    %757 = arith.mulf %753, %691 : vector<2x8x1xf32>
    %cst_216 = arith.constant dense<0.000000e+00> : vector<2x8xf32>
    %758 = vector.multi_reduction <add>, %756, %cst_216 [2] : vector<2x8x64xf32> to vector<2x8xf32>
    %759 = vector.shape_cast %758 : vector<2x8xf32> to vector<2x8x1xf32>
    %760 = arith.addf %757, %759 : vector<2x8x1xf32>
    %761 = vector.broadcast %753 : vector<2x8x1xf32> to vector<2x8x8xf32>
    %762 = arith.mulf %761, %695 : vector<2x8x8xf32>
    %763 = arith.truncf %756 : vector<2x8x64xf32> to vector<2x8x64xbf16>
    "tpu.trace_start"() <{level = 10 : i32, message = "bqk,bkd->bqd"}> : () -> ()
    %cst_217 = arith.constant dense<0.000000e+00> : vector<2x8x8xf32>
    %764 = tpu.matmul %763, %747, %cst_217 {dimension_numbers = #tpu.dot_dimension_numbers<[2], [1], [1], [2], [0, 0, 0, 1, 1, 2], [0], [0]>} : vector<2x8x64xbf16>, vector<2x64x8xbf16>, vector<2x8x8xf32> -> vector<2x8x8xf32>
    "tpu.trace_stop"() : () -> ()
    %765 = arith.addf %762, %764 : vector<2x8x8xf32>
    %766 = vector.extract_strided_slice %709 {offsets = [0, 16], sizes = [128, 8], strides = [1, 1]} : vector<128x32xf32> to vector<128x8xf32>
    %767 = vector.shape_cast %766 : vector<128x8xf32> to vector<2x64x8xf32>
    %768 = arith.truncf %767 : vector<2x64x8xf32> to vector<2x64x8xbf16>
    %769 = vector.extract_strided_slice %717 {offsets = [0, 16], sizes = [128, 8], strides = [1, 1]} : vector<128x32xf32> to vector<128x8xf32>
    %770 = vector.shape_cast %769 : vector<128x8xf32> to vector<2x64x8xf32>
    %771 = arith.truncf %770 : vector<2x64x8xf32> to vector<2x64x8xbf16>
    "tpu.trace_start"() <{level = 10 : i32, message = "bqd,bkd->bqk"}> : () -> ()
    %cst_218 = arith.constant dense<0.000000e+00> : vector<2x8x64xf32>
    %772 = tpu.matmul %682, %768, %cst_218 {dimension_numbers = #tpu.dot_dimension_numbers<[2], [2], [1], [1], [0, 0, 0, 1, 1, 1], [0], [0]>} : vector<2x8x8xbf16>, vector<2x64x8xbf16>, vector<2x8x64xf32> -> vector<2x8x64xf32>
    "tpu.trace_stop"() : () -> ()
    %cst_219 = arith.constant dense<0xFF800000> : vector<2x8xf32>
    %773 = vector.multi_reduction <maximumf>, %772, %cst_219 [2] : vector<2x8x64xf32> to vector<2x8xf32>
    %774 = vector.shape_cast %773 : vector<2x8xf32> to vector<2x8x1xf32>
    %775 = arith.maximumf %688, %774 : vector<2x8x1xf32>
    %776 = arith.subf %688, %775 : vector<2x8x1xf32>
    %777 = math.exp %776 : vector<2x8x1xf32>
    %778 = vector.broadcast %775 : vector<2x8x1xf32> to vector<2x8x64xf32>
    %779 = arith.subf %772, %778 : vector<2x8x64xf32>
    %780 = math.exp %779 : vector<2x8x64xf32>
    %781 = arith.mulf %777, %692 : vector<2x8x1xf32>
    %cst_220 = arith.constant dense<0.000000e+00> : vector<2x8xf32>
    %782 = vector.multi_reduction <add>, %780, %cst_220 [2] : vector<2x8x64xf32> to vector<2x8xf32>
    %783 = vector.shape_cast %782 : vector<2x8xf32> to vector<2x8x1xf32>
    %784 = arith.addf %781, %783 : vector<2x8x1xf32>
    %785 = vector.broadcast %777 : vector<2x8x1xf32> to vector<2x8x8xf32>
    %786 = arith.mulf %785, %696 : vector<2x8x8xf32>
    %787 = arith.truncf %780 : vector<2x8x64xf32> to vector<2x8x64xbf16>
    "tpu.trace_start"() <{level = 10 : i32, message = "bqk,bkd->bqd"}> : () -> ()
    %cst_221 = arith.constant dense<0.000000e+00> : vector<2x8x8xf32>
    %788 = tpu.matmul %787, %771, %cst_221 {dimension_numbers = #tpu.dot_dimension_numbers<[2], [1], [1], [2], [0, 0, 0, 1, 1, 2], [0], [0]>} : vector<2x8x64xbf16>, vector<2x64x8xbf16>, vector<2x8x8xf32> -> vector<2x8x8xf32>
    "tpu.trace_stop"() : () -> ()
    %789 = arith.addf %786, %788 : vector<2x8x8xf32>
    %790 = vector.extract_strided_slice %709 {offsets = [0, 24], sizes = [128, 8], strides = [1, 1]} : vector<128x32xf32> to vector<128x8xf32>
    %791 = vector.shape_cast %790 : vector<128x8xf32> to vector<2x64x8xf32>
    %792 = arith.truncf %791 : vector<2x64x8xf32> to vector<2x64x8xbf16>
    %793 = vector.extract_strided_slice %717 {offsets = [0, 24], sizes = [128, 8], strides = [1, 1]} : vector<128x32xf32> to vector<128x8xf32>
    %794 = vector.shape_cast %793 : vector<128x8xf32> to vector<2x64x8xf32>
    %795 = arith.truncf %794 : vector<2x64x8xf32> to vector<2x64x8xbf16>
    "tpu.trace_start"() <{level = 10 : i32, message = "bqd,bkd->bqk"}> : () -> ()
    %cst_222 = arith.constant dense<0.000000e+00> : vector<2x8x64xf32>
    %796 = tpu.matmul %685, %792, %cst_222 {dimension_numbers = #tpu.dot_dimension_numbers<[2], [2], [1], [1], [0, 0, 0, 1, 1, 1], [0], [0]>} : vector<2x8x8xbf16>, vector<2x64x8xbf16>, vector<2x8x64xf32> -> vector<2x8x64xf32>
    "tpu.trace_stop"() : () -> ()
    %cst_223 = arith.constant dense<0xFF800000> : vector<2x8xf32>
    %797 = vector.multi_reduction <maximumf>, %796, %cst_223 [2] : vector<2x8x64xf32> to vector<2x8xf32>
    %798 = vector.shape_cast %797 : vector<2x8xf32> to vector<2x8x1xf32>
    %799 = arith.maximumf %689, %798 : vector<2x8x1xf32>
    %800 = arith.subf %689, %799 : vector<2x8x1xf32>
    %801 = math.exp %800 : vector<2x8x1xf32>
    %802 = vector.broadcast %799 : vector<2x8x1xf32> to vector<2x8x64xf32>
    %803 = arith.subf %796, %802 : vector<2x8x64xf32>
    %804 = math.exp %803 : vector<2x8x64xf32>
    %805 = arith.mulf %801, %693 : vector<2x8x1xf32>
    %cst_224 = arith.constant dense<0.000000e+00> : vector<2x8xf32>
    %806 = vector.multi_reduction <add>, %804, %cst_224 [2] : vector<2x8x64xf32> to vector<2x8xf32>
    %807 = vector.shape_cast %806 : vector<2x8xf32> to vector<2x8x1xf32>
    %808 = arith.addf %805, %807 : vector<2x8x1xf32>
    %809 = vector.broadcast %801 : vector<2x8x1xf32> to vector<2x8x8xf32>
    %810 = arith.mulf %809, %697 : vector<2x8x8xf32>
    %811 = arith.truncf %804 : vector<2x8x64xf32> to vector<2x8x64xbf16>
    "tpu.trace_start"() <{level = 10 : i32, message = "bqk,bkd->bqd"}> : () -> ()
    %cst_225 = arith.constant dense<0.000000e+00> : vector<2x8x8xf32>
    %812 = tpu.matmul %811, %795, %cst_225 {dimension_numbers = #tpu.dot_dimension_numbers<[2], [1], [1], [2], [0, 0, 0, 1, 1, 2], [0], [0]>} : vector<2x8x64xbf16>, vector<2x64x8xbf16>, vector<2x8x8xf32> -> vector<2x8x8xf32>
    "tpu.trace_stop"() : () -> ()
    %813 = arith.addf %810, %812 : vector<2x8x8xf32>
    %814 = tpu.reciprocal %736 {approx = true} : vector<2x8x1xf32> -> vector<2x8x1xf32>
    %815 = vector.broadcast %814 : vector<2x8x1xf32> to vector<2x8x8xf32>
    %816 = arith.mulf %741, %815 : vector<2x8x8xf32>
    %817 = vector.shape_cast %816 : vector<2x8x8xf32> to vector<16x8xf32>
    %818 = arith.truncf %817 : vector<16x8xf32> to vector<16x8xbf16>
    %819 = vector.extract_strided_slice %660 {offsets = [0, 0], sizes = [8, 32], strides = [1, 1]} : vector<32x32xbf16> to vector<8x32xbf16>
    %cst_226 = arith.constant dense<0.000000e+00> : vector<16x32xf32>
    %820 = tpu.matmul %818, %819, %cst_226 {dimension_numbers = #tpu.dot_dimension_numbers<[1], [0], [0], [1], [0, 0, 1, 1], [], []>} : vector<16x8xbf16>, vector<8x32xbf16>, vector<16x32xf32> -> vector<16x32xf32>
    %821 = tpu.reciprocal %760 {approx = true} : vector<2x8x1xf32> -> vector<2x8x1xf32>
    %822 = vector.broadcast %821 : vector<2x8x1xf32> to vector<2x8x8xf32>
    %823 = arith.mulf %765, %822 : vector<2x8x8xf32>
    %824 = vector.shape_cast %823 : vector<2x8x8xf32> to vector<16x8xf32>
    %825 = arith.truncf %824 : vector<16x8xf32> to vector<16x8xbf16>
    %826 = vector.extract_strided_slice %660 {offsets = [8, 0], sizes = [8, 32], strides = [1, 1]} : vector<32x32xbf16> to vector<8x32xbf16>
    %cst_227 = arith.constant dense<0.000000e+00> : vector<16x32xf32>
    %827 = tpu.matmul %825, %826, %cst_227 {dimension_numbers = #tpu.dot_dimension_numbers<[1], [0], [0], [1], [0, 0, 1, 1], [], []>} : vector<16x8xbf16>, vector<8x32xbf16>, vector<16x32xf32> -> vector<16x32xf32>
    %828 = arith.addf %820, %827 : vector<16x32xf32>
    %829 = tpu.reciprocal %784 {approx = true} : vector<2x8x1xf32> -> vector<2x8x1xf32>
    %830 = vector.broadcast %829 : vector<2x8x1xf32> to vector<2x8x8xf32>
    %831 = arith.mulf %789, %830 : vector<2x8x8xf32>
    %832 = vector.shape_cast %831 : vector<2x8x8xf32> to vector<16x8xf32>
    %833 = arith.truncf %832 : vector<16x8xf32> to vector<16x8xbf16>
    %834 = vector.extract_strided_slice %660 {offsets = [16, 0], sizes = [8, 32], strides = [1, 1]} : vector<32x32xbf16> to vector<8x32xbf16>
    %cst_228 = arith.constant dense<0.000000e+00> : vector<16x32xf32>
    %835 = tpu.matmul %833, %834, %cst_228 {dimension_numbers = #tpu.dot_dimension_numbers<[1], [0], [0], [1], [0, 0, 1, 1], [], []>} : vector<16x8xbf16>, vector<8x32xbf16>, vector<16x32xf32> -> vector<16x32xf32>
    %836 = arith.addf %828, %835 : vector<16x32xf32>
    %837 = tpu.reciprocal %808 {approx = true} : vector<2x8x1xf32> -> vector<2x8x1xf32>
    %838 = vector.broadcast %837 : vector<2x8x1xf32> to vector<2x8x8xf32>
    %839 = arith.mulf %813, %838 : vector<2x8x8xf32>
    %840 = vector.shape_cast %839 : vector<2x8x8xf32> to vector<16x8xf32>
    %841 = arith.truncf %840 : vector<16x8xf32> to vector<16x8xbf16>
    %842 = vector.extract_strided_slice %660 {offsets = [24, 0], sizes = [8, 32], strides = [1, 1]} : vector<32x32xbf16> to vector<8x32xbf16>
    %cst_229 = arith.constant dense<0.000000e+00> : vector<16x32xf32>
    %843 = tpu.matmul %841, %842, %cst_229 {dimension_numbers = #tpu.dot_dimension_numbers<[1], [0], [0], [1], [0, 0, 1, 1], [], []>} : vector<16x8xbf16>, vector<8x32xbf16>, vector<16x32xf32> -> vector<16x32xf32>
    %844 = arith.addf %836, %843 : vector<16x32xf32>
    %845 = vector.shape_cast %662 : vector<32xf32> to vector<1x32xf32>
    %846 = vector.broadcast %845 : vector<1x32xf32> to vector<16x32xf32>
    %847 = arith.addf %844, %846 : vector<16x32xf32>
    %848 = arith.addf %627, %847 : vector<16x32xf32>
    %849 = vector.extract_strided_slice %450 {offsets = [2, 0], sizes = [1, 32], strides = [1, 1]} : vector<3x32xf32> to vector<1x32xf32>
    %850 = vector.shape_cast %849 : vector<1x32xf32> to vector<32xf32>
    %851 = vector.extract_strided_slice %452 {offsets = [2, 0], sizes = [1, 32], strides = [1, 1]} : vector<3x32xf32> to vector<1x32xf32>
    %852 = vector.shape_cast %851 : vector<1x32xf32> to vector<32xf32>
    %cst_230 = arith.constant dense<0.000000e+00> : vector<16xf32>
    %853 = vector.multi_reduction <add>, %848, %cst_230 [1] : vector<16x32xf32> to vector<16xf32>
    %854 = vector.shape_cast %853 : vector<16xf32> to vector<16x1xf32>
    %cst_231 = arith.constant 3.200000e+01 : f32
    %855 = vector.broadcast %cst_231 : f32 to vector<16x1xf32>
    %856 = arith.divf %854, %855 : vector<16x1xf32>
    %857 = vector.broadcast %856 : vector<16x1xf32> to vector<16x32xf32>
    %858 = arith.subf %848, %857 : vector<16x32xf32>
    %859 = arith.mulf %858, %858 : vector<16x32xf32>
    %cst_232 = arith.constant dense<0.000000e+00> : vector<16xf32>
    %860 = vector.multi_reduction <add>, %859, %cst_232 [1] : vector<16x32xf32> to vector<16xf32>
    %861 = vector.shape_cast %860 : vector<16xf32> to vector<16x1xf32>
    %cst_233 = arith.constant 3.200000e+01 : f32
    %862 = vector.broadcast %cst_233 : f32 to vector<16x1xf32>
    %863 = arith.divf %861, %862 : vector<16x1xf32>
    %cst_234 = arith.constant 9.99999974E-6 : f32
    %864 = vector.broadcast %cst_234 : f32 to vector<16x1xf32>
    %865 = arith.addf %863, %864 : vector<16x1xf32>
    %866 = math.rsqrt %865 : vector<16x1xf32>
    %867 = vector.broadcast %866 : vector<16x1xf32> to vector<16x32xf32>
    %868 = arith.mulf %858, %867 : vector<16x32xf32>
    %869 = vector.shape_cast %850 : vector<32xf32> to vector<1x32xf32>
    %870 = vector.broadcast %869 : vector<1x32xf32> to vector<16x32xf32>
    %871 = arith.mulf %868, %870 : vector<16x32xf32>
    %872 = vector.shape_cast %852 : vector<32xf32> to vector<1x32xf32>
    %873 = vector.broadcast %872 : vector<1x32xf32> to vector<16x32xf32>
    %874 = arith.addf %871, %873 : vector<16x32xf32>
    %875 = arith.truncf %874 : vector<16x32xf32> to vector<16x32xbf16>
    %c1_235 = arith.constant 1 : index
    %c0_236 = arith.constant 0 : index
    %c0_237 = arith.constant 0 : index
    %876 = vector.load %arg13[%c1_235, %c0_236, %c0_237] : memref<2x32x64xbf16, #tpu.memory_space<vmem>>, vector<1x32x64xbf16>
    %877 = vector.shape_cast %876 : vector<1x32x64xbf16> to vector<32x64xbf16>
    %cst_238 = arith.constant dense<0.000000e+00> : vector<16x64xf32>
    %878 = tpu.matmul %875, %877, %cst_238 {dimension_numbers = #tpu.dot_dimension_numbers<[1], [0], [0], [1], [0, 0, 1, 1], [], []>} : vector<16x32xbf16>, vector<32x64xbf16>, vector<16x64xf32> -> vector<16x64xf32>
    %c1_239 = arith.constant 1 : index
    %c0_240 = arith.constant 0 : index
    %879 = vector.load %arg14[%c1_239, %c0_240] : memref<2x64xf32, #tpu.memory_space<vmem>>, vector<1x64xf32>
    %880 = vector.shape_cast %879 : vector<1x64xf32> to vector<64xf32>
    %881 = vector.shape_cast %880 : vector<64xf32> to vector<1x64xf32>
    %882 = vector.broadcast %881 : vector<1x64xf32> to vector<16x64xf32>
    %883 = arith.addf %878, %882 : vector<16x64xf32>
    %cst_241 = arith.constant 0.000000e+00 : f32
    %884 = vector.broadcast %cst_241 : f32 to vector<16x64xf32>
    %885 = arith.maximumf %883, %884 : vector<16x64xf32>
    %886 = arith.truncf %885 : vector<16x64xf32> to vector<16x64xbf16>
    %c1_242 = arith.constant 1 : index
    %c0_243 = arith.constant 0 : index
    %c0_244 = arith.constant 0 : index
    %887 = vector.load %arg15[%c1_242, %c0_243, %c0_244] : memref<2x64x32xbf16, #tpu.memory_space<vmem>>, vector<1x64x32xbf16>
    %888 = vector.shape_cast %887 : vector<1x64x32xbf16> to vector<64x32xbf16>
    %cst_245 = arith.constant dense<0.000000e+00> : vector<16x32xf32>
    %889 = tpu.matmul %886, %888, %cst_245 {dimension_numbers = #tpu.dot_dimension_numbers<[1], [0], [0], [1], [0, 0, 1, 1], [], []>} : vector<16x64xbf16>, vector<64x32xbf16>, vector<16x32xf32> -> vector<16x32xf32>
    %890 = arith.addf %848, %889 : vector<16x32xf32>
    %c1_246 = arith.constant 1 : index
    %c0_247 = arith.constant 0 : index
    %891 = vector.load %arg16[%c1_246, %c0_247] : memref<2x32xf32, #tpu.memory_space<vmem>>, vector<1x32xf32>
    %892 = vector.shape_cast %891 : vector<1x32xf32> to vector<32xf32>
    %893 = vector.shape_cast %892 : vector<32xf32> to vector<1x32xf32>
    %894 = vector.broadcast %893 : vector<1x32xf32> to vector<16x32xf32>
    %895 = arith.addf %890, %894 : vector<16x32xf32>
    %c0_248 = arith.constant 0 : index
    %c0_249 = arith.constant 0 : index
    %896 = vector.load %arg17[%c0_248, %c0_249] : memref<1x32xf32, #tpu.memory_space<vmem>>, vector<1x32xf32>
    %c0_250 = arith.constant 0 : index
    %c0_251 = arith.constant 0 : index
    %897 = vector.load %arg18[%c0_250, %c0_251] : memref<1x32xf32, #tpu.memory_space<vmem>>, vector<1x32xf32>
    %cst_252 = arith.constant dense<0.000000e+00> : vector<16xf32>
    %898 = vector.multi_reduction <add>, %895, %cst_252 [1] : vector<16x32xf32> to vector<16xf32>
    %899 = vector.shape_cast %898 : vector<16xf32> to vector<16x1xf32>
    %cst_253 = arith.constant 3.200000e+01 : f32
    %900 = vector.broadcast %cst_253 : f32 to vector<16x1xf32>
    %901 = arith.divf %899, %900 : vector<16x1xf32>
    %902 = vector.broadcast %901 : vector<16x1xf32> to vector<16x32xf32>
    %903 = arith.subf %895, %902 : vector<16x32xf32>
    %904 = arith.mulf %903, %903 : vector<16x32xf32>
    %cst_254 = arith.constant dense<0.000000e+00> : vector<16xf32>
    %905 = vector.multi_reduction <add>, %904, %cst_254 [1] : vector<16x32xf32> to vector<16xf32>
    %906 = vector.shape_cast %905 : vector<16xf32> to vector<16x1xf32>
    %cst_255 = arith.constant 3.200000e+01 : f32
    %907 = vector.broadcast %cst_255 : f32 to vector<16x1xf32>
    %908 = arith.divf %906, %907 : vector<16x1xf32>
    %cst_256 = arith.constant 9.99999974E-6 : f32
    %909 = vector.broadcast %cst_256 : f32 to vector<16x1xf32>
    %910 = arith.addf %908, %909 : vector<16x1xf32>
    %911 = math.rsqrt %910 : vector<16x1xf32>
    %912 = vector.broadcast %911 : vector<16x1xf32> to vector<16x32xf32>
    %913 = arith.mulf %903, %912 : vector<16x32xf32>
    %914 = vector.broadcast %896 : vector<1x32xf32> to vector<16x32xf32>
    %915 = arith.mulf %913, %914 : vector<16x32xf32>
    %916 = vector.broadcast %897 : vector<1x32xf32> to vector<16x32xf32>
    %917 = arith.addf %915, %916 : vector<16x32xf32>
    %918 = arith.truncf %917 : vector<16x32xf32> to vector<16x32xbf16>
    %c0_257 = arith.constant 0 : index
    %c0_258 = arith.constant 0 : index
    %919 = vector.load %arg19[%c0_257, %c0_258] : memref<32x128xbf16, #tpu.memory_space<vmem>>, vector<32x128xbf16>
    %cst_259 = arith.constant dense<0.000000e+00> : vector<16x128xf32>
    %920 = tpu.matmul %918, %919, %cst_259 {dimension_numbers = #tpu.dot_dimension_numbers<[1], [0], [0], [1], [0, 0, 1, 1], [], []>} : vector<16x32xbf16>, vector<32x128xbf16>, vector<16x128xf32> -> vector<16x128xf32>
    %c0_260 = arith.constant 0 : index
    %c0_261 = arith.constant 0 : index
    %921 = vector.load %arg20[%c0_260, %c0_261] : memref<1x128xf32, #tpu.memory_space<vmem>>, vector<1x128xf32>
    %922 = vector.broadcast %921 : vector<1x128xf32> to vector<16x128xf32>
    %923 = arith.addf %920, %922 : vector<16x128xf32>
    %924 = vector.extract_strided_slice %923 {offsets = [0, 0], sizes = [16, 32], strides = [1, 1]} : vector<16x128xf32> to vector<16x32xf32>
    %cst_262 = arith.constant 0.000000e+00 : f32
    %925 = vector.broadcast %cst_262 : f32 to vector<16x32xf32>
    %926 = arith.maximumf %924, %925 : vector<16x32xf32>
    %927 = vector.extract_strided_slice %923 {offsets = [0, 32], sizes = [16, 1], strides = [1, 1]} : vector<16x128xf32> to vector<16x1xf32>
    %928 = vector.extract_strided_slice %923 {offsets = [0, 33], sizes = [16, 1], strides = [1, 1]} : vector<16x128xf32> to vector<16x1xf32>
    %929 = arith.subf %927, %928 : vector<16x1xf32>
    %930 = arith.negf %929 : vector<16x1xf32>
    %931 = math.exp %930 : vector<16x1xf32>
    %cst_263 = arith.constant 1.000000e+00 : f32
    %932 = vector.broadcast %cst_263 : f32 to vector<16x1xf32>
    %933 = arith.addf %932, %931 : vector<16x1xf32>
    %934 = arith.divf %932, %933 : vector<16x1xf32>
    %935 = arith.truncf %926 : vector<16x32xf32> to vector<16x32xbf16>
    %c0_264 = arith.constant 0 : index
    %c0_265 = arith.constant 0 : index
    %936 = vector.load %arg21[%c0_264, %c0_265] : memref<32x32xbf16, #tpu.memory_space<vmem>>, vector<32x32xbf16>
    %cst_266 = arith.constant dense<0.000000e+00> : vector<16x32xf32>
    %937 = tpu.matmul %935, %936, %cst_266 {dimension_numbers = #tpu.dot_dimension_numbers<[1], [0], [0], [1], [0, 0, 1, 1], [], []>} : vector<16x32xbf16>, vector<32x32xbf16>, vector<16x32xf32> -> vector<16x32xf32>
    %c0_267 = arith.constant 0 : index
    %c0_268 = arith.constant 0 : index
    %938 = vector.load %arg22[%c0_267, %c0_268] : memref<1x32xf32, #tpu.memory_space<vmem>>, vector<1x32xf32>
    %939 = vector.broadcast %938 : vector<1x32xf32> to vector<16x32xf32>
    %940 = arith.addf %937, %939 : vector<16x32xf32>
    %cst_269 = arith.constant 0.000000e+00 : f32
    %941 = vector.broadcast %cst_269 : f32 to vector<16x32xf32>
    %942 = arith.maximumf %940, %941 : vector<16x32xf32>
    %943 = arith.truncf %942 : vector<16x32xf32> to vector<16x32xbf16>
    %c0_270 = arith.constant 0 : index
    %c0_271 = arith.constant 0 : index
    %944 = vector.load %arg23[%c0_270, %c0_271] : memref<32x128xbf16, #tpu.memory_space<vmem>>, vector<32x128xbf16>
    %cst_272 = arith.constant dense<0.000000e+00> : vector<16x128xf32>
    %945 = tpu.matmul %943, %944, %cst_272 {dimension_numbers = #tpu.dot_dimension_numbers<[1], [0], [0], [1], [0, 0, 1, 1], [], []>} : vector<16x32xbf16>, vector<32x128xbf16>, vector<16x128xf32> -> vector<16x128xf32>
    %c0_273 = arith.constant 0 : index
    %c0_274 = arith.constant 0 : index
    %946 = vector.load %arg24[%c0_273, %c0_274] : memref<1x128xf32, #tpu.memory_space<vmem>>, vector<1x128xf32>
    %947 = vector.broadcast %946 : vector<1x128xf32> to vector<16x128xf32>
    %948 = arith.addf %945, %947 : vector<16x128xf32>
    %949 = arith.negf %948 : vector<16x128xf32>
    %950 = math.exp %949 : vector<16x128xf32>
    %cst_275 = arith.constant 1.000000e+00 : f32
    %951 = vector.broadcast %cst_275 : f32 to vector<16x128xf32>
    %952 = arith.addf %951, %950 : vector<16x128xf32>
    %953 = arith.divf %951, %952 : vector<16x128xf32>
    %954 = vector.extract_strided_slice %953 {offsets = [0, 0], sizes = [16, 1], strides = [1, 1]} : vector<16x128xf32> to vector<16x1xf32>
    %955 = vector.extract_strided_slice %953 {offsets = [0, 1], sizes = [16, 1], strides = [1, 1]} : vector<16x128xf32> to vector<16x1xf32>
    %956 = vector.extract_strided_slice %953 {offsets = [0, 2], sizes = [16, 1], strides = [1, 1]} : vector<16x128xf32> to vector<16x1xf32>
    %957 = vector.extract_strided_slice %953 {offsets = [0, 3], sizes = [16, 1], strides = [1, 1]} : vector<16x128xf32> to vector<16x1xf32>
    %cst_276 = arith.constant 0.000000e+00 : f32
    %958 = vector.broadcast %cst_276 : f32 to vector<16x123xf32>
    %cst_277 = arith.constant 5.000000e-01 : f32
    %959 = vector.broadcast %cst_277 : f32 to vector<16x1xf32>
    %960 = arith.mulf %959, %957 : vector<16x1xf32>
    %961 = arith.subf %955, %960 : vector<16x1xf32>
    %cst_278 = arith.constant 5.000000e-01 : f32
    %962 = vector.broadcast %cst_278 : f32 to vector<16x1xf32>
    %963 = arith.mulf %962, %956 : vector<16x1xf32>
    %964 = arith.subf %954, %963 : vector<16x1xf32>
    %cst_279 = arith.constant 5.000000e-01 : f32
    %965 = vector.broadcast %cst_279 : f32 to vector<16x1xf32>
    %966 = arith.mulf %965, %957 : vector<16x1xf32>
    %967 = arith.addf %955, %966 : vector<16x1xf32>
    %cst_280 = arith.constant 5.000000e-01 : f32
    %968 = vector.broadcast %cst_280 : f32 to vector<16x1xf32>
    %969 = arith.mulf %968, %956 : vector<16x1xf32>
    %970 = arith.addf %954, %969 : vector<16x1xf32>
    %971 = tpu.concatenate %934, %961, %964, %967, %970, %958 in 1 : vector<16x1xf32>, vector<16x1xf32>, vector<16x1xf32>, vector<16x1xf32>, vector<16x1xf32>, vector<16x123xf32> -> vector<16x128xf32>
    %c0_281 = arith.constant 0 : index
    %c0_282 = arith.constant 0 : index
    %972 = vector.load %arg25[%c0_281, %c0_282] : memref<16x128xf32, #tpu.memory_space<vmem>>, vector<16x128xf32>
    tpu.vector_store %arg25[%c0_281, %c0_282], %971 {strides = array<i32>} : memref<16x128xf32, #tpu.memory_space<vmem>>, vector<16x128xf32>,
    return
  }
}

</mosaic_0001>

<bundles_post_ra>
// kernel: tpu_custom_call.1
= control target key start
LH: loop header
LB: loop body
LE: loop exit
PB: predicated region body
PF: predicated region fallthrough
CT: control target
= control target key end

     0   :  { %s7363_s0 = inlined_call_operand.hbm [shape: f32[16,32], index: 0, kind: input, shape index: {}]   ;;  %s7364_s1 = inlined_call_operand.vmem [shape: bf16[2,64,32], index: 1, kind: input, shape index: {}]   ;;  %s7365_s2 = inlined_call_operand.vmem [shape: bf16[2,64,32], index: 2, kind: input, shape index: {}]   ;;  %s7366_s3 = inlined_call_operand.vmem [shape: bf16[2,3,32,32], index: 3, kind: input, shape index: {}]   ;;  %s7367_s4 = inlined_call_operand.vmem [shape: f32[2,3,32], index: 4, kind: input, shape index: {}]   ;;  %s7368_s5 = inlined_call_operand.vmem [shape: bf16[2,32,32], index: 5, kind: input, shape index: {}]   ;;  %s7369_s6 = inlined_call_operand.hbm [shape: f32[2,32], index: 6, kind: input, shape index: {}]   ;;  %s7370_s7 = inlined_call_operand.vmem [shape: bf16[2,3,32,32], index: 7, kind: input, shape index: {}]   ;;  %s7371_s8 = inlined_call_operand.vmem [shape: f32[2,3,32], index: 8, kind: input, shape index: {}]   ;;  %s7372_s9 = inlined_call_operand.hbm [shape: bf16[2,32,32], index: 9, kind: input, shape index: {}]   ;;  %s7373_s10 = inlined_call_operand.hbm [shape: f32[2,32], index: 10, kind: input, shape index: {}]   ;;  %s7374_s11 = inlined_call_operand.vmem [shape: f32[2,3,32], index: 11, kind: input, shape index: {}]   ;;  %s7375_s12 = inlined_call_operand.vmem [shape: f32[2,3,32], index: 12, kind: input, shape index: {}]   ;;  %s7376_s13 = inlined_call_operand.hbm [shape: bf16[2,32,64], index: 13, kind: input, shape index: {}]   ;;  %s7377_s14 = inlined_call_operand.hbm [shape: f32[2,64], index: 14, kind: input, shape index: {}]   ;;  %s7378_s15 = inlined_call_operand.vmem [shape: bf16[2,64,32], index: 15, kind: input, shape index: {}]   ;;  %s7379_s16 = inlined_call_operand.vmem [shape: f32[2,32], index: 16, kind: input, shape index: {}]   ;;  %s7380_s17 = inlined_call_operand.vmem [shape: f32[1,32], index: 17, kind: input, shape index: {}]   ;;  %s7381_s18 = inlined_call_operand.vmem [shape: f32[1,32], index: 18, kind: input, shape index: {}]   ;;  %s7382_s19 = inlined_call_operand.vmem [shape: bf16[32,128], index: 19, kind: input, shape index: {}]   ;;  %s7383_s20 = inlined_call_operand.vmem [shape: f32[1,128], index: 20, kind: input, shape index: {}]   ;;  %s7384_s21 = inlined_call_operand.hbm [shape: bf16[32,32], index: 21, kind: input, shape index: {}]   ;;  %s7385_s22 = inlined_call_operand.vmem [shape: f32[1,32], index: 22, kind: input, shape index: {}]   ;;  %s7386_s23 = inlined_call_operand.hbm [shape: bf16[32,128], index: 23, kind: input, shape index: {}]   ;;  %s7387_s24 = inlined_call_operand.vmem [shape: f32[1,128], index: 24, kind: input, shape index: {}]   ;;  %s7388_s25 = inlined_call_operand.hbm [shape: f32[16,128], index: 25, kind: output, shape index: {}]  }
   0x1   :  { %7397 = sst [smem:[#allocation23_spill]] %s7363_s0 }
   0x2   :  { %7398 = sst [smem:[#allocation24_spill]] %s7364_s1 }
   0x3   :  { %7399 = sst [smem:[#allocation25_spill]] %s7365_s2 }
   0x4   :  { %7400 = sst [smem:[#allocation26_spill]] %s7366_s3 }
   0x5   :  { %7401 = sst [smem:[#allocation27_spill]] %s7367_s4 }
   0x6   :  { %7402 = sst [smem:[#allocation28_spill]] %s7368_s5 }
   0x7   :  { %7403 = sst [smem:[#allocation29_spill]] %s7369_s6 }
   0x8   :  { %7404 = sst [smem:[#allocation30_spill]] %s7370_s7 }
   0x9   :  { %7405 = sst [smem:[#allocation31_spill]] %s7371_s8 }
   0xa   :  { %7406 = sst [smem:[#allocation32_spill]] %s7372_s9 }
   0xb   :  { %7407 = sst [smem:[#allocation33_spill]] %s7388_s25 }
   0xc   :  { %30 = vsyncpa [#allocation3], 0 }
   0xd   :  { %31 = vsyncpa [#allocation6], 0 }
   0xe   :  { %32 = vsyncpa [#allocation9], 0 }
   0xf   :  { %33 = vsyncpa [#allocation12], 0 }
  0x10   :  { %34 = vsyncpa [#allocation15], 0  ;;  %s7408_s6 = sld [smem:[#allocation29_spill]] }
  0x16   :  { %s64_s30 = sshll.u32 %s7408_s6, 4  ;;  %s65_s30 = int_to_ptr.hbm [resolvable:$true] %s64_s30 }
  0x17   :  { %35 = vsyncpa [#allocation4], 0  ;;  %s5755_s7 = smov [#allocation5]   ;;  %s92_s8 = sshll.u32 %s7373_s10, 4  ;;  %s93_s8 = int_to_ptr.hbm [resolvable:$true] %s92_s8 }
  0x18   :  { %s66_s3 = sshll.u32 %s5755_s7, 4  ;;  %s5756_s27 = smov [#allocation8]   ;;  %s67_s3 = int_to_ptr.vmem [resolvable:$true] %s66_s3 }
  0x19   :  { %69 = dma.hbm_to_vmem [thread:$0]  %s65_s30, 32, %s67_s3, [#allocation6]  }
  0x1a   :  { %s94_s4 = sshll.u32 %s5756_s27, 4  ;;  %s120_s5 = sshll.u32 %s7377_s14, 4  ;;  %s95_s4 = int_to_ptr.vmem [resolvable:$true] %s94_s4  ;;  %s121_s5 = int_to_ptr.hbm [resolvable:$true] %s120_s5 }
  0x1b   :  { %97 = dma.hbm_to_vmem [thread:$0]  %s93_s8, 32, %s95_s4, [#allocation9]  }
  0x1c   :  { %s7409_s2 = sld [smem:[#allocation23_spill]]  ;;  %s5757_s7 = smov [#allocation11]  }
  0x1d   :  { %s122_s25 = sshll.u32 %s5757_s7, 4  ;;  %s5758_s10 = smov [#allocation2]   ;;  %s123_s25 = int_to_ptr.vmem [resolvable:$true] %s122_s25 }
  0x1e   :  { %125 = dma.hbm_to_vmem [thread:$0]  %s121_s5, 32, %s123_s25, [#allocation12]  }
  0x1f   :  { %s42_s30 = sshll.u32 %s5758_s10, 4  ;;  %s7396_s3 = smov 128   ;;  %s43_s30 = int_to_ptr.vmem [resolvable:$true] %s42_s30 }
  0x20   :  { %s5760_s26 = smov 8   ;;  %s7410_s8 = sld [smem:[#allocation32_spill]] }
  0x21   :  { %s5761_s4 = smov [#allocation7]   ;;  %s106_s25 = sshll.u32 %s7376_s13, 4  ;;  %s107_s25 = int_to_ptr.hbm [resolvable:$true] %s106_s25 }
  0x22   :  { %s40_s6 = sshll.u32 %s7409_s2, 4  ;;  %s80_s28 = sshll.u32 %s5761_s4, 4  ;;  %s41_s6 = int_to_ptr.hbm [resolvable:$true] %s40_s6  ;;  %s81_s28 = int_to_ptr.vmem [resolvable:$true] %s80_s28 }
  0x23   :  { %48 = dma.hbm_to_vmem [thread:$0]  %s41_s6, 256, %s43_s30, [#allocation3], %s7396_s3, %s7396_s3, %s5760_s26  }
  0x24   :  { %s5762_s5 = smov 64   ;;  %s5763_s29 = smov 4  }
  0x25   :  { %s5764_s2 = smov [#allocation10]   ;;  %s142_s30 = sshll.u32 %s7384_s21, 4  ;;  %s143_s30 = int_to_ptr.hbm [resolvable:$true] %s142_s30 }
  0x26   :  { %s78_s27 = sshll.u32 %s7410_s8, 4  ;;  %s108_s7 = sshll.u32 %s5764_s2, 4  ;;  %s79_s27 = int_to_ptr.hbm [resolvable:$true] %s78_s27  ;;  %s109_s7 = int_to_ptr.vmem [resolvable:$true] %s108_s7 }
  0x27   :  { %86 = dma.hbm_to_vmem [thread:$0]  %s79_s27, 512, %s81_s28, [#allocation6], %s5762_s5, %s5762_s5, %s5763_s29  }
  0x28   :  { %114 = dma.hbm_to_vmem [thread:$0]  %s107_s25, 512, %s109_s7, [#allocation9], %s5762_s5, %s5762_s5, %s5763_s29  }
  0x29   :  { %s157_s8 = sshll.u32 %s7386_s23, 4  ;;  %s5765_s13 = smov [#allocation13]   ;;  %s158_s8 = int_to_ptr.hbm [resolvable:$true] %s157_s8 }
  0x2a   :  { %s144_s4 = sshll.u32 %s5765_s13, 4  ;;  %s5766_s27 = smov [#allocation14]   ;;  %s145_s4 = int_to_ptr.vmem [resolvable:$true] %s144_s4 }
  0x2b   :  { %150 = dma.hbm_to_vmem [thread:$0]  %s143_s30, 256, %s145_s4, [#allocation12], %s5762_s5, %s5762_s5, %s5763_s29  }
  0x2c   :  { %s159_s28 = sshll.u32 %s5766_s27, 4  ;;  %s160_s28 = int_to_ptr.vmem [resolvable:$true] %s159_s28 }
  0x2d   :  { %165 = dma.hbm_to_vmem [thread:$0]  %s158_s8, 256, %s160_s28, [#allocation15], %s5762_s5, %s5762_s5, %s5763_s29  }
  0x2e   :  { %5743 = dma.done.wait [#allocation3], 256  }
  0x2f   :  { %5744 = vsyncadd [#allocation3], 4294967040 }
  0x30   :  { %5745 = dma.done.wait [#allocation6], 544  }
  0x31   :  { %5746 = vsyncadd [#allocation6], 4294966752 }
  0x32   :  { %5747 = dma.done.wait [#allocation9], 544  }
  0x33   :  { %5748 = vsyncadd [#allocation9], 4294966752 }
  0x34   :  { %5749 = dma.done.wait [#allocation12], 288  }
  0x35   :  { %5750 = vsyncadd [#allocation12], 4294967008 }
  0x36   :  { %5751 = dma.done.wait [#allocation15], 256  }
  0x37   :  { %5752 = vsyncadd [#allocation15], 4294967040  ;;  %v5767_v0 = vmov 0.0   ;;  %v5768_v1 = vmov 32.0   ;;  %vm217_vm1 = vcmask 261120   ;;  %s7411_s9 = sld [smem:[#allocation26_spill]] }
  0x38   :  { %205 = vadd.xlane.f32.xlu0 %v5767_v0  ;;  %5311 = vrcp.f32 %v5768_v1  ;;  %v5964_v27 = vld [vmem:[%s7374_s11] sm:$0x7]  ;;  %v202_v36 = vld [vmem:[#allocation2 + $0x8] sm:$0xff]  ;;  %s7412_s23 = sld [smem:[#allocation27_spill]]  ;;  %vm355_vm5 = vcmask 64512   ;;  %vm421_vm6 = vcmask 1043456  }
  0x39   :  { %v5969_v29 = vld [vmem:[%s7375_s12] sm:$0x7]  ;;  %v234_v30 = vperm.slane %v5964_v27, 0  ;;  %s5769_s0 = smov 120   ;;  %s5770_s25 = smov 112   ;;  %vm1421_vm13 = vcmask 523264  }
  0x3a   :  { %v236_v33 = vperm.slane %v5969_v29, 0  ;;  %v201_v35 = vld [vmem:[#allocation2] sm:$0xff]  ;;  %s5771_s5 = smov 104   ;;  %s7413_s6 = sld [smem:[#allocation28_spill]] }
  0x3b   :  { %s7414_s28 = sld [smem:[#allocation30_spill]]  ;;  %s5772_s21 = smov 127  }
  0x3c   :  { %s7415_s30 = sld [smem:[#allocation24_spill]] }
  0x3d   :  { %v5207_v13 = vld [vmem:[%s7411_s9 + $0x28] sm:$0xff]  ;;  %v5205_v15 = vld [vmem:[%s7411_s9 + $0x18] sm:$0xff]  ;;  %v5206_v16 = vld [vmem:[%s7411_s9 + $0x20] sm:$0xff]  ;;  %s7416_s14 = sld [smem:[#allocation25_spill]] }
  0x3e   :  { %v5312_v2 = vpop.eup %5311  ;;  %v5203_v14 = vld [vmem:[%s7411_s9 + $0x8] sm:$0xff]  ;;  %341 = vmatpush.bf16.msra.mxu2 %v5207_v13  ;;  %310 = vmatpush.bf16.msra.mxu1 %v5205_v15  ;;  %v5202_v17 = vld [vmem:[%s7411_s9] sm:$0xff]  ;;  %v5204_v18 = vld [vmem:[%s7411_s9 + $0x10] sm:$0xff]  ;;  %s7417_s13 = sld [smem:[#allocation31_spill]] }
  0x3f   :  { %v208_v3 = vmul.f32 32.0, %v5312_v2  ;;  %vm212_vm0 = vweird.f32 %v5312_v2  ;;  %281 = vmatpush.bf16.msra.mxu0 %v5203_v14  ;;  %v252_v42 = vld [vmem:[%s7412_s23] sm:$0x7]  ;;  %s7420_s2 = sld [smem:[#allocation33_spill]] }
  0x40   :  { %v259_v43 = vperm.slane %v252_v42, 0  ;;  %v291_v44 = vperm.slane %v252_v42, 1  ;;  %v319_v49 = vperm.slane %v252_v42, 2 }
  0x41   :  { %v209_v4 = vsub.f32 1.0, %v208_v3 }
  0x42   :  { %342 = vmatpush.bf16.msra.mxu2 %v5206_v16  ;;  %311 = vmatpush.bf16.msra.mxu1 %v5204_v18 }
  0x43   :  { %v210_v5 = vmul.f32 %v5312_v2, %v209_v4  ;;  %282 = vmatpush.bf16.msra.mxu0 %v5202_v17 }
  0x45   :  { %v211_v6 = vadd.f32 %v5312_v2, %v210_v5  ;;  %s4718_s7 = sshll.u32 %s7420_s2, 4  ;;  %s4719_s7 = int_to_ptr.hbm [resolvable:$true] %s4718_s7 }
  0x47   :  { %v5938_v7 = vsel %vm212_vm0, %v5312_v2, %v211_v6 }
  0xab   :  { %v206_v8 = vpop.xlane.xlu0 %205 }
  0xac   :  { %v214_v9 = vmul.f32 %v5938_v7, %v206_v8 }
  0xae   :  { %v215_v10 = vsub.f32 0.0, %v214_v9 }
  0xb0   :  { %v216_v11 = vmul.f32 %v215_v10, %v215_v10 }
  0xb2   :  { %v218_v12 = vsel %vm217_vm1, %v216_v11, 0.0 }
  0xb3   :  { %219 = vadd.xlane.f32.xlu0 %v218_v12 }
 0x126   :  { %v220_v19 = vpop.xlane.xlu0 %219 }
 0x127   :  { %v221_v20 = vmul.f32 %v220_v19, %v5938_v7 }
 0x129   :  { %v222_v21 = vadd.f32 1e-05, %v221_v20 }
 0x12b   :  { %5313 = vrsqrt.f32 %v222_v21  ;;  %vm229_vm3 = vweird.f32 %v222_v21 }
 0x131   :  { %v5314_v22 = vpop.eup %5313 }
 0x132   :  { %v224_v23 = vmul.f32 %v5314_v22, %v222_v21  ;;  %vm230_vm2 = vweird.f32 %v5314_v22 }
 0x133   :  { %vm231_vm4 = vmor %vm229_vm3, %vm230_vm2 }
 0x134   :  { %v225_v24 = vmul.f32 %v5314_v22, %v224_v23 }
 0x136   :  { %v226_v25 = vmul.f32 0.5, %v225_v24 }
 0x138   :  { %v227_v26 = vsub.f32 1.5, %v226_v25 }
 0x13a   :  { %v228_v28 = vmul.f32 %v5314_v22, %v227_v26 }
 0x13c   :  { %v232_v31 = vsel %vm231_vm4, %v5314_v22, %v228_v28 }
 0x13d   :  { %v233_v32 = vmul.f32 %v232_v31, %v215_v10 }
 0x13f   :  { %v235_v34 = vmul.f32 %v234_v30, %v233_v32 }
 0x141   :  { %v237_v37 = vadd.f32 %v236_v33, %v235_v34 }
 0x143   :  { %v318_v38 = vpack.c.bf16 %v237_v37, %v237_v37  ;;  %v238_v39 = vadd.f32 %v237_v37, %v201_v35  ;;  %v239_v40 = vadd.f32 %v237_v37, %v202_v36 }
 0x145   :  { %4761 = vmatmul.msk.bf16.vlgmr.msra.gmra.mxu2 %vm217_vm1, %v318_v38  ;;  %v258_v41 = vpack.c.bf16 %v239_v40, %v238_v39 }
 0x147   :  { %4743 = vmatmul.msk.bf16.vlgmr.msra.gmra.mxu0 %vm217_vm1, %v258_v41  ;;  %4752 = vmatmul.msk.bf16.vlgmr.msra.gmra.mxu1 %vm217_vm1, %v258_v41 }
 0x1c4   :  { %v284_v45 = vpop.f32.mrf.mxu0  ;;  %v313_v46 = vpop.f32.mrf.mxu1 }
 0x1c5   :  { %v285_v47 = vadd.f32 %v284_v45, %v259_v43  ;;  %v314_v48 = vadd.f32 %v313_v46, %v291_v44 }
 0x1c7   :  { %v289_v50 = vmul.f32 0.35355338, %v285_v47  ;;  %v351_v51 = vpack.c.bf16 %v314_v48, %v314_v48 }
 0x1c8   :  { %v344_v52 = vpop.f32.mrf.mxu2 }
 0x1c9   :  { %v464_v53 = vunpack.c.l.b16 %v351_v51  ;;  %v345_v54 = vadd.f32 %v344_v52, %v319_v49  ;;  %v360_v55 = vsel %vm355_vm5, %v351_v51, 0  ;;  %v349_v56 = vpack.c.bf16 %v289_v50, %v289_v50 }
 0x1ca   :  { %369 = vmatpush.bf16.xpose.msra.mxu3 %v360_v55 }
 0x1cb   :  { %v5980_v57 = vpack.c.b16 %v464_v53, %v464_v53  ;;  %v353_v58 = vpack.c.bf16 %v345_v54, %v345_v54  ;;  %v459_v0 = vunpack.c.l.b16 %v349_v56 }
 0x1cc   :  { %v286_v59 = vpop.f32.mrf.mxu0  ;;  %v315_v60 = vpop.f32.mrf.mxu1 }
 0x1cd   :  { %v287_v61 = vadd.f32 %v286_v59, %v259_v43  ;;  %v316_v62 = vadd.f32 %v315_v60, %v291_v44  ;;  %466 = vrot.lane.b32.xlu1 %v5980_v57, %s5769_s0  ;;  %v423_v63 = vsel %vm421_vm6, %v353_v58, 0  ;;  %v5991_v11 = vpack.c.b16 %v459_v0, %v459_v0 }
 0x1ce   :  { %432 = vmatpush.bf16.msrb.mxu1 %v423_v63  ;;  %v541_v26 = vunpack.c.l.b16 %v353_v58 }
 0x1cf   :  { %v290_v1 = vmul.f32 0.35355338, %v287_v61  ;;  %v352_v2 = vpack.c.bf16 %v316_v62, %v316_v62 }
 0x1d0   :  { %v346_v3 = vpop.f32.mrf.mxu2  ;;  %v6009_v28 = vpack.c.b16 %v541_v26, %v541_v26 }
 0x1d1   :  { %v493_v4 = vunpack.c.l.b16 %v352_v2  ;;  %v347_v5 = vadd.f32 %v346_v3, %v319_v49  ;;  %4762 = vmatmul.msk.bf16.vlgmr.msra.gmra.mxu3 %vm355_vm5, %v349_v56  ;;  %v379_v6 = vsel %vm355_vm5, %v352_v2, 0  ;;  %v350_v8 = vpack.c.bf16 %v290_v1, %v290_v1 }
 0x1d2   :  { %388 = vmatpush.bf16.xpose.msrb.mxu0 %v379_v6 }
 0x1d3   :  { %v5987_v9 = vpack.c.bf16 %v347_v5, %v347_v5  ;;  %v5989_v10 = vpack.c.b16 %v493_v4, %v493_v4  ;;  %v488_v13 = vunpack.c.l.b16 %v350_v8 }
 0x1d5   :  { %495 = vrot.lane.b32.xlu2 %v5989_v10, %s5769_s0  ;;  %461 = vrot.lane.b32.xlu1 %v5991_v11, %s5769_s0  ;;  %v442_v12 = vsel %vm421_vm6, %v5987_v9, 0  ;;  %v6000_v14 = vpack.c.b16 %v488_v13, %v488_v13 }
 0x1d6   :  { %451 = vmatpush.bf16.msrb.mxu2 %v442_v12 }
 0x1d9   :  { %4763 = vmatmul.msk.bf16.vlgmr.msrb.gmra.mxu0 %vm355_vm5, %v350_v8 }
 0x1dd   :  { %490 = vrot.lane.b32.xlu2 %v6000_v14, %s5769_s0 }
 0x22f   :  { %v496_v15 = vpop.permute.xlu2 %495 }
 0x230   :  { %v501_v16 = vsel %vm355_vm5, %v496_v15, 0 }
 0x231   :  { %510 = vmatpush.bf16.xpose.msra.mxu0 %v501_v16 }
 0x237   :  { %v491_v17 = vpop.permute.xlu2 %490 }
 0x238   :  { %4767 = vmatmul.msk.bf16.vlgmr.msra.gmra.mxu0 %vm355_vm5, %v491_v17 }
 0x23f   :  { %v467_v18 = vpop.permute.xlu1 %466 }
 0x240   :  { %v472_v19 = vsel %vm355_vm5, %v467_v18, 0  ;;  %v565_v18 = vunpack.c.l.b16 %v5987_v9 }
 0x241   :  { %481 = vmatpush.bf16.xpose.msrb.mxu3 %v472_v19 }
 0x242   :  { %v6039_v19 = vpack.c.b16 %v565_v18, %v565_v18 }
 0x247   :  { %v462_v20 = vpop.permute.xlu1 %461 }
 0x248   :  { %4766 = vmatmul.msk.bf16.vlgmr.msrb.gmra.mxu3 %vm355_vm5, %v462_v20  ;;  %v253_v20 = vld [vmem:[%s7413_s6] sm:$0xf] }
 0x249   :  { %v613_v9 = vsel %vm421_vm6, %v253_v20, 0 }
 0x24a   :  { %622 = vmatpush.bf16.msrb.mxu0 %v613_v9 }
 0x254   :  { %v371_v21 = vpop.f32.mrf.mxu3 }
 0x255   :  { %v394_v22 = vsel %vm355_vm5, %v371_v21, -inf }
 0x256   :  { %v390_v23 = vpop.f32.mrf.mxu0  ;;  %395 = vmax.xlane.f32.xlu0 %v394_v22 }
 0x257   :  { %v397_v42 = vsel %vm355_vm5, %v390_v23, -inf }
 0x25c   :  { %v373_v24 = vpop.f32.mrf.mxu3 }
 0x25e   :  { %v392_v25 = vpop.f32.mrf.mxu0 }
 0x26a   :  { %543 = vrot.lane.b32.xlu0 %v6009_v28, %s5769_s0 }
 0x2b5   :  { %v6013_v30 = vpop.f32.mrf.mxu0 }
 0x2b6   :  { %v519_v58 = vsel %vm355_vm5, %v6013_v30, -inf }
 0x2bd   :  { %v514_v31 = vpop.f32.mrf.mxu0 }
 0x2c9   :  { %v396_v32 = vpop.xlane.xlu0 %395 }
 0x2ca   :  { %v400_v33 = vsub.f32 %v371_v21, %v396_v32 }
 0x2cb   :  { %v483_v34 = vpop.f32.mrf.mxu3 }
 0x2cc   :  { %v402_v35 = vmul.f32 1.442695, %v400_v33  ;;  %v516_v36 = vsel %vm355_vm5, %v483_v34, -inf }
 0x2cd   :  { %517 = vmax.xlane.f32.xlu1 %v516_v36 }
 0x2ce   :  { %5315 = vpow2.f32 %v402_v35 }
 0x2d3   :  { %v485_v37 = vpop.f32.mrf.mxu3 }
 0x2d4   :  { %v5316_v38 = vpop.eup %5315 }
 0x2d5   :  { %v406_v39 = vsel %vm355_vm5, %v5316_v38, 0.0 }
 0x2d6   :  { %407 = vadd.xlane.f32.xlu2 %v406_v39 }
 0x2dc   :  { %v544_v40 = vpop.permute.xlu0 %543 }
 0x2dd   :  { %v549_v41 = vsel %vm421_vm6, %v544_v40, 0 }
 0x2de   :  { %398 = vmax.xlane.f32.xlu2 %v397_v42  ;;  %558 = vmatpush.bf16.msra.mxu1 %v549_v41 }
 0x2e6   :  { %629 = vrot.lane.b32.xlu1 %v5991_v11, %s5770_s25 }
 0x2ee   :  { %654 = vrot.lane.b32.xlu1 %v5989_v10, %s5770_s25 }
 0x2f6   :  { %652 = vrot.lane.b32.xlu1 %v6000_v14, %s5770_s25 }
 0x340   :  { %v518_v43 = vpop.xlane.xlu1 %517 }
 0x341   :  { %v522_v44 = vsub.f32 %v483_v34, %v518_v43 }
 0x343   :  { %v524_v45 = vmul.f32 1.442695, %v522_v44 }
 0x345   :  { %5317 = vpow2.f32 %v524_v45 }
 0x349   :  { %v408_v46 = vpop.xlane.xlu2 %407 }
 0x34a   :  { %5319 = vrcp.f32 %v408_v46 }
 0x34b   :  { %v5318_v47 = vpop.eup %5317 }
 0x34c   :  { %v528_v48 = vsel %vm355_vm5, %v5318_v47, 0.0 }
 0x34d   :  { %529 = vadd.xlane.f32.xlu0 %v528_v48 }
 0x350   :  { %v5320_v49 = vpop.eup %5319 }
 0x351   :  { %v399_v50 = vpop.xlane.xlu2 %398  ;;  %v414_v51 = vmul.f32 %v5320_v49, %v5316_v38 }
 0x352   :  { %v401_v52 = vsub.f32 %v390_v23, %v399_v50 }
 0x353   :  { %v416_v53 = vpack.c.bf16 %v414_v51, %v414_v51 }
 0x354   :  { %v404_v54 = vmul.f32 1.442695, %v401_v52 }
 0x355   :  { %4764 = vmatmul.msk.bf16.vlgmr.msrb.gmra.mxu1 %vm355_vm5, %v416_v53 }
 0x356   :  { %5321 = vpow2.f32 %v404_v54 }
 0x358   :  { %v630_v6 = vpop.permute.xlu1 %629 }
 0x35c   :  { %v5322_v55 = vpop.eup %5321 }
 0x35d   :  { %v409_v56 = vsel %vm355_vm5, %v5322_v55, 0.0 }
 0x35e   :  { %410 = vadd.xlane.f32.xlu2 %v409_v56 }
 0x360   :  { %v655_v33 = vpop.permute.xlu1 %654 }
 0x361   :  { %631 = vrot.lane.b32.xlu0 %v5980_v57, %s5770_s25  ;;  %v660_v37 = vsel %vm355_vm5, %v655_v33, 0 }
 0x368   :  { %v653_v41 = vpop.permute.xlu1 %652 }
 0x38b   :  { %520 = vmax.xlane.f32.xlu0 %v519_v58 }
 0x3c0   :  { %v530_v59 = vpop.xlane.xlu0 %529 }
 0x3c1   :  { %5323 = vrcp.f32 %v530_v59 }
 0x3c7   :  { %v5324_v60 = vpop.eup %5323 }
 0x3c8   :  { %v536_v61 = vmul.f32 %v5324_v60, %v5318_v47 }
 0x3ca   :  { %v538_v62 = vpack.c.bf16 %v536_v61, %v536_v61 }
 0x3cc   :  { %4768 = vmatmul.msk.bf16.vlgmr.msra.gmra.mxu1 %vm355_vm5, %v538_v62 }
 0x3d1   :  { %v411_v63 = vpop.xlane.xlu2 %410 }
 0x3d2   :  { %5325 = vrcp.f32 %v411_v63  ;;  %v434_v0 = vpop.f32.mrf.mxu1 }
 0x3d3   :  { %v632_v1 = vpop.permute.xlu0 %631 }
 0x3d4   :  { %v637_v2 = vsel %vm355_vm5, %v632_v1, 0 }
 0x3d5   :  { %646 = vmatpush.bf16.xpose.msrb.mxu1 %v637_v2 }
 0x3d8   :  { %v5326_v3 = vpop.eup %5325 }
 0x3d9   :  { %v415_v4 = vmul.f32 %v5326_v3, %v5322_v55 }
 0x3da   :  { %v436_v5 = vpop.f32.mrf.mxu1 }
 0x3db   :  { %v417_v8 = vpack.c.bf16 %v415_v4, %v415_v4 }
 0x3dc   :  { %4772 = vmatmul.msk.bf16.vlgmr.msrb.gmra.mxu1 %vm355_vm5, %v630_v6 }
 0x3dd   :  { %4765 = vmatmul.msk.bf16.vlgmr.msrb.gmra.mxu2 %vm355_vm5, %v417_v8 }
 0x3fe   :  { %v521_v12 = vpop.xlane.xlu0 %520 }
 0x3ff   :  { %v523_v13 = vsub.f32 %v6013_v30, %v521_v12  ;;  %v254_v30 = vld [vmem:[%s7413_s6 + $0x4] sm:$0xf] }
 0x400   :  { %v593_v31 = vsel %vm421_vm6, %v254_v30, 0 }
 0x401   :  { %v526_v15 = vmul.f32 1.442695, %v523_v13  ;;  %602 = vmatpush.bf16.msra.mxu3 %v593_v31 }
 0x403   :  { %5327 = vpow2.f32 %v526_v15 }
 0x409   :  { %v5328_v16 = vpop.eup %5327 }
 0x40a   :  { %v531_v17 = vsel %vm355_vm5, %v5328_v16, 0.0 }
 0x40b   :  { %532 = vadd.xlane.f32.xlu2 %v531_v17 }
 0x423   :  { %567 = vrot.lane.b32.xlu2 %v6039_v19, %s5769_s0 }
 0x42b   :  { %699 = vrot.lane.b32.xlu2 %v6009_v28, %s5770_s25 }
 0x433   :  { %789 = vrot.lane.b32.xlu2 %v5989_v10, %s5771_s5 }
 0x43b   :  { %764 = vrot.lane.b32.xlu2 %v5991_v11, %s5771_s5 }
 0x443   :  { %787 = vrot.lane.b32.xlu2 %v6000_v14, %s5771_s5 }
 0x449   :  { %v560_v21 = vpop.f32.mrf.mxu1 }
 0x451   :  { %v562_v22 = vpop.f32.mrf.mxu1 }
 0x459   :  { %v648_v23 = vpop.f32.mrf.mxu1 }
 0x45a   :  { %v675_v24 = vsel %vm355_vm5, %v648_v23, -inf }
 0x45b   :  { %676 = vmax.xlane.f32.xlu1 %v675_v24 }
 0x460   :  { %v453_v10 = vpop.f32.mrf.mxu2 }
 0x461   :  { %v457_v25 = vpack.c.bf16 %v453_v10, %v434_v0  ;;  %v650_v26 = vpop.f32.mrf.mxu1 }
 0x463   :  { %4771 = vmatmul.msk.bf16.vlgmr.msrb.gmra.mxu0 %vm355_vm5, %v457_v25 }
 0x468   :  { %v455_v11 = vpop.f32.mrf.mxu2 }
 0x474   :  { %720 = vrot.lane.b32.xlu1 %v6039_v19, %s5770_s25 }
 0x47e   :  { %v533_v14 = vpop.xlane.xlu2 %532 }
 0x47f   :  { %5329 = vrcp.f32 %v533_v14 }
 0x485   :  { %v5330_v32 = vpop.eup %5329 }
 0x486   :  { %v537_v34 = vmul.f32 %v5330_v32, %v5328_v16  ;;  %v568_v35 = vpop.permute.xlu2 %567 }
 0x487   :  { %v573_v36 = vsel %vm421_vm6, %v568_v35, 0  ;;  %v255_v35 = vld [vmem:[%s7413_s6 + $0x8] sm:$0xf] }
 0x488   :  { %v539_v38 = vpack.c.bf16 %v537_v34, %v537_v34  ;;  %582 = vmatpush.bf16.msra.mxu2 %v573_v36  ;;  %v746_v36 = vsel %vm421_vm6, %v255_v35, 0  ;;  %v5212_v35 = vld [vmem:[%s7414_s28 + $0x20] sm:$0xff] }
 0x489   :  { %755 = vmatpush.bf16.msra.mxu1 %v746_v36 }
 0x48b   :  { %4769 = vmatmul.msk.bf16.vlgmr.msra.gmra.mxu2 %vm355_vm5, %v539_v38 }
 0x48c   :  { %669 = vmatpush.bf16.xpose.msrb.mxu2 %v660_v37 }
 0x48e   :  { %v700_v39 = vpop.permute.xlu2 %699 }
 0x48f   :  { %v705_v40 = vsel %vm421_vm6, %v700_v39, 0 }
 0x490   :  { %714 = vmatpush.bf16.msrb.mxu3 %v705_v40 }
 0x496   :  { %v790_v49 = vpop.permute.xlu2 %789 }
 0x497   :  { %v795_v52 = vsel %vm355_vm5, %v790_v49, 0 }
 0x49b   :  { %4773 = vmatmul.msk.bf16.vlgmr.msrb.gmra.mxu2 %vm355_vm5, %v653_v41 }
 0x4ce   :  { %v677_v42 = vpop.xlane.xlu1 %676 }
 0x4cf   :  { %v681_v43 = vsub.f32 %v648_v23, %v677_v42 }
 0x4d1   :  { %v683_v44 = vmul.f32 1.442695, %v681_v43 }
 0x4d3   :  { %5331 = vpow2.f32 %v683_v44 }
 0x4d9   :  { %v5332_v45 = vpop.eup %5331 }
 0x4da   :  { %v687_v46 = vsel %vm355_vm5, %v5332_v45, 0.0 }
 0x4db   :  { %688 = vadd.xlane.f32.xlu0 %v687_v46 }
 0x4e0   :  { %v624_v37 = vpop.f32.mrf.mxu0 }
 0x4e6   :  { %v721_v47 = vpop.permute.xlu1 %720 }
 0x4e7   :  { %v726_v48 = vsel %vm421_vm6, %v721_v47, 0 }
 0x4e8   :  { %735 = vmatpush.bf16.msra.mxu0 %v726_v48  ;;  %v626_v38 = vpop.f32.mrf.mxu0 }
 0x4ef   :  { %766 = vrot.lane.b32.xlu0 %v5980_v57, %s5771_s5  ;;  %v765_v57 = vpop.permute.xlu2 %764 }
 0x4f7   :  { %v788_v0 = vpop.permute.xlu2 %787 }
 0x50e   :  { %v584_v50 = vpop.f32.mrf.mxu2 }
 0x50f   :  { %v588_v51 = vpack.c.bf16 %v584_v50, %v560_v21 }
 0x511   :  { %4770 = vmatmul.msk.bf16.vlgmr.msra.gmra.mxu3 %vm355_vm5, %v588_v51 }
 0x512   :  { %804 = vmatpush.bf16.xpose.msra.mxu3 %v795_v52 }
 0x516   :  { %v586_v53 = vpop.f32.mrf.mxu2 }
 0x51e   :  { %v671_v54 = vpop.f32.mrf.mxu2 }
 0x51f   :  { %v678_v55 = vsel %vm355_vm5, %v671_v54, -inf }
 0x520   :  { %679 = vmax.xlane.f32.xlu0 %v678_v55  ;;  %v256_v55 = vld [vmem:[%s7413_s6 + $0xc] sm:$0xf] }
 0x526   :  { %v673_v56 = vpop.f32.mrf.mxu2 }
 0x527   :  { %v881_v56 = vsel %vm421_vm6, %v256_v55, 0 }
 0x54e   :  { %v689_v58 = vpop.xlane.xlu0 %688 }
 0x54f   :  { %5333 = vrcp.f32 %v689_v58  ;;  %v5211_v58 = vld [vmem:[%s7414_s28 + $0x18] sm:$0xff] }
 0x555   :  { %v5334_v59 = vpop.eup %5333 }
 0x556   :  { %v695_v60 = vmul.f32 %v5334_v59, %v5332_v45  ;;  %v5210_v59 = vld [vmem:[%s7414_s28 + $0x10] sm:$0xff] }
 0x558   :  { %v697_v61 = vpack.c.bf16 %v695_v60, %v695_v60 }
 0x55a   :  { %4774 = vmatmul.msk.bf16.vlgmr.msrb.gmra.mxu3 %vm355_vm5, %v697_v61 }
 0x561   :  { %v767_v62 = vpop.permute.xlu0 %766 }
 0x562   :  { %v772_v63 = vsel %vm355_vm5, %v767_v62, 0 }
 0x563   :  { %781 = vmatpush.bf16.xpose.msra.mxu2 %v772_v63 }
 0x56a   :  { %4777 = vmatmul.msk.bf16.vlgmr.msra.gmra.mxu2 %vm355_vm5, %v765_v57  ;;  %4778 = vmatmul.msk.bf16.vlgmr.msra.gmra.mxu3 %vm355_vm5, %v788_v0 }
 0x56b   :  { %890 = vmatpush.bf16.msrb.mxu2 %v881_v56 }
 0x593   :  { %v680_v1 = vpop.xlane.xlu0 %679 }
 0x594   :  { %v682_v2 = vsub.f32 %v671_v54, %v680_v1  ;;  %v604_v6 = vpop.f32.mrf.mxu3  ;;  %v5214_v1 = vld [vmem:[%s7415_s30] sm:$0xff] }
 0x595   :  { %v625_v52 = vadd.f32 %v624_v37, %v604_v6 }
 0x596   :  { %v685_v3 = vmul.f32 1.442695, %v682_v2  ;;  %v5215_v2 = vld [vmem:[%s7415_s30 + $0x8] sm:$0xff] }
 0x598   :  { %5335 = vpow2.f32 %v685_v3  ;;  %v5216_v3 = vld [vmem:[%s7415_s30 + $0x10] sm:$0xff] }
 0x59c   :  { %v6080_v8 = vpop.f32.mrf.mxu3 }
 0x59e   :  { %v5336_v4 = vpop.eup %5335 }
 0x59f   :  { %v690_v5 = vsel %vm355_vm5, %v5336_v4, 0.0 }
 0x5a0   :  { %691 = vadd.xlane.f32.xlu2 %v690_v5 }
 0x5dd   :  { %v716_v12 = vpop.f32.mrf.mxu3 }
 0x5e5   :  { %v718_v13 = vpop.f32.mrf.mxu3 }
 0x5e6   :  { %v627_v13 = vadd.f32 %v626_v38, %v6080_v8  ;;  %v5218_v8 = vld [vmem:[%s7415_s30 + $0x20] sm:$0xff] }
 0x5ed   :  { %v783_v15 = vpop.f32.mrf.mxu2  ;;  %v806_v16 = vpop.f32.mrf.mxu3 }
 0x5ee   :  { %v810_v17 = vsel %vm355_vm5, %v783_v15, -inf  ;;  %v813_v18 = vsel %vm355_vm5, %v806_v16, -inf }
 0x5ef   :  { %811 = vmax.xlane.f32.xlu1 %v810_v17  ;;  %814 = vmax.xlane.f32.xlu0 %v813_v18 }
 0x5f5   :  { %v785_v20 = vpop.f32.mrf.mxu2  ;;  %v808_v9 = vpop.f32.mrf.mxu3 }
 0x613   :  { %v692_v21 = vpop.xlane.xlu2 %691 }
 0x614   :  { %5337 = vrcp.f32 %v692_v21  ;;  %v5217_v21 = vld [vmem:[%s7415_s30 + $0x18] sm:$0xff] }
 0x61a   :  { %v5338_v22 = vpop.eup %5337 }
 0x61b   :  { %v696_v23 = vmul.f32 %v5338_v22, %v5336_v4  ;;  %v5298_v4 = vld [vmem:[#allocation5] ss:$0 sm:$0xff]  ;;  %v5219_v22 = vld [vmem:[%s7415_s30 + $0x28] sm:$0xff] }
 0x61d   :  { %v698_v24 = vpack.c.bf16 %v696_v23, %v696_v23  ;;  %v5220_v23 = vld [vmem:[%s7415_s30 + $0x30] sm:$0xff] }
 0x61f   :  { %4775 = vmatmul.msk.bf16.vlgmr.msra.gmra.mxu0 %vm355_vm5, %v698_v24  ;;  %v5221_v24 = vld [vmem:[%s7415_s30 + $0x38] sm:$0xff] }
 0x662   :  { %v812_v10 = vpop.xlane.xlu1 %811  ;;  %v815_v25 = vpop.xlane.xlu0 %814 }
 0x663   :  { %v816_v26 = vsub.f32 %v783_v15, %v812_v10  ;;  %v817_v11 = vsub.f32 %v806_v16, %v815_v25 }
 0x665   :  { %v818_v30 = vmul.f32 1.442695, %v816_v26  ;;  %v820_v31 = vmul.f32 1.442695, %v817_v11 }
 0x667   :  { %5339 = vpow2.f32 %v818_v30 }
 0x668   :  { %5341 = vpow2.f32 %v820_v31 }
 0x66d   :  { %v5340_v14 = vpop.eup %5339 }
 0x66e   :  { %v5342_v32 = vpop.eup %5341  ;;  %v822_v33 = vsel %vm355_vm5, %v5340_v14, 0.0 }
 0x66f   :  { %823 = vadd.xlane.f32.xlu2 %v822_v33  ;;  %v825_v34 = vsel %vm355_vm5, %v5342_v32, 0.0 }
 0x670   :  { %826 = vadd.xlane.f32.xlu0 %v825_v34 }
 0x684   :  { %855 = vrot.lane.b32.xlu0 %v6039_v19, %s5771_s5 }
 0x687   :  { %834 = vrot.lane.b32.xlu2 %v6009_v28, %s5771_s5 }
 0x69c   :  { %v737_v39 = vpop.f32.mrf.mxu0 }
 0x69d   :  { %v741_v40 = vpack.c.bf16 %v737_v39, %v716_v12  ;;  %v5222_v39 = vld [vmem:[%s7416_s14] sm:$0xff] }
 0x69f   :  { %4776 = vmatmul.msk.bf16.vlgmr.msra.gmra.mxu1 %vm355_vm5, %v741_v40 }
 0x6a4   :  { %v739_v41 = vpop.f32.mrf.mxu0 }
 0x6a5   :  { %v6179_v41 = vld [vmem:[%s7417_s13] sm:$0x7] }
 0x6e2   :  { %v824_v42 = vpop.xlane.xlu2 %823 }
 0x6e3   :  { %5343 = vrcp.f32 %v824_v42  ;;  %v827_v44 = vpop.xlane.xlu0 %826 }
 0x6e4   :  { %5345 = vrcp.f32 %v827_v44 }
 0x6e9   :  { %v5344_v43 = vpop.eup %5343 }
 0x6ea   :  { %v830_v45 = vmul.f32 %v5344_v43, %v5340_v14  ;;  %v835_v46 = vpop.permute.xlu2 %834  ;;  %v5346_v28 = vpop.eup %5345 }
 0x6eb   :  { %v840_v47 = vsel %vm421_vm6, %v835_v46, 0  ;;  %v831_v19 = vmul.f32 %v5346_v28, %v5342_v32  ;;  %v5213_v32 = vld [vmem:[%s7414_s28 + $0x28] sm:$0xff] }
 0x6ec   :  { %v832_v48 = vpack.c.bf16 %v830_v45, %v830_v45  ;;  %849 = vmatpush.bf16.msrb.mxu0 %v840_v47  ;;  %v6186_v45 = vperm.slane %v6179_v41, 1 }
 0x6ed   :  { %v833_v51 = vpack.c.bf16 %v831_v19, %v831_v19 }
 0x6ef   :  { %4779 = vmatmul.msk.bf16.vlgmr.msrb.gmra.mxu0 %vm355_vm5, %v832_v48 }
 0x6f0   :  { %1124 = vmatpush.bf16.msra.mxu0 %v5211_v58 }
 0x6f4   :  { %1125 = vmatpush.bf16.msra.mxu0 %v5210_v59 }
 0x6f6   :  { %v856_v49 = vpop.permute.xlu0 %855 }
 0x6f7   :  { %v861_v50 = vsel %vm421_vm6, %v856_v49, 0 }
 0x6f8   :  { %870 = vmatpush.bf16.msrb.mxu1 %v861_v50 }
 0x6fb   :  { %4780 = vmatmul.msk.bf16.vlgmr.msrb.gmra.mxu1 %vm355_vm5, %v833_v51 }
 0x6fc   :  { %1250 = vmatpush.bf16.msra.mxu1 %v5213_v32 }
 0x6ff   :  { %4831 = vmatmul.msk.bf16.vlgmr.msra.gmra.mxu0 %vm217_vm1, %v5214_v1  ;;  %v5225_v1 = vld [vmem:[%s7416_s14 + $0x18] sm:$0xff] }
 0x700   :  { %1251 = vmatpush.bf16.msra.mxu1 %v5212_v35 }
 0x70b   :  { %4879 = vmatmul.msk.bf16.vlgmr.msra.gmra.mxu1 %vm217_vm1, %v5222_v39 }
 0x70f   :  { %4832 = vmatmul.msk.bf16.gmra.mxu0 %vm217_vm1, %v5215_v2 }
 0x71c   :  { %v757_v53 = vpop.f32.mrf.mxu1 }
 0x71d   :  { %v762_v54 = vadd.f32 %v757_v53, %v625_v52  ;;  %v5223_v52 = vld [vmem:[%s7416_s14 + $0x8] sm:$0xff] }
 0x71e   :  { %4880 = vmatmul.msk.bf16.gmra.mxu1 %vm217_vm1, %v5223_v52 }
 0x71f   :  { %4833 = vmatmul.msk.bf16.gmra.mxu0 %vm217_vm1, %v5216_v3 }
 0x724   :  { %v759_v61 = vpop.f32.mrf.mxu1 }
 0x725   :  { %v763_v16 = vadd.f32 %v759_v61, %v627_v13 }
 0x72f   :  { %4834 = vmatmul.msk.bf16.gmra.mxu0 %vm217_vm1, %v5217_v21 }
 0x73f   :  { %4835 = vmatmul.msk.bf16.gmra.mxu0 %vm217_vm1, %v5218_v8 }
 0x74f   :  { %4836 = vmatmul.msk.bf16.gmra.mxu0 %vm217_vm1, %v5219_v22 }
 0x75f   :  { %4837 = vmatmul.msk.bf16.gmra.mxu0 %vm217_vm1, %v5220_v23 }
 0x76c   :  { %v851_v60 = vpop.f32.mrf.mxu0 }
 0x76f   :  { %4838 = vmatmul.msk.bf16.gmra.mxu0 %vm217_vm1, %v5221_v24 }
 0x774   :  { %v853_v57 = vpop.f32.mrf.mxu0 }
 0x778   :  { %v872_v62 = vpop.f32.mrf.mxu1 }
 0x779   :  { %v876_v63 = vpack.c.bf16 %v872_v62, %v851_v60  ;;  %v5224_v62 = vld [vmem:[%s7416_s14 + $0x10] sm:$0xff] }
 0x77a   :  { %4881 = vmatmul.msk.bf16.gmra.mxu1 %vm217_vm1, %v5224_v62 }
 0x77b   :  { %4781 = vmatmul.msk.bf16.vlgmr.msrb.gmra.mxu2 %vm355_vm5, %v876_v63 }
 0x77c   :  { %v6152_v10 = vpop.f32.mrf.mxu0 }
 0x780   :  { %v874_v0 = vpop.f32.mrf.mxu1 }
 0x784   :  { %v6154_v25 = vpop.f32.mrf.mxu0 }
 0x78a   :  { %4882 = vmatmul.msk.bf16.gmra.mxu1 %vm217_vm1, %v5225_v1  ;;  %v5208_v1 = vld [vmem:[%s7414_s28] sm:$0xff] }
 0x78c   :  { %v1132_v26 = vpop.f32.mrf.mxu0 }
 0x78d   :  { %v1133_v46 = vadd.f32 %v1132_v26, %v6186_v45 }
 0x78f   :  { %v1295_v28 = vpack.c.bf16 %v1133_v46, %v1133_v46 }
 0x791   :  { %v1335_v50 = vunpack.c.l.b16 %v1295_v28 }
 0x794   :  { %v1134_v11 = vpop.f32.mrf.mxu0 }
 0x795   :  { %v1135_v47 = vadd.f32 %v1134_v11, %v6186_v45 }
 0x797   :  { %v1296_v19 = vpack.c.bf16 %v1135_v47, %v1135_v47  ;;  %v1128_v47 = vadd.f32 %v6152_v10, %v6186_v45  ;;  %v5227_v10 = vld [vmem:[%s7416_s14 + $0x28] sm:$0xff] }
 0x799   :  { %v1336_v51 = vunpack.c.l.b16 %v1296_v19 }
 0x79b   :  { %v6195_v55 = vpack.c.b16 %v1336_v51, %v1335_v50  ;;  %v1293_v50 = vpack.c.bf16 %v1128_v47, %v1128_v47  ;;  %v951_v47 = vperm.slane %v5969_v29, 1 }
 0x79c   :  { %v1137_v34 = vpop.f32.mrf.mxu0 }
 0x79d   :  { %v1138_v22 = vadd.f32 %v1137_v34, %v6186_v45 }
 0x7a4   :  { %v1139_v43 = vpop.f32.mrf.mxu0 }
 0x7a5   :  { %v1140_v24 = vadd.f32 %v1139_v43, %v6186_v45 }
 0x7a7   :  { %v1298_v32 = vpack.c.bf16 %v1140_v24, %v1140_v24 }
 0x7ac   :  { %v1142_v48 = vpop.f32.mrf.mxu0 }
 0x7ad   :  { %v1143_v49 = vadd.f32 %v1142_v48, %v6186_v45  ;;  %v1130_v48 = vadd.f32 %v6154_v25, %v6186_v45  ;;  %v1352_v25 = vsel %vm355_vm5, %v6195_v55, 0 }
 0x7af   :  { %v1299_v53 = vpack.c.bf16 %v1143_v49, %v1143_v49  ;;  %v1294_v51 = vpack.c.bf16 %v1130_v48, %v1130_v48 }
 0x7b1   :  { %v1339_v59 = vunpack.c.l.b16 %v1299_v53  ;;  %v1333_v53 = vunpack.c.l.b16 %v1293_v50 }
 0x7fe   :  { %v892_v5 = vpop.f32.mrf.mxu2 }
 0x7ff   :  { %v897_v6 = vadd.f32 %v892_v5, %v762_v54  ;;  %v1144_v54 = vpop.f32.mrf.mxu0 }
 0x800   :  { %v1145_v56 = vadd.f32 %v1144_v54, %v6186_v45  ;;  %v1334_v54 = vunpack.c.l.b16 %v1294_v51 }
 0x801   :  { %v6123_v12 = vadd.f32 %v5298_v4, %v897_v6 }
 0x802   :  { %v1300_v58 = vpack.c.bf16 %v1145_v56, %v1145_v56  ;;  %v6258_v56 = vpack.c.b16 %v1334_v54, %v1333_v53  ;;  %v5516_v54 = vld [vmem:[#allocation2 + $0x8] sm:$0xff] }
 0x803   :  { %v904_v15 = vsel %vm217_vm1, %v6123_v12, 0.0 }
 0x804   :  { %905 = vadd.xlane.f32.xlu0 %v904_v15  ;;  %v1340_v60 = vunpack.c.l.b16 %v1300_v58 }
 0x806   :  { %v894_v17 = vpop.f32.mrf.mxu2  ;;  %v6200_v61 = vpack.c.b16 %v1340_v60, %v1339_v59  ;;  %v5209_v59 = vld [vmem:[%s7414_s28 + $0x8] sm:$0xff] }
 0x807   :  { %v898_v18 = vadd.f32 %v894_v17, %v763_v16  ;;  %v6202_v57 = vpop.f32.mrf.mxu0  ;;  %997 = vmatpush.bf16.msrb.mxu3 %v5209_v59 }
 0x809   :  { %v6128_v20 = vadd.f32 %v5298_v4, %v898_v18 }
 0x80b   :  { %v907_v9 = vsel %vm217_vm1, %v6128_v20, 0.0  ;;  %998 = vmatpush.bf16.msrb.mxu3 %v5208_v1 }
 0x80c   :  { %908 = vadd.xlane.f32.xlu1 %v907_v9 }
 0x80f   :  { %v6209_v63 = vpop.f32.mrf.mxu0 }
 0x817   :  { %v1152_v0 = vpop.f32.mrf.mxu0 }
 0x818   :  { %v1153_v34 = vadd.f32 %v1152_v0, %v6186_v45  ;;  %v1349_v0 = vsel %vm355_vm5, %v6258_v56, 0 }
 0x81f   :  { %v1154_v2 = vpop.f32.mrf.mxu0 }
 0x820   :  { %v1155_v39 = vadd.f32 %v1154_v2, %v6186_v45 }
 0x822   :  { %v1304_v46 = vpack.c.bf16 %v1155_v39, %v1155_v39 }
 0x824   :  { %v1384_v19 = vunpack.c.l.b16 %v1304_v46 }
 0x827   :  { %v1157_v3 = vpop.f32.mrf.mxu0 }
 0x828   :  { %v1158_v4 = vadd.f32 %v1157_v3, %v6186_v45 }
 0x82a   :  { %v1305_v5 = vpack.c.bf16 %v1158_v4, %v1158_v4  ;;  %v5228_v4 = vld [vmem:[%s7416_s14 + $0x30] sm:$0xff] }
 0x82c   :  { %v1385_v15 = vunpack.c.l.b16 %v1305_v5 }
 0x82f   :  { %v1159_v6 = vpop.f32.mrf.mxu0 }
 0x830   :  { %v1160_v13 = vadd.f32 %v1159_v6, %v6186_v45 }
 0x832   :  { %v1306_v16 = vpack.c.bf16 %v1160_v13, %v1160_v13 }
 0x834   :  { %v1386_v17 = vunpack.c.l.b16 %v1306_v16 }
 0x836   :  { %v6218_v18 = vpack.c.b16 %v1386_v17, %v1385_v15  ;;  %v1148_v17 = vadd.f32 %v6202_v57, %v6186_v45 }
 0x837   :  { %v1162_v9 = vpop.f32.mrf.mxu0 }
 0x838   :  { %1584 = vrot.lane.b32.xlu0 %v6218_v18, %s5769_s0  ;;  %v1163_v21 = vadd.f32 %v1162_v9, %v6186_v45  ;;  %v1150_v9 = vadd.f32 %v6209_v63, %v6186_v45 }
 0x83a   :  { %v1307_v8 = vpack.c.bf16 %v1163_v21, %v1163_v21  ;;  %v6282_v21 = vpop.f32.mrf.mxu1 }
 0x83c   :  { %v1387_v11 = vunpack.c.l.b16 %v1307_v8  ;;  %v1403_v8 = vsel %vm355_vm5, %v6218_v18, 0 }
 0x83f   :  { %v1164_v23 = vpop.f32.mrf.mxu0 }
 0x840   :  { %v1165_v26 = vadd.f32 %v1164_v23, %v6186_v45 }
 0x842   :  { %v1255_v63 = vpop.f32.mrf.mxu1 }
 0x877   :  { %v906_v30 = vpop.xlane.xlu0 %905 }
 0x878   :  { %v910_v31 = vmul.f32 %v906_v30, %v5938_v7  ;;  %v1308_v30 = vpack.c.bf16 %v1165_v26, %v1165_v26  ;;  %v1301_v26 = vpack.c.bf16 %v1148_v17, %v1148_v17 }
 0x87a   :  { %v6158_v14 = vsub.f32 %v6123_v12, %v910_v31  ;;  %v1297_v31 = vpack.c.bf16 %v1138_v22, %v1138_v22 }
 0x87c   :  { %v914_v33 = vmul.f32 %v6158_v14, %v6158_v14 }
 0x87e   :  { %v916_v36 = vsel %vm217_vm1, %v914_v33, 0.0  ;;  %v1388_v33 = vunpack.c.l.b16 %v1308_v30 }
 0x87f   :  { %917 = vadd.xlane.f32.xlu2 %v916_v36  ;;  %v909_v37 = vpop.xlane.xlu1 %908  ;;  %v1337_v36 = vunpack.c.l.b16 %v1297_v31 }
 0x880   :  { %v911_v38 = vmul.f32 %v909_v37, %v5938_v7  ;;  %v6226_v35 = vpack.c.b16 %v1388_v33, %v1387_v11  ;;  %v5226_v37 = vld [vmem:[%s7416_s14 + $0x20] sm:$0xff]  ;;  %v1302_v11 = vpack.c.bf16 %v1150_v9, %v1150_v9  ;;  %v1381_v33 = vunpack.c.l.b16 %v1301_v26 }
 0x881   :  { %4883 = vmatmul.msk.bf16.gmra.mxu1 %vm217_vm1, %v5226_v37 }
 0x882   :  { %v6174_v40 = vsub.f32 %v6128_v20, %v911_v38  ;;  %v1338_v38 = vunpack.c.l.b16 %v1298_v32  ;;  %v1406_v5 = vsel %vm355_vm5, %v6226_v35, 0  ;;  %v1382_v45 = vunpack.c.l.b16 %v1302_v11 }
 0x883   :  { %1412 = vmatpush.bf16.xpose.msra.mxu3 %v1406_v5 }
 0x884   :  { %v915_v42 = vmul.f32 %v6174_v40, %v6174_v40  ;;  %v6238_v43 = vpack.c.b16 %v1338_v38, %v1337_v36  ;;  %v5229_v38 = vld [vmem:[%s7416_s14 + $0x38] sm:$0xff] }
 0x886   :  { %v919_v44 = vsel %vm217_vm1, %v915_v42, 0.0  ;;  %v1358_v42 = vsel %vm355_vm5, %v6200_v61, 0  ;;  %v1355_v49 = vsel %vm355_vm5, %v6238_v43, 0 }
 0x887   :  { %920 = vadd.xlane.f32.xlu1 %v919_v44  ;;  %1364 = vmatpush.bf16.xpose.msra.mxu2 %v1358_v42  ;;  %v1303_v44 = vpack.c.bf16 %v1153_v34, %v1153_v34  ;;  %v948_v34 = vperm.slane %v5964_v27, 1 }
 0x889   :  { %v1383_v28 = vunpack.c.l.b16 %v1303_v44  ;;  %v6293_v44 = vpack.c.b16 %v1382_v45, %v1381_v33 }
 0x88b   :  { %v6248_v52 = vpack.c.b16 %v1384_v19, %v1383_v28  ;;  %1413 = vmatpush.bf16.xpose.msra.mxu3 %v1403_v8  ;;  %v1397_v27 = vsel %vm355_vm5, %v6293_v44, 0 }
 0x88d   :  { %v1400_v36 = vsel %vm355_vm5, %v6248_v52, 0 }
 0x88f   :  { %1365 = vmatpush.bf16.xpose.msra.mxu2 %v1355_v49  ;;  %v1258_v49 = vpop.f32.mrf.mxu1 }
 0x891   :  { %4884 = vmatmul.msk.bf16.gmra.mxu1 %vm217_vm1, %v5227_v10  ;;  %v5515_v10 = vld [vmem:[#allocation2] sm:$0xff] }
 0x893   :  { %1414 = vmatpush.bf16.xpose.msra.mxu3 %v1400_v36 }
 0x897   :  { %1541 = vrot.lane.b32.xlu2 %v6195_v55, %s5769_s0  ;;  %1366 = vmatpush.bf16.xpose.msra.mxu2 %v1352_v25  ;;  %v1260_v59 = vpop.f32.mrf.mxu1 }
 0x89b   :  { %1415 = vmatpush.bf16.xpose.msra.mxu3 %v1397_v27 }
 0x89f   :  { %1367 = vmatpush.bf16.xpose.msra.mxu2 %v1349_v0  ;;  %v1263_v29 = vpop.f32.mrf.mxu1 }
 0x8a0   :  { %1545 = vrot.lane.b32.xlu1 %v6200_v61, %s5769_s0 }
 0x8a1   :  { %4885 = vmatmul.msk.bf16.gmra.mxu1 %vm217_vm1, %v5228_v4 }
 0x8a8   :  { %1586 = vrot.lane.b32.xlu1 %v6226_v35, %s5769_s0 }
 0x8b0   :  { %1543 = vrot.lane.b32.xlu1 %v6238_v43, %s5769_s0 }
 0x8b1   :  { %4886 = vmatmul.msk.bf16.gmra.mxu1 %vm217_vm1, %v5229_v38 }
 0x8b8   :  { %1582 = vrot.lane.b32.xlu1 %v6248_v52, %s5769_s0 }
 0x8c0   :  { %1539 = vrot.lane.b32.xlu1 %v6258_v56, %s5769_s0 }
 0x8f2   :  { %v918_v58 = vpop.xlane.xlu2 %917 }
 0x8f3   :  { %v922_v60 = vmul.f32 %v918_v58, %v5938_v7 }
 0x8f5   :  { %v924_v62 = vadd.f32 1e-05, %v922_v60  ;;  %v1265_v60 = vpop.f32.mrf.mxu1 }
 0x8f7   :  { %5347 = vrsqrt.f32 %v924_v62  ;;  %vm932_vm8 = vweird.f32 %v924_v62 }
 0x8fa   :  { %v921_v2 = vpop.xlane.xlu1 %920 }
 0x8fb   :  { %v923_v3 = vmul.f32 %v921_v2, %v5938_v7 }
 0x8fd   :  { %v5348_v6 = vpop.eup %5347  ;;  %v925_v13 = vadd.f32 1e-05, %v923_v3 }
 0x8fe   :  { %v927_v15 = vmul.f32 %v5348_v6, %v924_v62  ;;  %vm933_vm7 = vweird.f32 %v5348_v6  ;;  %v1268_v62 = vpop.f32.mrf.mxu1 }
 0x8ff   :  { %5349 = vrsqrt.f32 %v925_v13  ;;  %vm934_vm9 = vmor %vm932_vm8, %vm933_vm7  ;;  %vm942_vm11 = vweird.f32 %v925_v13 }
 0x900   :  { %v928_v16 = vmul.f32 %v5348_v6, %v927_v15 }
 0x902   :  { %v929_v22 = vmul.f32 0.5, %v928_v16 }
 0x904   :  { %v930_v23 = vsub.f32 1.5, %v929_v22 }
 0x905   :  { %v5350_v24 = vpop.eup %5349 }
 0x906   :  { %v931_v30 = vmul.f32 %v5348_v6, %v930_v23  ;;  %v937_v31 = vmul.f32 %v5350_v24, %v925_v13  ;;  %vm943_vm10 = vweird.f32 %v5350_v24  ;;  %v1270_v5 = vpop.f32.mrf.mxu1 }
 0x907   :  { %vm944_vm12 = vmor %vm942_vm11, %vm943_vm10 }
 0x908   :  { %v935_v57 = vsel %vm934_vm9, %v5348_v6, %v931_v30  ;;  %v938_v32 = vmul.f32 %v5350_v24, %v937_v31 }
 0x909   :  { %v946_v39 = vmul.f32 %v935_v57, %v6158_v14 }
 0x90a   :  { %v939_v37 = vmul.f32 0.5, %v938_v32 }
 0x90b   :  { %v949_v48 = vmul.f32 %v948_v34, %v946_v39 }
 0x90c   :  { %v940_v42 = vsub.f32 1.5, %v939_v37 }
 0x90d   :  { %v952_v14 = vadd.f32 %v951_v47, %v949_v48 }
 0x90e   :  { %v941_v46 = vmul.f32 %v5350_v24, %v940_v42 }
 0x90f   :  { %v954_v53 = vadd.f32 %v5515_v10, %v952_v14 }
 0x910   :  { %v945_v28 = vsel %vm944_vm12, %v5350_v24, %v941_v46 }
 0x911   :  { %v947_v19 = vmul.f32 %v945_v28, %v6174_v40  ;;  %v1167_v40 = vperm.slane %v6179_v41, 2 }
 0x912   :  { %v1546_v14 = vpop.permute.xlu1 %1545 }
 0x913   :  { %v950_v50 = vmul.f32 %v948_v34, %v947_v19  ;;  %v1269_v0 = vadd.f32 %v1268_v62, %v1167_v40  ;;  %v1264_v1 = vadd.f32 %v1263_v29, %v1167_v40  ;;  %v1266_v2 = vadd.f32 %v1265_v60, %v1167_v40 }
 0x914   :  { %v1259_v4 = vadd.f32 %v1258_v49, %v1167_v40  ;;  %v1261_v6 = vadd.f32 %v1260_v59, %v1167_v40  ;;  %v1271_v16 = vadd.f32 %v1270_v5, %v1167_v40  ;;  %v1254_v8 = vadd.f32 %v6282_v21, %v1167_v40 }
 0x915   :  { %v953_v51 = vadd.f32 %v951_v47, %v950_v50  ;;  %v1315_v3 = vpack.c.bf16 %v1269_v0, %v1269_v0  ;;  %v1313_v13 = vpack.c.bf16 %v1264_v1, %v1264_v1  ;;  %v1314_v15 = vpack.c.bf16 %v1266_v2, %v1266_v2 }
 0x916   :  { %v1316_v9 = vpack.c.bf16 %v1271_v16, %v1271_v16  ;;  %v1256_v22 = vadd.f32 %v1255_v63, %v1167_v40  ;;  %v1311_v23 = vpack.c.bf16 %v1259_v4, %v1259_v4  ;;  %v1312_v24 = vpack.c.bf16 %v1261_v6, %v1261_v6  ;;  %v1273_v63 = vpop.f32.mrf.mxu1 }
 0x917   :  { %v955_v25 = vadd.f32 %v5516_v54, %v953_v51  ;;  %v1466_v17 = vunpack.c.l.b16 %v1315_v3  ;;  %v1464_v26 = vunpack.c.l.b16 %v1313_v13  ;;  %v1465_v11 = vunpack.c.l.b16 %v1314_v15 }
 0x918   :  { %v1467_v30 = vunpack.c.l.b16 %v1316_v9  ;;  %v1309_v57 = vpack.c.bf16 %v1254_v8, %v1254_v8  ;;  %v1310_v32 = vpack.c.bf16 %v1256_v22, %v1256_v22  ;;  %v1462_v33 = vunpack.c.l.b16 %v1311_v23 }
 0x919   :  { %v974_v58 = vpack.c.bf16 %v955_v25, %v954_v53  ;;  %v1463_v45 = vunpack.c.l.b16 %v1312_v24  ;;  %v6305_v36 = vpack.c.b16 %v1465_v11, %v1464_v26  ;;  %v1274_v60 = vadd.f32 %v1273_v63, %v1167_v40 }
 0x91a   :  { %v6303_v31 = vpack.c.b16 %v1467_v30, %v1466_v17  ;;  %v1460_v37 = vunpack.c.l.b16 %v1309_v57  ;;  %v1461_v38 = vunpack.c.l.b16 %v1310_v32  ;;  %v975_v6 = vperm.slane %v6179_v41, 0  ;;  %v1587_v13 = vpop.permute.xlu1 %1586 }
 0x91b   :  { %4790 = vmatmul.msk.bf16.vlgmr.msrb.gmra.mxu3 %vm217_vm1, %v974_v58  ;;  %v6308_v34 = vpack.c.b16 %v1463_v45, %v1462_v33  ;;  %v1317_v15 = vpack.c.bf16 %v1274_v60, %v1274_v60  ;;  %v1560_v41 = vsel %vm355_vm5, %v1546_v14, 0 }
 0x91c   :  { %1483 = vmatpush.bf16.msrb.mxu2 %v6303_v31  ;;  %v6311_v21 = vpack.c.b16 %v1461_v38, %v1460_v37 }
 0x91d   :  { %v1500_v23 = vunpack.c.l.b16 %v1317_v15 }
 0x91e   :  { %v1275_v39 = vpop.f32.mrf.mxu1 }
 0x91f   :  { %v1276_v62 = vadd.f32 %v1275_v39, %v1167_v40  ;;  %v1601_v39 = vsel %vm355_vm5, %v1587_v13, 0 }
 0x920   :  { %1484 = vmatpush.bf16.msrb.mxu2 %v6305_v36 }
 0x921   :  { %v1318_v16 = vpack.c.bf16 %v1276_v62, %v1276_v62 }
 0x922   :  { %v1544_v33 = vpop.permute.xlu1 %1543 }
 0x923   :  { %v1501_v24 = vunpack.c.l.b16 %v1318_v16 }
 0x924   :  { %1485 = vmatpush.bf16.msrb.mxu2 %v6308_v34 }
 0x925   :  { %v6325_v57 = vpack.c.b16 %v1501_v24, %v1500_v23 }
 0x926   :  { %v1278_v42 = vpop.f32.mrf.mxu1 }
 0x927   :  { %v1279_v25 = vadd.f32 %v1278_v42, %v1167_v40 }
 0x928   :  { %1486 = vmatpush.bf16.msrb.mxu2 %v6311_v21 }
 0x929   :  { %v1319_v3 = vpack.c.bf16 %v1279_v25, %v1279_v25 }
 0x92b   :  { %v1502_v9 = vunpack.c.l.b16 %v1319_v3 }
 0x92e   :  { %v1280_v46 = vpop.f32.mrf.mxu1 }
 0x92f   :  { %v1281_v58 = vadd.f32 %v1280_v46, %v1167_v40  ;;  %v1557_v46 = vsel %vm355_vm5, %v1544_v33, 0 }
 0x931   :  { %v1320_v4 = vpack.c.bf16 %v1281_v58, %v1281_v58 }
 0x933   :  { %v1503_v8 = vunpack.c.l.b16 %v1320_v4 }
 0x935   :  { %v6322_v11 = vpack.c.b16 %v1503_v8, %v1502_v9 }
 0x936   :  { %v1283_v47 = vpop.f32.mrf.mxu1 }
 0x937   :  { %v1284_v49 = vadd.f32 %v1283_v47, %v1167_v40  ;;  %v1583_v47 = vpop.permute.xlu1 %1582 }
 0x938   :  { %v1595_v14 = vsel %vm355_vm5, %v1583_v47, 0 }
 0x939   :  { %v1321_v10 = vpack.c.bf16 %v1284_v49, %v1284_v49 }
 0x93b   :  { %v1504_v0 = vunpack.c.l.b16 %v1321_v10 }
 0x93e   :  { %v1285_v48 = vpop.f32.mrf.mxu1 }
 0x93f   :  { %v1286_v27 = vadd.f32 %v1285_v48, %v1167_v40  ;;  %v1585_v48 = vpop.permute.xlu0 %1584 }
 0x941   :  { %v1322_v53 = vpack.c.bf16 %v1286_v27, %v1286_v27  ;;  %v1540_v27 = vpop.permute.xlu1 %1539 }
 0x943   :  { %v1505_v1 = vunpack.c.l.b16 %v1322_v53 }
 0x945   :  { %v6318_v17 = vpack.c.b16 %v1505_v1, %v1504_v0 }
 0x946   :  { %v1288_v28 = vpop.f32.mrf.mxu1 }
 0x947   :  { %v1289_v19 = vadd.f32 %v1288_v28, %v1167_v40  ;;  %v1542_v28 = vpop.permute.xlu2 %1541 }
 0x948   :  { %v1554_v49 = vsel %vm355_vm5, %v1542_v28, 0 }
 0x949   :  { %v1323_v50 = vpack.c.bf16 %v1289_v19, %v1289_v19  ;;  %v1598_v19 = vsel %vm355_vm5, %v1585_v48, 0 }
 0x94b   :  { %v1506_v59 = vunpack.c.l.b16 %v1323_v50  ;;  %v1551_v50 = vsel %vm355_vm5, %v1540_v27, 0 }
 0x94e   :  { %v1290_v51 = vpop.f32.mrf.mxu1 }
 0x94f   :  { %v1291_v54 = vadd.f32 %v1290_v51, %v1167_v40 }
 0x951   :  { %v1324_v29 = vpack.c.bf16 %v1291_v54, %v1291_v54 }
 0x953   :  { %v1507_v2 = vunpack.c.l.b16 %v1324_v29 }
 0x955   :  { %v6315_v5 = vpack.c.b16 %v1507_v2, %v1506_v59 }
 0x957   :  { %1523 = vmatpush.bf16.msrb.mxu3 %v6315_v5 }
 0x95b   :  { %1524 = vmatpush.bf16.msrb.mxu3 %v6318_v17 }
 0x95f   :  { %1525 = vmatpush.bf16.msrb.mxu3 %v6322_v11 }
 0x963   :  { %1526 = vmatpush.bf16.msrb.mxu3 %v6325_v57 }
 0x99e   :  { %v1000_v22 = vpop.f32.mrf.mxu3 }
 0x99f   :  { %v1001_v40 = vadd.f32 %v1000_v22, %v975_v6 }
 0x9a1   :  { %v1005_v26 = vmul.f32 0.35355338, %v1001_v40 }
 0x9a3   :  { %v1007_v30 = vpack.c.bf16 %v1005_v26, %v1005_v26 }
 0x9a5   :  { %v1535_v32 = vunpack.c.l.b16 %v1007_v30  ;;  %4887 = vmatmul.msk.bf16.vlgmr.msra.gmra.mxu2 %vm355_vm5, %v1007_v30 }
 0x9a6   :  { %1566 = vmatpush.bf16.xpose.msra.mxu2 %v1560_v41  ;;  %v1002_v45 = vpop.f32.mrf.mxu3 }
 0x9a7   :  { %v1003_v37 = vadd.f32 %v1002_v45, %v975_v6  ;;  %v6329_v38 = vpack.c.b16 %v1535_v32, %v1535_v32 }
 0x9a9   :  { %v1006_v63 = vmul.f32 0.35355338, %v1003_v37  ;;  %1537 = vrot.lane.b32.xlu1 %v6329_v38, %s5769_s0 }
 0x9ab   :  { %v1008_v42 = vpack.c.bf16 %v1006_v63, %v1006_v63 }
 0x9ad   :  { %4888 = vmatmul.msk.bf16.vlgmr.msra.gmra.mxu3 %vm355_vm5, %v1008_v42  ;;  %v1576_v59 = vunpack.c.l.b16 %v1008_v42 }
 0x9ae   :  { %1567 = vmatpush.bf16.xpose.msra.mxu2 %v1557_v46  ;;  %1607 = vmatpush.bf16.xpose.msra.mxu3 %v1601_v39 }
 0x9af   :  { %v6357_v29 = vpack.c.b16 %v1576_v59, %v1576_v59 }
 0x9b1   :  { %1750 = vrot.lane.b32.xlu1 %v6226_v35, %s5770_s25 }
 0x9b6   :  { %1568 = vmatpush.bf16.xpose.msra.mxu2 %v1554_v49  ;;  %1608 = vmatpush.bf16.xpose.msra.mxu3 %v1598_v19 }
 0x9b9   :  { %1676 = vrot.lane.b32.xlu1 %v6322_v11, %s5769_s0 }
 0x9be   :  { %1569 = vmatpush.bf16.xpose.msra.mxu2 %v1551_v50  ;;  %1609 = vmatpush.bf16.xpose.msra.mxu3 %v1595_v14 }
 0x9c1   :  { %1876 = vrot.lane.b32.xlu1 %v6200_v61, %s5771_s5 }
 0x9c9   :  { %1744 = vrot.lane.b32.xlu1 %v6293_v44, %s5770_s25 }
 0x9d1   :  { %1704 = vrot.lane.b32.xlu1 %v6329_v38, %s5770_s25 }
 0xa1b   :  { %v1538_v16 = vpop.permute.xlu1 %1537 }
 0xa23   :  { %v1751_v8 = vpop.permute.xlu1 %1750 }
 0xa24   :  { %v1765_v33 = vsel %vm355_vm5, %v1751_v8, 0 }
 0xa28   :  { %v1369_v51 = vpop.f32.mrf.mxu2 }
 0xa29   :  { %v1422_v10 = vsel %vm1421_vm13, %v1369_v51, -inf }
 0xa2a   :  { %1423 = vmax.xlane.f32.xlu0 %v1422_v10 }
 0xa2b   :  { %v1677_v40 = vpop.permute.xlu1 %1676 }
 0xa30   :  { %v1371_v53 = vpop.f32.mrf.mxu2  ;;  %v1417_v54 = vpop.f32.mrf.mxu3 }
 0xa31   :  { %v1425_v25 = vsel %vm1421_vm13, %v1417_v54, -inf }
 0xa32   :  { %1426 = vmax.xlane.f32.xlu2 %v1425_v25 }
 0xa33   :  { %v1877_v39 = vpop.permute.xlu1 %1876 }
 0xa38   :  { %v1419_v58 = vpop.f32.mrf.mxu3 }
 0xa3b   :  { %v1745_v48 = vpop.permute.xlu1 %1744 }
 0xa3c   :  { %v1756_v49 = vsel %vm355_vm5, %v1745_v48, 0 }
 0xa3e   :  { %1580 = vrot.lane.b32.xlu0 %v6293_v44, %s5769_s0 }
 0xa46   :  { %1712 = vrot.lane.b32.xlu0 %v6200_v61, %s5770_s25 }
 0xa4a   :  { %1578 = vrot.lane.b32.xlu2 %v6357_v29, %s5769_s0 }
 0xa4e   :  { %1680 = vrot.lane.b32.xlu0 %v6315_v5, %s5769_s0 }
 0xa52   :  { %1652 = vrot.lane.b32.xlu2 %v6303_v31, %s5769_s0 }
 0xa56   :  { %1650 = vrot.lane.b32.xlu0 %v6305_v36, %s5769_s0 }
 0xa5a   :  { %1646 = vrot.lane.b32.xlu2 %v6311_v21, %s5769_s0 }
 0xa5e   :  { %1678 = vrot.lane.b32.xlu0 %v6318_v17, %s5769_s0 }
 0xa62   :  { %1914 = vrot.lane.b32.xlu2 %v6226_v35, %s5771_s5 }
 0xa66   :  { %1710 = vrot.lane.b32.xlu0 %v6238_v43, %s5770_s25 }
 0xa6a   :  { %1874 = vrot.lane.b32.xlu2 %v6238_v43, %s5771_s5 }
 0xa6e   :  { %1748 = vrot.lane.b32.xlu0 %v6218_v18, %s5770_s25 }
 0xa72   :  { %1742 = vrot.lane.b32.xlu2 %v6357_v29, %s5770_s25 }
 0xa76   :  { %1648 = vrot.lane.b32.xlu0 %v6308_v34, %s5769_s0 }
 0xa7e   :  { %1674 = vrot.lane.b32.xlu0 %v6325_v57, %s5769_s0 }
 0xa86   :  { %1708 = vrot.lane.b32.xlu0 %v6195_v55, %s5770_s25 }
 0xa8e   :  { %1746 = vrot.lane.b32.xlu0 %v6248_v52, %s5770_s25 }
 0xa96   :  { %1706 = vrot.lane.b32.xlu0 %v6258_v56, %s5770_s25 }
 0xa9d   :  { %v6391_v61 = vpop.xlane.xlu0 %1423 }
 0xa9e   :  { %v1434_v35 = vsub.f32 %v1369_v51, %v6391_v61  ;;  %1912 = vrot.lane.b32.xlu0 %v6218_v18, %s5771_s5 }
 0xaa0   :  { %v1436_v43 = vmul.f32 1.442695, %v1434_v35 }
 0xaa2   :  { %5351 = vpow2.f32 %v1436_v43 }
 0xaa5   :  { %v6396_v60 = vpop.xlane.xlu2 %1426 }
 0xaa6   :  { %v1435_v62 = vsub.f32 %v1417_v54, %v6396_v60  ;;  %1872 = vrot.lane.b32.xlu0 %v6195_v55, %s5771_s5 }
 0xaa8   :  { %v6401_v0 = vpop.eup %5351  ;;  %v1438_v1 = vmul.f32 1.442695, %v1435_v62 }
 0xaa9   :  { %v1450_v2 = vpack.c.bf16 %v6401_v0, %v6401_v0 }
 0xaaa   :  { %5353 = vpow2.f32 %v1438_v1 }
 0xaab   :  { %4889 = vmatmul.msk.bf16.vlgmr.msrb.gmra.mxu2 %vm1421_vm13, %v1450_v2 }
 0xaad   :  { %v1579_v3 = vpop.permute.xlu2 %1578 }
 0xaae   :  { %1908 = vrot.lane.b32.xlu0 %v6293_v44, %s5771_s5 }
 0xab0   :  { %v6408_v18 = vpop.eup %5353  ;;  %v1581_v4 = vpop.permute.xlu0 %1580 }
 0xab1   :  { %v1451_v6 = vpack.c.bf16 %v6408_v18, %v6408_v18  ;;  %v1592_v55 = vsel %vm355_vm5, %v1581_v4, 0 }
 0xab2   :  { %1610 = vmatpush.bf16.xpose.msra.mxu3 %v1592_v55 }
 0xab3   :  { %4890 = vmatmul.msk.bf16.vlgmr.msrb.gmra.mxu3 %vm1421_vm13, %v1451_v6 }
 0xab5   :  { %v1653_v13 = vpop.permute.xlu2 %1652 }
 0xab6   :  { %1816 = vrot.lane.b32.xlu0 %v6303_v31, %s5770_s25  ;;  %1665 = vmatpush.bf16.msrb.mxu2 %v1653_v13 }
 0xab8   :  { %v1713_v15 = vpop.permute.xlu0 %1712 }
 0xab9   :  { %v1727_v30 = vsel %vm355_vm5, %v1713_v15, 0 }
 0xabb   :  { %4891 = vmatmul.msk.bf16.vlgmr.msra.gmra.mxu2 %vm355_vm5, %v1538_v16  ;;  %v1891_v16 = vsel %vm355_vm5, %v1877_v39, 0 }
 0xabd   :  { %v1647_v41 = vpop.permute.xlu2 %1646 }
 0xac0   :  { %v1681_v44 = vpop.permute.xlu0 %1680 }
 0xac1   :  { %1693 = vmatpush.bf16.msrb.mxu3 %v1681_v44 }
 0xac3   :  { %4892 = vmatmul.msk.bf16.vlgmr.msra.gmra.mxu3 %vm355_vm5, %v1579_v3 }
 0xac8   :  { %v1651_v9 = vpop.permute.xlu0 %1650 }
 0xac9   :  { %1666 = vmatpush.bf16.msrb.mxu2 %v1651_v9 }
 0xad0   :  { %v1679_v22 = vpop.permute.xlu0 %1678 }
 0xad1   :  { %1694 = vmatpush.bf16.msrb.mxu3 %v1679_v22 }
 0xad5   :  { %1695 = vmatpush.bf16.msrb.mxu3 %v1677_v40 }
 0xad8   :  { %v1711_v23 = vpop.permute.xlu0 %1710 }
 0xad9   :  { %v1724_v45 = vsel %vm355_vm5, %v1711_v23, 0 }
 0xae0   :  { %v1749_v24 = vpop.permute.xlu0 %1748 }
 0xae1   :  { %v1762_v63 = vsel %vm355_vm5, %v1749_v24, 0 }
 0xae8   :  { %v1649_v26 = vpop.permute.xlu0 %1648 }
 0xae9   :  { %1667 = vmatpush.bf16.msrb.mxu2 %v1649_v26 }
 0xaed   :  { %1668 = vmatpush.bf16.msrb.mxu2 %v1647_v41 }
 0xaf0   :  { %v1675_v32 = vpop.permute.xlu0 %1674 }
 0xaf1   :  { %1733 = vmatpush.bf16.xpose.msra.mxu2 %v1727_v30  ;;  %1696 = vmatpush.bf16.msrb.mxu3 %v1675_v32 }
 0xaf5   :  { %1771 = vmatpush.bf16.xpose.msra.mxu3 %v1765_v33 }
 0xaf8   :  { %v1709_v37 = vpop.permute.xlu0 %1708 }
 0xaf9   :  { %1734 = vmatpush.bf16.xpose.msra.mxu2 %v1724_v45  ;;  %v1721_v42 = vsel %vm355_vm5, %v1709_v37, 0 }
 0xafd   :  { %1772 = vmatpush.bf16.xpose.msra.mxu3 %v1762_v63 }
 0xb00   :  { %v1747_v46 = vpop.permute.xlu0 %1746 }
 0xb01   :  { %1735 = vmatpush.bf16.xpose.msra.mxu2 %v1721_v42  ;;  %v1759_v47 = vsel %vm355_vm5, %v1747_v46, 0 }
 0xb05   :  { %1773 = vmatpush.bf16.xpose.msra.mxu3 %v1759_v47 }
 0xb08   :  { %v1707_v28 = vpop.permute.xlu0 %1706 }
 0xb09   :  { %v1718_v19 = vsel %vm355_vm5, %v1707_v28, 0 }
 0xb0a   :  { %1736 = vmatpush.bf16.xpose.msra.mxu2 %v1718_v19 }
 0xb0d   :  { %1774 = vmatpush.bf16.xpose.msra.mxu3 %v1756_v49 }
 0xb10   :  { %v1913_v27 = vpop.permute.xlu0 %1912 }
 0xb11   :  { %v1926_v24 = vsel %vm355_vm5, %v1913_v27, 0 }
 0xb18   :  { %v1873_v14 = vpop.permute.xlu0 %1872 }
 0xb19   :  { %v1885_v23 = vsel %vm355_vm5, %v1873_v14, 0 }
 0xb20   :  { %v6426_v50 = vpop.permute.xlu0 %1908 }
 0xb21   :  { %v1920_v45 = vsel %vm355_vm5, %v6426_v50, 0 }
 0xb28   :  { %v1817_v51 = vpop.permute.xlu0 %1816 }
 0xb29   :  { %1829 = vmatpush.bf16.msrb.mxu0 %v1817_v51 }
 0xb2e   :  { %v6428_v10 = vpop.f32.mrf.mxu2 }
 0xb36   :  { %v1490_v53 = vpop.f32.mrf.mxu2  ;;  %v6430_v54 = vpop.f32.mrf.mxu3 }
 0xb3e   :  { %v1530_v25 = vpop.f32.mrf.mxu3  ;;  %v1571_v58 = vpop.f32.mrf.mxu2 }
 0xb3f   :  { %v1616_v59 = vsel %vm1421_vm13, %v1571_v58, -inf }
 0xb40   :  { %1617 = vmax.xlane.f32.xlu1 %v1616_v59 }
 0xb46   :  { %v1573_v35 = vpop.f32.mrf.mxu2  ;;  %v1612_v43 = vpop.f32.mrf.mxu3 }
 0xb47   :  { %v1619_v62 = vsel %vm1421_vm13, %v1612_v43, -inf }
 0xb48   :  { %1620 = vmax.xlane.f32.xlu2 %v1619_v62 }
 0xb4e   :  { %v1614_v1 = vpop.f32.mrf.mxu3 }
 0xb59   :  { %1910 = vrot.lane.b32.xlu1 %v6248_v52, %s5771_s5  ;;  %v1915_v52 = vpop.permute.xlu2 %1914 }
 0xb5a   :  { %v1929_v8 = vsel %vm355_vm5, %v1915_v52, 0 }
 0xb60   :  { %1870 = vrot.lane.b32.xlu2 %v6258_v56, %s5771_s5 }
 0xb61   :  { %1868 = vrot.lane.b32.xlu1 %v6329_v38, %s5771_s5  ;;  %v1875_v56 = vpop.permute.xlu2 %1874  ;;  %v1705_v38 = vpop.permute.xlu1 %1704 }
 0xb62   :  { %v1888_v22 = vsel %vm355_vm5, %v1875_v56, 0 }
 0xb68   :  { %1906 = vrot.lane.b32.xlu2 %v6357_v29, %s5771_s5 }
 0xb69   :  { %1844 = vrot.lane.b32.xlu1 %v6315_v5, %s5770_s25  ;;  %v1743_v29 = vpop.permute.xlu2 %1742 }
 0xb70   :  { %1838 = vrot.lane.b32.xlu2 %v6325_v57, %s5770_s25 }
 0xb71   :  { %1814 = vrot.lane.b32.xlu1 %v6305_v36, %s5770_s25 }
 0xb79   :  { %1842 = vrot.lane.b32.xlu1 %v6318_v17, %s5770_s25 }
 0xb81   :  { %1812 = vrot.lane.b32.xlu1 %v6308_v34, %s5770_s25 }
 0xb89   :  { %1840 = vrot.lane.b32.xlu1 %v6322_v11, %s5770_s25 }
 0xb91   :  { %1810 = vrot.lane.b32.xlu1 %v6311_v21, %s5770_s25 }
 0xb99   :  { %2008 = vrot.lane.b32.xlu1 %v6315_v5, %s5771_s5 }
 0xbb3   :  { %v6458_v2 = vpop.xlane.xlu1 %1617 }
 0xbb4   :  { %v1628_v3 = vsub.f32 %v1571_v58, %v6458_v2 }
 0xbb6   :  { %v1630_v4 = vmul.f32 1.442695, %v1628_v3 }
 0xbb8   :  { %5355 = vpow2.f32 %v1630_v4 }
 0xbbb   :  { %v6461_v6 = vpop.xlane.xlu2 %1620 }
 0xbbc   :  { %v1629_v55 = vsub.f32 %v1612_v43, %v6461_v6 }
 0xbbe   :  { %v6464_v13 = vpop.eup %5355  ;;  %v1632_v15 = vmul.f32 1.442695, %v1629_v55 }
 0xbbf   :  { %v1644_v5 = vpack.c.bf16 %v6464_v13, %v6464_v13 }
 0xbc0   :  { %5357 = vpow2.f32 %v1632_v15 }
 0xbc1   :  { %4893 = vmatmul.msk.bf16.vlgmr.msrb.gmra.mxu2 %vm1421_vm13, %v1644_v5 }
 0xbc2   :  { %1897 = vmatpush.bf16.xpose.msrb.mxu2 %v1891_v16 }
 0xbc3   :  { %v1871_v41 = vpop.permute.xlu2 %1870 }
 0xbc4   :  { %v1882_v30 = vsel %vm355_vm5, %v1871_v41, 0 }
 0xbc6   :  { %v6470_v44 = vpop.eup %5357 }
 0xbc7   :  { %v1645_v9 = vpack.c.bf16 %v6470_v44, %v6470_v44 }
 0xbc9   :  { %4894 = vmatmul.msk.bf16.vlgmr.msrb.gmra.mxu3 %vm1421_vm13, %v1645_v9 }
 0xbca   :  { %1898 = vmatpush.bf16.xpose.msrb.mxu2 %v1888_v22  ;;  %1935 = vmatpush.bf16.xpose.msrb.mxu3 %v1929_v8 }
 0xbcb   :  { %v1911_v40 = vpop.permute.xlu1 %1910  ;;  %v1907_v63 = vpop.permute.xlu2 %1906 }
 0xbcc   :  { %v1923_v32 = vsel %vm355_vm5, %v1911_v40, 0 }
 0xbd1   :  { %4895 = vmatmul.msk.bf16.vlgmr.msra.gmra.mxu2 %vm355_vm5, %v1705_v38 }
 0xbd2   :  { %1899 = vmatpush.bf16.xpose.msrb.mxu2 %v1885_v23  ;;  %1936 = vmatpush.bf16.xpose.msrb.mxu3 %v1926_v24 }
 0xbd3   :  { %v1869_v26 = vpop.permute.xlu1 %1868  ;;  %v1839_v47 = vpop.permute.xlu2 %1838 }
 0xbd9   :  { %4896 = vmatmul.msk.bf16.vlgmr.msra.gmra.mxu3 %vm355_vm5, %v1743_v29 }
 0xbda   :  { %1900 = vmatpush.bf16.xpose.msrb.mxu2 %v1882_v30  ;;  %1937 = vmatpush.bf16.xpose.msrb.mxu3 %v1923_v32 }
 0xbdb   :  { %v1845_v33 = vpop.permute.xlu1 %1844 }
 0xbdc   :  { %1857 = vmatpush.bf16.msrb.mxu1 %v1845_v33  ;;  %v1429_v33 = vsub.f32 -inf, %v6396_v60 }
 0xbe1   :  { %4899 = vmatmul.msk.bf16.vlgmr.msrb.gmra.mxu2 %vm355_vm5, %v1869_v26 }
 0xbe2   :  { %1938 = vmatpush.bf16.xpose.msrb.mxu3 %v1920_v45  ;;  %v969_v45 = vld [vmem:[#allocation7] sm:$0xf] }
 0xbe3   :  { %v1815_v37 = vpop.permute.xlu1 %1814 }
 0xbe4   :  { %1830 = vmatpush.bf16.msrb.mxu0 %v1815_v37  ;;  %v1428_v37 = vsub.f32 -inf, %v6391_v61 }
 0xbe9   :  { %4900 = vmatmul.msk.bf16.vlgmr.msrb.gmra.mxu3 %vm355_vm5, %v1907_v63  ;;  %v1432_v63 = vmul.f32 1.442695, %v1429_v33 }
 0xbeb   :  { %v1843_v39 = vpop.permute.xlu1 %1842 }
 0xbec   :  { %1858 = vmatpush.bf16.msrb.mxu1 %v1843_v39  ;;  %v2066_v39 = vsel %vm421_vm6, %v969_v45, 0 }
 0xbf3   :  { %v1813_v42 = vpop.permute.xlu1 %1812 }
 0xbf4   :  { %1831 = vmatpush.bf16.msrb.mxu0 %v1813_v42  ;;  %v1622_v42 = vsub.f32 -inf, %v6458_v2 }
 0xbfb   :  { %v1841_v46 = vpop.permute.xlu1 %1840 }
 0xbfc   :  { %1859 = vmatpush.bf16.msrb.mxu1 %v1841_v46  ;;  %v1430_v46 = vmul.f32 1.442695, %v1428_v37 }
 0xc00   :  { %1860 = vmatpush.bf16.msrb.mxu1 %v1839_v47 }
 0xc03   :  { %v1811_v48 = vpop.permute.xlu1 %1810 }
 0xc04   :  { %1832 = vmatpush.bf16.msrb.mxu0 %v1811_v48 }
 0xc0b   :  { %v2009_v28 = vpop.permute.xlu1 %2008 }
 0xc0c   :  { %2021 = vmatpush.bf16.msra.mxu1 %v2009_v28  ;;  %v1624_v28 = vmul.f32 1.442695, %v1622_v42 }
 0xc44   :  { %v6487_v19 = vpop.f32.mrf.mxu2 }
 0xc4c   :  { %v1672_v49 = vpop.f32.mrf.mxu2  ;;  %v6489_v27 = vpop.f32.mrf.mxu3 }
 0xc54   :  { %v1700_v14 = vpop.f32.mrf.mxu3  ;;  %v1738_v50 = vpop.f32.mrf.mxu2 }
 0xc55   :  { %v1780_v51 = vsel %vm1421_vm13, %v1738_v50, -inf }
 0xc56   :  { %1781 = vmax.xlane.f32.xlu2 %v1780_v51 }
 0xc5c   :  { %v1740_v53 = vpop.f32.mrf.mxu2  ;;  %v1776_v25 = vpop.f32.mrf.mxu3 }
 0xc5d   :  { %v1783_v58 = vsel %vm1421_vm13, %v1776_v25, -inf }
 0xc5e   :  { %1784 = vmax.xlane.f32.xlu0 %v1783_v58 }
 0xc64   :  { %v1778_v59 = vpop.f32.mrf.mxu3  ;;  %v1902_v35 = vpop.f32.mrf.mxu2 }
 0xc65   :  { %v1944_v43 = vsel %vm1421_vm13, %v1902_v35, -inf }
 0xc66   :  { %1945 = vmax.xlane.f32.xlu1 %v1944_v43 }
 0xc6c   :  { %v1904_v62 = vpop.f32.mrf.mxu2  ;;  %v6494_v1 = vpop.f32.mrf.mxu3 }
 0xc6e   :  { %1978 = vrot.lane.b32.xlu2 %v6305_v36, %s5771_s5  ;;  %v1947_v36 = vsel %vm1421_vm13, %v6494_v1, -inf }
 0xc72   :  { %1980 = vrot.lane.b32.xlu0 %v6303_v31, %s5771_s5  ;;  %v1445_v31 = vsel %vm1421_vm13, %v6408_v18, 0.0 }
 0xc74   :  { %v1942_v52 = vpop.f32.mrf.mxu3 }
 0xc76   :  { %2006 = vrot.lane.b32.xlu2 %v6318_v17, %s5771_s5  ;;  %v1636_v17 = vsel %vm1421_vm13, %v6464_v13, 0.0 }
 0xc7e   :  { %1976 = vrot.lane.b32.xlu2 %v6308_v34, %s5771_s5  ;;  %v1442_v34 = vsel %vm1421_vm13, %v6401_v0, 0.0 }
 0xc7f   :  { %2002 = vrot.lane.b32.xlu1 %v6325_v57, %s5771_s5 }
 0xc86   :  { %2004 = vrot.lane.b32.xlu2 %v6322_v11, %s5771_s5 }
 0xc8e   :  { %1974 = vrot.lane.b32.xlu2 %v6311_v21, %s5771_s5 }
 0xc9c   :  { %1948 = vmax.xlane.f32.xlu0 %v1947_v36 }
 0xca4   :  { %1446 = vadd.xlane.f32.xlu0 %v1445_v31  ;;  %v1639_v31 = vsel %vm1421_vm13, %v6470_v44, 0.0 }
 0xca9   :  { %1443 = vadd.xlane.f32.xlu1 %v1442_v34 }
 0xcac   :  { %1637 = vadd.xlane.f32.xlu0 %v1636_v17 }
 0xcc9   :  { %v6518_v11 = vpop.xlane.xlu2 %1781 }
 0xcca   :  { %v1792_v21 = vsub.f32 %v1738_v50, %v6518_v11 }
 0xccc   :  { %v1794_v57 = vmul.f32 1.442695, %v1792_v21 }
 0xcce   :  { %5359 = vpow2.f32 %v1794_v57 }
 0xcd1   :  { %v6521_v56 = vpop.xlane.xlu0 %1784  ;;  %v1979_v38 = vpop.permute.xlu2 %1978 }
 0xcd2   :  { %v1793_v18 = vsub.f32 %v1776_v25, %v6521_v56 }
 0xcd4   :  { %v5360_v29 = vpop.eup %5359  ;;  %v1796_v3 = vmul.f32 1.442695, %v1793_v18 }
 0xcd5   :  { %v1808_v4 = vpack.c.bf16 %v5360_v29, %v5360_v29  ;;  %v1800_v0 = vsel %vm1421_vm13, %v5360_v29, 0.0 }
 0xcd6   :  { %5361 = vpow2.f32 %v1796_v3  ;;  %1801 = vadd.xlane.f32.xlu2 %v1800_v0  ;;  %v971_v0 = vld [vmem:[#allocation7 + $0x8] sm:$0xf] }
 0xcd7   :  { %4897 = vmatmul.msk.bf16.vlgmr.msrb.gmra.mxu0 %vm1421_vm13, %v1808_v4  ;;  %v2091_v44 = vsel %vm421_vm6, %v971_v0, 0 }
 0xcd8   :  { %2100 = vmatpush.bf16.msra.mxu2 %v2091_v44 }
 0xcd9   :  { %v2007_v55 = vpop.permute.xlu2 %2006  ;;  %v6526_v13 = vpop.xlane.xlu1 %1945 }
 0xcda   :  { %v1956_v15 = vsub.f32 %v1902_v35, %v6526_v13  ;;  %2022 = vmatpush.bf16.msra.mxu1 %v2007_v55  ;;  %v1786_v55 = vsub.f32 -inf, %v6518_v11 }
 0xcdc   :  { %v5362_v5 = vpop.eup %5361  ;;  %v1958_v16 = vmul.f32 1.442695, %v1956_v15 }
 0xcdd   :  { %v1809_v9 = vpack.c.bf16 %v5362_v5, %v5362_v5  ;;  %v1803_v8 = vsel %vm1421_vm13, %v5362_v5, 0.0 }
 0xcde   :  { %1804 = vadd.xlane.f32.xlu0 %v1803_v8  ;;  %5363 = vpow2.f32 %v1958_v16 }
 0xcdf   :  { %4898 = vmatmul.msk.bf16.vlgmr.msrb.gmra.mxu1 %vm1421_vm13, %v1809_v9  ;;  %5365 = vpow2.f32 %v1432_v63 }
 0xce0   :  { %5367 = vpow2.f32 %v1430_v46  ;;  %v972_v46 = vld [vmem:[#allocation7 + $0xc] sm:$0xf] }
 0xce1   :  { %v1977_v22 = vpop.permute.xlu2 %1976 }
 0xce4   :  { %v1981_v40 = vpop.permute.xlu0 %1980  ;;  %v5364_v23 = vpop.eup %5363 }
 0xce5   :  { %1993 = vmatpush.bf16.msra.mxu0 %v1981_v40  ;;  %v1964_v24 = vsel %vm1421_vm13, %v5364_v23, 0.0  ;;  %v1972_v32 = vpack.c.bf16 %v5364_v23, %v5364_v23  ;;  %v5366_v60 = vpop.eup %5365 }
 0xce6   :  { %1965 = vadd.xlane.f32.xlu0 %v1964_v24  ;;  %v1441_v61 = vmul.f32 0.0, %v5366_v60  ;;  %v5368_v50 = vpop.eup %5367  ;;  %v970_v60 = vld [vmem:[#allocation7 + $0x4] sm:$0xf] }
 0xce7   :  { %v1440_v2 = vmul.f32 0.0, %v5368_v50 }
 0xce8   :  { %v1533_v17 = vadd.f32 %v6430_v54, %v1441_v61  ;;  %v1788_v54 = vmul.f32 1.442695, %v1786_v55 }
 0xce9   :  { %v2005_v26 = vpop.permute.xlu2 %2004  ;;  %1994 = vmatpush.bf16.msra.mxu0 %v1979_v38  ;;  %v1532_v34 = vadd.f32 %v6428_v10, %v1440_v2  ;;  %v1787_v10 = vsub.f32 -inf, %v6521_v56 }
 0xcea   :  { %2023 = vmatpush.bf16.msra.mxu1 %v2005_v26 }
 0xceb   :  { %v1790_v15 = vmul.f32 1.442695, %v1787_v10 }
 0xced   :  { %1995 = vmatpush.bf16.msra.mxu0 %v1977_v22 }
 0xcf1   :  { %v1975_v41 = vpop.permute.xlu2 %1974  ;;  %v2003_v30 = vpop.permute.xlu1 %2002 }
 0xcf2   :  { %1996 = vmatpush.bf16.msra.mxu0 %v1975_v41  ;;  %2024 = vmatpush.bf16.msra.mxu1 %v2003_v30 }
 0xcf5   :  { %4901 = vmatmul.msk.bf16.vlgmr.msra.gmra.mxu0 %vm1421_vm13, %v1972_v32 }
 0xcf6   :  { %2075 = vmatpush.bf16.msrb.mxu1 %v2066_v39 }
 0xd0f   :  { %v6537_v47 = vpop.xlane.xlu0 %1948 }
 0xd10   :  { %v1957_v48 = vsub.f32 %v6494_v1, %v6537_v47 }
 0xd12   :  { %v1960_v49 = vmul.f32 1.442695, %v1957_v48  ;;  %v1950_v48 = vsub.f32 -inf, %v6526_v13 }
 0xd14   :  { %5369 = vpow2.f32 %v1960_v49  ;;  %v1951_v49 = vsub.f32 -inf, %v6537_v47 }
 0xd15   :  { %5371 = vpow2.f32 %v1624_v28  ;;  %v2118_v28 = vsel %vm421_vm6, %v972_v46, 0 }
 0xd16   :  { %2127 = vmatpush.bf16.msra.mxu3 %v2118_v28  ;;  %v1954_v50 = vmul.f32 1.442695, %v1951_v49  ;;  %v5231_v49 = vld [vmem:[#allocation10 + $0x8] sm:$0xff] }
 0xd17   :  { %v1447_v14 = vpop.xlane.xlu0 %1446 }
 0xd18   :  { %v1449_v51 = vadd.f32 %v1447_v14, %v1441_v61  ;;  %v1952_v61 = vmul.f32 1.442695, %v1950_v48  ;;  %v2046_v14 = vsel %vm421_vm6, %v970_v60, 0 }
 0xd19   :  { %2055 = vmatpush.bf16.msrb.mxu0 %v2046_v14 }
 0xd1a   :  { %v5370_v53 = vpop.eup %5369  ;;  %5373 = vrcp.f32 %v1449_v51  ;;  %v1623_v51 = vsub.f32 -inf, %v6461_v6 }
 0xd1b   :  { %v5372_v25 = vpop.eup %5371  ;;  %v1973_v58 = vpack.c.bf16 %v5370_v53, %v5370_v53  ;;  %v1967_v59 = vsel %vm1421_vm13, %v5370_v53, 0.0 }
 0xd1c   :  { %1968 = vadd.xlane.f32.xlu0 %v1967_v59  ;;  %v1444_v35 = vpop.xlane.xlu1 %1443  ;;  %v1634_v62 = vmul.f32 0.0, %v5372_v25  ;;  %v1626_v25 = vmul.f32 1.442695, %v1623_v51 }
 0xd1d   :  { %v1448_v43 = vadd.f32 %v1444_v35, %v1440_v2  ;;  %4902 = vmatmul.msk.bf16.vlgmr.msra.gmra.mxu1 %vm1421_vm13, %v1973_v58  ;;  %2219 = vmatpush.bf16.msra.mxu0 %v5231_v49 }
 0xd1e   :  { %v1702_v18 = vadd.f32 %v6487_v19, %v1634_v62 }
 0xd1f   :  { %5375 = vrcp.f32 %v1448_v43  ;;  %v1638_v1 = vpop.xlane.xlu0 %1637 }
 0xd20   :  { %v1642_v52 = vadd.f32 %v1638_v1, %v1634_v62  ;;  %v5374_v36 = vpop.eup %5373 }
 0xd21   :  { %v2035_v57 = vmul.f32 %v5374_v36, %v1533_v17 }
 0xd22   :  { %5377 = vrcp.f32 %v1642_v52 }
 0xd23   :  { %5379 = vpow2.f32 %v1788_v54 }
 0xd24   :  { %1640 = vadd.xlane.f32.xlu0 %v1639_v31  ;;  %5381 = vpow2.f32 %v1790_v15 }
 0xd25   :  { %v5376_v21 = vpop.eup %5375 }
 0xd26   :  { %v2034_v38 = vmul.f32 %v5376_v21, %v1532_v34 }
 0xd28   :  { %v5378_v29 = vpop.eup %5377  ;;  %v2036_v3 = vpack.c.bf16 %v2035_v57, %v2034_v38 }
 0xd29   :  { %v6548_v4 = vmul.f32 %v5378_v29, %v1702_v18  ;;  %v5380_v5 = vpop.eup %5379 }
 0xd2a   :  { %v5382_v19 = vpop.eup %5381  ;;  %v1798_v9 = vmul.f32 0.0, %v5380_v5 }
 0xd2b   :  { %v1799_v22 = vmul.f32 0.0, %v5382_v19 }
 0xd2d   :  { %4904 = vmatmul.msk.bf16.vlgmr.msrb.gmra.mxu1 %vm355_vm5, %v2036_v3 }
 0xd49   :  { %v1802_v16 = vpop.xlane.xlu2 %1801 }
 0xd4a   :  { %v1806_v40 = vadd.f32 %v1802_v16, %v1798_v9 }
 0xd4c   :  { %5383 = vrcp.f32 %v1806_v40 }
 0xd51   :  { %v1805_v8 = vpop.xlane.xlu0 %1804 }
 0xd52   :  { %v1807_v23 = vadd.f32 %v1805_v8, %v1799_v22  ;;  %v5384_v56 = vpop.eup %5383 }
 0xd54   :  { %v1834_v24 = vpop.f32.mrf.mxu0  ;;  %5385 = vrcp.f32 %v1807_v23 }
 0xd55   :  { %v1866_v11 = vadd.f32 %v1834_v24, %v1798_v9  ;;  %5387 = vpow2.f32 %v1952_v61  ;;  %v5299_v9 = vld [vmem:[#allocation8] ss:$0 sm:$0xff] }
 0xd56   :  { %5389 = vpow2.f32 %v1954_v50  ;;  %v5230_v50 = vld [vmem:[#allocation10] sm:$0xff] }
 0xd57   :  { %v2084_v33 = vmul.f32 %v5384_v56, %v1866_v11  ;;  %5391 = vpow2.f32 %v1626_v25  ;;  %2220 = vmatpush.bf16.msra.mxu0 %v5230_v50  ;;  %v5237_v50 = vld [vmem:[%s7411_s9 + $0x38] sm:$0xff] }
 0xd58   :  { %2385 = vmatpush.bf16.msrb.mxu2 %v5237_v50 }
 0xd59   :  { %v1966_v53 = vpop.xlane.xlu0 %1965 }
 0xd5a   :  { %v5386_v32 = vpop.eup %5385 }
 0xd5b   :  { %v5388_v2 = vpop.eup %5387 }
 0xd5c   :  { %v1836_v26 = vpop.f32.mrf.mxu0  ;;  %v1862_v41 = vpop.f32.mrf.mxu1  ;;  %v1962_v13 = vmul.f32 0.0, %v5388_v2 }
 0xd5d   :  { %v1867_v30 = vadd.f32 %v1862_v41, %v1799_v22  ;;  %v5390_v58 = vpop.eup %5389 }
 0xd5e   :  { %v1963_v35 = vmul.f32 0.0, %v5390_v58  ;;  %v1970_v47 = vadd.f32 %v1966_v53, %v1962_v13  ;;  %v5392_v62 = vpop.eup %5391 }
 0xd5f   :  { %v2085_v45 = vmul.f32 %v5386_v32, %v1867_v30  ;;  %v1635_v1 = vmul.f32 0.0, %v5392_v62 }
 0xd60   :  { %5393 = vrcp.f32 %v1970_v47 }
 0xd61   :  { %v2086_v37 = vpack.c.bf16 %v2085_v45, %v2084_v33  ;;  %v1703_v18 = vadd.f32 %v6489_v27, %v1635_v1 }
 0xd63   :  { %4905 = vmatmul.msk.bf16.vlgmr.msra.gmra.mxu2 %vm355_vm5, %v2086_v37 }
 0xd64   :  { %v1864_v63 = vpop.f32.mrf.mxu1 }
 0xd66   :  { %v5394_v34 = vpop.eup %5393 }
 0xd72   :  { %v1998_v39 = vpop.f32.mrf.mxu0 }
 0xd73   :  { %v2030_v31 = vadd.f32 %v1998_v39, %v1962_v13 }
 0xd75   :  { %v2111_v57 = vmul.f32 %v5394_v34, %v2030_v31 }
 0xd7a   :  { %v2000_v42 = vpop.f32.mrf.mxu0 }
 0xd8f   :  { %v1969_v59 = vpop.xlane.xlu0 %1968 }
 0xd90   :  { %v1971_v43 = vadd.f32 %v1969_v59, %v1963_v35 }
 0xd92   :  { %5395 = vrcp.f32 %v1971_v43 }
 0xd97   :  { %v1641_v52 = vpop.xlane.xlu0 %1640 }
 0xd98   :  { %v1643_v36 = vadd.f32 %v1641_v52, %v1635_v1  ;;  %v5396_v21 = vpop.eup %5395 }
 0xd9a   :  { %5397 = vrcp.f32 %v1643_v36  ;;  %v2026_v6 = vpop.f32.mrf.mxu1 }
 0xd9b   :  { %v2031_v17 = vadd.f32 %v2026_v6, %v1963_v35  ;;  %v5517_v6 = vld [vmem:[%s7374_s11] sm:$0x7] }
 0xd9c   :  { %v2185_v34 = vperm.slane %v5517_v6, 2 }
 0xd9d   :  { %v2112_v38 = vmul.f32 %v5396_v21, %v2031_v17 }
 0xd9f   :  { %v2113_v29 = vpack.c.bf16 %v2112_v38, %v2111_v57  ;;  %v5518_v38 = vld [vmem:[%s7375_s12] sm:$0x7] }
 0xda0   :  { %v5398_v3 = vpop.eup %5397 }
 0xda1   :  { %v2040_v0 = vmul.f32 %v5398_v3, %v1703_v18  ;;  %4906 = vmatmul.msk.bf16.vlgmr.msra.gmra.mxu3 %vm355_vm5, %v2113_v29  ;;  %v2188_v18 = vperm.slane %v5518_v38, 2 }
 0xda2   :  { %v2028_v55 = vpop.f32.mrf.mxu1 }
 0xda3   :  { %v2041_v44 = vpack.c.bf16 %v2040_v0, %v6548_v4 }
 0xda5   :  { %4903 = vmatmul.msk.bf16.vlgmr.msrb.gmra.mxu0 %vm355_vm5, %v2041_v44 }
 0xdaa   :  { %v2077_v10 = vpop.f32.mrf.mxu1 }
 0xdb2   :  { %v2079_v27 = vpop.f32.mrf.mxu1 }
 0xde6   :  { %v2102_v54 = vpop.f32.mrf.mxu2 }
 0xdee   :  { %v2104_v11 = vpop.f32.mrf.mxu2 }
 0xe22   :  { %v2057_v15 = vpop.f32.mrf.mxu0 }
 0xe23   :  { %v2078_v5 = vadd.f32 %v2077_v10, %v2057_v15  ;;  %v5234_v15 = vld [vmem:[%s7378_s15 + $0x10] sm:$0xff] }
 0xe24   :  { %v2129_v19 = vpop.f32.mrf.mxu3 }
 0xe25   :  { %v2107_v16 = vadd.f32 %v2102_v54, %v2078_v5  ;;  %v5235_v54 = vld [vmem:[%s7378_s15 + $0x18] sm:$0xff]  ;;  %v5233_v5 = vld [vmem:[%s7378_s15 + $0x8] sm:$0xff] }
 0xe26   :  { %2269 = vmatpush.bf16.msra.mxu1 %v5235_v54 }
 0xe27   :  { %v2134_v8 = vadd.f32 %v2129_v19, %v2107_v16  ;;  %v5232_v19 = vld [vmem:[%s7378_s15] sm:$0xff] }
 0xe29   :  { %v2137_v22 = vadd.f32 %v5299_v9, %v2134_v8 }
 0xe2a   :  { %v2059_v40 = vpop.f32.mrf.mxu0  ;;  %2270 = vmatpush.bf16.msra.mxu1 %v5234_v15 }
 0xe2b   :  { %v6565_v23 = vadd.f32 %v2137_v22, %v6123_v12  ;;  %v2080_v24 = vadd.f32 %v2079_v27, %v2059_v40 }
 0xe2c   :  { %v2131_v41 = vpop.f32.mrf.mxu3 }
 0xe2d   :  { %v2108_v26 = vadd.f32 %v2104_v11, %v2080_v24  ;;  %v2141_v4 = vsel %vm217_vm1, %v6565_v23, 0.0 }
 0xe2e   :  { %2142 = vadd.xlane.f32.xlu2 %v2141_v4  ;;  %2271 = vmatpush.bf16.msra.mxu1 %v5233_v5 }
 0xe2f   :  { %v2135_v56 = vadd.f32 %v2131_v41, %v2108_v26  ;;  %v5301_v26 = vld [vmem:[%s7379_s16] ss:$0 sm:$0xff] }
 0xe31   :  { %v2138_v30 = vadd.f32 %v5299_v9, %v2135_v56  ;;  %v5300_v9 = vld [vmem:[#allocation11] ss:$0 sm:$0xff] }
 0xe32   :  { %2272 = vmatpush.bf16.msra.mxu1 %v5232_v19 }
 0xe33   :  { %v6570_v32 = vadd.f32 %v2138_v30, %v6128_v20 }
 0xe35   :  { %v2144_v33 = vsel %vm217_vm1, %v6570_v32, 0.0 }
 0xe36   :  { %2145 = vadd.xlane.f32.xlu0 %v2144_v33 }
 0xea1   :  { %v2143_v45 = vpop.xlane.xlu2 %2142 }
 0xea2   :  { %v2147_v12 = vmul.f32 %v2143_v45, %v5938_v7 }
 0xea4   :  { %v2149_v37 = vsub.f32 %v6565_v23, %v2147_v12 }
 0xea6   :  { %v2151_v63 = vmul.f32 %v2149_v37, %v2149_v37 }
 0xea8   :  { %v2153_v39 = vsel %vm217_vm1, %v2151_v63, 0.0 }
 0xea9   :  { %v2146_v42 = vpop.xlane.xlu0 %2145  ;;  %2154 = vadd.xlane.f32.xlu2 %v2153_v39 }
 0xeaa   :  { %v2148_v46 = vmul.f32 %v2146_v42, %v5938_v7 }
 0xeac   :  { %v2150_v48 = vsub.f32 %v6570_v32, %v2148_v46 }
 0xeae   :  { %v2152_v20 = vmul.f32 %v2150_v48, %v2150_v48 }
 0xeb0   :  { %v2156_v28 = vsel %vm217_vm1, %v2152_v20, 0.0 }
 0xeb1   :  { %2157 = vadd.xlane.f32.xlu0 %v2156_v28 }
 0xf1c   :  { %v2155_v60 = vpop.xlane.xlu2 %2154 }
 0xf1d   :  { %v2159_v61 = vmul.f32 %v2155_v60, %v5938_v7  ;;  %v5241_v60 = vld [vmem:[%s7411_s9 + $0x58] sm:$0xff] }
 0xf1e   :  { %2445 = vmatpush.bf16.msrb.mxu0 %v5241_v60 }
 0xf1f   :  { %v2161_v14 = vadd.f32 1e-05, %v2159_v61 }
 0xf21   :  { %5399 = vrsqrt.f32 %v2161_v14  ;;  %vm2169_vm15 = vweird.f32 %v2161_v14 }
 0xf24   :  { %v2158_v51 = vpop.xlane.xlu0 %2157 }
 0xf25   :  { %v2160_v53 = vmul.f32 %v2158_v51, %v5938_v7  ;;  %v5239_v51 = vld [vmem:[%s7411_s9 + $0x48] sm:$0xff] }
 0xf26   :  { %2414 = vmatpush.bf16.msrb.mxu3 %v5239_v51 }
 0xf27   :  { %v5400_v25 = vpop.eup %5399  ;;  %v2162_v2 = vadd.f32 1e-05, %v2160_v53 }
 0xf28   :  { %v2164_v58 = vmul.f32 %v5400_v25, %v2161_v14  ;;  %vm2170_vm14 = vweird.f32 %v5400_v25 }
 0xf29   :  { %5401 = vrsqrt.f32 %v2162_v2  ;;  %vm2171_vm0 = vmor %vm2169_vm15, %vm2170_vm14  ;;  %vm2179_vm3 = vweird.f32 %v2162_v2 }
 0xf2a   :  { %v2165_v13 = vmul.f32 %v5400_v25, %v2164_v58  ;;  %v5238_v58 = vld [vmem:[%s7411_s9 + $0x40] sm:$0xff] }
 0xf2b   :  { %2415 = vmatpush.bf16.msrb.mxu3 %v5238_v58 }
 0xf2c   :  { %v2166_v59 = vmul.f32 0.5, %v2165_v13 }
 0xf2e   :  { %v2167_v35 = vsub.f32 1.5, %v2166_v59 }
 0xf2f   :  { %v5402_v47 = vpop.eup %5401 }
 0xf30   :  { %v2168_v43 = vmul.f32 %v5400_v25, %v2167_v35  ;;  %v2174_v62 = vmul.f32 %v5402_v47, %v2162_v2  ;;  %vm2180_vm2 = vweird.f32 %v5402_v47  ;;  %v5236_v2 = vld [vmem:[%s7411_s9 + $0x30] sm:$0xff] }
 0xf31   :  { %vm2181_vm4 = vmor %vm2179_vm3, %vm2180_vm2  ;;  %2386 = vmatpush.bf16.msrb.mxu2 %v5236_v2 }
 0xf32   :  { %v2175_v1 = vmul.f32 %v5402_v47, %v2174_v62  ;;  %v2172_v52 = vsel %vm2171_vm0, %v5400_v25, %v2168_v43  ;;  %v5240_v25 = vld [vmem:[%s7411_s9 + $0x50] sm:$0xff] }
 0xf33   :  { %v2183_v17 = vmul.f32 %v2172_v52, %v2149_v37  ;;  %2446 = vmatpush.bf16.msrb.mxu0 %v5240_v25 }
 0xf34   :  { %v2176_v36 = vmul.f32 0.5, %v2175_v1 }
 0xf35   :  { %v2186_v29 = vmul.f32 %v2185_v34, %v2183_v17 }
 0xf36   :  { %v2177_v31 = vsub.f32 1.5, %v2176_v36 }
 0xf37   :  { %v2189_v55 = vadd.f32 %v2188_v18, %v2186_v29  ;;  %v4934_v29 = vld [vmem:[%s7375_s12 + $0x4] sm:$0x7] }
 0xf38   :  { %v2178_v21 = vmul.f32 %v5402_v47, %v2177_v31 }
 0xf3a   :  { %v2182_v57 = vsel %vm2181_vm4, %v5402_v47, %v2178_v21 }
 0xf3b   :  { %v2184_v3 = vmul.f32 %v2182_v57, %v2150_v48 }
 0xf3d   :  { %v2187_v0 = vmul.f32 %v2185_v34, %v2184_v3  ;;  %v4933_v34 = vld [vmem:[%s7374_s11 + $0x4] sm:$0x7] }
 0xf3e   :  { %v2333_v38 = vperm.slane %v4933_v34, 0 }
 0xf3f   :  { %v2190_v44 = vadd.f32 %v2188_v18, %v2187_v0 }
 0xf41   :  { %v2191_v10 = vpack.c.bf16 %v2190_v44, %v2189_v55  ;;  %v2336_v55 = vperm.slane %v4934_v29, 0 }
 0xf43   :  { %4915 = vmatmul.msk.bf16.vlgmr.msra.gmra.mxu0 %vm217_vm1, %v2191_v10 }
 0xfc0   :  { %v2222_v16 = vpop.f32.mrf.mxu0 }
 0xfc1   :  { %v2223_v8 = vadd.f32 %v5300_v9, %v2222_v16  ;;  %v5519_v16 = vld [vmem:[#allocation2] sm:$0xff] }
 0xfc3   :  { %v2227_v40 = vmax.f32 %v2223_v8, 0.0  ;;  %v5520_v8 = vld [vmem:[#allocation2 + $0x8] sm:$0xff] }
 0xfc8   :  { %v2224_v22 = vpop.f32.mrf.mxu0 }
 0xfc9   :  { %v2225_v27 = vadd.f32 %v5300_v9, %v2224_v22 }
 0xfcb   :  { %v2228_v24 = vmax.f32 %v2225_v27, 0.0 }
 0xfcd   :  { %v2229_v11 = vpack.c.bf16 %v2228_v24, %v2227_v40  ;;  %v4947_v24 = vld [vmem:[%s7412_s23 + $0x4] sm:$0x7] }
 0xfcf   :  { %4932 = vmatmul.msk.bf16.vlgmr.msra.gmra.mxu1 %vm1421_vm13, %v2229_v11  ;;  %v2423_v11 = vperm.slane %v4947_v24, 2 }
0x104c   :  { %v2274_v4 = vpop.f32.mrf.mxu1 }
0x104d   :  { %v2279_v41 = vadd.f32 %v2274_v4, %v6565_v23 }
0x104f   :  { %v6606_v56 = vadd.f32 %v5301_v26, %v2279_v41 }
0x1051   :  { %v2289_v30 = vsel %vm217_vm1, %v6606_v56, 0.0 }
0x1052   :  { %2290 = vadd.xlane.f32.xlu2 %v2289_v30 }
0x1054   :  { %v2276_v33 = vpop.f32.mrf.mxu1 }
0x1055   :  { %v2280_v45 = vadd.f32 %v2276_v33, %v6570_v32  ;;  %v2363_v33 = vperm.slane %v4947_v24, 0 }
0x1057   :  { %v6611_v12 = vadd.f32 %v5301_v26, %v2280_v45  ;;  %v2395_v45 = vperm.slane %v4947_v24, 1 }
0x1059   :  { %v2292_v37 = vsel %vm217_vm1, %v6611_v12, 0.0 }
0x105a   :  { %2293 = vadd.xlane.f32.xlu1 %v2292_v37 }
0x10c5   :  { %v2291_v63 = vpop.xlane.xlu2 %2290 }
0x10c6   :  { %v2295_v39 = vmul.f32 %v2291_v63, %v5938_v7 }
0x10c8   :  { %v2297_v23 = vsub.f32 %v6606_v56, %v2295_v39 }
0x10ca   :  { %v2299_v42 = vmul.f32 %v2297_v23, %v2297_v23 }
0x10cc   :  { %v2301_v46 = vsel %vm217_vm1, %v2299_v42, 0.0 }
0x10cd   :  { %2302 = vadd.xlane.f32.xlu0 %v2301_v46  ;;  %v2294_v48 = vpop.xlane.xlu1 %2293 }
0x10ce   :  { %v2296_v20 = vmul.f32 %v2294_v48, %v5938_v7 }
0x10d0   :  { %v2298_v32 = vsub.f32 %v6611_v12, %v2296_v20 }
0x10d2   :  { %v2300_v28 = vmul.f32 %v2298_v32, %v2298_v32 }
0x10d4   :  { %v2304_v49 = vsel %vm217_vm1, %v2300_v28, 0.0 }
0x10d5   :  { %2305 = vadd.xlane.f32.xlu2 %v2304_v49 }
0x1140   :  { %v2303_v61 = vpop.xlane.xlu0 %2302 }
0x1141   :  { %v2307_v14 = vmul.f32 %v2303_v61, %v5938_v7 }
0x1143   :  { %v2309_v53 = vadd.f32 1e-05, %v2307_v14 }
0x1145   :  { %5403 = vrsqrt.f32 %v2309_v53  ;;  %vm2317_vm8 = vweird.f32 %v2309_v53 }
0x1148   :  { %v2306_v13 = vpop.xlane.xlu2 %2305 }
0x1149   :  { %v2308_v59 = vmul.f32 %v2306_v13, %v5938_v7 }
0x114b   :  { %v5404_v35 = vpop.eup %5403  ;;  %v2310_v47 = vadd.f32 1e-05, %v2308_v59 }
0x114c   :  { %v2312_v43 = vmul.f32 %v5404_v35, %v2309_v53  ;;  %vm2318_vm7 = vweird.f32 %v5404_v35 }
0x114d   :  { %5405 = vrsqrt.f32 %v2310_v47  ;;  %vm2319_vm9 = vmor %vm2317_vm8, %vm2318_vm7  ;;  %vm2327_vm11 = vweird.f32 %v2310_v47 }
0x114e   :  { %v2313_v62 = vmul.f32 %v5404_v35, %v2312_v43 }
0x1150   :  { %v2314_v1 = vmul.f32 0.5, %v2313_v62 }
0x1152   :  { %v2315_v52 = vsub.f32 1.5, %v2314_v1 }
0x1153   :  { %v5406_v36 = vpop.eup %5405 }
0x1154   :  { %v2316_v31 = vmul.f32 %v5404_v35, %v2315_v52  ;;  %v2322_v6 = vmul.f32 %v5406_v36, %v2310_v47  ;;  %vm2328_vm10 = vweird.f32 %v5406_v36 }
0x1155   :  { %vm2329_vm12 = vmor %vm2327_vm11, %vm2328_vm10 }
0x1156   :  { %v2320_v17 = vsel %vm2319_vm9, %v5404_v35, %v2316_v31  ;;  %v2323_v21 = vmul.f32 %v5406_v36, %v2322_v6 }
0x1157   :  { %v2331_v18 = vmul.f32 %v2320_v17, %v2297_v23 }
0x1158   :  { %v2324_v57 = vmul.f32 0.5, %v2323_v21 }
0x1159   :  { %v2334_v44 = vmul.f32 %v2333_v38, %v2331_v18 }
0x115a   :  { %v2325_v3 = vsub.f32 1.5, %v2324_v57 }
0x115b   :  { %v2337_v15 = vadd.f32 %v2336_v55, %v2334_v44 }
0x115c   :  { %v2326_v0 = vmul.f32 %v5406_v36, %v2325_v3 }
0x115d   :  { %v2339_v9 = vadd.f32 %v5519_v16, %v2337_v15 }
0x115e   :  { %v2330_v10 = vsel %vm2329_vm12, %v5406_v36, %v2326_v0 }
0x115f   :  { %v2332_v54 = vmul.f32 %v2330_v10, %v2298_v32 }
0x1161   :  { %v2335_v5 = vmul.f32 %v2333_v38, %v2332_v54 }
0x1163   :  { %v2338_v19 = vadd.f32 %v2336_v55, %v2335_v5 }
0x1165   :  { %v2340_v22 = vadd.f32 %v5520_v8, %v2338_v19  ;;  %v2422_v27 = vpack.c.bf16 %v2338_v19, %v2337_v15 }
0x1167   :  { %4978 = vmatmul.msk.bf16.vlgmr.msrb.gmra.mxu0 %vm217_vm1, %v2422_v27  ;;  %v2362_v40 = vpack.c.bf16 %v2340_v22, %v2339_v9 }
0x1169   :  { %4960 = vmatmul.msk.bf16.vlgmr.msrb.gmra.mxu2 %vm217_vm1, %v2362_v40  ;;  %4969 = vmatmul.msk.bf16.vlgmr.msrb.gmra.mxu3 %vm217_vm1, %v2362_v40 }
0x11e4   :  { %v2448_v26 = vpop.f32.mrf.mxu0 }
0x11e5   :  { %v2449_v4 = vadd.f32 %v2448_v26, %v2423_v11 }
0x11e7   :  { %v6653_v41 = vpack.c.bf16 %v2449_v4, %v2449_v4 }
0x11e9   :  { %v2525_v30 = vsel %vm421_vm6, %v6653_v41, 0  ;;  %v2643_v8 = vunpack.c.l.b16 %v6653_v41 }
0x11ea   :  { %2534 = vmatpush.bf16.msra.mxu3 %v2525_v30 }
0x11eb   :  { %v6689_v22 = vpack.c.b16 %v2643_v8, %v2643_v8 }
0x11ec   :  { %v2388_v37 = vpop.f32.mrf.mxu2  ;;  %v2417_v63 = vpop.f32.mrf.mxu3 }
0x11ed   :  { %v2389_v39 = vadd.f32 %v2388_v37, %v2363_v33  ;;  %v2418_v23 = vadd.f32 %v2417_v63, %v2395_v45  ;;  %v2450_v42 = vpop.f32.mrf.mxu0 }
0x11ee   :  { %v2451_v46 = vadd.f32 %v2450_v42, %v2423_v11 }
0x11ef   :  { %v2393_v48 = vmul.f32 0.35355338, %v2389_v39  ;;  %v2455_v20 = vpack.c.bf16 %v2418_v23, %v2418_v23 }
0x11f0   :  { %v6657_v32 = vpack.c.bf16 %v2451_v46, %v2451_v46 }
0x11f1   :  { %v2453_v28 = vpack.c.bf16 %v2393_v48, %v2393_v48  ;;  %v2463_v49 = vsel %vm355_vm5, %v2455_v20, 0  ;;  %v2566_v60 = vunpack.c.l.b16 %v2455_v20 }
0x11f2   :  { %2472 = vmatpush.bf16.xpose.msrb.mxu1 %v2463_v49  ;;  %v2544_v61 = vsel %vm421_vm6, %v6657_v32, 0  ;;  %v2667_v24 = vunpack.c.l.b16 %v6657_v32 }
0x11f3   :  { %v2561_v14 = vunpack.c.l.b16 %v2453_v28  ;;  %v6662_v50 = vpack.c.b16 %v2566_v60, %v2566_v60  ;;  %2553 = vmatpush.bf16.msra.mxu0 %v2544_v61 }
0x11f4   :  { %v2390_v51 = vpop.f32.mrf.mxu2  ;;  %v2419_v53 = vpop.f32.mrf.mxu3  ;;  %v6698_v11 = vpack.c.b16 %v2667_v24, %v2667_v24 }
0x11f5   :  { %v2391_v25 = vadd.f32 %v2390_v51, %v2363_v33  ;;  %v2420_v2 = vadd.f32 %v2419_v53, %v2395_v45  ;;  %2568 = vrot.lane.b32.xlu1 %v6662_v50, %s5769_s0  ;;  %v6666_v58 = vpack.c.b16 %v2561_v14, %v2561_v14 }
0x11f7   :  { %v2394_v13 = vmul.f32 0.35355338, %v2391_v25  ;;  %v2456_v59 = vpack.c.bf16 %v2420_v2, %v2420_v2  ;;  %2563 = vrot.lane.b32.xlu0 %v6666_v58, %s5769_s0 }
0x11f9   :  { %v2454_v35 = vpack.c.bf16 %v2394_v13, %v2394_v13  ;;  %v2595_v47 = vunpack.c.l.b16 %v2456_v59  ;;  %4979 = vmatmul.msk.bf16.vlgmr.msrb.gmra.mxu1 %vm355_vm5, %v2453_v28  ;;  %v2482_v43 = vsel %vm355_vm5, %v2456_v59, 0 }
0x11fa   :  { %2491 = vmatpush.bf16.xpose.msra.mxu2 %v2482_v43 }
0x11fb   :  { %v6672_v62 = vpack.c.b16 %v2595_v47, %v2595_v47  ;;  %v2590_v1 = vunpack.c.l.b16 %v2454_v35 }
0x11fd   :  { %2597 = vrot.lane.b32.xlu2 %v6672_v62, %s5769_s0  ;;  %v6676_v52 = vpack.c.b16 %v2590_v1, %v2590_v1 }
0x11ff   :  { %2592 = vrot.lane.b32.xlu0 %v6676_v52, %s5769_s0 }
0x1201   :  { %4980 = vmatmul.msk.bf16.vlgmr.msra.gmra.mxu2 %vm355_vm5, %v2454_v35 }
0x1257   :  { %v2598_v36 = vpop.permute.xlu2 %2597 }
0x1258   :  { %v2603_v31 = vsel %vm355_vm5, %v2598_v36, 0 }
0x1259   :  { %2612 = vmatpush.bf16.xpose.msrb.mxu2 %v2603_v31 }
0x1267   :  { %v2569_v6 = vpop.permute.xlu1 %2568 }
0x1268   :  { %v2574_v34 = vsel %vm355_vm5, %v2569_v6, 0 }
0x1269   :  { %2583 = vmatpush.bf16.xpose.msra.mxu1 %v2574_v34  ;;  %v2564_v17 = vpop.permute.xlu0 %2563 }
0x1270   :  { %4983 = vmatmul.msk.bf16.vlgmr.msra.gmra.mxu1 %vm355_vm5, %v2564_v17 }
0x1271   :  { %v2593_v21 = vpop.permute.xlu0 %2592 }
0x1272   :  { %4984 = vmatmul.msk.bf16.vlgmr.msrb.gmra.mxu2 %vm355_vm5, %v2593_v21 }
0x1276   :  { %v2474_v57 = vpop.f32.mrf.mxu1 }
0x1277   :  { %v2497_v38 = vsel %vm355_vm5, %v2474_v57, -inf }
0x1278   :  { %2498 = vmax.xlane.f32.xlu1 %v2497_v38 }
0x127e   :  { %v2476_v18 = vpop.f32.mrf.mxu1 }
0x1284   :  { %v2493_v29 = vpop.f32.mrf.mxu2 }
0x1285   :  { %v2500_v27 = vsel %vm355_vm5, %v2493_v29, -inf }
0x128c   :  { %v2495_v3 = vpop.f32.mrf.mxu2 }
0x12eb   :  { %v2499_v0 = vpop.xlane.xlu1 %2498 }
0x12ec   :  { %v2503_v55 = vsub.f32 %v2474_v57, %v2499_v0 }
0x12ed   :  { %v2585_v44 = vpop.f32.mrf.mxu1 }
0x12ee   :  { %v2505_v10 = vmul.f32 1.442695, %v2503_v55  ;;  %v2618_v54 = vsel %vm355_vm5, %v2585_v44, -inf }
0x12ef   :  { %2619 = vmax.xlane.f32.xlu2 %v2618_v54 }
0x12f0   :  { %5407 = vpow2.f32 %v2505_v10 }
0x12f5   :  { %v2587_v15 = vpop.f32.mrf.mxu1  ;;  %v2614_v5 = vpop.f32.mrf.mxu2 }
0x12f6   :  { %v5408_v19 = vpop.eup %5407  ;;  %v2621_v40 = vsel %vm355_vm5, %v2614_v5, -inf }
0x12f7   :  { %v2509_v16 = vsel %vm355_vm5, %v5408_v19, 0.0 }
0x12f8   :  { %2510 = vadd.xlane.f32.xlu0 %v2509_v16 }
0x12fd   :  { %v2616_v9 = vpop.f32.mrf.mxu2 }
0x1307   :  { %2645 = vrot.lane.b32.xlu2 %v6689_v22, %s5769_s0 }
0x130c   :  { %2733 = vrot.lane.b32.xlu0 %v6662_v50, %s5770_s25 }
0x1330   :  { %2501 = vmax.xlane.f32.xlu2 %v2500_v27 }
0x1336   :  { %2622 = vmax.xlane.f32.xlu0 %v2621_v40  ;;  %v4948_v40 = vld [vmem:[%s7413_s6 + $0x10] sm:$0xf] }
0x1337   :  { %v2715_v24 = vsel %vm421_vm6, %v4948_v40, 0 }
0x1338   :  { %2724 = vmatpush.bf16.msra.mxu2 %v2715_v24 }
0x134a   :  { %2669 = vrot.lane.b32.xlu0 %v6698_v11, %s5769_s0 }
0x1362   :  { %v2620_v26 = vpop.xlane.xlu2 %2619 }
0x1363   :  { %v2624_v4 = vsub.f32 %v2585_v44, %v2620_v26 }
0x1365   :  { %v2626_v41 = vmul.f32 1.442695, %v2624_v4 }
0x1367   :  { %5409 = vpow2.f32 %v2626_v41 }
0x136a   :  { %v2646_v30 = vpop.permute.xlu2 %2645 }
0x136b   :  { %v2651_v33 = vsel %vm421_vm6, %v2646_v30, 0  ;;  %v2511_v45 = vpop.xlane.xlu0 %2510 }
0x136c   :  { %5411 = vrcp.f32 %v2511_v45  ;;  %2660 = vmatpush.bf16.msrb.mxu3 %v2651_v33 }
0x136d   :  { %v5410_v37 = vpop.eup %5409 }
0x136e   :  { %v2630_v63 = vsel %vm355_vm5, %v5410_v37, 0.0 }
0x136f   :  { %2631 = vadd.xlane.f32.xlu1 %v2630_v63 }
0x1372   :  { %v5412_v39 = vpop.eup %5411 }
0x1373   :  { %v2517_v23 = vmul.f32 %v5412_v39, %v5408_v19 }
0x1375   :  { %v2519_v42 = vpack.c.bf16 %v2517_v23, %v2517_v23 }
0x1377   :  { %4981 = vmatmul.msk.bf16.vlgmr.msra.gmra.mxu3 %vm355_vm5, %v2519_v42 }
0x137e   :  { %v2734_v46 = vpop.permute.xlu0 %2733 }
0x137f   :  { %v2739_v48 = vsel %vm355_vm5, %v2734_v46, 0 }
0x1380   :  { %2748 = vmatpush.bf16.xpose.msra.mxu3 %v2739_v48 }
0x1388   :  { %2731 = vrot.lane.b32.xlu1 %v6666_v58, %s5770_s25 }
0x13a3   :  { %v2502_v20 = vpop.xlane.xlu2 %2501 }
0x13a4   :  { %v2504_v32 = vsub.f32 %v2493_v29, %v2502_v20 }
0x13a6   :  { %v2507_v28 = vmul.f32 1.442695, %v2504_v32 }
0x13a8   :  { %5413 = vpow2.f32 %v2507_v28 }
0x13a9   :  { %v2623_v49 = vpop.xlane.xlu0 %2622 }
0x13aa   :  { %v2625_v60 = vsub.f32 %v2614_v5, %v2623_v49 }
0x13ac   :  { %v2628_v61 = vmul.f32 1.442695, %v2625_v60 }
0x13ae   :  { %v5414_v14 = vpop.eup %5413  ;;  %5415 = vpow2.f32 %v2628_v61 }
0x13af   :  { %v2512_v51 = vsel %vm355_vm5, %v5414_v14, 0.0 }
0x13b2   :  { %2513 = vadd.xlane.f32.xlu1 %v2512_v51 }
0x13b4   :  { %v5416_v53 = vpop.eup %5415 }
0x13b5   :  { %v2633_v25 = vsel %vm355_vm5, %v5416_v53, 0.0 }
0x13b6   :  { %2634 = vadd.xlane.f32.xlu2 %v2633_v25 }
0x13bc   :  { %v2670_v2 = vpop.permute.xlu0 %2669 }
0x13bd   :  { %v2675_v13 = vsel %vm421_vm6, %v2670_v2, 0  ;;  %v4950_v2 = vld [vmem:[%s7413_s6 + $0x18] sm:$0xf] }
0x13be   :  { %2684 = vmatpush.bf16.msrb.mxu0 %v2675_v13  ;;  %v2848_v13 = vsel %vm421_vm6, %v4950_v2, 0  ;;  %v5302_v2 = vld [vmem:[#allocation5 + $0x1] ss:$0 sm:$0xff] }
0x13cb   :  { %2756 = vrot.lane.b32.xlu1 %v6672_v62, %s5770_s25 }
0x13ce   :  { %2754 = vrot.lane.b32.xlu2 %v6676_v52, %s5770_s25 }
0x13d6   :  { %2801 = vrot.lane.b32.xlu2 %v6689_v22, %s5770_s25 }
0x13de   :  { %2868 = vrot.lane.b32.xlu2 %v6662_v50, %s5771_s5  ;;  %v4949_v50 = vld [vmem:[%s7413_s6 + $0x14] sm:$0xf] }
0x13df   :  { %v2695_v6 = vsel %vm421_vm6, %v4949_v50, 0 }
0x13e0   :  { %2704 = vmatpush.bf16.msrb.mxu1 %v2695_v6 }
0x13e2   :  { %v2632_v59 = vpop.xlane.xlu1 %2631 }
0x13e3   :  { %5417 = vrcp.f32 %v2632_v59 }
0x13e6   :  { %2891 = vrot.lane.b32.xlu2 %v6672_v62, %s5771_s5 }
0x13e9   :  { %v5418_v35 = vpop.eup %5417 }
0x13ea   :  { %v2638_v47 = vmul.f32 %v5418_v35, %v5410_v37 }
0x13ec   :  { %v2640_v43 = vpack.c.bf16 %v2638_v47, %v2638_v47 }
0x13ee   :  { %2866 = vrot.lane.b32.xlu2 %v6666_v58, %s5771_s5  ;;  %4985 = vmatmul.msk.bf16.vlgmr.msrb.gmra.mxu3 %vm355_vm5, %v2640_v43 }
0x13ef   :  { %2857 = vmatpush.bf16.msrb.mxu3 %v2848_v13 }
0x13fa   :  { %v2536_v1 = vpop.f32.mrf.mxu3  ;;  %v2732_v36 = vpop.permute.xlu1 %2731 }
0x13fe   :  { %4989 = vmatmul.msk.bf16.vlgmr.msra.gmra.mxu3 %vm355_vm5, %v2732_v36 }
0x1402   :  { %v2538_v31 = vpop.f32.mrf.mxu3 }
0x1425   :  { %v2514_v62 = vpop.xlane.xlu1 %2513 }
0x1426   :  { %5419 = vrcp.f32 %v2514_v62 }
0x1429   :  { %v2635_v34 = vpop.xlane.xlu2 %2634 }
0x142a   :  { %5421 = vrcp.f32 %v2635_v34 }
0x142c   :  { %v5420_v17 = vpop.eup %5419 }
0x142d   :  { %v2518_v21 = vmul.f32 %v5420_v17, %v5414_v14 }
0x142f   :  { %v2520_v58 = vpack.c.bf16 %v2518_v21, %v2518_v21 }
0x1430   :  { %v5422_v38 = vpop.eup %5421 }
0x1431   :  { %4982 = vmatmul.msk.bf16.vlgmr.msra.gmra.mxu0 %vm355_vm5, %v2520_v58  ;;  %v2755_v57 = vpop.permute.xlu2 %2754  ;;  %v2639_v3 = vmul.f32 %v5422_v38, %v5416_v53 }
0x1433   :  { %v2641_v44 = vpack.c.bf16 %v2639_v3, %v2639_v3 }
0x1439   :  { %v2802_v18 = vpop.permute.xlu2 %2801 }
0x143a   :  { %v2807_v29 = vsel %vm421_vm6, %v2802_v18, 0 }
0x143b   :  { %2816 = vmatpush.bf16.msra.mxu1 %v2807_v29 }
0x143d   :  { %v2757_v0 = vpop.permute.xlu1 %2756 }
0x143e   :  { %v2762_v55 = vsel %vm355_vm5, %v2757_v0, 0 }
0x143f   :  { %2771 = vmatpush.bf16.xpose.msra.mxu0 %v2762_v55 }
0x1441   :  { %4986 = vmatmul.msk.bf16.vlgmr.msrb.gmra.mxu0 %vm355_vm5, %v2641_v44  ;;  %v2869_v10 = vpop.permute.xlu2 %2868 }
0x1442   :  { %v2874_v54 = vsel %vm355_vm5, %v2869_v10, 0 }
0x1447   :  { %2883 = vmatpush.bf16.xpose.msrb.mxu0 %v2874_v54 }
0x1449   :  { %v2892_v15 = vpop.permute.xlu2 %2891 }
0x144a   :  { %v2897_v45 = vsel %vm355_vm5, %v2892_v15, 0 }
0x1451   :  { %4990 = vmatmul.msk.bf16.vlgmr.msra.gmra.mxu0 %vm355_vm5, %v2755_v57  ;;  %v2867_v5 = vpop.permute.xlu2 %2866 }
0x1461   :  { %4994 = vmatmul.msk.bf16.vlgmr.msrb.gmra.mxu0 %vm355_vm5, %v2867_v5 }
0x1471   :  { %v2662_v19 = vpop.f32.mrf.mxu3 }
0x1479   :  { %v2664_v16 = vpop.f32.mrf.mxu3 }
0x1481   :  { %v2750_v9 = vpop.f32.mrf.mxu3 }
0x1482   :  { %v2777_v8 = vsel %vm355_vm5, %v2750_v9, -inf }
0x1483   :  { %2778 = vmax.xlane.f32.xlu0 %v2777_v8 }
0x1489   :  { %v2752_v27 = vpop.f32.mrf.mxu3 }
0x1497   :  { %2889 = vrot.lane.b32.xlu0 %v6676_v52, %s5771_s5 }
0x14ae   :  { %v2555_v26 = vpop.f32.mrf.mxu0 }
0x14af   :  { %v2559_v4 = vpack.c.bf16 %v2555_v26, %v2536_v1 }
0x14b1   :  { %4988 = vmatmul.msk.bf16.vlgmr.msra.gmra.mxu2 %vm355_vm5, %v2559_v4 }
0x14b6   :  { %v2557_v41 = vpop.f32.mrf.mxu0 }
0x14be   :  { %v2686_v30 = vpop.f32.mrf.mxu0 }
0x14bf   :  { %v2690_v33 = vpack.c.bf16 %v2686_v30, %v2662_v19 }
0x14c1   :  { %4987 = vmatmul.msk.bf16.vlgmr.msrb.gmra.mxu1 %vm355_vm5, %v2690_v33 }
0x14c2   :  { %2906 = vmatpush.bf16.xpose.msrb.mxu1 %v2897_v45 }
0x14c6   :  { %v2688_v37 = vpop.f32.mrf.mxu0 }
0x14ce   :  { %v2773_v63 = vpop.f32.mrf.mxu0 }
0x14cf   :  { %v2780_v39 = vsel %vm355_vm5, %v2773_v63, -inf }
0x14d0   :  { %2781 = vmax.xlane.f32.xlu2 %v2780_v39 }
0x14d6   :  { %v2775_v23 = vpop.f32.mrf.mxu0 }
0x14de   :  { %v2885_v42 = vpop.f32.mrf.mxu0 }
0x14df   :  { %v2912_v52 = vsel %vm355_vm5, %v2885_v42, -inf }
0x14e0   :  { %2913 = vmax.xlane.f32.xlu0 %v2912_v52 }
0x14e6   :  { %v2887_v46 = vpop.f32.mrf.mxu0 }
0x14f4   :  { %2957 = vrot.lane.b32.xlu0 %v6698_v11, %s5771_s5 }
0x14f6   :  { %v2779_v48 = vpop.xlane.xlu0 %2778 }
0x14f7   :  { %v2783_v20 = vsub.f32 %v2750_v9, %v2779_v48 }
0x14f9   :  { %v2785_v32 = vmul.f32 1.442695, %v2783_v20 }
0x14fb   :  { %5423 = vpow2.f32 %v2785_v32 }
0x1501   :  { %v5424_v28 = vpop.eup %5423 }
0x1502   :  { %v2789_v49 = vsel %vm355_vm5, %v5424_v28, 0.0 }
0x1503   :  { %2790 = vadd.xlane.f32.xlu1 %v2789_v49 }
0x1509   :  { %v2890_v47 = vpop.permute.xlu0 %2889 }
0x1534   :  { %v2726_v60 = vpop.f32.mrf.mxu2 }
0x153c   :  { %v2728_v5 = vpop.f32.mrf.mxu2 }
0x153e   :  { %v2706_v61 = vpop.f32.mrf.mxu1 }
0x153f   :  { %v2727_v14 = vadd.f32 %v2726_v60, %v2706_v61 }
0x1543   :  { %v2782_v51 = vpop.xlane.xlu2 %2781 }
0x1544   :  { %v2784_v53 = vsub.f32 %v2773_v63, %v2782_v51  ;;  %v5244_v51 = vld [vmem:[%s7414_s28 + $0x40] sm:$0xff] }
0x1546   :  { %v2787_v25 = vmul.f32 1.442695, %v2784_v53  ;;  %v2708_v0 = vpop.f32.mrf.mxu1  ;;  %v5248_v53 = vld [vmem:[%s7415_s30] sm:$0xff] }
0x1548   :  { %5425 = vpow2.f32 %v2787_v25  ;;  %v5249_v25 = vld [vmem:[%s7415_s30 + $0x8] sm:$0xff] }
0x154e   :  { %v5426_v59 = vpop.eup %5425 }
0x154f   :  { %v2792_v35 = vsel %vm355_vm5, %v5426_v59, 0.0 }
0x1550   :  { %2793 = vadd.xlane.f32.xlu1 %v2792_v35 }
0x1553   :  { %v2914_v43 = vpop.xlane.xlu0 %2913 }
0x1554   :  { %v2918_v34 = vsub.f32 %v2885_v42, %v2914_v43 }
0x1556   :  { %v2920_v17 = vmul.f32 1.442695, %v2918_v34 }
0x1566   :  { %v2958_v1 = vpop.permute.xlu0 %2957 }
0x1567   :  { %v2963_v36 = vsel %vm421_vm6, %v2958_v1, 0 }
0x1568   :  { %2972 = vmatpush.bf16.msra.mxu3 %v2963_v36 }
0x1569   :  { %2822 = vrot.lane.b32.xlu1 %v6698_v11, %s5770_s25 }
0x1576   :  { %v2791_v31 = vpop.xlane.xlu1 %2790 }
0x1577   :  { %5427 = vrcp.f32 %v2791_v31 }
0x1578   :  { %5429 = vpow2.f32 %v2920_v17 }
0x157d   :  { %v5428_v50 = vpop.eup %5427 }
0x157e   :  { %v2797_v6 = vmul.f32 %v5428_v50, %v5424_v28  ;;  %v5430_v21 = vpop.eup %5429 }
0x157f   :  { %v2924_v58 = vsel %vm355_vm5, %v5430_v21, 0.0 }
0x1580   :  { %v2799_v62 = vpack.c.bf16 %v2797_v6, %v2797_v6 }
0x1582   :  { %4991 = vmatmul.msk.bf16.vlgmr.msra.gmra.mxu1 %vm355_vm5, %v2799_v62  ;;  %v5250_v62 = vld [vmem:[%s7415_s30 + $0x10] sm:$0xff] }
0x1592   :  { %4995 = vmatmul.msk.bf16.vlgmr.msrb.gmra.mxu1 %vm355_vm5, %v2890_v47  ;;  %v2729_v47 = vadd.f32 %v2728_v5, %v2708_v0  ;;  %v5259_v0 = vld [vmem:[%s7416_s14 + $0x18] sm:$0xff] }
0x1593   :  { %2925 = vadd.xlane.f32.xlu1 %v2924_v58  ;;  %v5256_v58 = vld [vmem:[%s7416_s14] sm:$0xff] }
0x15c3   :  { %v2794_v57 = vpop.xlane.xlu1 %2793 }
0x15c4   :  { %5431 = vrcp.f32 %v2794_v57  ;;  %v5252_v57 = vld [vmem:[%s7415_s30 + $0x20] sm:$0xff] }
0x15ca   :  { %v5432_v38 = vpop.eup %5431 }
0x15cb   :  { %v2798_v11 = vmul.f32 %v5432_v38, %v5426_v59  ;;  %v5257_v38 = vld [vmem:[%s7416_s14 + $0x8] sm:$0xff] }
0x15cd   :  { %v2800_v3 = vpack.c.bf16 %v2798_v11, %v2798_v11  ;;  %v5253_v11 = vld [vmem:[%s7415_s30 + $0x28] sm:$0xff] }
0x15db   :  { %v2823_v18 = vpop.permute.xlu1 %2822 }
0x15dc   :  { %v2828_v29 = vsel %vm421_vm6, %v2823_v18, 0  ;;  %v5254_v18 = vld [vmem:[%s7415_s30 + $0x30] sm:$0xff] }
0x15dd   :  { %2837 = vmatpush.bf16.msrb.mxu2 %v2828_v29  ;;  %v5255_v29 = vld [vmem:[%s7415_s30 + $0x38] sm:$0xff] }
0x15e0   :  { %4992 = vmatmul.msk.bf16.vlgmr.msrb.gmra.mxu2 %vm355_vm5, %v2800_v3  ;;  %v5258_v3 = vld [vmem:[%s7416_s14 + $0x10] sm:$0xff] }
0x15ff   :  { %v2818_v55 = vpop.f32.mrf.mxu1 }
0x1606   :  { %v2926_v30 = vpop.xlane.xlu1 %2925 }
0x1607   :  { %v2820_v44 = vpop.f32.mrf.mxu1 }
0x160f   :  { %v2908_v10 = vpop.f32.mrf.mxu1 }
0x1610   :  { %v2915_v54 = vsel %vm355_vm5, %v2908_v10, -inf }
0x1611   :  { %2916 = vmax.xlane.f32.xlu2 %v2915_v54 }
0x1617   :  { %v2910_v15 = vpop.f32.mrf.mxu1 }
0x1618   :  { %v5260_v15 = vld [vmem:[%s7416_s14 + $0x20] sm:$0xff] }
0x1663   :  { %v2839_v19 = vpop.f32.mrf.mxu2 }
0x1664   :  { %v2843_v16 = vpack.c.bf16 %v2839_v19, %v2818_v55 }
0x1666   :  { %4993 = vmatmul.msk.bf16.vlgmr.msrb.gmra.mxu3 %vm355_vm5, %v2843_v16 }
0x166b   :  { %v2841_v9 = vpop.f32.mrf.mxu2 }
0x1684   :  { %v2917_v8 = vpop.xlane.xlu2 %2916 }
0x1685   :  { %v2919_v27 = vsub.f32 %v2908_v10, %v2917_v8 }
0x1687   :  { %v2922_v40 = vmul.f32 1.442695, %v2919_v27 }
0x1689   :  { %5433 = vpow2.f32 %v2922_v40 }
0x168a   :  { %5435 = vrcp.f32 %v2926_v30  ;;  %v6872_v30 = vld [vmem:[%s7417_s13 + $0x4] sm:$0x7] }
0x168f   :  { %v5434_v24 = vpop.eup %5433 }
0x1690   :  { %v2927_v26 = vsel %vm355_vm5, %v5434_v24, 0.0  ;;  %v5436_v45 = vpop.eup %5435 }
0x1691   :  { %2928 = vadd.xlane.f32.xlu2 %v2927_v26  ;;  %v2932_v63 = vmul.f32 %v5436_v45, %v5430_v21  ;;  %v5246_v21 = vld [vmem:[%s7414_s28 + $0x50] sm:$0xff]  ;;  %v6875_v45 = vperm.slane %v6872_v30, 1 }
0x1693   :  { %v2934_v46 = vpack.c.bf16 %v2932_v63, %v2932_v63 }
0x16a9   :  { %2936 = vrot.lane.b32.xlu2 %v6689_v22, %s5771_s5  ;;  %v4951_v22 = vld [vmem:[%s7413_s6 + $0x1c] sm:$0xf] }
0x16aa   :  { %v2983_v48 = vsel %vm421_vm6, %v4951_v22, 0 }
0x16ab   :  { %2992 = vmatpush.bf16.msra.mxu0 %v2983_v48 }
0x16e9   :  { %v2859_v4 = vpop.f32.mrf.mxu3 }
0x16ea   :  { %v2864_v41 = vadd.f32 %v2859_v4, %v2727_v14  ;;  %v5245_v14 = vld [vmem:[%s7414_s28 + $0x48] sm:$0xff] }
0x16f1   :  { %v2861_v20 = vpop.f32.mrf.mxu3 }
0x16f2   :  { %v2865_v1 = vadd.f32 %v2861_v20, %v2729_v47 }
0x1704   :  { %v2929_v33 = vpop.xlane.xlu2 %2928 }
0x1705   :  { %5437 = vrcp.f32 %v2929_v33 }
0x170b   :  { %v5438_v37 = vpop.eup %5437 }
0x170c   :  { %v2933_v39 = vmul.f32 %v5438_v37, %v5434_v24  ;;  %v2937_v23 = vpop.permute.xlu2 %2936 }
0x170d   :  { %v2942_v42 = vsel %vm421_vm6, %v2937_v23, 0 }
0x170e   :  { %v2935_v52 = vpack.c.bf16 %v2933_v39, %v2933_v39  ;;  %2951 = vmatpush.bf16.msra.mxu2 %v2942_v42 }
0x1710   :  { %4997 = vmatmul.msk.bf16.vlgmr.msra.gmra.mxu3 %vm355_vm5, %v2935_v52 }
0x1711   :  { %4996 = vmatmul.msk.bf16.vlgmr.msra.gmra.mxu2 %vm355_vm5, %v2934_v46 }
0x1712   :  { %3229 = vmatpush.bf16.msrb.mxu2 %v5245_v14 }
0x1716   :  { %3230 = vmatpush.bf16.msrb.mxu2 %v5244_v51 }
0x1721   :  { %5061 = vmatmul.msk.bf16.vlgmr.msrb.gmra.mxu2 %vm217_vm1, %v5248_v53 }
0x1731   :  { %5062 = vmatmul.msk.bf16.gmra.mxu2 %vm217_vm1, %v5249_v25 }
0x1741   :  { %5063 = vmatmul.msk.bf16.gmra.mxu2 %vm217_vm1, %v5250_v62 }
0x1793   :  { %v2974_v32 = vpop.f32.mrf.mxu3 }
0x1794   :  { %v2953_v28 = vpop.f32.mrf.mxu2 }
0x1795   :  { %v2978_v49 = vpack.c.bf16 %v2974_v32, %v2953_v28 }
0x1797   :  { %4998 = vmatmul.msk.bf16.vlgmr.msra.gmra.mxu0 %vm355_vm5, %v2978_v49 }
0x179b   :  { %v2976_v60 = vpop.f32.mrf.mxu3 }
0x179c   :  { %v2955_v61 = vpop.f32.mrf.mxu2 }
0x17a4   :  { %v3232_v55 = vpop.f32.mrf.mxu2 }
0x17a5   :  { %v3233_v60 = vadd.f32 %v3232_v55, %v6875_v45 }
0x17a7   :  { %v3398_v25 = vpack.c.bf16 %v3233_v60, %v3233_v60 }
0x17a9   :  { %v3438_v47 = vunpack.c.l.b16 %v3398_v25 }
0x17ac   :  { %v3234_v10 = vpop.f32.mrf.mxu2 }
0x17ad   :  { %v3235_v61 = vadd.f32 %v3234_v10, %v6875_v45 }
0x17b4   :  { %v3237_v8 = vpop.f32.mrf.mxu2 }
0x17b5   :  { %v3238_v23 = vadd.f32 %v3237_v8, %v6875_v45 }
0x17b7   :  { %v3400_v48 = vpack.c.bf16 %v3238_v23, %v3238_v23 }
0x17b9   :  { %v3440_v14 = vunpack.c.l.b16 %v3400_v48 }
0x17bc   :  { %v3239_v4 = vpop.f32.mrf.mxu2 }
0x17bd   :  { %v3240_v42 = vadd.f32 %v3239_v4, %v6875_v45 }
0x17bf   :  { %v3401_v20 = vpack.c.bf16 %v3240_v42, %v3240_v42 }
0x17c1   :  { %v3441_v51 = vunpack.c.l.b16 %v3401_v20 }
0x17c4   :  { %v3242_v33 = vpop.f32.mrf.mxu2 }
0x17c5   :  { %v3243_v37 = vadd.f32 %v3242_v33, %v6875_v45 }
0x17c7   :  { %v3402_v63 = vpack.c.bf16 %v3243_v37, %v3243_v37 }
0x17c9   :  { %v3442_v46 = vunpack.c.l.b16 %v3402_v63 }
0x17cc   :  { %v3244_v39 = vpop.f32.mrf.mxu2 }
0x17cd   :  { %v3245_v52 = vadd.f32 %v3244_v39, %v6875_v45 }
0x17cf   :  { %v3403_v22 = vpack.c.bf16 %v3245_v52, %v3245_v52 }
0x17d1   :  { %v3443_v32 = vunpack.c.l.b16 %v3403_v22 }
0x17d3   :  { %v6881_v28 = vpack.c.b16 %v3443_v32, %v3442_v46 }
0x17d5   :  { %v3460_v37 = vsel %vm355_vm5, %v6881_v28, 0 }
0x1814   :  { %v2994_v13 = vpop.f32.mrf.mxu0 }
0x1815   :  { %v2999_v59 = vadd.f32 %v2994_v13, %v2864_v41  ;;  %v5261_v41 = vld [vmem:[%s7416_s14 + $0x28] sm:$0xff]  ;;  %v6888_v13 = vpack.c.b16 %v3441_v51, %v3440_v14 }
0x1817   :  { %v3002_v35 = vadd.f32 %v5302_v2, %v2999_v59 }
0x1819   :  { %v6792_v43 = vadd.f32 %v3002_v35, %v6606_v56  ;;  %v5247_v56 = vld [vmem:[%s7414_s28 + $0x58] sm:$0xff] }
0x181a   :  { %3355 = vmatpush.bf16.msrb.mxu3 %v5247_v56 }
0x181b   :  { %v3006_v36 = vsel %vm217_vm1, %v6792_v43, 0.0 }
0x181c   :  { %3007 = vadd.xlane.f32.xlu2 %v3006_v36  ;;  %v2996_v31 = vpop.f32.mrf.mxu0 }
0x181d   :  { %v3000_v50 = vadd.f32 %v2996_v31, %v2865_v1 }
0x181e   :  { %3356 = vmatpush.bf16.msrb.mxu3 %v5246_v21 }
0x181f   :  { %v3003_v6 = vadd.f32 %v5302_v2, %v3000_v50  ;;  %v3399_v2 = vpack.c.bf16 %v3235_v61, %v3235_v61 }
0x1821   :  { %v6800_v34 = vadd.f32 %v3003_v6, %v6611_v12  ;;  %v5251_v12 = vld [vmem:[%s7415_s30 + $0x18] sm:$0xff]  ;;  %5109 = vmatmul.msk.bf16.vlgmr.msrb.gmra.mxu3 %vm217_vm1, %v5256_v58  ;;  %v3439_v1 = vunpack.c.l.b16 %v3399_v2 }
0x1822   :  { %5064 = vmatmul.msk.bf16.gmra.mxu2 %vm217_vm1, %v5251_v12  ;;  %v5243_v2 = vld [vmem:[%s7414_s28 + $0x38] sm:$0xff] }
0x1823   :  { %v3009_v17 = vsel %vm217_vm1, %v6800_v34, 0.0  ;;  %v6893_v6 = vpack.c.b16 %v3439_v1, %v3438_v47  ;;  %3102 = vmatpush.bf16.msra.mxu1 %v5243_v2 }
0x1824   :  { %3010 = vadd.xlane.f32.xlu0 %v3009_v17 }
0x1831   :  { %5110 = vmatmul.msk.bf16.gmra.mxu3 %vm217_vm1, %v5257_v38 }
0x1832   :  { %5065 = vmatmul.msk.bf16.gmra.mxu2 %vm217_vm1, %v5252_v57 }
0x1838   :  { %3647 = vrot.lane.b32.xlu0 %v6881_v28, %s5769_s0 }
0x1840   :  { %3645 = vrot.lane.b32.xlu0 %v6888_v13, %s5769_s0 }
0x1841   :  { %5111 = vmatmul.msk.bf16.gmra.mxu3 %vm217_vm1, %v5258_v3 }
0x1842   :  { %5066 = vmatmul.msk.bf16.gmra.mxu2 %vm217_vm1, %v5253_v11 }
0x1848   :  { %3643 = vrot.lane.b32.xlu0 %v6893_v6, %s5769_s0 }
0x1851   :  { %5112 = vmatmul.msk.bf16.gmra.mxu3 %vm217_vm1, %v5259_v0 }
0x1852   :  { %5067 = vmatmul.msk.bf16.gmra.mxu2 %vm217_vm1, %v5254_v18 }
0x1861   :  { %5113 = vmatmul.msk.bf16.gmra.mxu3 %vm217_vm1, %v5260_v15  ;;  %v5262_v15 = vld [vmem:[%s7416_s14 + $0x30] sm:$0xff] }
0x1862   :  { %5068 = vmatmul.msk.bf16.gmra.mxu2 %vm217_vm1, %v5255_v29 }
0x1871   :  { %5114 = vmatmul.msk.bf16.gmra.mxu3 %vm217_vm1, %v5261_v41 }
0x1881   :  { %5115 = vmatmul.msk.bf16.gmra.mxu3 %vm217_vm1, %v5262_v15 }
0x188f   :  { %v3008_v44 = vpop.xlane.xlu2 %3007 }
0x1890   :  { %v3012_v54 = vmul.f32 %v3008_v44, %v5938_v7 }
0x1892   :  { %v6852_v5 = vsub.f32 %v6792_v43, %v3012_v54 }
0x1894   :  { %v3016_v19 = vmul.f32 %v6852_v5, %v6852_v5 }
0x1896   :  { %v3018_v16 = vsel %vm217_vm1, %v3016_v19, 0.0 }
0x1897   :  { %3019 = vadd.xlane.f32.xlu1 %v3018_v16  ;;  %v3011_v9 = vpop.xlane.xlu0 %3010 }
0x1898   :  { %v3013_v27 = vmul.f32 %v3011_v9, %v5938_v7 }
0x189a   :  { %v6860_v40 = vsub.f32 %v6800_v34, %v3013_v27 }
0x189c   :  { %v3017_v24 = vmul.f32 %v6860_v40, %v6860_v40 }
0x189e   :  { %v3021_v26 = vsel %vm217_vm1, %v3017_v24, 0.0  ;;  %v5263_v24 = vld [vmem:[%s7416_s14 + $0x38] sm:$0xff] }
0x189f   :  { %3022 = vadd.xlane.f32.xlu1 %v3021_v26  ;;  %5116 = vmatmul.msk.bf16.gmra.mxu3 %vm217_vm1, %v5263_v24 }
0x18a4   :  { %v6903_v18 = vpop.f32.mrf.mxu3 }
0x18a5   :  { %v3247_v49 = vpop.f32.mrf.mxu2 }
0x18a6   :  { %v3248_v53 = vadd.f32 %v3247_v49, %v6875_v45  ;;  %v3457_v49 = vsel %vm355_vm5, %v6888_v13, 0 }
0x18a8   :  { %v3404_v59 = vpack.c.bf16 %v3248_v53, %v3248_v53 }
0x18aa   :  { %v3444_v31 = vunpack.c.l.b16 %v3404_v59 }
0x18ac   :  { %v6907_v55 = vpop.f32.mrf.mxu3 }
0x18ad   :  { %v3249_v35 = vpop.f32.mrf.mxu2 }
0x18ae   :  { %v3250_v36 = vadd.f32 %v3249_v35, %v6875_v45 }
0x18b0   :  { %v3405_v50 = vpack.c.bf16 %v3250_v36, %v3250_v36 }
0x18b2   :  { %v3445_v62 = vunpack.c.l.b16 %v3405_v50  ;;  %v5242_v50 = vld [vmem:[%s7414_s28 + $0x30] sm:$0xff] }
0x18b3   :  { %3103 = vmatpush.bf16.msra.mxu1 %v5242_v50 }
0x18b4   :  { %v6895_v17 = vpack.c.b16 %v3445_v62, %v3444_v31  ;;  %v3363_v54 = vpop.f32.mrf.mxu3 }
0x18b5   :  { %v3252_v56 = vpop.f32.mrf.mxu2 }
0x18b6   :  { %v3253_v21 = vadd.f32 %v3252_v56, %v6875_v45  ;;  %v3463_v27 = vsel %vm355_vm5, %v6895_v17, 0 }
0x18b7   :  { %3469 = vmatpush.bf16.xpose.msrb.mxu0 %v3463_v27 }
0x18b8   :  { %3649 = vrot.lane.b32.xlu1 %v6895_v17, %s5769_s0  ;;  %v3406_v12 = vpack.c.bf16 %v3253_v21, %v3253_v21 }
0x18ba   :  { %v3486_v38 = vunpack.c.l.b16 %v3406_v12 }
0x18bc   :  { %v3365_v16 = vpop.f32.mrf.mxu3 }
0x18bd   :  { %v3254_v58 = vpop.f32.mrf.mxu2 }
0x18be   :  { %v3255_v57 = vadd.f32 %v3254_v58, %v6875_v45  ;;  %v3454_v58 = vsel %vm355_vm5, %v6893_v6, 0 }
0x18bf   :  { %3470 = vmatpush.bf16.xpose.msrb.mxu0 %v3460_v37 }
0x18c0   :  { %v3407_v11 = vpack.c.bf16 %v3255_v57, %v3255_v57 }
0x18c2   :  { %v3487_v29 = vunpack.c.l.b16 %v3407_v11 }
0x18c4   :  { %v6905_v3 = vpack.c.b16 %v3487_v29, %v3486_v38  ;;  %v3368_v8 = vpop.f32.mrf.mxu3 }
0x18c5   :  { %v3257_v0 = vpop.f32.mrf.mxu2 }
0x18c6   :  { %v3258_v46 = vadd.f32 %v3257_v0, %v6875_v45 }
0x18c7   :  { %3471 = vmatpush.bf16.xpose.msrb.mxu0 %v3457_v49 }
0x18c8   :  { %v3408_v51 = vpack.c.bf16 %v3258_v46, %v3258_v46 }
0x18ca   :  { %v3488_v36 = vunpack.c.l.b16 %v3408_v51 }
0x18cc   :  { %v3370_v4 = vpop.f32.mrf.mxu3 }
0x18cd   :  { %v3259_v44 = vpop.f32.mrf.mxu2 }
0x18ce   :  { %v3260_v20 = vadd.f32 %v3259_v44, %v6875_v45 }
0x18cf   :  { %3472 = vmatpush.bf16.xpose.msrb.mxu0 %v3454_v58 }
0x18d0   :  { %v3409_v59 = vpack.c.bf16 %v3260_v20, %v3260_v20 }
0x18d2   :  { %v3489_v56 = vunpack.c.l.b16 %v3409_v59 }
0x18d4   :  { %v3373_v48 = vpop.f32.mrf.mxu3 }
0x18d5   :  { %v3262_v10 = vpop.f32.mrf.mxu2 }
0x18d6   :  { %v3263_v22 = vadd.f32 %v3262_v10, %v6875_v45 }
0x18d8   :  { %v3410_v60 = vpack.c.bf16 %v3263_v22, %v3263_v22 }
0x18da   :  { %v3490_v25 = vunpack.c.l.b16 %v3410_v60 }
0x18dc   :  { %v3375_v62 = vpop.f32.mrf.mxu3 }
0x18dd   :  { %v3264_v19 = vpop.f32.mrf.mxu2 }
0x18de   :  { %v3265_v32 = vadd.f32 %v3264_v19, %v6875_v45  ;;  %v6956_v19 = vpack.c.b16 %v3489_v56, %v3488_v36 }
0x18e0   :  { %v3411_v14 = vpack.c.bf16 %v3265_v32, %v3265_v32 }
0x18e2   :  { %v3491_v35 = vunpack.c.l.b16 %v3411_v14 }
0x18e4   :  { %v6940_v1 = vpack.c.b16 %v3491_v35, %v3490_v25 }
0x18e5   :  { %v3267_v9 = vpop.f32.mrf.mxu2 }
0x18e6   :  { %v3268_v41 = vadd.f32 %v3267_v9, %v6875_v45 }
0x18e8   :  { %v3412_v63 = vpack.c.bf16 %v3268_v41, %v3268_v41 }
0x18ea   :  { %v3492_v23 = vunpack.c.l.b16 %v3412_v63 }
0x18ed   :  { %v3269_v26 = vpop.f32.mrf.mxu2 }
0x18ee   :  { %v3270_v33 = vadd.f32 %v3269_v26, %v6875_v45  ;;  %v6938_v45 = vperm.slane %v6872_v30, 2 }
0x18f0   :  { %v3413_v39 = vpack.c.bf16 %v3270_v33, %v3270_v33  ;;  %v3369_v31 = vadd.f32 %v3368_v8, %v6938_v45  ;;  %v3371_v21 = vadd.f32 %v3370_v4, %v6938_v45  ;;  %v3374_v12 = vadd.f32 %v3373_v48, %v6938_v45 }
0x18f1   :  { %v3364_v57 = vadd.f32 %v3363_v54, %v6938_v45  ;;  %v3366_v11 = vadd.f32 %v3365_v16, %v6938_v45  ;;  %v3376_v15 = vadd.f32 %v3375_v62, %v6938_v45  ;;  %v3359_v8 = vadd.f32 %v6903_v18, %v6938_v45 }
0x18f2   :  { %v3493_v42 = vunpack.c.l.b16 %v3413_v39  ;;  %v3420_v29 = vpack.c.bf16 %v3374_v12, %v3374_v12  ;;  %v3418_v44 = vpack.c.bf16 %v3369_v31, %v3369_v31  ;;  %v3419_v10 = vpack.c.bf16 %v3371_v21, %v3371_v21  ;;  %v3378_v39 = vpop.f32.mrf.mxu3 }
0x18f3   :  { %v3421_v26 = vpack.c.bf16 %v3376_v15, %v3376_v15  ;;  %v3361_v54 = vadd.f32 %v6907_v55, %v6938_v45  ;;  %v3416_v4 = vpack.c.bf16 %v3364_v57, %v3364_v57  ;;  %v3417_v41 = vpack.c.bf16 %v3366_v11, %v3366_v11  ;;  %v5521_v57 = vld [vmem:[%s7374_s11 + $0x4] sm:$0x7] }
0x18f4   :  { %v6923_v52 = vpack.c.b16 %v3493_v42, %v3492_v23  ;;  %v3570_v24 = vunpack.c.l.b16 %v3420_v29  ;;  %v3568_v33 = vunpack.c.l.b16 %v3418_v44  ;;  %v3569_v37 = vunpack.c.l.b16 %v3419_v10 }
0x18f5   :  { %v3571_v63 = vunpack.c.l.b16 %v3421_v26  ;;  %v3414_v46 = vpack.c.bf16 %v3359_v8, %v3359_v8  ;;  %v3379_v22 = vadd.f32 %v3378_v39, %v6938_v45  ;;  %v3415_v48 = vpack.c.bf16 %v3361_v54, %v3361_v54 }
0x18f6   :  { %3690 = vrot.lane.b32.xlu2 %v6923_v52, %s5769_s0  ;;  %v3511_v18 = vsel %vm355_vm5, %v6923_v52, 0  ;;  %v3566_v20 = vunpack.c.l.b16 %v3416_v4  ;;  %v3567_v32 = vunpack.c.l.b16 %v3417_v41  ;;  %v6969_v49 = vpack.c.b16 %v3569_v37, %v3568_v33 }
0x18f7   :  { %v6966_v42 = vpack.c.b16 %v3571_v63, %v3570_v24  ;;  %3517 = vmatpush.bf16.xpose.msrb.mxu1 %v3511_v18  ;;  %v3564_v25 = vunpack.c.l.b16 %v3414_v46  ;;  %v3565_v2 = vunpack.c.l.b16 %v3415_v48  ;;  %v3505_v15 = vsel %vm355_vm5, %v6956_v19, 0  ;;  %v5523_v63 = vld [vmem:[#allocation2] sm:$0xff] }
0x18f8   :  { %v6976_v35 = vpack.c.b16 %v3567_v32, %v3566_v20  ;;  %v3502_v37 = vsel %vm355_vm5, %v6905_v3, 0 }
0x18f9   :  { %3587 = vmatpush.bf16.msra.mxu0 %v6966_v42  ;;  %v6986_v58 = vpack.c.b16 %v3565_v2, %v3564_v25 }
0x18fa   :  { %v3380_v36 = vpop.f32.mrf.mxu3 }
0x18fb   :  { %v3381_v62 = vadd.f32 %v3380_v36, %v6938_v45 }
0x18fd   :  { %3588 = vmatpush.bf16.msra.mxu0 %v6969_v49  ;;  %v3423_v12 = vpack.c.bf16 %v3381_v62, %v3381_v62 }
0x18fe   :  { %3688 = vrot.lane.b32.xlu2 %v6940_v1, %s5769_s0 }
0x1901   :  { %3589 = vmatpush.bf16.msra.mxu0 %v6976_v35 }
0x1905   :  { %3590 = vmatpush.bf16.msra.mxu0 %v6986_v58 }
0x1906   :  { %3686 = vrot.lane.b32.xlu2 %v6956_v19, %s5769_s0 }
0x190a   :  { %v3020_v61 = vpop.xlane.xlu1 %3019 }
0x190b   :  { %v3024_v53 = vmul.f32 %v3020_v61, %v5938_v7 }
0x190d   :  { %v3026_v47 = vadd.f32 1e-05, %v3024_v53  ;;  %v3422_v53 = vpack.c.bf16 %v3379_v22, %v3379_v22 }
0x190e   :  { %3684 = vrot.lane.b32.xlu2 %v6905_v3, %s5769_s0 }
0x190f   :  { %5439 = vrsqrt.f32 %v3026_v47  ;;  %vm3034_vm15 = vweird.f32 %v3026_v47  ;;  %v3604_v21 = vunpack.c.l.b16 %v3422_v53 }
0x1912   :  { %v3023_v38 = vpop.xlane.xlu1 %3022 }
0x1913   :  { %v3025_v0 = vmul.f32 %v3023_v38, %v5938_v7  ;;  %v3050_v38 = vperm.slane %v5521_v57, 1 }
0x1915   :  { %v5440_v9 = vpop.eup %5439  ;;  %v3027_v27 = vadd.f32 1e-05, %v3025_v0  ;;  %v3605_v0 = vunpack.c.l.b16 %v3423_v12 }
0x1916   :  { %v3029_v16 = vmul.f32 %v5440_v9, %v3026_v47  ;;  %vm3035_vm14 = vweird.f32 %v5440_v9  ;;  %v3508_v47 = vsel %vm355_vm5, %v6940_v1, 0  ;;  %3816 = vrot.lane.b32.xlu2 %v6895_v17, %s5770_s25 }
0x1917   :  { %5441 = vrsqrt.f32 %v3027_v27  ;;  %vm6972_vm0 = vmor %vm3034_vm15, %vm3035_vm14  ;;  %3518 = vmatpush.bf16.xpose.msrb.mxu1 %v3508_v47  ;;  %vm3044_vm3 = vweird.f32 %v3027_v27  ;;  %v6993_v10 = vpack.c.b16 %v3605_v0, %v3604_v21 }
0x1918   :  { %v3030_v23 = vmul.f32 %v5440_v9, %v3029_v16 }
0x191a   :  { %v3031_v55 = vmul.f32 0.5, %v3030_v23  ;;  %v5524_v23 = vld [vmem:[#allocation2 + $0x8] sm:$0xff] }
0x191c   :  { %v3032_v60 = vsub.f32 1.5, %v3031_v55 }
0x191d   :  { %v5442_v61 = vpop.eup %5441 }
0x191e   :  { %v3033_v14 = vmul.f32 %v5440_v9, %v3032_v60  ;;  %v3039_v51 = vmul.f32 %v5442_v61, %v3027_v27  ;;  %vm3045_vm2 = vweird.f32 %v5442_v61  ;;  %3756 = vrot.lane.b32.xlu2 %v6966_v42, %s5769_s0 }
0x191f   :  { %vm3046_vm4 = vmor %vm3044_vm3, %vm3045_vm2  ;;  %3519 = vmatpush.bf16.xpose.msrb.mxu1 %v3505_v15 }
0x1920   :  { %v3037_v31 = vsel %vm6972_vm0, %v5440_v9, %v3033_v14  ;;  %v3040_v50 = vmul.f32 %v5442_v61, %v3039_v51  ;;  %v5522_v9 = vld [vmem:[%s7375_s12 + $0x4] sm:$0x7] }
0x1921   :  { %v3048_v11 = vmul.f32 %v3037_v31, %v6852_v5  ;;  %v3053_v8 = vperm.slane %v5522_v9, 1  ;;  %v3383_v5 = vpop.f32.mrf.mxu3  ;;  %v3648_v9 = vpop.permute.xlu0 %3647 }
0x1922   :  { %v3041_v56 = vmul.f32 0.5, %v3040_v50  ;;  %v3384_v54 = vadd.f32 %v3383_v5, %v6938_v45 }
0x1923   :  { %v3051_v24 = vmul.f32 %v3050_v38, %v3048_v11 }
0x1924   :  { %v3042_v29 = vsub.f32 1.5, %v3041_v56  ;;  %v3424_v33 = vpack.c.bf16 %v3384_v54, %v3384_v54 }
0x1925   :  { %v3054_v16 = vadd.f32 %v3053_v8, %v3051_v24 }
0x1926   :  { %v3043_v44 = vmul.f32 %v5442_v61, %v3042_v29  ;;  %v3606_v22 = vunpack.c.l.b16 %v3424_v33 }
0x1927   :  { %v3056_v39 = vadd.f32 %v5523_v63, %v3054_v16  ;;  %3520 = vmatpush.bf16.xpose.msrb.mxu1 %v3502_v37  ;;  %v3661_v16 = vsel %vm355_vm5, %v3648_v9, 0 }
0x1928   :  { %v3047_v26 = vsel %vm3046_vm4, %v5442_v61, %v3043_v44 }
0x1929   :  { %v3049_v27 = vmul.f32 %v3047_v26, %v6860_v40  ;;  %v3385_v46 = vpop.f32.mrf.mxu3  ;;  %v3646_v33 = vpop.permute.xlu0 %3645 }
0x192a   :  { %v3386_v55 = vadd.f32 %v3385_v46, %v6938_v45  ;;  %v3650_v29 = vpop.permute.xlu1 %3649  ;;  %v3658_v63 = vsel %vm355_vm5, %v3646_v33, 0 }
0x192b   :  { %v3052_v4 = vmul.f32 %v3050_v38, %v3049_v27  ;;  %v3080_v38 = vperm.slane %v6872_v30, 0  ;;  %v3664_v15 = vsel %vm355_vm5, %v3650_v29, 0 }
0x192c   :  { %v3425_v48 = vpack.c.bf16 %v3386_v55, %v3386_v55 }
0x192d   :  { %v3055_v41 = vadd.f32 %v3053_v8, %v3052_v4 }
0x192e   :  { %v3607_v20 = vunpack.c.l.b16 %v3425_v48 }
0x192f   :  { %v3057_v18 = vadd.f32 %v5524_v23, %v3055_v41 }
0x1930   :  { %v7011_v32 = vpack.c.b16 %v3607_v20, %v3606_v22 }
0x1931   :  { %v3079_v40 = vpack.c.bf16 %v3057_v18, %v3056_v39  ;;  %v3388_v60 = vpop.f32.mrf.mxu3  ;;  %v3644_v23 = vpop.permute.xlu0 %3643 }
0x1932   :  { %3780 = vrot.lane.b32.xlu2 %v7011_v32, %s5769_s0  ;;  %v3389_v53 = vadd.f32 %v3388_v60, %v6938_v45  ;;  %v3655_v46 = vsel %vm355_vm5, %v3644_v23, 0 }
0x1933   :  { %5020 = vmatmul.msk.bf16.vlgmr.msra.gmra.mxu1 %vm217_vm1, %v3079_v40 }
0x1934   :  { %v3426_v36 = vpack.c.bf16 %v3389_v53, %v3389_v53 }
0x1936   :  { %v3608_v47 = vunpack.c.l.b16 %v3426_v36 }
0x1939   :  { %v3390_v61 = vpop.f32.mrf.mxu3 }
0x193a   :  { %3980 = vrot.lane.b32.xlu2 %v6895_v17, %s5771_s5  ;;  %v3391_v25 = vadd.f32 %v3390_v61, %v6938_v45 }
0x193c   :  { %v3427_v31 = vpack.c.bf16 %v3391_v25, %v3391_v25 }
0x193e   :  { %v3609_v56 = vunpack.c.l.b16 %v3427_v31 }
0x1940   :  { %v7025_v57 = vpack.c.b16 %v3609_v56, %v3608_v47 }
0x1941   :  { %v3393_v14 = vpop.f32.mrf.mxu3 }
0x1942   :  { %3848 = vrot.lane.b32.xlu2 %v6905_v3, %s5770_s25  ;;  %v3394_v51 = vadd.f32 %v3393_v14, %v6938_v45 }
0x1944   :  { %v3428_v2 = vpack.c.bf16 %v3394_v51, %v3394_v51 }
0x1946   :  { %v3610_v62 = vunpack.c.l.b16 %v3428_v2 }
0x1949   :  { %v3395_v59 = vpop.f32.mrf.mxu3 }
0x194a   :  { %v3396_v50 = vadd.f32 %v3395_v59, %v6938_v45 }
0x194c   :  { %v3429_v17 = vpack.c.bf16 %v3396_v50, %v3396_v50 }
0x194e   :  { %v3611_v21 = vunpack.c.l.b16 %v3429_v17 }
0x1950   :  { %v7023_v12 = vpack.c.b16 %v3611_v21, %v3610_v62  ;;  %v3691_v24 = vpop.permute.xlu2 %3690 }
0x1951   :  { %v3705_v30 = vsel %vm355_vm5, %v3691_v24, 0 }
0x1952   :  { %3627 = vmatpush.bf16.msra.mxu1 %v7023_v12 }
0x1956   :  { %3628 = vmatpush.bf16.msra.mxu1 %v7025_v57 }
0x1958   :  { %v3689_v41 = vpop.permute.xlu2 %3688 }
0x1959   :  { %v3702_v37 = vsel %vm355_vm5, %v3689_v41, 0 }
0x195a   :  { %3629 = vmatpush.bf16.msra.mxu1 %v7011_v32 }
0x195e   :  { %3630 = vmatpush.bf16.msra.mxu1 %v6993_v10 }
0x1960   :  { %v3687_v39 = vpop.permute.xlu2 %3686 }
0x1961   :  { %v3699_v18 = vsel %vm355_vm5, %v3687_v39, 0 }
0x1968   :  { %v3685_v55 = vpop.permute.xlu2 %3684 }
0x1969   :  { %v3696_v40 = vsel %vm355_vm5, %v3685_v55, 0 }
0x1970   :  { %v3817_v2 = vpop.permute.xlu2 %3816 }
0x1971   :  { %v3831_v24 = vsel %vm355_vm5, %v3817_v2, 0 }
0x1978   :  { %v3757_v62 = vpop.permute.xlu2 %3756 }
0x19b0   :  { %v3105_v45 = vpop.f32.mrf.mxu1 }
0x19b1   :  { %v3106_v11 = vadd.f32 %v3105_v45, %v3080_v38 }
0x19b3   :  { %v3110_v0 = vmul.f32 0.35355338, %v3106_v11  ;;  %v3781_v11 = vpop.permute.xlu2 %3780 }
0x19b5   :  { %v3112_v44 = vpack.c.bf16 %v3110_v0, %v3110_v0 }
0x19b7   :  { %v3639_v8 = vunpack.c.l.b16 %v3112_v44  ;;  %5117 = vmatmul.msk.bf16.vlgmr.msrb.gmra.mxu0 %vm355_vm5, %v3112_v44 }
0x19b8   :  { %3670 = vmatpush.bf16.xpose.msrb.mxu0 %v3664_v15  ;;  %v3107_v5 = vpop.f32.mrf.mxu1 }
0x19b9   :  { %v7034_v26 = vpack.c.b16 %v3639_v8, %v3639_v8  ;;  %v3108_v27 = vadd.f32 %v3107_v5, %v3080_v38 }
0x19bb   :  { %v3111_v54 = vmul.f32 0.35355338, %v3108_v27  ;;  %3808 = vrot.lane.b32.xlu2 %v7034_v26, %s5770_s25 }
0x19bd   :  { %v3113_v4 = vpack.c.bf16 %v3111_v54, %v3111_v54  ;;  %v7116_v54 = vpop.permute.xlu2 %3980 }
0x19bf   :  { %5118 = vmatmul.msk.bf16.vlgmr.msrb.gmra.mxu1 %vm355_vm5, %v3113_v4  ;;  %v3680_v51 = vunpack.c.l.b16 %v3113_v4 }
0x19c0   :  { %3671 = vmatpush.bf16.xpose.msrb.mxu0 %v3661_v16  ;;  %3711 = vmatpush.bf16.xpose.msrb.mxu1 %v3705_v30 }
0x19c1   :  { %v7052_v53 = vpack.c.b16 %v3680_v51, %v3680_v51 }
0x19c5   :  { %v3849_v41 = vpop.permute.xlu2 %3848 }
0x19c8   :  { %3672 = vmatpush.bf16.xpose.msrb.mxu0 %v3658_v63  ;;  %3712 = vmatpush.bf16.xpose.msrb.mxu1 %v3702_v37  ;;  %v3860_v37 = vsel %vm355_vm5, %v3849_v41, 0 }
0x19d0   :  { %3673 = vmatpush.bf16.xpose.msrb.mxu0 %v3655_v46  ;;  %3713 = vmatpush.bf16.xpose.msrb.mxu1 %v3699_v18 }
0x19d8   :  { %3714 = vmatpush.bf16.xpose.msrb.mxu1 %v3696_v40 }
0x1a34   :  { %v3474_v22 = vpop.f32.mrf.mxu0 }
0x1a35   :  { %v3526_v48 = vsel %vm1421_vm13, %v3474_v22, -inf }
0x1a36   :  { %3527 = vmax.xlane.f32.xlu0 %v3526_v48 }
0x1a3c   :  { %v3476_v20 = vpop.f32.mrf.mxu0  ;;  %v3522_v60 = vpop.f32.mrf.mxu1 }
0x1a3d   :  { %v3529_v61 = vsel %vm1421_vm13, %v3522_v60, -inf }
0x1a3e   :  { %3530 = vmax.xlane.f32.xlu1 %v3529_v61 }
0x1a44   :  { %v3524_v14 = vpop.f32.mrf.mxu1 }
0x1a4a   :  { %3641 = vrot.lane.b32.xlu0 %v7034_v26, %s5769_s0 }
0x1a52   :  { %3854 = vrot.lane.b32.xlu0 %v6923_v52, %s5770_s25 }
0x1a57   :  { %3682 = vrot.lane.b32.xlu1 %v7052_v53, %s5769_s0 }
0x1a5a   :  { %3784 = vrot.lane.b32.xlu0 %v7023_v12, %s5769_s0 }
0x1a5f   :  { %3754 = vrot.lane.b32.xlu1 %v6969_v49, %s5769_s0 }
0x1a62   :  { %3778 = vrot.lane.b32.xlu0 %v6993_v10, %s5769_s0 }
0x1a67   :  { %3782 = vrot.lane.b32.xlu1 %v7025_v57, %s5769_s0 }
0x1a6a   :  { %4018 = vrot.lane.b32.xlu0 %v6923_v52, %s5771_s5 }
0x1a6f   :  { %3814 = vrot.lane.b32.xlu1 %v6881_v28, %s5770_s25 }
0x1a72   :  { %3978 = vrot.lane.b32.xlu0 %v6881_v28, %s5771_s5 }
0x1a77   :  { %3852 = vrot.lane.b32.xlu1 %v6940_v1, %s5770_s25 }
0x1a7a   :  { %3846 = vrot.lane.b32.xlu0 %v7052_v53, %s5770_s25 }
0x1a7f   :  { %3752 = vrot.lane.b32.xlu1 %v6976_v35, %s5769_s0 }
0x1a87   :  { %3750 = vrot.lane.b32.xlu1 %v6986_v58, %s5769_s0 }
0x1a8f   :  { %3812 = vrot.lane.b32.xlu1 %v6888_v13, %s5770_s25 }
0x1a97   :  { %3850 = vrot.lane.b32.xlu1 %v6956_v19, %s5770_s25 }
0x1a9f   :  { %3810 = vrot.lane.b32.xlu1 %v6893_v6, %s5770_s25 }
0x1aa7   :  { %4016 = vrot.lane.b32.xlu1 %v6940_v1, %s5771_s5 }
0x1aa9   :  { %v7086_v28 = vpop.xlane.xlu0 %3527 }
0x1aaa   :  { %v3538_v52 = vsub.f32 %v3474_v22, %v7086_v28  ;;  %v3532_v18 = vsub.f32 -inf, %v7086_v28 }
0x1aac   :  { %v3540_v25 = vmul.f32 1.442695, %v3538_v52  ;;  %v3534_v46 = vmul.f32 1.442695, %v3532_v18 }
0x1aae   :  { %5443 = vpow2.f32 %v3540_v25 }
0x1aaf   :  { %3976 = vrot.lane.b32.xlu1 %v6888_v13, %s5771_s5 }
0x1ab1   :  { %v7091_v59 = vpop.xlane.xlu1 %3530 }
0x1ab2   :  { %v3539_v36 = vsub.f32 %v3522_v60, %v7091_v59  ;;  %v3533_v40 = vsub.f32 -inf, %v7091_v59 }
0x1ab4   :  { %v3542_v31 = vmul.f32 1.442695, %v3539_v36  ;;  %v7094_v50 = vpop.eup %5443  ;;  %v3536_v22 = vmul.f32 1.442695, %v3533_v40 }
0x1ab5   :  { %v3554_v1 = vpack.c.bf16 %v7094_v50, %v7094_v50 }
0x1ab6   :  { %5445 = vpow2.f32 %v3542_v31 }
0x1ab7   :  { %4012 = vrot.lane.b32.xlu1 %v6905_v3, %s5771_s5  ;;  %5119 = vmatmul.msk.bf16.vlgmr.msra.gmra.mxu0 %vm1421_vm13, %v3554_v1  ;;  %5447 = vpow2.f32 %v3534_v46 }
0x1ab8   :  { %3769 = vmatpush.bf16.msra.mxu0 %v3757_v62  ;;  %5449 = vpow2.f32 %v3536_v22 }
0x1abc   :  { %v3642_v17 = vpop.permute.xlu0 %3641  ;;  %v7101_v13 = vpop.eup %5445 }
0x1abd   :  { %v3555_v47 = vpack.c.bf16 %v7101_v13, %v7101_v13  ;;  %v5448_v48 = vpop.eup %5447 }
0x1abe   :  { %v7130_v60 = vmul.f32 0.0, %v5448_v48  ;;  %v5450_v51 = vpop.eup %5449 }
0x1abf   :  { %3920 = vrot.lane.b32.xlu1 %v6966_v42, %s5770_s25  ;;  %5120 = vmatmul.msk.bf16.vlgmr.msra.gmra.mxu1 %vm1421_vm13, %v3555_v47  ;;  %v7135_v52 = vmul.f32 0.0, %v5450_v51 }
0x1ac4   :  { %v3855_v56 = vpop.permute.xlu0 %3854 }
0x1ac5   :  { %v3869_v44 = vsel %vm355_vm5, %v3855_v56, 0 }
0x1ac7   :  { %4084 = vrot.lane.b32.xlu1 %v6966_v42, %s5771_s5  ;;  %5121 = vmatmul.msk.bf16.vlgmr.msrb.gmra.mxu0 %vm355_vm5, %v3642_v17 }
0x1ac9   :  { %v3683_v3 = vpop.permute.xlu1 %3682 }
0x1acc   :  { %v3785_v21 = vpop.permute.xlu0 %3784 }
0x1acd   :  { %3797 = vmatpush.bf16.msra.mxu1 %v3785_v21 }
0x1acf   :  { %5122 = vmatmul.msk.bf16.vlgmr.msrb.gmra.mxu1 %vm355_vm5, %v3683_v3 }
0x1ad1   :  { %v3755_v38 = vpop.permute.xlu1 %3754 }
0x1ad2   :  { %3770 = vmatpush.bf16.msra.mxu0 %v3755_v38 }
0x1ad4   :  { %v3779_v29 = vpop.permute.xlu0 %3778 }
0x1ad9   :  { %v3783_v45 = vpop.permute.xlu1 %3782 }
0x1ada   :  { %3798 = vmatpush.bf16.msra.mxu1 %v3783_v45 }
0x1ade   :  { %3799 = vmatpush.bf16.msra.mxu1 %v3781_v11 }
0x1ae1   :  { %v3815_v0 = vpop.permute.xlu1 %3814 }
0x1ae2   :  { %3800 = vmatpush.bf16.msra.mxu1 %v3779_v29  ;;  %v3828_v27 = vsel %vm355_vm5, %v3815_v0, 0 }
0x1ae6   :  { %3875 = vmatpush.bf16.xpose.msrb.mxu1 %v3869_v44 }
0x1ae9   :  { %v3853_v42 = vpop.permute.xlu1 %3852 }
0x1aea   :  { %v3866_v15 = vsel %vm355_vm5, %v3853_v42, 0 }
0x1aee   :  { %3876 = vmatpush.bf16.xpose.msrb.mxu1 %v3866_v15 }
0x1af1   :  { %v3753_v9 = vpop.permute.xlu1 %3752 }
0x1af2   :  { %3771 = vmatpush.bf16.msra.mxu0 %v3753_v9 }
0x1af9   :  { %v3751_v8 = vpop.permute.xlu1 %3750 }
0x1afa   :  { %3772 = vmatpush.bf16.msra.mxu0 %v3751_v8 }
0x1afe   :  { %3837 = vmatpush.bf16.xpose.msrb.mxu0 %v3831_v24 }
0x1b01   :  { %v3813_v5 = vpop.permute.xlu1 %3812 }
0x1b02   :  { %v3825_v16 = vsel %vm355_vm5, %v3813_v5, 0 }
0x1b06   :  { %3838 = vmatpush.bf16.xpose.msrb.mxu0 %v3828_v27 }
0x1b09   :  { %v3851_v30 = vpop.permute.xlu1 %3850 }
0x1b0a   :  { %v3863_v4 = vsel %vm355_vm5, %v3851_v30, 0 }
0x1b0b   :  { %3877 = vmatpush.bf16.xpose.msrb.mxu1 %v3863_v4 }
0x1b0e   :  { %3839 = vmatpush.bf16.xpose.msrb.mxu0 %v3825_v16 }
0x1b11   :  { %v3811_v33 = vpop.permute.xlu1 %3810 }
0x1b12   :  { %v3822_v63 = vsel %vm355_vm5, %v3811_v33, 0 }
0x1b13   :  { %3878 = vmatpush.bf16.xpose.msrb.mxu1 %v3860_v37 }
0x1b16   :  { %3840 = vmatpush.bf16.xpose.msrb.mxu0 %v3822_v63 }
0x1b19   :  { %v7122_v39 = vpop.permute.xlu1 %4016 }
0x1b1a   :  { %v4030_v27 = vsel %vm355_vm5, %v7122_v39, 0 }
0x1b21   :  { %v7124_v23 = vpop.permute.xlu1 %3976 }
0x1b29   :  { %v7127_v55 = vpop.permute.xlu1 %4012 }
0x1b2a   :  { %v4024_v37 = vsel %vm355_vm5, %v7127_v55, 0 }
0x1b31   :  { %v3921_v20 = vpop.permute.xlu1 %3920 }
0x1b32   :  { %3933 = vmatpush.bf16.msra.mxu2 %v3921_v20 }
0x1b34   :  { %v3592_v61 = vpop.f32.mrf.mxu0 }
0x1b35   :  { %v7133_v14 = vadd.f32 %v3592_v61, %v7130_v60 }
0x1b39   :  { %v4085_v46 = vpop.permute.xlu1 %4084 }
0x1b3c   :  { %v3594_v28 = vpop.f32.mrf.mxu0  ;;  %v3632_v25 = vpop.f32.mrf.mxu1 }
0x1b3d   :  { %v7138_v2 = vadd.f32 %v3632_v25, %v7135_v52 }
0x1b44   :  { %v3634_v59 = vpop.f32.mrf.mxu1  ;;  %v3675_v36 = vpop.f32.mrf.mxu0 }
0x1b45   :  { %v3720_v31 = vsel %vm1421_vm13, %v3675_v36, -inf }
0x1b46   :  { %3721 = vmax.xlane.f32.xlu2 %v3720_v31 }
0x1b4c   :  { %v3677_v1 = vpop.f32.mrf.mxu0  ;;  %v3716_v62 = vpop.f32.mrf.mxu1 }
0x1b4d   :  { %v3723_v17 = vsel %vm1421_vm13, %v3716_v62, -inf }
0x1b4e   :  { %3724 = vmax.xlane.f32.xlu0 %v3723_v17 }
0x1b54   :  { %v3718_v47 = vpop.f32.mrf.mxu1 }
0x1b5e   :  { %4014 = vrot.lane.b32.xlu2 %v6956_v19, %s5771_s5 }
0x1b62   :  { %3974 = vrot.lane.b32.xlu0 %v6893_v6, %s5771_s5  ;;  %v4019_v6 = vpop.permute.xlu0 %4018 }
0x1b63   :  { %v4033_v8 = vsel %vm355_vm5, %v4019_v6, 0 }
0x1b66   :  { %3972 = vrot.lane.b32.xlu2 %v7034_v26, %s5771_s5  ;;  %v3809_v26 = vpop.permute.xlu2 %3808 }
0x1b6a   :  { %4010 = vrot.lane.b32.xlu0 %v7052_v53, %s5771_s5  ;;  %v3979_v19 = vpop.permute.xlu0 %3978 }
0x1b6b   :  { %v3992_v24 = vsel %vm355_vm5, %v3979_v19, 0 }
0x1b6e   :  { %3948 = vrot.lane.b32.xlu2 %v7023_v12, %s5770_s25 }
0x1b72   :  { %v3847_v53 = vpop.permute.xlu0 %3846 }
0x1b76   :  { %3918 = vrot.lane.b32.xlu2 %v6969_v49, %s5770_s25 }
0x1b7e   :  { %3946 = vrot.lane.b32.xlu2 %v7025_v57, %s5770_s25 }
0x1b86   :  { %3916 = vrot.lane.b32.xlu2 %v6976_v35, %s5770_s25 }
0x1b8e   :  { %3944 = vrot.lane.b32.xlu2 %v7011_v32, %s5770_s25 }
0x1b96   :  { %3914 = vrot.lane.b32.xlu2 %v6986_v58, %s5770_s25 }
0x1b9e   :  { %4112 = vrot.lane.b32.xlu2 %v7023_v12, %s5771_s5  ;;  %v3995_v12 = vsel %vm355_vm5, %v7116_v54, 0  ;;  %v3989_v54 = vsel %vm355_vm5, %v7124_v23, 0 }
0x1bb9   :  { %v3722_v56 = vpop.xlane.xlu2 %3721 }
0x1bba   :  { %v3732_v3 = vsub.f32 %v3675_v36, %v3722_v56  ;;  %v3726_v40 = vsub.f32 -inf, %v3722_v56 }
0x1bbc   :  { %v3734_v21 = vmul.f32 1.442695, %v3732_v3  ;;  %v3728_v22 = vmul.f32 1.442695, %v3726_v40 }
0x1bbe   :  { %5451 = vpow2.f32 %v3734_v21 }
0x1bc1   :  { %v4015_v38 = vpop.permute.xlu2 %4014  ;;  %v3725_v45 = vpop.xlane.xlu0 %3724 }
0x1bc2   :  { %v3733_v11 = vsub.f32 %v3716_v62, %v3725_v45  ;;  %v4027_v4 = vsel %vm355_vm5, %v4015_v38, 0  ;;  %v3727_v48 = vsub.f32 -inf, %v3725_v45 }
0x1bc4   :  { %v3736_v29 = vmul.f32 1.442695, %v3733_v11  ;;  %v7164_v0 = vpop.eup %5451  ;;  %v3730_v20 = vmul.f32 1.442695, %v3727_v48 }
0x1bc5   :  { %v3748_v44 = vpack.c.bf16 %v7164_v0, %v7164_v0 }
0x1bc6   :  { %5453 = vpow2.f32 %v3736_v29 }
0x1bc7   :  { %5123 = vmatmul.msk.bf16.vlgmr.msra.gmra.mxu0 %vm1421_vm13, %v3748_v44  ;;  %5455 = vpow2.f32 %v3728_v22 }
0x1bc8   :  { %4001 = vmatpush.bf16.xpose.msra.mxu0 %v3995_v12  ;;  %5457 = vpow2.f32 %v3730_v20 }
0x1bc9   :  { %v3973_v42 = vpop.permute.xlu2 %3972 }
0x1bcc   :  { %v7171_v15 = vpop.eup %5453 }
0x1bcd   :  { %v3749_v9 = vpack.c.bf16 %v7171_v15, %v7171_v15  ;;  %v5456_v55 = vpop.eup %5455 }
0x1bce   :  { %v7190_v61 = vmul.f32 0.0, %v5456_v55  ;;  %v5458_v25 = vpop.eup %5457 }
0x1bcf   :  { %5124 = vmatmul.msk.bf16.vlgmr.msra.gmra.mxu1 %vm1421_vm13, %v3749_v9  ;;  %v7195_v59 = vmul.f32 0.0, %v5458_v25 }
0x1bd0   :  { %4002 = vmatpush.bf16.xpose.msra.mxu0 %v3992_v24  ;;  %4039 = vmatpush.bf16.xpose.msra.mxu1 %v4033_v8 }
0x1bd1   :  { %v3949_v5 = vpop.permute.xlu2 %3948 }
0x1bd2   :  { %3961 = vmatpush.bf16.msra.mxu3 %v3949_v5 }
0x1bd4   :  { %v3975_v16 = vpop.permute.xlu0 %3974 }
0x1bd5   :  { %v3986_v41 = vsel %vm355_vm5, %v3975_v16, 0 }
0x1bd7   :  { %5125 = vmatmul.msk.bf16.vlgmr.msrb.gmra.mxu0 %vm355_vm5, %v3809_v26 }
0x1bd8   :  { %4003 = vmatpush.bf16.xpose.msra.mxu0 %v3989_v54  ;;  %4040 = vmatpush.bf16.xpose.msra.mxu1 %v4030_v27 }
0x1bd9   :  { %v3919_v30 = vpop.permute.xlu2 %3918 }
0x1bda   :  { %3934 = vmatpush.bf16.msra.mxu2 %v3919_v30 }
0x1bdc   :  { %v4011_v39 = vpop.permute.xlu0 %4010 }
0x1bdf   :  { %5126 = vmatmul.msk.bf16.vlgmr.msrb.gmra.mxu1 %vm355_vm5, %v3847_v53 }
0x1be0   :  { %4004 = vmatpush.bf16.xpose.msra.mxu0 %v3986_v41  ;;  %4041 = vmatpush.bf16.xpose.msra.mxu1 %v4027_v4 }
0x1be1   :  { %v3947_v33 = vpop.permute.xlu2 %3946 }
0x1be2   :  { %3962 = vmatpush.bf16.msra.mxu3 %v3947_v33 }
0x1be7   :  { %5129 = vmatmul.msk.bf16.vlgmr.msra.gmra.mxu0 %vm355_vm5, %v3973_v42 }
0x1be8   :  { %4042 = vmatpush.bf16.xpose.msra.mxu1 %v4024_v37 }
0x1be9   :  { %v3917_v63 = vpop.permute.xlu2 %3916 }
0x1bea   :  { %3935 = vmatpush.bf16.msra.mxu2 %v3917_v63 }
0x1bef   :  { %5130 = vmatmul.msk.bf16.vlgmr.msra.gmra.mxu1 %vm355_vm5, %v4011_v39 }
0x1bf1   :  { %v3945_v23 = vpop.permute.xlu2 %3944 }
0x1bf2   :  { %3963 = vmatpush.bf16.msra.mxu3 %v3945_v23 }
0x1bf9   :  { %v3915_v18 = vpop.permute.xlu2 %3914 }
0x1bfa   :  { %3936 = vmatpush.bf16.msra.mxu2 %v3915_v18  ;;  %v3075_v18 = vld [vmem:[#allocation7 + $0x14] sm:$0xf] }
0x1bfe   :  { %4097 = vmatpush.bf16.msrb.mxu2 %v4085_v46  ;;  %v4150_v46 = vsel %vm421_vm6, %v3075_v18, 0 }
0x1c44   :  { %v3774_v51 = vpop.f32.mrf.mxu0 }
0x1c45   :  { %v7193_v28 = vadd.f32 %v3774_v51, %v7190_v61 }
0x1c4c   :  { %v3776_v36 = vpop.f32.mrf.mxu0  ;;  %v3802_v31 = vpop.f32.mrf.mxu1 }
0x1c4d   :  { %v7198_v1 = vadd.f32 %v3802_v31, %v7195_v59 }
0x1c54   :  { %v3804_v62 = vpop.f32.mrf.mxu1  ;;  %v3842_v17 = vpop.f32.mrf.mxu0 }
0x1c55   :  { %v3884_v47 = vsel %vm1421_vm13, %v3842_v17, -inf }
0x1c56   :  { %3885 = vmax.xlane.f32.xlu0 %v3884_v47 }
0x1c5c   :  { %v3844_v6 = vpop.f32.mrf.mxu0  ;;  %v3880_v19 = vpop.f32.mrf.mxu1 }
0x1c5d   :  { %v3887_v26 = vsel %vm1421_vm13, %v3880_v19, -inf }
0x1c5e   :  { %3888 = vmax.xlane.f32.xlu1 %v3887_v26 }
0x1c64   :  { %v3882_v53 = vpop.f32.mrf.mxu1  ;;  %v4006_v56 = vpop.f32.mrf.mxu0 }
0x1c65   :  { %v4048_v3 = vsel %vm1421_vm13, %v4006_v56, -inf }
0x1c66   :  { %4049 = vmax.xlane.f32.xlu2 %v4048_v3 }
0x1c6a   :  { %3942 = vrot.lane.b32.xlu0 %v6993_v10, %s5770_s25 }
0x1c6c   :  { %v4008_v21 = vpop.f32.mrf.mxu0  ;;  %v7205_v38 = vpop.f32.mrf.mxu1 }
0x1c6d   :  { %v4051_v11 = vsel %vm1421_vm13, %v7205_v38, -inf }
0x1c74   :  { %v4046_v45 = vpop.f32.mrf.mxu1 }
0x1c77   :  { %4082 = vrot.lane.b32.xlu1 %v6969_v49, %s5771_s5  ;;  %v3546_v49 = vsel %vm1421_vm13, %v7094_v50, 0.0  ;;  %v4113_v50 = vpop.permute.xlu2 %4112 }
0x1c7e   :  { %4078 = vrot.lane.b32.xlu2 %v6986_v58, %s5771_s5  ;;  %v3740_v58 = vsel %vm1421_vm13, %v7164_v0, 0.0 }
0x1c7f   :  { %4110 = vrot.lane.b32.xlu1 %v7025_v57, %s5771_s5 }
0x1c87   :  { %4080 = vrot.lane.b32.xlu1 %v6976_v35, %s5771_s5  ;;  %v3743_v35 = vsel %vm1421_vm13, %v7171_v15, 0.0 }
0x1c8f   :  { %4108 = vrot.lane.b32.xlu1 %v7011_v32, %s5771_s5  ;;  %v3549_v32 = vsel %vm1421_vm13, %v7101_v13, 0.0 }
0x1c94   :  { %4052 = vmax.xlane.f32.xlu0 %v4051_v11 }
0x1c97   :  { %4106 = vrot.lane.b32.xlu1 %v6993_v10, %s5771_s5 }
0x1c9c   :  { %3547 = vadd.xlane.f32.xlu0 %v3546_v49 }
0x1ca4   :  { %3741 = vadd.xlane.f32.xlu0 %v3740_v58  ;;  %v3076_v58 = vld [vmem:[#allocation7 + $0x18] sm:$0xf] }
0x1ca7   :  { %3744 = vadd.xlane.f32.xlu2 %v3743_v35 }
0x1cc1   :  { %3550 = vadd.xlane.f32.xlu1 %v3549_v32 }
0x1cc9   :  { %v7229_v57 = vpop.xlane.xlu0 %3885 }
0x1cca   :  { %v3896_v10 = vsub.f32 %v3842_v17, %v7229_v57  ;;  %v3890_v35 = vsub.f32 -inf, %v7229_v57 }
0x1ccc   :  { %v3898_v29 = vmul.f32 1.442695, %v3896_v10  ;;  %v3892_v32 = vmul.f32 1.442695, %v3890_v35 }
0x1cce   :  { %5459 = vpow2.f32 %v3898_v29 }
0x1cd1   :  { %v7232_v44 = vpop.xlane.xlu1 %3888 }
0x1cd2   :  { %v3897_v0 = vsub.f32 %v3880_v19, %v7232_v44 }
0x1cd4   :  { %v3900_v12 = vmul.f32 1.442695, %v3897_v0  ;;  %v5460_v42 = vpop.eup %5459 }
0x1cd5   :  { %v3912_v9 = vpack.c.bf16 %v5460_v42, %v5460_v42  ;;  %v3904_v15 = vsel %vm1421_vm13, %v5460_v42, 0.0 }
0x1cd6   :  { %5461 = vpow2.f32 %v3900_v12  ;;  %3905 = vadd.xlane.f32.xlu0 %v3904_v15 }
0x1cd7   :  { %5127 = vmatmul.msk.bf16.vlgmr.msra.gmra.mxu2 %vm1421_vm13, %v3912_v9 }
0x1cd9   :  { %v7237_v13 = vpop.xlane.xlu2 %4049 }
0x1cda   :  { %v4060_v8 = vsub.f32 %v4006_v56, %v7237_v13 }
0x1cdc   :  { %v4062_v24 = vmul.f32 1.442695, %v4060_v8  ;;  %v3943_v5 = vpop.permute.xlu0 %3942  ;;  %v5462_v27 = vpop.eup %5461 }
0x1cdd   :  { %3964 = vmatpush.bf16.msra.mxu3 %v3943_v5  ;;  %v3913_v54 = vpack.c.bf16 %v5462_v27, %v5462_v27  ;;  %v3907_v30 = vsel %vm1421_vm13, %v5462_v27, 0.0 }
0x1cde   :  { %5463 = vpow2.f32 %v4062_v24  ;;  %3908 = vadd.xlane.f32.xlu0 %v3907_v30 }
0x1ce0   :  { %5128 = vmatmul.msk.bf16.vlgmr.msra.gmra.mxu3 %vm1421_vm13, %v3913_v54 }
0x1ce1   :  { %4125 = vmatpush.bf16.msrb.mxu3 %v4113_v50  ;;  %v4079_v63 = vpop.permute.xlu2 %4078 }
0x1ce4   :  { %v5464_v16 = vpop.eup %5463 }
0x1ce5   :  { %v4068_v4 = vsel %vm1421_vm13, %v5464_v16, 0.0  ;;  %v4076_v39 = vpack.c.bf16 %v5464_v16, %v5464_v16 }
0x1ce6   :  { %4069 = vadd.xlane.f32.xlu0 %v4068_v4 }
0x1ce9   :  { %v4083_v41 = vpop.permute.xlu1 %4082 }
0x1cea   :  { %4098 = vmatpush.bf16.msrb.mxu2 %v4083_v41  ;;  %v3077_v41 = vld [vmem:[#allocation7 + $0x1c] sm:$0xf] }
0x1cf1   :  { %v4111_v33 = vpop.permute.xlu1 %4110 }
0x1cf2   :  { %4126 = vmatpush.bf16.msrb.mxu3 %v4111_v33  ;;  %v4222_v33 = vsel %vm421_vm6, %v3077_v41, 0 }
0x1cf3   :  { %4231 = vmatpush.bf16.msrb.mxu1 %v4222_v33 }
0x1cf9   :  { %v4081_v37 = vpop.permute.xlu1 %4080 }
0x1cfa   :  { %4099 = vmatpush.bf16.msrb.mxu2 %v4081_v37  ;;  %v4054_v37 = vsub.f32 -inf, %v7237_v13 }
0x1cfe   :  { %4100 = vmatpush.bf16.msrb.mxu2 %v4079_v63 }
0x1d01   :  { %v4109_v23 = vpop.permute.xlu1 %4108  ;;  %5131 = vmatmul.msk.bf16.vlgmr.msrb.gmra.mxu2 %vm1421_vm13, %v4076_v39  ;;  %v4056_v39 = vmul.f32 1.442695, %v4054_v37 }
0x1d02   :  { %4127 = vmatpush.bf16.msrb.mxu3 %v4109_v23  ;;  %4159 = vmatpush.bf16.msra.mxu2 %v4150_v46 }
0x1d07   :  { %v7245_v40 = vpop.xlane.xlu0 %4052 }
0x1d08   :  { %v4061_v22 = vsub.f32 %v7205_v38, %v7245_v40  ;;  %v4055_v63 = vsub.f32 -inf, %v7245_v40 }
0x1d09   :  { %v4107_v48 = vpop.permute.xlu1 %4106 }
0x1d0a   :  { %v4064_v20 = vmul.f32 1.442695, %v4061_v22  ;;  %4128 = vmatpush.bf16.msrb.mxu3 %v4107_v48  ;;  %v4058_v23 = vmul.f32 1.442695, %v4055_v63 }
0x1d0c   :  { %5465 = vpow2.f32 %v4064_v20 }
0x1d0f   :  { %v3548_v55 = vpop.xlane.xlu0 %3547 }
0x1d10   :  { %v3552_v51 = vadd.f32 %v3548_v55, %v7130_v60  ;;  %v3074_v60 = vld [vmem:[#allocation7 + $0x10] sm:$0xf] }
0x1d11   :  { %v4170_v53 = vsel %vm421_vm6, %v3074_v60, 0 }
0x1d12   :  { %5467 = vrcp.f32 %v3552_v51  ;;  %v5466_v25 = vpop.eup %5465  ;;  %4179 = vmatpush.bf16.msra.mxu3 %v4170_v53 }
0x1d13   :  { %v4077_v36 = vpack.c.bf16 %v5466_v25, %v5466_v25  ;;  %v4071_v31 = vsel %vm1421_vm13, %v5466_v25, 0.0 }
0x1d14   :  { %4072 = vadd.xlane.f32.xlu0 %v4071_v31 }
0x1d15   :  { %5132 = vmatmul.msk.bf16.vlgmr.msrb.gmra.mxu3 %vm1421_vm13, %v4077_v36 }
0x1d17   :  { %v3742_v62 = vpop.xlane.xlu0 %3741 }
0x1d18   :  { %v5468_v17 = vpop.eup %5467  ;;  %v3746_v47 = vadd.f32 %v3742_v62, %v7190_v61 }
0x1d19   :  { %v4138_v6 = vmul.f32 %v5468_v17, %v7133_v14 }
0x1d1a   :  { %5469 = vrcp.f32 %v3746_v47  ;;  %v3745_v19 = vpop.xlane.xlu2 %3744 }
0x1d1b   :  { %v3747_v26 = vadd.f32 %v3745_v19, %v7195_v59 }
0x1d1d   :  { %5471 = vrcp.f32 %v3747_v26 }
0x1d20   :  { %v5470_v56 = vpop.eup %5469 }
0x1d21   :  { %v4143_v3 = vmul.f32 %v5470_v56, %v7193_v28  ;;  %v4195_v28 = vsel %vm421_vm6, %v3076_v58, 0 }
0x1d22   :  { %4204 = vmatpush.bf16.msrb.mxu0 %v4195_v28 }
0x1d23   :  { %v5472_v21 = vpop.eup %5471 }
0x1d24   :  { %v4144_v38 = vmul.f32 %v5472_v21, %v7198_v1  ;;  %v3891_v1 = vsub.f32 -inf, %v7232_v44 }
0x1d26   :  { %v4145_v45 = vpack.c.bf16 %v4144_v38, %v4143_v3  ;;  %v3894_v10 = vmul.f32 1.442695, %v3891_v1 }
0x1d28   :  { %5133 = vmatmul.msk.bf16.vlgmr.msra.gmra.mxu2 %vm355_vm5, %v4145_v45  ;;  %v5303_v45 = vld [vmem:[#allocation8 + $0x1] ss:$0 sm:$0xff] }
0x1d34   :  { %v3551_v61 = vpop.xlane.xlu1 %3550 }
0x1d35   :  { %v3553_v14 = vadd.f32 %v3551_v61, %v7135_v52 }
0x1d37   :  { %5473 = vrcp.f32 %v3553_v14 }
0x1d38   :  { %5475 = vpow2.f32 %v3892_v32 }
0x1d39   :  { %5477 = vpow2.f32 %v3894_v10 }
0x1d3d   :  { %v5474_v11 = vpop.eup %5473 }
0x1d3e   :  { %v4139_v59 = vmul.f32 %v5474_v11, %v7138_v2  ;;  %v5476_v52 = vpop.eup %5475 }
0x1d3f   :  { %v5478_v50 = vpop.eup %5477  ;;  %v3902_v0 = vmul.f32 0.0, %v5476_v52 }
0x1d40   :  { %v4140_v49 = vpack.c.bf16 %v4139_v59, %v4138_v6  ;;  %v3903_v12 = vmul.f32 0.0, %v5478_v50 }
0x1d42   :  { %5134 = vmatmul.msk.bf16.vlgmr.msra.gmra.mxu3 %vm355_vm5, %v4140_v49 }
0x1d49   :  { %v3906_v29 = vpop.xlane.xlu0 %3905 }
0x1d4a   :  { %v3910_v42 = vadd.f32 %v3906_v29, %v3902_v0 }
0x1d4c   :  { %5479 = vrcp.f32 %v3910_v42 }
0x1d51   :  { %v3909_v2 = vpop.xlane.xlu0 %3908 }
0x1d52   :  { %v3911_v9 = vadd.f32 %v3909_v2, %v3903_v12  ;;  %v5480_v44 = vpop.eup %5479 }
0x1d54   :  { %5481 = vrcp.f32 %v3911_v9 }
0x1d55   :  { %5483 = vpow2.f32 %v4056_v39 }
0x1d56   :  { %5485 = vpow2.f32 %v4058_v23 }
0x1d59   :  { %v4070_v46 = vpop.xlane.xlu0 %4069 }
0x1d5a   :  { %v3938_v15 = vpop.f32.mrf.mxu2  ;;  %v5482_v27 = vpop.eup %5481 }
0x1d5b   :  { %v3970_v57 = vadd.f32 %v3938_v15, %v3902_v0  ;;  %v5484_v22 = vpop.eup %5483 }
0x1d5c   :  { %v5486_v48 = vpop.eup %5485  ;;  %v4066_v55 = vmul.f32 0.0, %v5484_v22 }
0x1d5d   :  { %v4188_v54 = vmul.f32 %v5480_v44, %v3970_v57  ;;  %v4067_v25 = vmul.f32 0.0, %v5486_v48  ;;  %v5265_v44 = vld [vmem:[#allocation10 + $0x18] sm:$0xff] }
0x1d5e   :  { %v4074_v36 = vadd.f32 %v4070_v46, %v4066_v55  ;;  %4324 = vmatpush.bf16.msrb.mxu2 %v5265_v44 }
0x1d60   :  { %5487 = vrcp.f32 %v4074_v36 }
0x1d62   :  { %v3940_v8 = vpop.f32.mrf.mxu2 }
0x1d63   :  { %v3966_v24 = vpop.f32.mrf.mxu3 }
0x1d64   :  { %v3971_v5 = vadd.f32 %v3966_v24, %v3903_v12 }
0x1d66   :  { %v4189_v30 = vmul.f32 %v5482_v27, %v3971_v5  ;;  %v5488_v17 = vpop.eup %5487 }
0x1d68   :  { %v4190_v16 = vpack.c.bf16 %v4189_v30, %v4188_v54  ;;  %v5264_v54 = vld [vmem:[#allocation10 + $0x10] sm:$0xff] }
0x1d69   :  { %4325 = vmatpush.bf16.msrb.mxu2 %v5264_v54 }
0x1d6a   :  { %5135 = vmatmul.msk.bf16.vlgmr.msrb.gmra.mxu0 %vm355_vm5, %v4190_v16 }
0x1d6b   :  { %v3968_v4 = vpop.f32.mrf.mxu3 }
0x1d84   :  { %v4102_v18 = vpop.f32.mrf.mxu2 }
0x1d85   :  { %v4134_v13 = vadd.f32 %v4102_v18, %v4066_v55 }
0x1d87   :  { %v4073_v51 = vpop.xlane.xlu0 %4072  ;;  %v4215_v6 = vmul.f32 %v5488_v17, %v4134_v13  ;;  %v5526_v17 = vld [vmem:[%s7375_s12 + $0x4] sm:$0x7]  ;;  %s7421_s12 = smov 128  }
0x1d88   :  { %v4075_v31 = vadd.f32 %v4073_v51, %v4067_v25 }
0x1d8a   :  { %5489 = vrcp.f32 %v4075_v31 }
0x1d8c   :  { %v4104_v20 = vpop.f32.mrf.mxu2 }
0x1d90   :  { %v5490_v47 = vpop.eup %5489 }
0x1d98   :  { %v4130_v62 = vpop.f32.mrf.mxu3 }
0x1d99   :  { %v4135_v40 = vadd.f32 %v4130_v62, %v4067_v25  ;;  %v5525_v25 = vld [vmem:[%s7374_s11 + $0x4] sm:$0x7] }
0x1d9a   :  { %v4289_v36 = vperm.slane %v5525_v25, 2 }
0x1d9b   :  { %v4216_v19 = vmul.f32 %v5490_v47, %v4135_v40  ;;  %v4292_v40 = vperm.slane %v5526_v17, 2 }
0x1d9d   :  { %v4217_v26 = vpack.c.bf16 %v4216_v19, %v4215_v6 }
0x1d9f   :  { %5136 = vmatmul.msk.bf16.vlgmr.msrb.gmra.mxu1 %vm355_vm5, %v4217_v26 }
0x1da0   :  { %v4132_v60 = vpop.f32.mrf.mxu3 }
0x1dab   :  { %v4161_v56 = vpop.f32.mrf.mxu2 }
0x1db3   :  { %v4163_v49 = vpop.f32.mrf.mxu2 }
0x1dc5   :  { %v4181_v53 = vpop.f32.mrf.mxu3 }
0x1dc6   :  { %v4182_v21 = vadd.f32 %v4181_v53, %v4161_v56  ;;  %v5269_v56 = vld [vmem:[%s7378_s15 + $0x38] sm:$0xff] }
0x1dc7   :  { %4375 = vmatpush.bf16.msrb.mxu3 %v5269_v56  ;;  %v5308_v56 = vld [vmem:[%s7383_s20] ss:$0 sm:$0xff] }
0x1dcd   :  { %v4183_v11 = vpop.f32.mrf.mxu3 }
0x1dce   :  { %v4184_v35 = vadd.f32 %v4183_v11, %v4163_v49 }
0x1de7   :  { %v4206_v3 = vpop.f32.mrf.mxu0 }
0x1de8   :  { %v4211_v38 = vadd.f32 %v4206_v3, %v4182_v21  ;;  %v5268_v3 = vld [vmem:[%s7378_s15 + $0x30] sm:$0xff]  ;;  %v5267_v21 = vld [vmem:[%s7378_s15 + $0x28] sm:$0xff] }
0x1de9   :  { %4376 = vmatpush.bf16.msrb.mxu3 %v5268_v3 }
0x1ded   :  { %4377 = vmatpush.bf16.msrb.mxu3 %v5267_v21 }
0x1def   :  { %v4208_v58 = vpop.f32.mrf.mxu0 }
0x1df0   :  { %v4212_v1 = vadd.f32 %v4208_v58, %v4184_v35 }
0x1e1c   :  { %v4233_v61 = vpop.f32.mrf.mxu1 }
0x1e1d   :  { %v4238_v14 = vadd.f32 %v4233_v61, %v4211_v38  ;;  %v5266_v38 = vld [vmem:[%s7378_s15 + $0x20] sm:$0xff]  ;;  %v5304_v61 = vld [vmem:[#allocation11 + $0x1] ss:$0 sm:$0xff] }
0x1e1e   :  { %4378 = vmatpush.bf16.msrb.mxu3 %v5266_v38 }
0x1e1f   :  { %v4241_v59 = vadd.f32 %v5303_v45, %v4238_v14 }
0x1e21   :  { %v7271_v28 = vadd.f32 %v4241_v59, %v6792_v43 }
0x1e23   :  { %v4245_v32 = vsel %vm217_vm1, %v7271_v28, 0.0 }
0x1e24   :  { %4246 = vadd.xlane.f32.xlu0 %v4245_v32  ;;  %v4235_v10 = vpop.f32.mrf.mxu1 }
0x1e25   :  { %v4239_v29 = vadd.f32 %v4235_v10, %v4212_v1  ;;  %v5305_v1 = vld [vmem:[%s7379_s16 + $0x1] ss:$0 sm:$0xff] }
0x1e27   :  { %v4242_v52 = vadd.f32 %v5303_v45, %v4239_v29 }
0x1e29   :  { %v7276_v50 = vadd.f32 %v4242_v52, %v6800_v34 }
0x1e2b   :  { %v4248_v0 = vsel %vm217_vm1, %v7276_v50, 0.0 }
0x1e2c   :  { %4249 = vadd.xlane.f32.xlu1 %v4248_v0 }
0x1e97   :  { %v4247_v2 = vpop.xlane.xlu0 %4246 }
0x1e98   :  { %v4251_v12 = vmul.f32 %v4247_v2, %v5938_v7 }
0x1e9a   :  { %v4253_v43 = vsub.f32 %v7271_v28, %v4251_v12 }
0x1e9c   :  { %v4255_v42 = vmul.f32 %v4253_v43, %v4253_v43 }
0x1e9e   :  { %v4257_v9 = vsel %vm217_vm1, %v4255_v42, 0.0 }
0x1e9f   :  { %4258 = vadd.xlane.f32.xlu2 %v4257_v9  ;;  %v4250_v15 = vpop.xlane.xlu1 %4249 }
0x1ea0   :  { %v4252_v57 = vmul.f32 %v4250_v15, %v5938_v7 }
0x1ea2   :  { %v4254_v8 = vsub.f32 %v7276_v50, %v4252_v57 }
0x1ea4   :  { %v4256_v34 = vmul.f32 %v4254_v8, %v4254_v8 }
0x1ea6   :  { %v4260_v24 = vsel %vm217_vm1, %v4256_v34, 0.0 }
0x1ea7   :  { %4261 = vadd.xlane.f32.xlu0 %v4260_v24 }
0x1f12   :  { %v4259_v5 = vpop.xlane.xlu2 %4258 }
0x1f13   :  { %v4263_v27 = vmul.f32 %v4259_v5, %v5938_v7 }
0x1f15   :  { %v4265_v30 = vadd.f32 1e-05, %v4263_v27 }
0x1f17   :  { %5491 = vrsqrt.f32 %v4265_v30  ;;  %vm4273_vm6 = vweird.f32 %v4265_v30 }
0x1f1a   :  { %v4262_v16 = vpop.xlane.xlu0 %4261 }
0x1f1b   :  { %v4264_v4 = vmul.f32 %v4262_v16, %v5938_v7 }
0x1f1d   :  { %v5492_v41 = vpop.eup %5491  ;;  %v4266_v33 = vadd.f32 1e-05, %v4264_v4 }
0x1f1e   :  { %v4268_v37 = vmul.f32 %v5492_v41, %v4265_v30  ;;  %vm4274_vm5 = vweird.f32 %v5492_v41  ;;  %v5270_v30 = vld [vmem:[%s7382_s19] sm:$0xff] }
0x1f1f   :  { %5493 = vrsqrt.f32 %v4266_v33  ;;  %vm4275_vm7 = vmor %vm4273_vm6, %vm4274_vm5  ;;  %vm4283_vm9 = vweird.f32 %v4266_v33 }
0x1f20   :  { %v4269_v63 = vmul.f32 %v5492_v41, %v4268_v37 }
0x1f22   :  { %v4270_v39 = vmul.f32 0.5, %v4269_v63 }
0x1f24   :  { %v4271_v23 = vsub.f32 1.5, %v4270_v39 }
0x1f25   :  { %v5494_v18 = vpop.eup %5493 }
0x1f26   :  { %v4272_v46 = vmul.f32 %v5492_v41, %v4271_v23  ;;  %v4278_v22 = vmul.f32 %v5494_v18, %v4266_v33  ;;  %vm4284_vm8 = vweird.f32 %v5494_v18 }
0x1f27   :  { %vm4285_vm10 = vmor %vm4283_vm9, %vm4284_vm8 }
0x1f28   :  { %v4279_v48 = vmul.f32 %v5494_v18, %v4278_v22  ;;  %v4276_v20 = vsel %vm4275_vm7, %v5492_v41, %v4272_v46 }
0x1f29   :  { %v4287_v31 = vmul.f32 %v4276_v20, %v4253_v43 }
0x1f2a   :  { %v4280_v55 = vmul.f32 0.5, %v4279_v48 }
0x1f2b   :  { %v4290_v47 = vmul.f32 %v4289_v36, %v4287_v31 }
0x1f2c   :  { %v4281_v51 = vsub.f32 1.5, %v4280_v55 }
0x1f2d   :  { %v4293_v26 = vadd.f32 %v4292_v40, %v4290_v47 }
0x1f2e   :  { %v4282_v13 = vmul.f32 %v5494_v18, %v4281_v51 }
0x1f30   :  { %v4286_v62 = vsel %vm4285_vm10, %v5494_v18, %v4282_v13 }
0x1f31   :  { %v4288_v6 = vmul.f32 %v4286_v62, %v4254_v8  ;;  %v5307_v62 = vld [vmem:[%s7381_s18] ss:$0 sm:$0xff]  ;;  %s5773_s18 = smov 96  }
0x1f33   :  { %v4291_v19 = vmul.f32 %v4289_v36, %v4288_v6 }
0x1f35   :  { %v4294_v60 = vadd.f32 %v4292_v40, %v4291_v19 }
0x1f37   :  { %v4295_v53 = vpack.c.bf16 %v4294_v60, %v4293_v26  ;;  %v5273_v60 = vld [vmem:[#allocation13 + $0x8] sm:$0xff] }
0x1f38   :  { %4565 = vmatpush.bf16.msra.mxu1 %v5273_v60 }
0x1f39   :  { %5145 = vmatmul.msk.bf16.vlgmr.msrb.gmra.mxu2 %vm217_vm1, %v4295_v53  ;;  %v5272_v53 = vld [vmem:[#allocation13] sm:$0xff] }
0x1f3c   :  { %4566 = vmatpush.bf16.msra.mxu1 %v5272_v53 }
0x1fbc   :  { %v4327_v45 = vpop.f32.mrf.mxu2 }
0x1fbd   :  { %v4328_v14 = vadd.f32 %v5304_v61, %v4327_v45 }
0x1fbf   :  { %v4332_v49 = vmax.f32 %v4328_v14, 0.0 }
0x1fc4   :  { %v4329_v11 = vpop.f32.mrf.mxu2 }
0x1fc5   :  { %v4330_v59 = vadd.f32 %v5304_v61, %v4329_v11 }
0x1fc7   :  { %v4333_v58 = vmax.f32 %v4330_v59, 0.0 }
0x1fc9   :  { %v4334_v35 = vpack.c.bf16 %v4333_v58, %v4332_v49 }
0x1fcb   :  { %5170 = vmatmul.msk.bf16.vlgmr.msrb.gmra.mxu3 %vm1421_vm13, %v4334_v35 }
0x204e   :  { %v4380_v32 = vpop.f32.mrf.mxu3 }
0x204f   :  { %v4385_v10 = vadd.f32 %v4380_v32, %v7271_v28 }
0x2051   :  { %v4389_v29 = vadd.f32 %v5305_v1, %v4385_v10 }
0x2053   :  { %v4393_v52 = vsel %vm217_vm1, %v4389_v29, 0.0 }
0x2054   :  { %4394 = vadd.xlane.f32.xlu1 %v4393_v52 }
0x2056   :  { %v4382_v0 = vpop.f32.mrf.mxu3 }
0x2057   :  { %v4386_v2 = vadd.f32 %v4382_v0, %v7276_v50  ;;  %v5271_v50 = vld [vmem:[%s7382_s19 + $0x8] sm:$0xff] }
0x2058   :  { %4477 = vmatpush.bf16.msra.mxu0 %v5271_v50 }
0x2059   :  { %v4390_v12 = vadd.f32 %v5305_v1, %v4386_v2 }
0x205b   :  { %v4396_v43 = vsel %vm217_vm1, %v4390_v12, 0.0 }
0x205c   :  { %4397 = vadd.xlane.f32.xlu2 %v4396_v43  ;;  %4478 = vmatpush.bf16.msra.mxu0 %v5270_v30  ;;  %v5274_v43 = vld [vmem:[#allocation14] sm:$0xff] }
0x20c7   :  { %v4395_v42 = vpop.xlane.xlu1 %4394 }
0x20c8   :  { %v4399_v9 = vmul.f32 %v4395_v42, %v5938_v7 }
0x20ca   :  { %v4401_v15 = vsub.f32 %v4389_v29, %v4399_v9  ;;  %v5275_v29 = vld [vmem:[#allocation14 + $0x8] sm:$0xff] }
0x20cb   :  { %4605 = vmatpush.bf16.msra.mxu2 %v5275_v29 }
0x20cc   :  { %v4403_v57 = vmul.f32 %v4401_v15, %v4401_v15 }
0x20ce   :  { %v4405_v8 = vsel %vm217_vm1, %v4403_v57, 0.0 }
0x20cf   :  { %4406 = vadd.xlane.f32.xlu0 %v4405_v8  ;;  %v4398_v28 = vpop.xlane.xlu2 %4397  ;;  %4606 = vmatpush.bf16.msra.mxu2 %v5274_v43 }
0x20d0   :  { %v4400_v34 = vmul.f32 %v4398_v28, %v5938_v7  ;;  %v5309_v28 = vld [vmem:[%s7385_s22] ss:$0 sm:$0xff]  ;;  %s5774_s22 = smov 126  }
0x20d2   :  { %v4402_v24 = vsub.f32 %v4390_v12, %v4400_v34 }
0x20d4   :  { %v4404_v44 = vmul.f32 %v4402_v24, %v4402_v24 }
0x20d6   :  { %v4408_v5 = vsel %vm217_vm1, %v4404_v44, 0.0 }
0x20d7   :  { %4409 = vadd.xlane.f32.xlu1 %v4408_v5 }
0x2142   :  { %v4407_v27 = vpop.xlane.xlu0 %4406 }
0x2143   :  { %v4411_v54 = vmul.f32 %v4407_v27, %v5938_v7 }
0x2145   :  { %v4413_v16 = vadd.f32 1e-05, %v4411_v54 }
0x2147   :  { %5495 = vrsqrt.f32 %v4413_v16  ;;  %vm4421_vm11 = vweird.f32 %v4413_v16 }
0x214a   :  { %v4410_v4 = vpop.xlane.xlu1 %4409 }
0x214b   :  { %v4412_v41 = vmul.f32 %v4410_v4, %v5938_v7  ;;  %v5306_v7 = vld [vmem:[%s7380_s17] ss:$0 sm:$0xff] }
0x214c   :  { %v5310_v4 = vld [vmem:[%s7387_s24] ss:$0 sm:$0xff]  ;;  %s5775_s24 = smov 2  }
0x214d   :  { %v5496_v33 = vpop.eup %5495  ;;  %v4414_v37 = vadd.f32 1e-05, %v4412_v41 }
0x214e   :  { %v4416_v63 = vmul.f32 %v5496_v33, %v4413_v16  ;;  %vm4422_vm13 = vweird.f32 %v5496_v33 }
0x214f   :  { %5497 = vrsqrt.f32 %v4414_v37  ;;  %vm4423_vm12 = vmor %vm4421_vm11, %vm4422_vm13  ;;  %vm4431_vm15 = vweird.f32 %v4414_v37 }
0x2150   :  { %v4417_v39 = vmul.f32 %v5496_v33, %v4416_v63 }
0x2152   :  { %v4418_v23 = vmul.f32 0.5, %v4417_v39 }
0x2154   :  { %v4419_v18 = vsub.f32 1.5, %v4418_v23 }
0x2155   :  { %v5498_v46 = vpop.eup %5497 }
0x2156   :  { %v4420_v22 = vmul.f32 %v5496_v33, %v4419_v18  ;;  %v4426_v48 = vmul.f32 %v5498_v46, %v4414_v37  ;;  %vm4432_vm14 = vweird.f32 %v5498_v46 }
0x2157   :  { %vm4433_vm0 = vmor %vm4431_vm15, %vm4432_vm14 }
0x2158   :  { %v4427_v20 = vmul.f32 %v5498_v46, %v4426_v48  ;;  %v4424_v55 = vsel %vm4423_vm12, %v5496_v33, %v4420_v22 }
0x2159   :  { %v4435_v36 = vmul.f32 %v4424_v55, %v4401_v15 }
0x215a   :  { %v4428_v51 = vmul.f32 0.5, %v4427_v20 }
0x215b   :  { %v4440_v17 = vmul.f32 %v5306_v7, %v4435_v36 }
0x215c   :  { %v4429_v25 = vsub.f32 1.5, %v4428_v51 }
0x215d   :  { %v4445_v6 = vadd.f32 %v5307_v62, %v4440_v17 }
0x215e   :  { %v4430_v31 = vmul.f32 %v5498_v46, %v4429_v25 }
0x2160   :  { %v4434_v13 = vsel %vm4433_vm0, %v5498_v46, %v4430_v31 }
0x2161   :  { %v4436_v40 = vmul.f32 %v4434_v13, %v4402_v24 }
0x2163   :  { %v4441_v47 = vmul.f32 %v5306_v7, %v4436_v40 }
0x2165   :  { %v4446_v19 = vadd.f32 %v5307_v62, %v4441_v47 }
0x2167   :  { %v4447_v26 = vpack.c.bf16 %v4446_v19, %v4445_v6 }
0x2169   :  { %5179 = vmatmul.msk.bf16.vlgmr.msra.gmra.mxu0 %vm217_vm1, %v4447_v26 }
0x21e6   :  { %v4480_v3 = vpop.f32.mrf.mxu0 }
0x21e7   :  { %v4481_v21 = vadd.f32 %v5308_v56, %v4480_v3 }
0x21e9   :  { %4489 = vrot.lane.b32.xlu2 %v4481_v21, %s5772_s21  ;;  %v4485_v61 = vmax.f32 %v4481_v21, 0.0 }
0x21ee   :  { %v4482_v38 = vpop.f32.mrf.mxu0 }
0x21ef   :  { %v4483_v45 = vadd.f32 %v5308_v56, %v4482_v38 }
0x21f1   :  { %v4486_v14 = vmax.f32 %v4483_v45, 0.0  ;;  %4491 = vrot.lane.b32.xlu0 %v4483_v45, %s5772_s21 }
0x21f3   :  { %v4535_v11 = vpack.c.bf16 %v4486_v14, %v4485_v61 }
0x21f5   :  { %5190 = vmatmul.msk.bf16.vlgmr.msra.gmra.mxu1 %vm217_vm1, %v4535_v11 }
0x2243   :  { %v4490_v59 = vpop.permute.xlu2 %4489 }
0x2244   :  { %v4495_v49 = vsub.f32 %v4481_v21, %v4490_v59 }
0x2246   :  { %v5180_v58 = vmul.f32 -1.442695, %v4495_v49 }
0x2248   :  { %5499 = vpow2.f32 %v5180_v58 }
0x224e   :  { %v5500_v35 = vpop.eup %5499 }
0x224f   :  { %v4503_v1 = vadd.f32 1.0, %v5500_v35 }
0x2251   :  { %5501 = vrcp.f32 %v4503_v1  ;;  %v4516_v0 = vand.u32 2147483648, %v4503_v1  ;;  %v4514_v12 = vand.u32 2147483647, %v4503_v1  ;;  %vm4510_vm3 = vweird.f32 %v4503_v1 }
0x2253   :  { %v4517_v9 = vor.u32 1.1754944e-38, %v4516_v0  ;;  %vm4515_vm5 = vcmp.eq.f32.partialorder %v4514_v12, 8.507059e+37 }
0x2257   :  { %v5502_v32 = vpop.eup %5501 }
0x2258   :  { %v4506_v10 = vmul.f32 %v5502_v32, %v4503_v1  ;;  %vm4511_vm2 = vweird.f32 %v5502_v32 }
0x2259   :  { %vm4512_vm4 = vmor %vm4510_vm3, %vm4511_vm2  ;;  %vm4695_vm2 = vcmask 7168   ;;  %vm4701_vm3 = vcmask 23552  }
0x225a   :  { %v4507_v52 = vsub.f32 1.0, %v4506_v10 }
0x225c   :  { %v4508_v2 = vmul.f32 %v5502_v32, %v4507_v52 }
0x225e   :  { %v4509_v42 = vadd.f32 %v5502_v32, %v4508_v2 }
0x2260   :  { %v4513_v15 = vsel %vm4512_vm4, %v5502_v32, %v4509_v42  ;;  %vm4698_vm4 = vcmask 15360  }
0x2261   :  { %v4518_v57 = vsel %vm4515_vm5, %v4517_v9, %v4513_v15  ;;  %vm4704_vm5 = vcmask 31744  }
0x2262   :  { %4667 = vrot.lane.b32.xlu2 %v4518_v57, %s5773_s18 }
0x2263   :  { %v4492_v54 = vpop.permute.xlu0 %4491 }
0x2264   :  { %v4496_v30 = vsub.f32 %v4483_v45, %v4492_v54 }
0x2266   :  { %v5181_v16 = vmul.f32 -1.442695, %v4496_v30 }
0x2268   :  { %5503 = vpow2.f32 %v5181_v16 }
0x226e   :  { %v5504_v63 = vpop.eup %5503 }
0x226f   :  { %v4504_v39 = vadd.f32 1.0, %v5504_v63 }
0x2271   :  { %vm4525_vm13 = vweird.f32 %v4504_v39  ;;  %v4531_v11 = vand.u32 2147483648, %v4504_v39  ;;  %v4529_v49 = vand.u32 2147483647, %v4504_v39 }
0x2272   :  { %v4568_v8 = vpop.f32.mrf.mxu1 }
0x2273   :  { %v4569_v34 = vadd.f32 %v5309_v28, %v4568_v8  ;;  %v4532_v10 = vor.u32 1.1754944e-38, %v4531_v11  ;;  %vm4530_vm0 = vcmp.eq.f32.partialorder %v4529_v49, 8.507059e+37 }
0x2275   :  { %v4573_v5 = vmax.f32 %v4569_v34, 0.0 }
0x227a   :  { %v4570_v24 = vpop.f32.mrf.mxu1 }
0x227b   :  { %v4571_v44 = vadd.f32 %v5309_v28, %v4570_v24 }
0x227d   :  { %v4574_v50 = vmax.f32 %v4571_v44, 0.0 }
0x227f   :  { %v4575_v27 = vpack.c.bf16 %v4574_v50, %v4573_v5 }
0x2281   :  { %5199 = vmatmul.msk.bf16.vlgmr.msra.gmra.mxu2 %vm217_vm1, %v4575_v27 }
0x22bc   :  { %v4668_v15 = vpop.permute.xlu2 %4667 }
0x2304   :  { %v4608_v41 = vpop.f32.mrf.mxu2 }
0x2305   :  { %v4609_v33 = vadd.f32 %v5310_v4, %v4608_v41 }
0x2307   :  { %v5200_v37 = vmul.f32 -1.442695, %v4609_v33 }
0x2309   :  { %5505 = vpow2.f32 %v5200_v37 }
0x230a   :  { %5507 = vrcp.f32 %v4504_v39 }
0x230c   :  { %v4610_v23 = vpop.f32.mrf.mxu2 }
0x230d   :  { %v4611_v18 = vadd.f32 %v5310_v4, %v4610_v23 }
0x230f   :  { %v5506_v46 = vpop.eup %5505  ;;  %v5201_v22 = vmul.f32 -1.442695, %v4611_v18 }
0x2310   :  { %v4619_v48 = vadd.f32 1.0, %v5506_v46  ;;  %v5508_v20 = vpop.eup %5507 }
0x2311   :  { %5509 = vpow2.f32 %v5201_v22  ;;  %v4521_v36 = vmul.f32 %v5508_v20, %v4504_v39  ;;  %vm4526_vm9 = vweird.f32 %v5508_v20 }
0x2312   :  { %5511 = vrcp.f32 %v4619_v48  ;;  %v4632_v13 = vand.u32 2147483648, %v4619_v48  ;;  %v4630_v17 = vand.u32 2147483647, %v4619_v48  ;;  %vm4626_vm6 = vweird.f32 %v4619_v48  ;;  %vm4527_vm12 = vmor %vm4525_vm13, %vm4526_vm9 }
0x2313   :  { %v4522_v40 = vsub.f32 1.0, %v4521_v36 }
0x2314   :  { %v4633_v19 = vor.u32 1.1754944e-38, %v4632_v13  ;;  %vm4631_vm8 = vcmp.eq.f32.partialorder %v4630_v17, 8.507059e+37 }
0x2315   :  { %v4523_v53 = vmul.f32 %v5508_v20, %v4522_v40 }
0x2317   :  { %v5510_v55 = vpop.eup %5509  ;;  %v4524_v14 = vadd.f32 %v5508_v20, %v4523_v53 }
0x2318   :  { %v5512_v51 = vpop.eup %5511  ;;  %v4620_v25 = vadd.f32 1.0, %v5510_v55 }
0x2319   :  { %v4622_v7 = vmul.f32 %v5512_v51, %v4619_v48  ;;  %vm4627_vm1 = vweird.f32 %v5512_v51  ;;  %v4528_v1 = vsel %vm4527_vm12, %v5508_v20, %v4524_v14 }
0x231a   :  { %5513 = vrcp.f32 %v4620_v25  ;;  %vm4628_vm7 = vmor %vm4626_vm6, %vm4627_vm1  ;;  %v4647_v38 = vand.u32 2147483648, %v4620_v25  ;;  %v4645_v61 = vand.u32 2147483647, %v4620_v25  ;;  %vm4641_vm11 = vweird.f32 %v4620_v25 }
0x231b   :  { %v4623_v31 = vsub.f32 1.0, %v4622_v7  ;;  %v4533_v52 = vsel %vm4530_vm0, %v4532_v10, %v4528_v1  ;;  %vm4707_vm1 = vcmask 39936  }
0x231c   :  { %v4648_v58 = vor.u32 1.1754944e-38, %v4647_v38  ;;  %vm4646_vm15 = vcmp.eq.f32.partialorder %v4645_v61, 8.507059e+37 }
0x231d   :  { %v4624_v62 = vmul.f32 %v5512_v51, %v4623_v31 }
0x231f   :  { %v4625_v47 = vadd.f32 %v5512_v51, %v4624_v62 }
0x2320   :  { %v5514_v6 = vpop.eup %5513 }
0x2321   :  { %v4637_v26 = vmul.f32 %v5514_v6, %v4620_v25  ;;  %v4629_v60 = vsel %vm4628_vm7, %v5512_v51, %v4625_v47  ;;  %vm4642_vm10 = vweird.f32 %v5514_v6 }
0x2322   :  { %v4634_v56 = vsel %vm4631_vm8, %v4633_v19, %v4629_v60  ;;  %vm4643_vm14 = vmor %vm4641_vm11, %vm4642_vm10 }
0x2323   :  { %v4638_v3 = vsub.f32 1.0, %v4637_v26  ;;  %v4651_v21 = vmul.f32 0.5, %v4634_v56 }
0x2325   :  { %v4639_v45 = vmul.f32 %v5514_v6, %v4638_v3  ;;  %4655 = vrot.lane.b32.xlu1 %v4651_v21, %s5774_s22 }
0x2327   :  { %v4640_v59 = vadd.f32 %v5514_v6, %v4639_v45 }
0x2329   :  { %v4644_v35 = vsel %vm4643_vm14, %v5514_v6, %v4640_v59 }
0x232a   :  { %v4649_v32 = vsel %vm4646_vm15, %v4648_v58, %v4644_v35 }
0x232b   :  { %v4652_v29 = vmul.f32 0.5, %v4649_v32 }
0x232d   :  { %4657 = vrot.lane.b32.xlu0 %v4652_v29, %s5774_s22  ;;  %4669 = vrot.lane.b32.xlu1 %v4533_v52, %s5773_s18 }
0x2397   :  { %v4656_v0 = vpop.permute.xlu1 %4655 }
0x2398   :  { %v4661_v2 = vsub.f32 %v4634_v56, %v4656_v0  ;;  %v4663_v12 = vadd.f32 %v4656_v0, %v4634_v56 }
0x239a   :  { %4683 = vrot.lane.b32.xlu1 %v4663_v12, %s5775_s24  ;;  %4675 = vrot.lane.b32.xlu0 %v4661_v2, %s5775_s24  ;;  %v4696_v34 = vsel %vm4695_vm2, %v4668_v15, %v4661_v2 }
0x239f   :  { %v4658_v43 = vpop.permute.xlu0 %4657  ;;  %v4670_v57 = vpop.permute.xlu1 %4669 }
0x23a0   :  { %v4662_v42 = vsub.f32 %v4649_v32, %v4658_v43  ;;  %v4664_v9 = vadd.f32 %v4658_v43, %v4649_v32 }
0x23a2   :  { %4677 = vrot.lane.b32.xlu2 %v4662_v42, %s5775_s24  ;;  %4691 = vrot.lane.b32.xlu1 %v4664_v9, %s5763_s29  ;;  %v4697_v30 = vsel %vm4695_vm2, %v4670_v57, %v4662_v42 }
0x23a3   :  { %4685 = vrot.lane.b32.xlu0 %v4664_v9, %s5775_s24 }
0x23aa   :  { %4689 = vrot.lane.b32.xlu2 %v4663_v12, %s5763_s29  ;;  %s5776_s29 = smov [#allocation16]  }
0x23ab   :  { %s4716_s3 = sshll.u32 %s5776_s29, 4  ;;  %s4717_s3 = int_to_ptr.vmem [resolvable:$true] %s4716_s3 }
0x23fc   :  { %v4678_v8 = vpop.permute.xlu2 %4677 }
0x23fd   :  { %v4700_v4 = vsel %vm4698_vm4, %v4697_v30, %v4678_v8 }
0x2404   :  { %v4690_v5 = vpop.permute.xlu2 %4689 }
0x240c   :  { %v4676_v28 = vpop.permute.xlu0 %4675  ;;  %v4684_v24 = vpop.permute.xlu1 %4683 }
0x240d   :  { %v4699_v44 = vsel %vm4698_vm4, %v4696_v34, %v4676_v28 }
0x240e   :  { %v4702_v50 = vsel %vm4701_vm3, %v4699_v44, %v4684_v24 }
0x240f   :  { %v4705_v27 = vsel %vm4704_vm5, %v4702_v50, %v4690_v5 }
0x2410   :  { %v4708_v54 = vsel %vm4707_vm1, %v4705_v27, 0.0 }
0x2411   :  { %4710 = vst [vmem:[#allocation16] sm:$0xff] %v4708_v54 }
0x2414   :  { %v4692_v16 = vpop.permute.xlu1 %4691 }
0x2415   :  { %v4686_v41 = vpop.permute.xlu0 %4685 }
0x2416   :  { %v4703_v33 = vsel %vm4701_vm3, %v4700_v4, %v4686_v41 }
0x2417   :  { %v4706_v37 = vsel %vm4704_vm5, %v4703_v33, %v4692_v16 }
0x2418   :  { %v4709_v63 = vsel %vm4707_vm1, %v4706_v37, 0.0 }
0x2419   :  { %4711 = vst [vmem:[#allocation16 + $0x8] sm:$0xff] %v4709_v63 }
0x241a   :  { %4724 = dma.vmem_to_hbm [thread:$0]  %s4717_s3, 256, %s4719_s7, [#allocation4], %s7421_s12, %s7421_s12, %s5760_s26  }
0x241b   :  { %5753 = dma.done.wait [#allocation4], 256  }
0x241c   :  { %5754 = vsyncadd [#allocation4], 4294967040 }
0x241d   :  { %4729 = vsyncpa [#allocation3], 1 }
0x241e   :  { %4730 = vsyncpa [#allocation6], 1 }
0x241f   :  { %4731 = vsyncpa [#allocation9], 1 }
0x2420   :  { %4732 = vsyncpa [#allocation12], 1 }
0x2421   :  { %4733 = vsyncpa [#allocation15], 1 }
0x2422   :  { %4734 = vsyncpa [#allocation4], 1 }

</bundles_post_ra>
